<compile_context>
chip_gen: v7x
topology: tpu7x:2x2x1
jax: 0.10.0
libtpu: 0.0.40
codegen_flags: <defaults>
</compile_context>

<pallas_src>
import jax
import jax.numpy as jnp
from jax.experimental import pallas as pl
from jax.experimental.pallas import tpu as pltpu


def attention_kernel(x_ref, vecs_ref, out_ref, scores_ref):
    x = x_ref[...].astype(jnp.float32)            # (tb, S, D), math in f32
    v = vecs_ref[...].astype(jnp.float32)         # (2, D): row0 = (W@p)^T, row1 = nu^T
    dim = x.shape[-1]

    wp = v[0:1, :].reshape(1, 1, dim)             # (1, 1, D) broadcast of W @ p
    nu = v[1:2, :].reshape(1, 1, dim)             # (1, 1, D) broadcast of nu

    # Both projections from the single VMEM-resident x tile:
    # VPU broadcast-multiply + XLU lane reduce (MXU would be >98% padded at N=2).
    logits = jnp.sum(x * wp, axis=-1)             # (tb, S)
    token = jnp.sum(x * nu, axis=-1)              # (tb, S)

    # Numerically stable softmax over the sequence axis.
    m = jnp.max(logits, axis=-1, keepdims=True)
    e = jnp.exp(logits - m)
    denom = jnp.sum(e, axis=-1, keepdims=True)
    scores = e * pl.reciprocal(denom, approx=True)  # EUP vrcp: free slot

    scores_ref[...] = scores
    # Weighted pooling over the sequence axis -> one scalar per batch row.
    out_ref[...] = jnp.sum(scores * token, axis=-1, keepdims=True)   # (tb, 1)


def _pick_block_b(batch, seq, dim, itemsize, budget_bytes=16 * 1024 * 1024):
    """Largest batch tile whose single x buffer fits the VMEM budget.

    Pallas double-buffers the input DMA, so the steady-state x footprint is
    ~2 * block_b * seq * dim * itemsize; 2 x 16 MiB stays well inside v7x's
    64 MiB VMEM and the raised scoped limit on v5e/v6e.
    """
    cap = max(1, budget_bytes // (seq * dim * itemsize))
    if batch <= cap:
        return batch
    # Keep tiles a multiple of 128 so the (tb, S) / (tb, 1) output blocks
    # satisfy the TPU (8, 128) block-shape constraints.
    return min(batch, max(128, (cap // 128) * 128))


def attention_forward(x, W, p, nu, *, block_b=None):
    """Returns (output (B,), attention_scores (B, S)) — forward_with_scores."""
    batch, seq, dim = x.shape

    # Fold W into a single D-vector outside the kernel: W only ever appears
    # as W @ p, so the DxD matrix never gets streamed through VMEM.
    wp = jnp.dot(W.astype(jnp.float32), p.astype(jnp.float32),
                 preferred_element_type=jnp.float32)                # (D, 1)
    # Fused, lane-dense parameter operand: row 0 = (W@p)^T, row 1 = nu^T.
    vecs = jnp.concatenate([wp, nu.astype(jnp.float32)], axis=1).T  # (2, D)

    if block_b is None:
        block_b = _pick_block_b(batch, seq, dim, jnp.dtype(x.dtype).itemsize)
    grid = (pl.cdiv(batch, block_b),)

    out2d, scores = pl.pallas_call(
        attention_kernel,
        grid=grid,
        in_specs=[
            pl.BlockSpec((block_b, seq, dim), lambda b: (b, 0, 0)),  # x tile
            pl.BlockSpec((2, dim), lambda b: (0, 0)),                # fused params
        ],
        out_specs=(
            pl.BlockSpec((block_b, 1), lambda b: (b, 0)),            # pooled output
            pl.BlockSpec((block_b, seq), lambda b: (b, 0)),          # attention scores
        ),
        out_shape=(
            jax.ShapeDtypeStruct((batch, 1), jnp.float32),
            jax.ShapeDtypeStruct((batch, seq), jnp.float32),
        ),
        compiler_params=pltpu.CompilerParams(
            dimension_semantics=("parallel",),      # batch tiles are independent
            vmem_limit_bytes=48 * 1024 * 1024,      # above 16/32 MiB scoped defaults
        ),
    )(x, vecs)
    return out2d[:, 0], scores


def reference_forward(x, W, p, nu):
    logits = jnp.einsum("bsd,de,eo->bs", x, W, p)
    scores = jax.nn.softmax(logits, axis=-1)
    token = jnp.einsum("bsd,do->bs", x, nu)
    return jnp.sum(scores * token, axis=1), scores


if __name__ == "__main__":
    # Small shapes consistent with the module; batch is big enough that
    # block_b=128 exercises a 2-step parallel grid (tests the index maps).
    B, S, D = 256, 8, 32
    key = jax.random.PRNGKey(0)
    kx, kw, kp, knu = jax.random.split(key, 4)

    x = jax.random.normal(kx, (B, S, D), dtype=jnp.float32)

    # Attention._reset_parameters() gives W = I, p = 0 (degenerate uniform
    # softmax); perturb deterministically so the whole projection -> softmax
    # -> pooling path is actually exercised. nu mirrors init_linear_head's
    # unit-norm direction.
    W = jnp.eye(D, dtype=jnp.float32) + 0.1 * jax.random.normal(kw, (D, D), dtype=jnp.float32)
    p = 0.3 * jax.random.normal(kp, (D, 1), dtype=jnp.float32)
    nu = jax.random.normal(knu, (D, 1), dtype=jnp.float32)
    nu = nu / jnp.linalg.norm(nu)

    # f32 path (matches the PyTorch module's default dtype).
    out, scores = attention_forward(x, W, p, nu, block_b=128)
    out = jax.block_until_ready(out)
    scores = jax.block_until_ready(scores)

    ref_out, ref_scores = reference_forward(x, W, p, nu)
    assert out.shape == (B,)
    assert scores.shape == (B, S)
    # 2e-3 headroom covers the approximate EUP reciprocal used for the softmax
    # normalization (exact-mode reciprocal matches the reference to ~1e-6).
    assert jnp.allclose(out, ref_out, atol=2e-3, rtol=2e-3)
    assert jnp.allclose(scores, ref_scores, atol=2e-3, rtol=2e-3)

    # bf16 activations: halves HBM traffic for the dominant operand on
    # v6e/v7x; kernel math stays in f32, so only input-quantization error
    # remains (hence the looser tolerance).
    out_bf16, scores_bf16 = attention_forward(x.astype(jnp.bfloat16), W, p, nu, block_b=128)
    out_bf16 = jax.block_until_ready(out_bf16)
    assert jnp.allclose(out_bf16, ref_out, atol=5e-2, rtol=5e-2)

    print("KERNEL_OK")
</pallas_src>

<mosaic_0001>
module attributes {stable_mosaic.version = 11 : i64} {
  func.func @attention_kernel(%arg0: i32, %arg1: memref<128x8x32xf32, #tpu.memory_space<vmem>>, %arg2: memref<2x32xf32, #tpu.memory_space<vmem>>, %arg3: memref<128x1xf32, #tpu.memory_space<vmem>>, %arg4: memref<128x8xf32, #tpu.memory_space<vmem>>) attributes {dimension_semantics = [#tpu.dimension_semantics<parallel>], iteration_bounds = array<i64: 2>, scalar_prefetch = 0 : i64, scratch_operands = 0 : i64, tpu.core_type = #tpu.core_type<tc>, window_params = [{transform_indices = @transform_0, window_bounds = array<i64: 128, 8, 32>}, {pipeline_mode = #tpu.pipeline_mode<synchronous>, transform_indices = @transform_1, window_bounds = array<i64: 2, 32>}, {transform_indices = @transform_2, window_bounds = array<i64: 128, 1>}, {transform_indices = @transform_3, window_bounds = array<i64: 128, 8>}]} {
    %c0 = arith.constant 0 : index
    %c0_0 = arith.constant 0 : index
    %c0_1 = arith.constant 0 : index
    %0 = vector.load %arg1[%c0, %c0_0, %c0_1] : memref<128x8x32xf32, #tpu.memory_space<vmem>>, vector<128x8x32xf32>
    %c0_2 = arith.constant 0 : index
    %c0_3 = arith.constant 0 : index
    %1 = vector.load %arg2[%c0_2, %c0_3] : memref<2x32xf32, #tpu.memory_space<vmem>>, vector<2x32xf32>
    %2 = vector.extract_strided_slice %1 {offsets = [0, 0], sizes = [1, 32], strides = [1, 1]} : vector<2x32xf32> to vector<1x32xf32>
    %3 = vector.shape_cast %2 : vector<1x32xf32> to vector<1x1x32xf32>
    %4 = vector.extract_strided_slice %1 {offsets = [1, 0], sizes = [1, 32], strides = [1, 1]} : vector<2x32xf32> to vector<1x32xf32>
    %5 = vector.shape_cast %4 : vector<1x32xf32> to vector<1x1x32xf32>
    %6 = vector.broadcast %3 : vector<1x1x32xf32> to vector<128x8x32xf32>
    %7 = arith.mulf %0, %6 : vector<128x8x32xf32>
    %cst = arith.constant dense<0.000000e+00> : vector<128x8xf32>
    %8 = vector.multi_reduction <add>, %7, %cst [2] : vector<128x8x32xf32> to vector<128x8xf32>
    %9 = vector.broadcast %5 : vector<1x1x32xf32> to vector<128x8x32xf32>
    %10 = arith.mulf %0, %9 : vector<128x8x32xf32>
    %cst_4 = arith.constant dense<0.000000e+00> : vector<128x8xf32>
    %11 = vector.multi_reduction <add>, %10, %cst_4 [2] : vector<128x8x32xf32> to vector<128x8xf32>
    %cst_5 = arith.constant dense<0xFF800000> : vector<128xf32>
    %12 = vector.multi_reduction <maximumf>, %8, %cst_5 [1] : vector<128x8xf32> to vector<128xf32>
    %13 = vector.shape_cast %12 : vector<128xf32> to vector<128x1xf32>
    %14 = vector.broadcast %13 : vector<128x1xf32> to vector<128x8xf32>
    %15 = arith.subf %8, %14 : vector<128x8xf32>
    %16 = math.exp %15 : vector<128x8xf32>
    %cst_6 = arith.constant dense<0.000000e+00> : vector<128xf32>
    %17 = vector.multi_reduction <add>, %16, %cst_6 [1] : vector<128x8xf32> to vector<128xf32>
    %18 = vector.shape_cast %17 : vector<128xf32> to vector<128x1xf32>
    %19 = tpu.reciprocal %18 {approx = true} : vector<128x1xf32> -> vector<128x1xf32>
    %20 = vector.broadcast %19 : vector<128x1xf32> to vector<128x8xf32>
    %21 = arith.mulf %16, %20 : vector<128x8xf32>
    %c0_7 = arith.constant 0 : index
    %c0_8 = arith.constant 0 : index
    %22 = vector.load %arg4[%c0_7, %c0_8] : memref<128x8xf32, #tpu.memory_space<vmem>>, vector<128x8xf32>
    tpu.vector_store %arg4[%c0_7, %c0_8], %21 {strides = array<i32>} : memref<128x8xf32, #tpu.memory_space<vmem>>, vector<128x8xf32>,
    %23 = arith.mulf %21, %11 : vector<128x8xf32>
    %cst_9 = arith.constant dense<0.000000e+00> : vector<128xf32>
    %24 = vector.multi_reduction <add>, %23, %cst_9 [1] : vector<128x8xf32> to vector<128xf32>
    %25 = vector.shape_cast %24 : vector<128xf32> to vector<128x1xf32>
    %c0_10 = arith.constant 0 : index
    %c0_11 = arith.constant 0 : index
    %26 = vector.load %arg3[%c0_10, %c0_11] : memref<128x1xf32, #tpu.memory_space<vmem>>, vector<128x1xf32>
    tpu.vector_store %arg3[%c0_10, %c0_11], %25 {strides = array<i32>} : memref<128x1xf32, #tpu.memory_space<vmem>>, vector<128x1xf32>,
    return
  }
  func.func @transform_0(%arg0: i32) -> (i32, i32, i32) {
    %c0_i32 = arith.constant 0 : i32
    %c0_i32_0 = arith.constant 0 : i32
    %c0_i32_1 = arith.constant 0 : i32
    return %arg0, %c0_i32, %c0_i32_0 : i32, i32, i32
  }
  func.func @transform_1(%arg0: i32) -> (i32, i32) {
    %c0_i32 = arith.constant 0 : i32
    %c0_i32_0 = arith.constant 0 : i32
    %c0_i32_1 = arith.constant 0 : i32
    return %c0_i32, %c0_i32_0 : i32, i32
  }
  func.func @transform_2(%arg0: i32) -> (i32, i32) {
    %c0_i32 = arith.constant 0 : i32
    %c0_i32_0 = arith.constant 0 : i32
    return %arg0, %c0_i32 : i32, i32
  }
  func.func @transform_3(%arg0: i32) -> (i32, i32) {
    %c0_i32 = arith.constant 0 : i32
    %c0_i32_0 = arith.constant 0 : i32
    return %arg0, %c0_i32 : i32, i32
  }
}

</mosaic_0001>

<bundles_post_ra>
// kernel: tpu_custom_call.1
= control target key start
LH: loop header
LB: loop body
LE: loop exit
PB: predicated region body
PF: predicated region fallthrough
CT: control target
= control target key end

     0   :  { %s8289_s12 = smov 0   ;;  %s13413_s0 = inlined_call_operand.vmem [shape: f32[256,8,32], index: 0, kind: input, shape index: {}]   ;;  %s13414_s1 = inlined_call_operand.vmem [shape: f32[2,32], index: 1, kind: input, shape index: {}]   ;;  %s13415_s2 = inlined_call_operand.vmem [shape: f32[256,1], index: 2, kind: output, shape index: {0}]   ;;  %s13416_s3 = inlined_call_operand.vmem [shape: f32[256,8], index: 3, kind: output, shape index: {1}]  }
   0x1 LB: > { %s7819_s13 = sadd.s32 4294967295, %s8266_s12   ;;  %p7823_p0 = scmp.ge.s32.totalorder %s8266_s12, 1  ;;  %s8266_s12 = sphi %s8289_s12, %s14_s12  }
   0x2   : > { %p141_p1 = scmp.lt.s32.totalorder %s8266_s12, 3 }
   0x4   : > { %p142_p2 = pnand %p7823_p0, %p141_p1 }
   0x6   : > { %145 = sbr.rel (%p142_p2) target bundleno = 2044 (0x7fc), region = 28 }
   0xd   : > { %s7824_s14 = sshll.u32 %s7819_s13, 7  ;;  %v13417_v0 = vlaneseq  ;;  %v316_v2 = vld [vmem:[%s13414_s1] sm:$0x3]  ;;  %vm449_vm0 = vcmask 261120   ;;  %vm1992_vm1 = vcmask 1041409   ;;  %vm1994_vm2 = vcmask 1042434  }
   0xe   : > { %p171_p3 = scmp.lt.s32.totalorder %s7824_s14, 255  ;;  %vm1996_vm3 = vcmask 1043459   ;;  %vm1998_vm4 = vcmask 1044484   ;;  %vm2000_vm5 = vcmask 1045509   ;;  %vm2002_vm6 = vcmask 1046534   ;;  %s7826_s23 = sshll.u32 %s7819_s13, 4 }
   0xf   : > { %v8300_v1 = vshrl.u32 %v13417_v0, 7  ;;  %vm2004_vm7 = vcmask 1047559   ;;  %vm2127_vm8 = vcmask 64512   ;;  %p177_p4 = scmp.lt.s32.totalorder %s7826_s23, 31  ;;  %vm7712_vm9 = vcmask 7168  }
  0x10   : > { %s14789_s14 = smov (!%p171_p3, %s7824_s14), 255 }
  0x11   : > { %v8306_v3 = vsub.s32 0, %v8300_v1  ;;  %s7825_s17 = sshll.u32 %s14789_s14, 3  ;;  %s14791_s23 = smov (!%p177_p4, %s7826_s23), 31 }
  0x12   : > { %s8311_s20 = scalar_lea.vmem %s13413_s0, %s7825_s17  ;;  %s7827_s24 = sshll.u32 %s14791_s23, 3 }
  0x13   : > { %13760 = vst [vmem:[#allocation2_spill] sm:$0xff] %v8306_v3  ;;  %v8314_v4 = vrot.slane %v316_v2, %v8306_v3  ;;  %v190_v5 = vld [vmem:[%s8311_s20 + $0x10] sm:$0xff]  ;;  %v188_v6 = vld [vmem:[%s8311_s20] sm:$0xff]  ;;  %v191_v7 = vld [vmem:[%s8311_s20 + $0x18] sm:$0xff]  ;;  %s12066_s27 = scalar_lea.vmem %s13416_s3, %s7827_s24  ;;  %s13291_s30 = scalar_lea.vmem %s13415_s2, %s7827_s24 }
  0x14   : > { %v189_v11 = vld [vmem:[%s8311_s20 + $0x8] sm:$0xff]  ;;  %v192_v14 = vld [vmem:[%s8311_s20 + $0x20] sm:$0xff]  ;;  %v195_v21 = vld [vmem:[%s8311_s20 + $0x38] sm:$0xff] }
  0x15   : > { %v323_v8 = vmul.f32 %v8314_v4, %v190_v5  ;;  %v321_v9 = vmul.f32 %v8314_v4, %v188_v6  ;;  %v324_v10 = vmul.f32 %v8314_v4, %v191_v7  ;;  %v322_v12 = vmul.f32 %v8314_v4, %v189_v11  ;;  %v193_v13 = vld [vmem:[%s8311_s20 + $0x28] sm:$0xff]  ;;  %v194_v22 = vld [vmem:[%s8311_s20 + $0x30] sm:$0xff]  ;;  %v196_v28 = vld [vmem:[%s8311_s20 + $0x40] sm:$0xff] }
  0x16   : > { %v326_v19 = vmul.f32 %v8314_v4, %v193_v13  ;;  %v325_v20 = vmul.f32 %v8314_v4, %v192_v14  ;;  %v328_v25 = vmul.f32 %v8314_v4, %v195_v21  ;;  %v327_v26 = vmul.f32 %v8314_v4, %v194_v22  ;;  %v197_v27 = vld [vmem:[%s8311_s20 + $0x48] sm:$0xff]  ;;  %v199_v33 = vld [vmem:[%s8311_s20 + $0x58] sm:$0xff]  ;;  %v198_v34 = vld [vmem:[%s8311_s20 + $0x50] sm:$0xff] }
  0x17   : > { %v456_v15 = vsel %vm449_vm0, %v323_v8, 0.0  ;;  %v450_v16 = vsel %vm449_vm0, %v321_v9, 0.0  ;;  %v459_v17 = vsel %vm449_vm0, %v324_v10, 0.0  ;;  %v453_v18 = vsel %vm449_vm0, %v322_v12, 0.0  ;;  %v201_v39 = vld [vmem:[%s8311_s20 + $0x68] sm:$0xff]  ;;  %v200_v40 = vld [vmem:[%s8311_s20 + $0x60] sm:$0xff] }
  0x18   : > { %457 = vadd.xlane.f32.xlu1 %v456_v15  ;;  %451 = vadd.xlane.f32.xlu0 %v450_v16  ;;  %v465_v23 = vsel %vm449_vm0, %v326_v19, 0.0  ;;  %v462_v24 = vsel %vm449_vm0, %v325_v20, 0.0  ;;  %v471_v29 = vsel %vm449_vm0, %v328_v25, 0.0  ;;  %v468_v30 = vsel %vm449_vm0, %v327_v26, 0.0  ;;  %v203_v45 = vld [vmem:[%s8311_s20 + $0x78] sm:$0xff]  ;;  %v202_v46 = vld [vmem:[%s8311_s20 + $0x70] sm:$0xff] }
  0x19   : > { %v330_v31 = vmul.f32 %v8314_v4, %v197_v27  ;;  %v329_v32 = vmul.f32 %v8314_v4, %v196_v28  ;;  %v332_v37 = vmul.f32 %v8314_v4, %v199_v33  ;;  %v331_v38 = vmul.f32 %v8314_v4, %v198_v34  ;;  %v205_v51 = vld [vmem:[%s8311_s20 + $0x88] sm:$0xff]  ;;  %v204_v52 = vld [vmem:[%s8311_s20 + $0x80] sm:$0xff]  ;;  %v207_v57 = vld [vmem:[%s8311_s20 + $0x98] sm:$0xff] }
  0x1a   : > { %v334_v43 = vmul.f32 %v8314_v4, %v201_v39  ;;  %v333_v44 = vmul.f32 %v8314_v4, %v200_v40  ;;  %v336_v49 = vmul.f32 %v8314_v4, %v203_v45  ;;  %v335_v50 = vmul.f32 %v8314_v4, %v202_v46  ;;  %v206_v58 = vld [vmem:[%s8311_s20 + $0x90] sm:$0xff]  ;;  %v209_v63 = vld [vmem:[%s8311_s20 + $0xa8] sm:$0xff]  ;;  %v208_v2 = vld [vmem:[%s8311_s20 + $0xa0] sm:$0xff] }
  0x1b   : > { %v477_v35 = vsel %vm449_vm0, %v330_v31, 0.0  ;;  %v474_v36 = vsel %vm449_vm0, %v329_v32, 0.0  ;;  %v483_v41 = vsel %vm449_vm0, %v332_v37, 0.0  ;;  %v480_v42 = vsel %vm449_vm0, %v331_v38, 0.0  ;;  %v211_v9 = vld [vmem:[%s8311_s20 + $0xb8] sm:$0xff]  ;;  %v210_v10 = vld [vmem:[%s8311_s20 + $0xb0] sm:$0xff] }
  0x1c   : > { %460 = vadd.xlane.f32.xlu1 %v459_v17  ;;  %454 = vadd.xlane.f32.xlu0 %v453_v18  ;;  %v489_v47 = vsel %vm449_vm0, %v334_v43, 0.0  ;;  %v486_v48 = vsel %vm449_vm0, %v333_v44, 0.0  ;;  %v495_v53 = vsel %vm449_vm0, %v336_v49, 0.0  ;;  %v492_v54 = vsel %vm449_vm0, %v335_v50, 0.0  ;;  %v213_v15 = vld [vmem:[%s8311_s20 + $0xc8] sm:$0xff]  ;;  %v212_v16 = vld [vmem:[%s8311_s20 + $0xc0] sm:$0xff] }
  0x1d   : > { %v338_v55 = vmul.f32 %v8314_v4, %v205_v51  ;;  %v337_v56 = vmul.f32 %v8314_v4, %v204_v52  ;;  %v340_v61 = vmul.f32 %v8314_v4, %v207_v57  ;;  %v339_v62 = vmul.f32 %v8314_v4, %v206_v58  ;;  %v215_v21 = vld [vmem:[%s8311_s20 + $0xd8] sm:$0xff]  ;;  %v214_v22 = vld [vmem:[%s8311_s20 + $0xd0] sm:$0xff]  ;;  %v217_v27 = vld [vmem:[%s8311_s20 + $0xe8] sm:$0xff] }
  0x1e   : > { %v342_v7 = vmul.f32 %v8314_v4, %v209_v63  ;;  %v341_v8 = vmul.f32 %v8314_v4, %v208_v2  ;;  %v344_v13 = vmul.f32 %v8314_v4, %v211_v9  ;;  %v343_v14 = vmul.f32 %v8314_v4, %v210_v10  ;;  %v216_v28 = vld [vmem:[%s8311_s20 + $0xe0] sm:$0xff]  ;;  %v219_v33 = vld [vmem:[%s8311_s20 + $0xf8] sm:$0xff]  ;;  %v218_v34 = vld [vmem:[%s8311_s20 + $0xf0] sm:$0xff] }
  0x1f   : > { %v501_v59 = vsel %vm449_vm0, %v338_v55, 0.0  ;;  %v498_v60 = vsel %vm449_vm0, %v337_v56, 0.0  ;;  %v507_v5 = vsel %vm449_vm0, %v340_v61, 0.0  ;;  %v504_v6 = vsel %vm449_vm0, %v339_v62, 0.0  ;;  %v221_v39 = vld [vmem:[%s8311_s20 + $0x108] sm:$0xff]  ;;  %v220_v40 = vld [vmem:[%s8311_s20 + $0x100] sm:$0xff] }
  0x20   : > { %466 = vadd.xlane.f32.xlu1 %v465_v23  ;;  %463 = vadd.xlane.f32.xlu0 %v462_v24  ;;  %v513_v11 = vsel %vm449_vm0, %v342_v7, 0.0  ;;  %v510_v12 = vsel %vm449_vm0, %v341_v8, 0.0  ;;  %v519_v17 = vsel %vm449_vm0, %v344_v13, 0.0  ;;  %v516_v18 = vsel %vm449_vm0, %v343_v14, 0.0  ;;  %v223_v45 = vld [vmem:[%s8311_s20 + $0x118] sm:$0xff]  ;;  %v222_v46 = vld [vmem:[%s8311_s20 + $0x110] sm:$0xff] }
  0x21   : > { %v346_v19 = vmul.f32 %v8314_v4, %v213_v15  ;;  %v345_v20 = vmul.f32 %v8314_v4, %v212_v16  ;;  %v348_v25 = vmul.f32 %v8314_v4, %v215_v21  ;;  %v347_v26 = vmul.f32 %v8314_v4, %v214_v22  ;;  %v225_v51 = vld [vmem:[%s8311_s20 + $0x128] sm:$0xff]  ;;  %v224_v52 = vld [vmem:[%s8311_s20 + $0x120] sm:$0xff]  ;;  %v227_v57 = vld [vmem:[%s8311_s20 + $0x138] sm:$0xff] }
  0x22   : > { %v350_v31 = vmul.f32 %v8314_v4, %v217_v27  ;;  %v349_v32 = vmul.f32 %v8314_v4, %v216_v28  ;;  %v352_v37 = vmul.f32 %v8314_v4, %v219_v33  ;;  %v351_v38 = vmul.f32 %v8314_v4, %v218_v34  ;;  %v226_v58 = vld [vmem:[%s8311_s20 + $0x130] sm:$0xff]  ;;  %v229_v63 = vld [vmem:[%s8311_s20 + $0x148] sm:$0xff]  ;;  %v228_v2 = vld [vmem:[%s8311_s20 + $0x140] sm:$0xff] }
  0x23   : > { %v525_v23 = vsel %vm449_vm0, %v346_v19, 0.0  ;;  %v522_v24 = vsel %vm449_vm0, %v345_v20, 0.0  ;;  %v354_v43 = vmul.f32 %v8314_v4, %v221_v39  ;;  %v353_v44 = vmul.f32 %v8314_v4, %v220_v40  ;;  %v231_v9 = vld [vmem:[%s8311_s20 + $0x158] sm:$0xff]  ;;  %v230_v10 = vld [vmem:[%s8311_s20 + $0x150] sm:$0xff]  ;;  %v233_v15 = vld [vmem:[%s8311_s20 + $0x168] sm:$0xff] }
  0x24   : > { %472 = vadd.xlane.f32.xlu1 %v471_v29  ;;  %469 = vadd.xlane.f32.xlu0 %v468_v30  ;;  %v531_v29 = vsel %vm449_vm0, %v348_v25, 0.0  ;;  %v528_v30 = vsel %vm449_vm0, %v347_v26, 0.0  ;;  %v356_v49 = vmul.f32 %v8314_v4, %v223_v45  ;;  %v355_v50 = vmul.f32 %v8314_v4, %v222_v46  ;;  %v232_v16 = vld [vmem:[%s8311_s20 + $0x160] sm:$0xff]  ;;  %v235_v21 = vld [vmem:[%s8311_s20 + $0x178] sm:$0xff]  ;;  %v234_v22 = vld [vmem:[%s8311_s20 + $0x170] sm:$0xff] }
  0x25   : > { %v358_v55 = vmul.f32 %v8314_v4, %v225_v51  ;;  %v357_v56 = vmul.f32 %v8314_v4, %v224_v52  ;;  %v360_v61 = vmul.f32 %v8314_v4, %v227_v57  ;;  %v359_v62 = vmul.f32 %v8314_v4, %v226_v58  ;;  %v237_v27 = vld [vmem:[%s8311_s20 + $0x188] sm:$0xff]  ;;  %v236_v28 = vld [vmem:[%s8311_s20 + $0x180] sm:$0xff]  ;;  %v239_v33 = vld [vmem:[%s8311_s20 + $0x198] sm:$0xff] }
  0x26   : > { %v362_v7 = vmul.f32 %v8314_v4, %v229_v63  ;;  %v361_v8 = vmul.f32 %v8314_v4, %v228_v2  ;;  %v364_v13 = vmul.f32 %v8314_v4, %v231_v9  ;;  %v363_v14 = vmul.f32 %v8314_v4, %v230_v10  ;;  %v238_v34 = vld [vmem:[%s8311_s20 + $0x190] sm:$0xff]  ;;  %v241_v39 = vld [vmem:[%s8311_s20 + $0x1a8] sm:$0xff]  ;;  %v240_v40 = vld [vmem:[%s8311_s20 + $0x1a0] sm:$0xff] }
  0x27   : > { %v366_v19 = vmul.f32 %v8314_v4, %v233_v15  ;;  %v365_v20 = vmul.f32 %v8314_v4, %v232_v16  ;;  %v368_v25 = vmul.f32 %v8314_v4, %v235_v21  ;;  %v367_v26 = vmul.f32 %v8314_v4, %v234_v22  ;;  %v243_v45 = vld [vmem:[%s8311_s20 + $0x1b8] sm:$0xff]  ;;  %v242_v46 = vld [vmem:[%s8311_s20 + $0x1b0] sm:$0xff]  ;;  %v245_v51 = vld [vmem:[%s8311_s20 + $0x1c8] sm:$0xff] }
  0x28   : > { %478 = vadd.xlane.f32.xlu1 %v477_v35  ;;  %475 = vadd.xlane.f32.xlu0 %v474_v36  ;;  %v537_v35 = vsel %vm449_vm0, %v350_v31, 0.0  ;;  %v534_v36 = vsel %vm449_vm0, %v349_v32, 0.0  ;;  %v370_v31 = vmul.f32 %v8314_v4, %v237_v27  ;;  %v369_v32 = vmul.f32 %v8314_v4, %v236_v28  ;;  %v244_v52 = vld [vmem:[%s8311_s20 + $0x1c0] sm:$0xff]  ;;  %v247_v57 = vld [vmem:[%s8311_s20 + $0x1d8] sm:$0xff]  ;;  %v246_v58 = vld [vmem:[%s8311_s20 + $0x1d0] sm:$0xff] }
  0x29   : > { %v249_v63 = vld [vmem:[%s8311_s20 + $0x1e8] sm:$0xff]  ;;  %v248_v2 = vld [vmem:[%s8311_s20 + $0x1e0] sm:$0xff]  ;;  %v251_v9 = vld [vmem:[%s8311_s20 + $0x1f8] sm:$0xff] }
  0x2a   : > { %v250_v10 = vld [vmem:[%s8311_s20 + $0x1f0] sm:$0xff]  ;;  %v253_v15 = vld [vmem:[%s8311_s20 + $0x208] sm:$0xff]  ;;  %v252_v16 = vld [vmem:[%s8311_s20 + $0x200] sm:$0xff] }
  0x2b   : > { %v255_v21 = vld [vmem:[%s8311_s20 + $0x218] sm:$0xff]  ;;  %v254_v22 = vld [vmem:[%s8311_s20 + $0x210] sm:$0xff]  ;;  %v257_v27 = vld [vmem:[%s8311_s20 + $0x228] sm:$0xff] }
  0x2c   : > { %484 = vadd.xlane.f32.xlu1 %v483_v41  ;;  %481 = vadd.xlane.f32.xlu0 %v480_v42  ;;  %v543_v41 = vsel %vm449_vm0, %v352_v37, 0.0  ;;  %v540_v42 = vsel %vm449_vm0, %v351_v38, 0.0  ;;  %v372_v37 = vmul.f32 %v8314_v4, %v239_v33  ;;  %v371_v38 = vmul.f32 %v8314_v4, %v238_v34  ;;  %v256_v28 = vld [vmem:[%s8311_s20 + $0x220] sm:$0xff]  ;;  %v259_v33 = vld [vmem:[%s8311_s20 + $0x238] sm:$0xff]  ;;  %v258_v34 = vld [vmem:[%s8311_s20 + $0x230] sm:$0xff] }
  0x2d   : > { %v313_v3 = vld [vmem:[%s8311_s20 + $0x3e8] sm:$0xff] }
  0x30   : > { %490 = vadd.xlane.f32.xlu1 %v489_v47  ;;  %487 = vadd.xlane.f32.xlu0 %v486_v48  ;;  %v549_v47 = vsel %vm449_vm0, %v354_v43, 0.0  ;;  %v546_v48 = vsel %vm449_vm0, %v353_v44, 0.0  ;;  %v374_v43 = vmul.f32 %v8314_v4, %v241_v39  ;;  %v373_v44 = vmul.f32 %v8314_v4, %v240_v40  ;;  %v261_v39 = vld [vmem:[%s8311_s20 + $0x248] sm:$0xff]  ;;  %v260_v40 = vld [vmem:[%s8311_s20 + $0x240] sm:$0xff] }
  0x34   : > { %496 = vadd.xlane.f32.xlu1 %v495_v53  ;;  %493 = vadd.xlane.f32.xlu0 %v492_v54  ;;  %v555_v53 = vsel %vm449_vm0, %v356_v49, 0.0  ;;  %v552_v54 = vsel %vm449_vm0, %v355_v50, 0.0  ;;  %v376_v49 = vmul.f32 %v8314_v4, %v243_v45  ;;  %v375_v50 = vmul.f32 %v8314_v4, %v242_v46  ;;  %v263_v45 = vld [vmem:[%s8311_s20 + $0x258] sm:$0xff]  ;;  %v262_v46 = vld [vmem:[%s8311_s20 + $0x250] sm:$0xff] }
  0x38   : > { %502 = vadd.xlane.f32.xlu1 %v501_v59  ;;  %499 = vadd.xlane.f32.xlu0 %v498_v60  ;;  %v561_v59 = vsel %vm449_vm0, %v358_v55, 0.0  ;;  %v558_v60 = vsel %vm449_vm0, %v357_v56, 0.0  ;;  %v378_v55 = vmul.f32 %v8314_v4, %v245_v51  ;;  %v377_v56 = vmul.f32 %v8314_v4, %v244_v52 }
  0x39   : > { %v396_v51 = vmul.f32 %v8314_v4, %v263_v45  ;;  %v395_v52 = vmul.f32 %v8314_v4, %v262_v46 }
  0x3c   : > { %508 = vadd.xlane.f32.xlu1 %v507_v5  ;;  %505 = vadd.xlane.f32.xlu0 %v504_v6  ;;  %v567_v5 = vsel %vm449_vm0, %v360_v61, 0.0  ;;  %v564_v6 = vsel %vm449_vm0, %v359_v62, 0.0  ;;  %v380_v61 = vmul.f32 %v8314_v4, %v247_v57  ;;  %v379_v62 = vmul.f32 %v8314_v4, %v246_v58 }
  0x3d   : > { %v675_v57 = vsel %vm449_vm0, %v396_v51, 0.0  ;;  %v672_v58 = vsel %vm449_vm0, %v395_v52, 0.0  ;;  %v279_v51 = vld [vmem:[%s8311_s20 + $0x2d8] sm:$0xff]  ;;  %v278_v52 = vld [vmem:[%s8311_s20 + $0x2d0] sm:$0xff] }
  0x40   : > { %514 = vadd.xlane.f32.xlu1 %v513_v11  ;;  %511 = vadd.xlane.f32.xlu0 %v510_v12  ;;  %v573_v11 = vsel %vm449_vm0, %v362_v7, 0.0  ;;  %v570_v12 = vsel %vm449_vm0, %v361_v8, 0.0  ;;  %v382_v7 = vmul.f32 %v8314_v4, %v249_v63  ;;  %v381_v8 = vmul.f32 %v8314_v4, %v248_v2 }
  0x44   : > { %520 = vadd.xlane.f32.xlu1 %v519_v17  ;;  %517 = vadd.xlane.f32.xlu0 %v516_v18  ;;  %v579_v17 = vsel %vm449_vm0, %v364_v13, 0.0  ;;  %v576_v18 = vsel %vm449_vm0, %v363_v14, 0.0  ;;  %v384_v13 = vmul.f32 %v8314_v4, %v251_v9  ;;  %v383_v14 = vmul.f32 %v8314_v4, %v250_v10  ;;  %v269_v9 = vld [vmem:[%s8311_s20 + $0x288] sm:$0xff]  ;;  %v268_v10 = vld [vmem:[%s8311_s20 + $0x280] sm:$0xff] }
  0x48   : > { %526 = vadd.xlane.f32.xlu1 %v525_v23  ;;  %523 = vadd.xlane.f32.xlu0 %v522_v24  ;;  %v585_v23 = vsel %vm449_vm0, %v366_v19, 0.0  ;;  %v582_v24 = vsel %vm449_vm0, %v365_v20, 0.0  ;;  %v386_v19 = vmul.f32 %v8314_v4, %v253_v15  ;;  %v385_v20 = vmul.f32 %v8314_v4, %v252_v16 }
  0x49   : > { %v402_v15 = vmul.f32 %v8314_v4, %v269_v9  ;;  %v401_v16 = vmul.f32 %v8314_v4, %v268_v10 }
  0x4c   : > { %532 = vadd.xlane.f32.xlu1 %v531_v29  ;;  %529 = vadd.xlane.f32.xlu0 %v528_v30  ;;  %v591_v29 = vsel %vm449_vm0, %v368_v25, 0.0  ;;  %v588_v30 = vsel %vm449_vm0, %v367_v26, 0.0  ;;  %v388_v25 = vmul.f32 %v8314_v4, %v255_v21  ;;  %v387_v26 = vmul.f32 %v8314_v4, %v254_v22 }
  0x4d   : > { %v693_v21 = vsel %vm449_vm0, %v402_v15, 0.0  ;;  %v690_v22 = vsel %vm449_vm0, %v401_v16, 0.0 }
  0x50   : > { %538 = vadd.xlane.f32.xlu1 %v537_v35  ;;  %535 = vadd.xlane.f32.xlu0 %v534_v36  ;;  %v597_v35 = vsel %vm449_vm0, %v370_v31, 0.0  ;;  %v594_v36 = vsel %vm449_vm0, %v369_v32, 0.0  ;;  %v390_v31 = vmul.f32 %v8314_v4, %v257_v27  ;;  %v389_v32 = vmul.f32 %v8314_v4, %v256_v28 }
  0x54   : > { %544 = vadd.xlane.f32.xlu1 %v543_v41  ;;  %541 = vadd.xlane.f32.xlu0 %v540_v42  ;;  %v603_v41 = vsel %vm449_vm0, %v372_v37, 0.0  ;;  %v600_v42 = vsel %vm449_vm0, %v371_v38, 0.0  ;;  %v392_v37 = vmul.f32 %v8314_v4, %v259_v33  ;;  %v391_v38 = vmul.f32 %v8314_v4, %v258_v34  ;;  %v275_v33 = vld [vmem:[%s8311_s20 + $0x2b8] sm:$0xff]  ;;  %v274_v34 = vld [vmem:[%s8311_s20 + $0x2b0] sm:$0xff] }
  0x58   : > { %550 = vadd.xlane.f32.xlu1 %v549_v47  ;;  %547 = vadd.xlane.f32.xlu0 %v546_v48  ;;  %v609_v47 = vsel %vm449_vm0, %v374_v43, 0.0  ;;  %v606_v48 = vsel %vm449_vm0, %v373_v44, 0.0  ;;  %v394_v43 = vmul.f32 %v8314_v4, %v261_v39  ;;  %v393_v44 = vmul.f32 %v8314_v4, %v260_v40 }
  0x59   : > { %v408_v39 = vmul.f32 %v8314_v4, %v275_v33  ;;  %v407_v40 = vmul.f32 %v8314_v4, %v274_v34  ;;  %v287_v33 = vld [vmem:[%s8311_s20 + $0x318] sm:$0xff]  ;;  %v286_v34 = vld [vmem:[%s8311_s20 + $0x310] sm:$0xff] }
  0x5b   : > { %v711_v45 = vsel %vm449_vm0, %v408_v39, 0.0  ;;  %v708_v46 = vsel %vm449_vm0, %v407_v40, 0.0 }
  0x5c   : > { %556 = vadd.xlane.f32.xlu1 %v555_v53  ;;  %553 = vadd.xlane.f32.xlu0 %v552_v54  ;;  %v615_v53 = vsel %vm449_vm0, %v376_v49, 0.0  ;;  %v612_v54 = vsel %vm449_vm0, %v375_v50, 0.0  ;;  %v669_v49 = vsel %vm449_vm0, %v394_v43, 0.0  ;;  %v666_v50 = vsel %vm449_vm0, %v393_v44, 0.0 }
  0x60   : > { %562 = vadd.xlane.f32.xlu1 %v561_v59  ;;  %559 = vadd.xlane.f32.xlu0 %v558_v60  ;;  %v621_v59 = vsel %vm449_vm0, %v378_v55, 0.0  ;;  %v618_v60 = vsel %vm449_vm0, %v377_v56, 0.0 }
  0x64   : > { %568 = vadd.xlane.f32.xlu1 %v567_v5  ;;  %565 = vadd.xlane.f32.xlu0 %v564_v6  ;;  %v627_v5 = vsel %vm449_vm0, %v380_v61, 0.0  ;;  %v624_v6 = vsel %vm449_vm0, %v379_v62, 0.0  ;;  %v267_v61 = vld [vmem:[%s8311_s20 + $0x278] sm:$0xff]  ;;  %v266_v62 = vld [vmem:[%s8311_s20 + $0x270] sm:$0xff] }
  0x68   : > { %574 = vadd.xlane.f32.xlu1 %v573_v11  ;;  %571 = vadd.xlane.f32.xlu0 %v570_v12  ;;  %v633_v11 = vsel %vm449_vm0, %v382_v7, 0.0  ;;  %v630_v12 = vsel %vm449_vm0, %v381_v8, 0.0  ;;  %v400_v7 = vmul.f32 %v8314_v4, %v267_v61  ;;  %v399_v8 = vmul.f32 %v8314_v4, %v266_v62  ;;  %v281_v61 = vld [vmem:[%s8311_s20 + $0x2e8] sm:$0xff]  ;;  %v280_v62 = vld [vmem:[%s8311_s20 + $0x2e0] sm:$0xff] }
  0x69   : > { %v414_v9 = vmul.f32 %v8314_v4, %v281_v61  ;;  %v413_v10 = vmul.f32 %v8314_v4, %v280_v62 }
  0x6c   : > { %580 = vadd.xlane.f32.xlu1 %v579_v17  ;;  %577 = vadd.xlane.f32.xlu0 %v576_v18  ;;  %v639_v17 = vsel %vm449_vm0, %v384_v13, 0.0  ;;  %v636_v18 = vsel %vm449_vm0, %v383_v14, 0.0  ;;  %v687_v13 = vsel %vm449_vm0, %v400_v7, 0.0  ;;  %v684_v14 = vsel %vm449_vm0, %v399_v8, 0.0 }
  0x70   : > { %586 = vadd.xlane.f32.xlu1 %v585_v23  ;;  %583 = vadd.xlane.f32.xlu0 %v582_v24  ;;  %v645_v23 = vsel %vm449_vm0, %v386_v19, 0.0  ;;  %v642_v24 = vsel %vm449_vm0, %v385_v20, 0.0 }
  0x74   : > { %592 = vadd.xlane.f32.xlu1 %v591_v29  ;;  %589 = vadd.xlane.f32.xlu0 %v588_v30  ;;  %v651_v29 = vsel %vm449_vm0, %v388_v25, 0.0  ;;  %v648_v30 = vsel %vm449_vm0, %v387_v26, 0.0  ;;  %v273_v25 = vld [vmem:[%s8311_s20 + $0x2a8] sm:$0xff]  ;;  %v272_v26 = vld [vmem:[%s8311_s20 + $0x2a0] sm:$0xff] }
  0x78   : > { %598 = vadd.xlane.f32.xlu1 %v597_v35  ;;  %595 = vadd.xlane.f32.xlu0 %v594_v36  ;;  %v657_v35 = vsel %vm449_vm0, %v390_v31, 0.0  ;;  %v654_v36 = vsel %vm449_vm0, %v389_v32, 0.0  ;;  %v406_v31 = vmul.f32 %v8314_v4, %v273_v25  ;;  %v405_v32 = vmul.f32 %v8314_v4, %v272_v26 }
  0x7c   : > { %604 = vadd.xlane.f32.xlu1 %v603_v41  ;;  %601 = vadd.xlane.f32.xlu0 %v600_v42  ;;  %v663_v41 = vsel %vm449_vm0, %v392_v37, 0.0  ;;  %v660_v42 = vsel %vm449_vm0, %v391_v38, 0.0  ;;  %v705_v37 = vsel %vm449_vm0, %v406_v31, 0.0  ;;  %v702_v38 = vsel %vm449_vm0, %v405_v32, 0.0 }
  0x80   : > { %610 = vadd.xlane.f32.xlu1 %v609_v47  ;;  %607 = vadd.xlane.f32.xlu0 %v606_v48 }
  0x84   : > { %616 = vadd.xlane.f32.xlu1 %v615_v53  ;;  %613 = vadd.xlane.f32.xlu0 %v612_v54  ;;  %v265_v53 = vld [vmem:[%s8311_s20 + $0x268] sm:$0xff]  ;;  %v264_v54 = vld [vmem:[%s8311_s20 + $0x260] sm:$0xff] }
  0x88   : > { %622 = vadd.xlane.f32.xlu1 %v621_v59  ;;  %619 = vadd.xlane.f32.xlu0 %v618_v60  ;;  %v398_v59 = vmul.f32 %v8314_v4, %v265_v53  ;;  %v397_v60 = vmul.f32 %v8314_v4, %v264_v54 }
  0x8c   : > { %628 = vadd.xlane.f32.xlu1 %v627_v5  ;;  %625 = vadd.xlane.f32.xlu0 %v624_v6  ;;  %v681_v5 = vsel %vm449_vm0, %v398_v59, 0.0  ;;  %v678_v6 = vsel %vm449_vm0, %v397_v60, 0.0  ;;  %v412_v59 = vmul.f32 %v8314_v4, %v279_v51  ;;  %v411_v60 = vmul.f32 %v8314_v4, %v278_v52 }
  0x8e   : > { %v723_v7 = vsel %vm449_vm0, %v412_v59, 0.0  ;;  %v720_v8 = vsel %vm449_vm0, %v411_v60, 0.0  ;;  %v291_v59 = vld [vmem:[%s8311_s20 + $0x338] sm:$0xff]  ;;  %v290_v60 = vld [vmem:[%s8311_s20 + $0x330] sm:$0xff] }
  0x90   : > { %634 = vadd.xlane.f32.xlu1 %v633_v11  ;;  %631 = vadd.xlane.f32.xlu0 %v630_v12 }
  0x94   : > { %640 = vadd.xlane.f32.xlu1 %v639_v17  ;;  %637 = vadd.xlane.f32.xlu0 %v636_v18  ;;  %v271_v17 = vld [vmem:[%s8311_s20 + $0x298] sm:$0xff]  ;;  %v270_v18 = vld [vmem:[%s8311_s20 + $0x290] sm:$0xff] }
  0x98   : > { %646 = vadd.xlane.f32.xlu1 %v645_v23  ;;  %643 = vadd.xlane.f32.xlu0 %v642_v24  ;;  %v404_v23 = vmul.f32 %v8314_v4, %v271_v17  ;;  %v403_v24 = vmul.f32 %v8314_v4, %v270_v18  ;;  %v729_v17 = vsel %vm449_vm0, %v414_v9, 0.0  ;;  %v726_v18 = vsel %vm449_vm0, %v413_v10, 0.0 }
  0x99   : > { %v424_v9 = vmul.f32 %v8314_v4, %v291_v59  ;;  %v423_v10 = vmul.f32 %v8314_v4, %v290_v60  ;;  %v299_v59 = vld [vmem:[%s8311_s20 + $0x378] sm:$0xff]  ;;  %v298_v60 = vld [vmem:[%s8311_s20 + $0x370] sm:$0xff] }
  0x9c   : > { %652 = vadd.xlane.f32.xlu1 %v651_v29  ;;  %649 = vadd.xlane.f32.xlu0 %v648_v30  ;;  %v699_v29 = vsel %vm449_vm0, %v404_v23, 0.0  ;;  %v696_v30 = vsel %vm449_vm0, %v403_v24, 0.0  ;;  %v285_v23 = vld [vmem:[%s8311_s20 + $0x308] sm:$0xff]  ;;  %v284_v24 = vld [vmem:[%s8311_s20 + $0x300] sm:$0xff] }
  0x9d   : > { %v418_v31 = vmul.f32 %v8314_v4, %v285_v23  ;;  %v417_v32 = vmul.f32 %v8314_v4, %v284_v24 }
  0x9f   : > { %v741_v39 = vsel %vm449_vm0, %v418_v31, 0.0  ;;  %v738_v40 = vsel %vm449_vm0, %v417_v32, 0.0 }
  0xa0   : > { %658 = vadd.xlane.f32.xlu1 %v657_v35  ;;  %655 = vadd.xlane.f32.xlu0 %v654_v36 }
  0xa4   : > { %664 = vadd.xlane.f32.xlu1 %v663_v41  ;;  %661 = vadd.xlane.f32.xlu0 %v660_v42  ;;  %v277_v41 = vld [vmem:[%s8311_s20 + $0x2c8] sm:$0xff]  ;;  %v276_v42 = vld [vmem:[%s8311_s20 + $0x2c0] sm:$0xff] }
  0xa5   : > { %v8538_v47 = vpop.xlane.xlu1 %457  ;;  %v8540_v48 = vpop.xlane.xlu0 %451 }
  0xa6   : > { %13761 = vst [vmem:[#allocation3_spill] sm:$0xff] %v8538_v47  ;;  %13762 = vst [vmem:[#allocation4_spill] sm:$0xff] %v8540_v48 }
  0xa8   : > { %670 = vadd.xlane.f32.xlu1 %v669_v49  ;;  %667 = vadd.xlane.f32.xlu0 %v666_v50  ;;  %v410_v49 = vmul.f32 %v8314_v4, %v277_v41  ;;  %v409_v50 = vmul.f32 %v8314_v4, %v276_v42  ;;  %v420_v41 = vmul.f32 %v8314_v4, %v287_v33 }
  0xa9   : > { %v8548_v55 = vpop.xlane.xlu1 %460  ;;  %v8550_v56 = vpop.xlane.xlu0 %454  ;;  %v419_v42 = vmul.f32 %v8314_v4, %v286_v34 }
  0xaa   : > { %13763 = vst [vmem:[#allocation5_spill] sm:$0xff] %v8550_v56  ;;  %v747_v51 = vsel %vm449_vm0, %v420_v41, 0.0  ;;  %v297_v41 = vld [vmem:[%s8311_s20 + $0x368] sm:$0xff] }
  0xab   : > { %v744_v52 = vsel %vm449_vm0, %v419_v42, 0.0  ;;  %v296_v42 = vld [vmem:[%s8311_s20 + $0x360] sm:$0xff] }
  0xac   : > { %676 = vadd.xlane.f32.xlu1 %v675_v57  ;;  %673 = vadd.xlane.f32.xlu0 %v672_v58  ;;  %v717_v57 = vsel %vm449_vm0, %v410_v49, 0.0  ;;  %v714_v58 = vsel %vm449_vm0, %v409_v50, 0.0 }
  0xad   : > { %v8558_v63 = vpop.xlane.xlu1 %466  ;;  %v8560_v2 = vpop.xlane.xlu0 %463 }
  0xae   : > { %13764 = vst [vmem:[#allocation6_spill] sm:$0xff] %v8560_v2 }
  0xb0   : > { %682 = vadd.xlane.f32.xlu1 %v681_v5  ;;  %679 = vadd.xlane.f32.xlu0 %v678_v6 }
  0xb1   : > { %v8568_v11 = vpop.xlane.xlu1 %472  ;;  %v8570_v12 = vpop.xlane.xlu0 %469 }
  0xb4   : > { %688 = vadd.xlane.f32.xlu1 %v687_v13  ;;  %685 = vadd.xlane.f32.xlu0 %v684_v14  ;;  %v283_v13 = vld [vmem:[%s8311_s20 + $0x2f8] sm:$0xff]  ;;  %v282_v14 = vld [vmem:[%s8311_s20 + $0x2f0] sm:$0xff] }
  0xb5   : > { %v8578_v19 = vpop.xlane.xlu1 %478  ;;  %v8580_v20 = vpop.xlane.xlu0 %475 }
  0xb6   : > { %13765 = vst [vmem:[#allocation7_spill] sm:$0xff] %v8580_v20 }
  0xb8   : > { %694 = vadd.xlane.f32.xlu1 %v693_v21  ;;  %691 = vadd.xlane.f32.xlu0 %v690_v22  ;;  %v416_v21 = vmul.f32 %v8314_v4, %v283_v13  ;;  %v415_v22 = vmul.f32 %v8314_v4, %v282_v14  ;;  %v293_v13 = vld [vmem:[%s8311_s20 + $0x348] sm:$0xff]  ;;  %v292_v14 = vld [vmem:[%s8311_s20 + $0x340] sm:$0xff] }
  0xb9   : > { %v8588_v27 = vpop.xlane.xlu1 %484  ;;  %v8590_v28 = vpop.xlane.xlu0 %481  ;;  %v426_v23 = vmul.f32 %v8314_v4, %v293_v13  ;;  %v425_v24 = vmul.f32 %v8314_v4, %v292_v14  ;;  %v432_v13 = vmul.f32 %v8314_v4, %v299_v59  ;;  %v431_v14 = vmul.f32 %v8314_v4, %v298_v60  ;;  %v305_v59 = vld [vmem:[%s8311_s20 + $0x3a8] sm:$0xff]  ;;  %v304_v60 = vld [vmem:[%s8311_s20 + $0x3a0] sm:$0xff] }
  0xba   : > { %13766 = vst [vmem:[#allocation8_spill] sm:$0xff] %v8590_v28 }
  0xbb   : > { %v765_v33 = vsel %vm449_vm0, %v426_v23, 0.0  ;;  %v762_v34 = vsel %vm449_vm0, %v425_v24, 0.0 }
  0xbc   : > { %700 = vadd.xlane.f32.xlu1 %v699_v29  ;;  %697 = vadd.xlane.f32.xlu0 %v696_v30  ;;  %v735_v29 = vsel %vm449_vm0, %v416_v21, 0.0  ;;  %v732_v30 = vsel %vm449_vm0, %v415_v22, 0.0  ;;  %v759_v21 = vsel %vm449_vm0, %v424_v9, 0.0  ;;  %v756_v22 = vsel %vm449_vm0, %v423_v10, 0.0 }
  0xbd   : > { %v8598_v35 = vpop.xlane.xlu1 %490  ;;  %v8600_v36 = vpop.xlane.xlu0 %487 }
  0xc0   : > { %706 = vadd.xlane.f32.xlu1 %v705_v37  ;;  %703 = vadd.xlane.f32.xlu0 %v702_v38 }
  0xc1   : > { %v8608_v43 = vpop.xlane.xlu1 %496  ;;  %v8610_v44 = vpop.xlane.xlu0 %493 }
  0xc4   : > { %712 = vadd.xlane.f32.xlu1 %v711_v45  ;;  %709 = vadd.xlane.f32.xlu0 %v708_v46  ;;  %v289_v45 = vld [vmem:[%s8311_s20 + $0x328] sm:$0xff]  ;;  %v288_v46 = vld [vmem:[%s8311_s20 + $0x320] sm:$0xff] }
  0xc5   : > { %v8618_v53 = vpop.xlane.xlu1 %502  ;;  %v8620_v54 = vpop.xlane.xlu0 %499 }
  0xc6   : > { %13767 = vst [vmem:[#allocation9_spill] sm:$0xff] %v8618_v53  ;;  %13768 = vst [vmem:[#allocation10_spill] sm:$0xff] %v8620_v54 }
  0xc8   : > { %718 = vadd.xlane.f32.xlu1 %v717_v57  ;;  %715 = vadd.xlane.f32.xlu0 %v714_v58  ;;  %v422_v57 = vmul.f32 %v8314_v4, %v289_v45  ;;  %v421_v58 = vmul.f32 %v8314_v4, %v288_v46 }
  0xc9   : > { %v8628_v5 = vpop.xlane.xlu1 %508  ;;  %v8630_v6 = vpop.xlane.xlu0 %505 }
  0xca   : > { %13769 = vst [vmem:[#allocation11_spill] sm:$0xff] %v8630_v6 }
  0xcc   : > { %724 = vadd.xlane.f32.xlu1 %v723_v7  ;;  %721 = vadd.xlane.f32.xlu0 %v720_v8  ;;  %v753_v7 = vsel %vm449_vm0, %v422_v57, 0.0  ;;  %v750_v8 = vsel %vm449_vm0, %v421_v58, 0.0  ;;  %v430_v57 = vmul.f32 %v8314_v4, %v297_v41  ;;  %v429_v58 = vmul.f32 %v8314_v4, %v296_v42 }
  0xcd   : > { %v8638_v15 = vpop.xlane.xlu1 %514  ;;  %v8640_v16 = vpop.xlane.xlu0 %511 }
  0xce   : > { %v777_v9 = vsel %vm449_vm0, %v430_v57, 0.0  ;;  %v774_v10 = vsel %vm449_vm0, %v429_v58, 0.0 }
  0xd0   : > { %730 = vadd.xlane.f32.xlu1 %v729_v17  ;;  %727 = vadd.xlane.f32.xlu0 %v726_v18 }
  0xd1   : > { %v8648_v25 = vpop.xlane.xlu1 %520  ;;  %v8650_v26 = vpop.xlane.xlu0 %517 }
  0xd4   : > { %736 = vadd.xlane.f32.xlu1 %v735_v29  ;;  %733 = vadd.xlane.f32.xlu0 %v732_v30  ;;  %v295_v29 = vld [vmem:[%s8311_s20 + $0x358] sm:$0xff]  ;;  %v294_v30 = vld [vmem:[%s8311_s20 + $0x350] sm:$0xff] }
  0xd5   : > { %v8658_v37 = vpop.xlane.xlu1 %526  ;;  %v8660_v38 = vpop.xlane.xlu0 %523 }
  0xd6   : > { %13770 = vst [vmem:[#allocation12_spill] sm:$0xff] %v8660_v38 }
  0xd8   : > { %742 = vadd.xlane.f32.xlu1 %v741_v39  ;;  %739 = vadd.xlane.f32.xlu0 %v738_v40  ;;  %v428_v39 = vmul.f32 %v8314_v4, %v295_v29  ;;  %v427_v40 = vmul.f32 %v8314_v4, %v294_v30  ;;  %v783_v29 = vsel %vm449_vm0, %v432_v13, 0.0  ;;  %v780_v30 = vsel %vm449_vm0, %v431_v14, 0.0 }
  0xd9   : > { %v8668_v49 = vpop.xlane.xlu1 %532  ;;  %v8670_v50 = vpop.xlane.xlu0 %529 }
  0xda   : > { %13771 = vst [vmem:[#allocation13_spill] sm:$0xff] %v8670_v50 }
  0xdc   : > { %748 = vadd.xlane.f32.xlu1 %v747_v51  ;;  %745 = vadd.xlane.f32.xlu0 %v744_v52  ;;  %v771_v51 = vsel %vm449_vm0, %v428_v39, 0.0  ;;  %v768_v52 = vsel %vm449_vm0, %v427_v40, 0.0  ;;  %v303_v39 = vld [vmem:[%s8311_s20 + $0x398] sm:$0xff]  ;;  %v302_v40 = vld [vmem:[%s8311_s20 + $0x390] sm:$0xff] }
  0xdd   : > { %v8678_v61 = vpop.xlane.xlu1 %538  ;;  %v8680_v62 = vpop.xlane.xlu0 %535  ;;  %v436_v57 = vmul.f32 %v8314_v4, %v303_v39  ;;  %v435_v58 = vmul.f32 %v8314_v4, %v302_v40 }
  0xde   : > { %13772 = vst [vmem:[#allocation14_spill] sm:$0xff] %v8680_v62 }
  0xdf   : > { %v795_v13 = vsel %vm449_vm0, %v436_v57, 0.0  ;;  %v792_v14 = vsel %vm449_vm0, %v435_v58, 0.0  ;;  %v309_v57 = vld [vmem:[%s8311_s20 + $0x3c8] sm:$0xff]  ;;  %v308_v58 = vld [vmem:[%s8311_s20 + $0x3c0] sm:$0xff] }
  0xe0   : > { %754 = vadd.xlane.f32.xlu1 %v753_v7  ;;  %751 = vadd.xlane.f32.xlu0 %v750_v8 }
  0xe1   : > { %v8688_v17 = vpop.xlane.xlu1 %544  ;;  %v8690_v18 = vpop.xlane.xlu0 %541 }
  0xe4   : > { %760 = vadd.xlane.f32.xlu1 %v759_v21  ;;  %757 = vadd.xlane.f32.xlu0 %v756_v22  ;;  %v301_v21 = vld [vmem:[%s8311_s20 + $0x388] sm:$0xff]  ;;  %v300_v22 = vld [vmem:[%s8311_s20 + $0x380] sm:$0xff] }
  0xe5   : > { %v8698_v31 = vpop.xlane.xlu1 %550  ;;  %v8700_v32 = vpop.xlane.xlu0 %547 }
  0xe6   : > { %13773 = vst [vmem:[#allocation15_spill] sm:$0xff] %v8700_v32 }
  0xe8   : > { %766 = vadd.xlane.f32.xlu1 %v765_v33  ;;  %763 = vadd.xlane.f32.xlu0 %v762_v34  ;;  %v434_v33 = vmul.f32 %v8314_v4, %v301_v21  ;;  %v433_v34 = vmul.f32 %v8314_v4, %v300_v22  ;;  %v438_v21 = vmul.f32 %v8314_v4, %v305_v59 }
  0xe9   : > { %v8708_v45 = vpop.xlane.xlu1 %556  ;;  %v8710_v46 = vpop.xlane.xlu0 %553  ;;  %v437_v22 = vmul.f32 %v8314_v4, %v304_v60 }
  0xea   : > { %13774 = vst [vmem:[#allocation16_spill] sm:$0xff] %v8710_v46  ;;  %v801_v39 = vsel %vm449_vm0, %v438_v21, 0.0  ;;  %v442_v21 = vmul.f32 %v8314_v4, %v309_v57 }
  0xeb   : > { %v798_v40 = vsel %vm449_vm0, %v437_v22, 0.0  ;;  %v441_v22 = vmul.f32 %v8314_v4, %v308_v58  ;;  %v312_v58 = vld [vmem:[%s8311_s20 + $0x3e0] sm:$0xff] }
  0xec   : > { %772 = vadd.xlane.f32.xlu1 %v771_v51  ;;  %769 = vadd.xlane.f32.xlu0 %v768_v52  ;;  %v789_v51 = vsel %vm449_vm0, %v434_v33, 0.0  ;;  %v786_v52 = vsel %vm449_vm0, %v433_v34, 0.0  ;;  %v813_v0 = vsel %vm449_vm0, %v442_v21, 0.0 }
  0xed   : > { %v8718_v7 = vpop.xlane.xlu1 %562  ;;  %v8720_v8 = vpop.xlane.xlu0 %559 }
  0xee   : > { %13775 = vst [vmem:[#allocation17_spill] sm:$0xff] %v8720_v8 }
  0xf0   : > { %778 = vadd.xlane.f32.xlu1 %v777_v9  ;;  %775 = vadd.xlane.f32.xlu0 %v774_v10 }
  0xf1   : > { %v8728_v23 = vpop.xlane.xlu1 %568  ;;  %v8730_v24 = vpop.xlane.xlu0 %565 }
  0xf2   : > { %13776 = vst [vmem:[#allocation18_spill] sm:$0xff] %v8728_v23  ;;  %13777 = vst [vmem:[#allocation19_spill] sm:$0xff] %v8730_v24 }
  0xf4   : > { %784 = vadd.xlane.f32.xlu1 %v783_v29  ;;  %781 = vadd.xlane.f32.xlu0 %v780_v30  ;;  %v307_v29 = vld [vmem:[%s8311_s20 + $0x3b8] sm:$0xff]  ;;  %v306_v30 = vld [vmem:[%s8311_s20 + $0x3b0] sm:$0xff] }
  0xf5   : > { %v8738_v41 = vpop.xlane.xlu1 %574  ;;  %v8740_v42 = vpop.xlane.xlu0 %571 }
  0xf6   : > { %13778 = vst [vmem:[#allocation20_spill] sm:$0xff] %v8740_v42 }
  0xf8   : > { %790 = vadd.xlane.f32.xlu1 %v789_v51  ;;  %787 = vadd.xlane.f32.xlu0 %v786_v52  ;;  %v440_v51 = vmul.f32 %v8314_v4, %v307_v29  ;;  %v439_v52 = vmul.f32 %v8314_v4, %v306_v30  ;;  %v311_v29 = vld [vmem:[%s8311_s20 + $0x3d8] sm:$0xff]  ;;  %v310_v30 = vld [vmem:[%s8311_s20 + $0x3d0] sm:$0xff] }
  0xf9   : > { %v8748_v9 = vpop.xlane.xlu1 %580  ;;  %v8750_v10 = vpop.xlane.xlu0 %577  ;;  %v443_v57 = vmul.f32 %v8314_v4, %v310_v30  ;;  %v315_v30 = vld [vmem:[%s8311_s20 + $0x3f8] sm:$0xff] }
  0xfa   : > { %13779 = vst [vmem:[#allocation21_spill] sm:$0xff] %v8750_v10 }
  0xfb   : > { %v816_v21 = vsel %vm449_vm0, %v443_v57, 0.0  ;;  %v448_v57 = vmul.f32 %v8314_v4, %v315_v30 }
  0xfc   : > { %796 = vadd.xlane.f32.xlu1 %v795_v13  ;;  %793 = vadd.xlane.f32.xlu0 %v792_v14  ;;  %v807_v13 = vsel %vm449_vm0, %v440_v51, 0.0  ;;  %v804_v14 = vsel %vm449_vm0, %v439_v52, 0.0  ;;  %v810_v51 = vsel %vm449_vm0, %v441_v22, 0.0  ;;  %v444_v52 = vmul.f32 %v8314_v4, %v311_v29 }
  0xfd   : > { %v8758_v33 = vpop.xlane.xlu1 %586  ;;  %v8760_v34 = vpop.xlane.xlu0 %583  ;;  %v445_v22 = vmul.f32 %v8314_v4, %v312_v58  ;;  %v8797_v29 = vsub.s32 1, %v8300_v1 }
  0xfe   : > { %13780 = vst [vmem:[#allocation22_spill] sm:$0xff] %v8758_v33  ;;  %13781 = vst [vmem:[#allocation23_spill] sm:$0xff] %v8760_v34  ;;  %v819_v23 = vsel %vm449_vm0, %v444_v52, 0.0  ;;  %v8131_v33 = vld [vmem:[%s13414_s1] sm:$0x3] }
  0xff   : > { %13788 = vst [vmem:[#allocation30_spill] sm:$0xff] %v8797_v29  ;;  %v822_v52 = vsel %vm449_vm0, %v445_v22, 0.0  ;;  %v831_v22 = vsel %vm449_vm0, %v448_v57, 0.0 }
 0x100   : > { %802 = vadd.xlane.f32.xlu1 %v801_v39  ;;  %799 = vadd.xlane.f32.xlu0 %v798_v40 }
 0x101   : > { %v8768_v59 = vpop.xlane.xlu1 %592  ;;  %v8770_v60 = vpop.xlane.xlu0 %589 }
 0x102   : > { %13782 = vst [vmem:[#allocation24_spill] sm:$0xff] %v8768_v59  ;;  %13783 = vst [vmem:[#allocation25_spill] sm:$0xff] %v8770_v60  ;;  %v314_v60 = vld [vmem:[%s8311_s20 + $0x3f0] sm:$0xff] }
 0x103   : > { %v447_v58 = vmul.f32 %v8314_v4, %v314_v60 }
 0x104   : > { %808 = vadd.xlane.f32.xlu1 %v807_v13  ;;  %805 = vadd.xlane.f32.xlu0 %v804_v14  ;;  %v446_v13 = vmul.f32 %v8314_v4, %v313_v3  ;;  %v8132_v4 = vld [vmem:[%s8311_s20 + $0x8] sm:$0xff] }
 0x105   : > { %v8778_v39 = vpop.xlane.xlu1 %598  ;;  %v8780_v40 = vpop.xlane.xlu0 %595  ;;  %v828_v30 = vsel %vm449_vm0, %v447_v58, 0.0 }
 0x106   : > { %13784 = vst [vmem:[#allocation26_spill] sm:$0xff] %v8778_v39  ;;  %13785 = vst [vmem:[#allocation27_spill] sm:$0xff] %v8780_v40 }
 0x108   : > { %814 = vadd.xlane.f32.xlu1 %v813_v0  ;;  %811 = vadd.xlane.f32.xlu0 %v810_v51  ;;  %v825_v0 = vsel %vm449_vm0, %v446_v13, 0.0 }
 0x109   : > { %v8789_v14 = vpop.xlane.xlu1 %604  ;;  %v8791_v59 = vpop.xlane.xlu0 %601 }
 0x10a   : > { %13786 = vst [vmem:[#allocation28_spill] sm:$0xff] %v8789_v14  ;;  %13787 = vst [vmem:[#allocation29_spill] sm:$0xff] %v8791_v59 }
 0x10c   : > { %820 = vadd.xlane.f32.xlu1 %v819_v23  ;;  %817 = vadd.xlane.f32.xlu0 %v816_v21  ;;  %v8813_v23 = vrot.slane %v8131_v33, %v8797_v29  ;;  %v8134_v29 = vld [vmem:[%s8311_s20 + $0x18] sm:$0xff] }
 0x10d   : > { %v8802_v3 = vpop.xlane.xlu1 %610  ;;  %v8804_v51 = vpop.xlane.xlu0 %607 }
 0x10e   : > { %13789 = vst [vmem:[#allocation31_spill] sm:$0xff] %v8802_v3  ;;  %13790 = vst [vmem:[#allocation32_spill] sm:$0xff] %v8804_v51  ;;  %v839_v60 = vmul.f32 %v8132_v4, %v8813_v23  ;;  %v8133_v3 = vld [vmem:[%s8311_s20] sm:$0xff]  ;;  %v841_v58 = vmul.f32 %v8134_v29, %v8813_v23 }
 0x10f   : > { %v838_v24 = vmul.f32 %v8133_v3, %v8813_v23 }
 0x110   : > { %826 = vadd.xlane.f32.xlu1 %v825_v0  ;;  %823 = vadd.xlane.f32.xlu0 %v822_v52  ;;  %v969_v52 = vsel %vm449_vm0, %v839_v60, 0.0 }
 0x111   : > { %v8815_v13 = vpop.xlane.xlu1 %616  ;;  %v8817_v21 = vpop.xlane.xlu0 %613  ;;  %v966_v57 = vsel %vm449_vm0, %v838_v24, 0.0 }
 0x112   : > { %13791 = vst [vmem:[#allocation33_spill] sm:$0xff] %v8815_v13  ;;  %13792 = vst [vmem:[#allocation34_spill] sm:$0xff] %v8817_v21  ;;  %v8135_v13 = vld [vmem:[%s8311_s20 + $0x10] sm:$0xff]  ;;  %v13887_v21 = vlaneseq }
 0x113   : > { %v840_v4 = vmul.f32 %v8135_v13, %v8813_v23 }
 0x114   : > { %832 = vadd.xlane.f32.xlu1 %v831_v22  ;;  %829 = vadd.xlane.f32.xlu0 %v828_v30  ;;  %v975_v30 = vsel %vm449_vm0, %v841_v58, 0.0 }
 0x115   : > { %v8825_v33 = vpop.xlane.xlu1 %622  ;;  %v8827_v0 = vpop.xlane.xlu0 %619  ;;  %v972_v60 = vsel %vm449_vm0, %v840_v4, 0.0 }
 0x116   : > { %13793 = vst [vmem:[#allocation35_spill] sm:$0xff] %v8825_v33  ;;  %13794 = vst [vmem:[#allocation36_spill] sm:$0xff] %v8827_v0  ;;  %v8136_v0 = vld [vmem:[%s8311_s20 + $0x28] sm:$0xff]  ;;  %v8137_v33 = vld [vmem:[%s8311_s20 + $0x20] sm:$0xff] }
 0x117   : > { %v843_v24 = vmul.f32 %v8136_v0, %v8813_v23  ;;  %v842_v29 = vmul.f32 %v8137_v33, %v8813_v23 }
 0x118   : > { %970 = vadd.xlane.f32.xlu1 %v969_v52  ;;  %967 = vadd.xlane.f32.xlu0 %v966_v57 }
 0x119   : > { %v8835_v3 = vpop.xlane.xlu1 %628  ;;  %v8837_v22 = vpop.xlane.xlu0 %625  ;;  %v981_v57 = vsel %vm449_vm0, %v843_v24, 0.0  ;;  %v978_v58 = vsel %vm449_vm0, %v842_v29, 0.0 }
 0x11a   : > { %13795 = vst [vmem:[#allocation37_spill] sm:$0xff] %v8835_v3  ;;  %13796 = vst [vmem:[#allocation38_spill] sm:$0xff] %v8837_v22  ;;  %v8138_v3 = vld [vmem:[%s8311_s20 + $0x38] sm:$0xff]  ;;  %v8139_v22 = vld [vmem:[%s8311_s20 + $0x30] sm:$0xff] }
 0x11b   : > { %v845_v4 = vmul.f32 %v8138_v3, %v8813_v23  ;;  %v844_v0 = vmul.f32 %v8139_v22, %v8813_v23 }
 0x11c   : > { %976 = vadd.xlane.f32.xlu1 %v975_v30  ;;  %973 = vadd.xlane.f32.xlu0 %v972_v60 }
 0x11d   : > { %v8845_v13 = vpop.xlane.xlu1 %634  ;;  %v8847_v52 = vpop.xlane.xlu0 %631  ;;  %v987_v60 = vsel %vm449_vm0, %v845_v4, 0.0  ;;  %v984_v24 = vsel %vm449_vm0, %v844_v0, 0.0 }
 0x11e   : > { %13797 = vst [vmem:[#allocation39_spill] sm:$0xff] %v8845_v13  ;;  %13798 = vst [vmem:[#allocation40_spill] sm:$0xff] %v8847_v52  ;;  %v8140_v13 = vld [vmem:[%s8311_s20 + $0x48] sm:$0xff]  ;;  %v8141_v52 = vld [vmem:[%s8311_s20 + $0x40] sm:$0xff] }
 0x11f   : > { %v847_v29 = vmul.f32 %v8140_v13, %v8813_v23  ;;  %v846_v3 = vmul.f32 %v8141_v52, %v8813_v23 }
 0x120   : > { %982 = vadd.xlane.f32.xlu1 %v981_v57  ;;  %979 = vadd.xlane.f32.xlu0 %v978_v58 }
 0x121   : > { %v8855_v33 = vpop.xlane.xlu1 %640  ;;  %v8857_v30 = vpop.xlane.xlu0 %637  ;;  %v993_v58 = vsel %vm449_vm0, %v847_v29, 0.0  ;;  %v990_v4 = vsel %vm449_vm0, %v846_v3, 0.0 }
 0x122   : > { %13799 = vst [vmem:[#allocation41_spill] sm:$0xff] %v8855_v33  ;;  %13800 = vst [vmem:[#allocation42_spill] sm:$0xff] %v8857_v30  ;;  %v8142_v33 = vld [vmem:[%s8311_s20 + $0x58] sm:$0xff]  ;;  %v8143_v30 = vld [vmem:[%s8311_s20 + $0x50] sm:$0xff] }
 0x123   : > { %v849_v0 = vmul.f32 %v8142_v33, %v8813_v23  ;;  %v848_v13 = vmul.f32 %v8143_v30, %v8813_v23 }
 0x124   : > { %988 = vadd.xlane.f32.xlu1 %v987_v60  ;;  %985 = vadd.xlane.f32.xlu0 %v984_v24 }
 0x125   : > { %v8865_v22 = vpop.xlane.xlu1 %646  ;;  %v8867_v57 = vpop.xlane.xlu0 %643  ;;  %v999_v24 = vsel %vm449_vm0, %v849_v0, 0.0  ;;  %v996_v29 = vsel %vm449_vm0, %v848_v13, 0.0 }
 0x126   : > { %13801 = vst [vmem:[#allocation43_spill] sm:$0xff] %v8865_v22  ;;  %13802 = vst [vmem:[#allocation44_spill] sm:$0xff] %v8867_v57  ;;  %v8144_v57 = vld [vmem:[%s8311_s20 + $0x68] sm:$0xff]  ;;  %v8145_v22 = vld [vmem:[%s8311_s20 + $0x60] sm:$0xff] }
 0x127   : > { %v851_v3 = vmul.f32 %v8144_v57, %v8813_v23  ;;  %v850_v33 = vmul.f32 %v8145_v22, %v8813_v23 }
 0x128   : > { %994 = vadd.xlane.f32.xlu1 %v993_v58  ;;  %991 = vadd.xlane.f32.xlu0 %v990_v4 }
 0x129   : > { %v8875_v52 = vpop.xlane.xlu1 %652  ;;  %v8877_v60 = vpop.xlane.xlu0 %649  ;;  %v1005_v4 = vsel %vm449_vm0, %v851_v3, 0.0  ;;  %v1002_v0 = vsel %vm449_vm0, %v850_v33, 0.0 }
 0x12a   : > { %13803 = vst [vmem:[#allocation45_spill] sm:$0xff] %v8875_v52  ;;  %13804 = vst [vmem:[#allocation46_spill] sm:$0xff] %v8877_v60  ;;  %v8146_v52 = vld [vmem:[%s8311_s20 + $0x78] sm:$0xff]  ;;  %v8147_v60 = vld [vmem:[%s8311_s20 + $0x70] sm:$0xff] }
 0x12b   : > { %v853_v13 = vmul.f32 %v8146_v52, %v8813_v23  ;;  %v852_v57 = vmul.f32 %v8147_v60, %v8813_v23 }
 0x12c   : > { %1000 = vadd.xlane.f32.xlu1 %v999_v24  ;;  %997 = vadd.xlane.f32.xlu0 %v996_v29 }
 0x12d   : > { %v8885_v30 = vpop.xlane.xlu1 %658  ;;  %v8887_v58 = vpop.xlane.xlu0 %655  ;;  %v1011_v29 = vsel %vm449_vm0, %v853_v13, 0.0  ;;  %v1008_v3 = vsel %vm449_vm0, %v852_v57, 0.0 }
 0x12e   : > { %13805 = vst [vmem:[#allocation47_spill] sm:$0xff] %v8885_v30  ;;  %13806 = vst [vmem:[#allocation48_spill] sm:$0xff] %v8887_v58  ;;  %v8148_v30 = vld [vmem:[%s8311_s20 + $0x88] sm:$0xff]  ;;  %v8149_v58 = vld [vmem:[%s8311_s20 + $0x80] sm:$0xff] }
 0x12f   : > { %v855_v33 = vmul.f32 %v8148_v30, %v8813_v23  ;;  %v854_v52 = vmul.f32 %v8149_v58, %v8813_v23 }
 0x130   : > { %1006 = vadd.xlane.f32.xlu1 %v1005_v4  ;;  %1003 = vadd.xlane.f32.xlu0 %v1002_v0 }
 0x131   : > { %v8895_v22 = vpop.xlane.xlu1 %664  ;;  %v8897_v24 = vpop.xlane.xlu0 %661  ;;  %v1017_v0 = vsel %vm449_vm0, %v855_v33, 0.0  ;;  %v1014_v13 = vsel %vm449_vm0, %v854_v52, 0.0 }
 0x132   : > { %13807 = vst [vmem:[#allocation49_spill] sm:$0xff] %v8895_v22  ;;  %13808 = vst [vmem:[#allocation50_spill] sm:$0xff] %v8897_v24  ;;  %v8150_v22 = vld [vmem:[%s8311_s20 + $0x98] sm:$0xff]  ;;  %v8151_v24 = vld [vmem:[%s8311_s20 + $0x90] sm:$0xff] }
 0x133   : > { %v857_v57 = vmul.f32 %v8150_v22, %v8813_v23  ;;  %v856_v30 = vmul.f32 %v8151_v24, %v8813_v23 }
 0x134   : > { %1012 = vadd.xlane.f32.xlu1 %v1011_v29  ;;  %1009 = vadd.xlane.f32.xlu0 %v1008_v3 }
 0x135   : > { %v8905_v60 = vpop.xlane.xlu1 %670  ;;  %v8907_v4 = vpop.xlane.xlu0 %667  ;;  %v1023_v3 = vsel %vm449_vm0, %v857_v57, 0.0  ;;  %v1020_v33 = vsel %vm449_vm0, %v856_v30, 0.0 }
 0x136   : > { %13809 = vst [vmem:[#allocation51_spill] sm:$0xff] %v8905_v60  ;;  %13810 = vst [vmem:[#allocation52_spill] sm:$0xff] %v8907_v4  ;;  %v8152_v4 = vld [vmem:[%s8311_s20 + $0xa8] sm:$0xff]  ;;  %v8153_v60 = vld [vmem:[%s8311_s20 + $0xa0] sm:$0xff] }
 0x137   : > { %v859_v52 = vmul.f32 %v8152_v4, %v8813_v23  ;;  %v858_v22 = vmul.f32 %v8153_v60, %v8813_v23 }
 0x138   : > { %1018 = vadd.xlane.f32.xlu1 %v1017_v0  ;;  %1015 = vadd.xlane.f32.xlu0 %v1014_v13 }
 0x139   : > { %v8915_v58 = vpop.xlane.xlu1 %676  ;;  %v8917_v29 = vpop.xlane.xlu0 %673  ;;  %v1029_v13 = vsel %vm449_vm0, %v859_v52, 0.0  ;;  %v1026_v57 = vsel %vm449_vm0, %v858_v22, 0.0 }
 0x13a   : > { %13811 = vst [vmem:[#allocation53_spill] sm:$0xff] %v8915_v58  ;;  %13812 = vst [vmem:[#allocation54_spill] sm:$0xff] %v8917_v29  ;;  %v8154_v58 = vld [vmem:[%s8311_s20 + $0xb8] sm:$0xff]  ;;  %v8155_v29 = vld [vmem:[%s8311_s20 + $0xb0] sm:$0xff] }
 0x13b   : > { %v861_v30 = vmul.f32 %v8154_v58, %v8813_v23  ;;  %v860_v4 = vmul.f32 %v8155_v29, %v8813_v23 }
 0x13c   : > { %1024 = vadd.xlane.f32.xlu1 %v1023_v3  ;;  %1021 = vadd.xlane.f32.xlu0 %v1020_v33 }
 0x13d   : > { %v8925_v24 = vpop.xlane.xlu1 %682  ;;  %v8927_v0 = vpop.xlane.xlu0 %679  ;;  %v1035_v33 = vsel %vm449_vm0, %v861_v30, 0.0  ;;  %v1032_v52 = vsel %vm449_vm0, %v860_v4, 0.0 }
 0x13e   : > { %13813 = vst [vmem:[#allocation55_spill] sm:$0xff] %v8925_v24  ;;  %13814 = vst [vmem:[#allocation56_spill] sm:$0xff] %v8927_v0  ;;  %v8156_v24 = vld [vmem:[%s8311_s20 + $0xc8] sm:$0xff]  ;;  %v8157_v0 = vld [vmem:[%s8311_s20 + $0xc0] sm:$0xff] }
 0x13f   : > { %v863_v22 = vmul.f32 %v8156_v24, %v8813_v23  ;;  %v862_v58 = vmul.f32 %v8157_v0, %v8813_v23 }
 0x140   : > { %1030 = vadd.xlane.f32.xlu1 %v1029_v13  ;;  %1027 = vadd.xlane.f32.xlu0 %v1026_v57 }
 0x141   : > { %v8935_v60 = vpop.xlane.xlu1 %688  ;;  %v8937_v3 = vpop.xlane.xlu0 %685  ;;  %v1041_v57 = vsel %vm449_vm0, %v863_v22, 0.0  ;;  %v1038_v30 = vsel %vm449_vm0, %v862_v58, 0.0 }
 0x142   : > { %13815 = vst [vmem:[#allocation57_spill] sm:$0xff] %v8935_v60  ;;  %13816 = vst [vmem:[#allocation58_spill] sm:$0xff] %v8937_v3  ;;  %v8158_v60 = vld [vmem:[%s8311_s20 + $0xd8] sm:$0xff]  ;;  %v8159_v3 = vld [vmem:[%s8311_s20 + $0xd0] sm:$0xff] }
 0x143   : > { %v865_v4 = vmul.f32 %v8158_v60, %v8813_v23  ;;  %v864_v24 = vmul.f32 %v8159_v3, %v8813_v23 }
 0x144   : > { %1036 = vadd.xlane.f32.xlu1 %v1035_v33  ;;  %1033 = vadd.xlane.f32.xlu0 %v1032_v52 }
 0x145   : > { %v8945_v29 = vpop.xlane.xlu1 %694  ;;  %v8947_v13 = vpop.xlane.xlu0 %691  ;;  %v1047_v52 = vsel %vm449_vm0, %v865_v4, 0.0  ;;  %v1044_v22 = vsel %vm449_vm0, %v864_v24, 0.0 }
 0x146   : > { %13817 = vst [vmem:[#allocation59_spill] sm:$0xff] %v8945_v29  ;;  %13818 = vst [vmem:[#allocation60_spill] sm:$0xff] %v8947_v13  ;;  %v8160_v13 = vld [vmem:[%s8311_s20 + $0xe8] sm:$0xff]  ;;  %v8161_v29 = vld [vmem:[%s8311_s20 + $0xe0] sm:$0xff] }
 0x147   : > { %v867_v58 = vmul.f32 %v8160_v13, %v8813_v23  ;;  %v866_v60 = vmul.f32 %v8161_v29, %v8813_v23 }
 0x148   : > { %1042 = vadd.xlane.f32.xlu1 %v1041_v57  ;;  %1039 = vadd.xlane.f32.xlu0 %v1038_v30 }
 0x149   : > { %v8955_v0 = vpop.xlane.xlu1 %700  ;;  %v8957_v33 = vpop.xlane.xlu0 %697  ;;  %v1053_v30 = vsel %vm449_vm0, %v867_v58, 0.0  ;;  %v1050_v4 = vsel %vm449_vm0, %v866_v60, 0.0 }
 0x14a   : > { %13819 = vst [vmem:[#allocation61_spill] sm:$0xff] %v8955_v0  ;;  %13820 = vst [vmem:[#allocation62_spill] sm:$0xff] %v8957_v33  ;;  %v8162_v0 = vld [vmem:[%s8311_s20 + $0xf8] sm:$0xff]  ;;  %v8163_v33 = vld [vmem:[%s8311_s20 + $0xf0] sm:$0xff] }
 0x14b   : > { %v869_v24 = vmul.f32 %v8162_v0, %v8813_v23  ;;  %v868_v13 = vmul.f32 %v8163_v33, %v8813_v23 }
 0x14c   : > { %1048 = vadd.xlane.f32.xlu1 %v1047_v52  ;;  %1045 = vadd.xlane.f32.xlu0 %v1044_v22 }
 0x14d   : > { %v8965_v3 = vpop.xlane.xlu1 %706  ;;  %v8967_v57 = vpop.xlane.xlu0 %703  ;;  %v1059_v22 = vsel %vm449_vm0, %v869_v24, 0.0  ;;  %v1056_v58 = vsel %vm449_vm0, %v868_v13, 0.0 }
 0x14e   : > { %13821 = vst [vmem:[#allocation63_spill] sm:$0xff] %v8965_v3  ;;  %13822 = vst [vmem:[#allocation64_spill] sm:$0xff] %v8967_v57  ;;  %v8164_v3 = vld [vmem:[%s8311_s20 + $0x108] sm:$0xff]  ;;  %v8165_v57 = vld [vmem:[%s8311_s20 + $0x100] sm:$0xff] }
 0x14f   : > { %v871_v60 = vmul.f32 %v8164_v3, %v8813_v23  ;;  %v870_v0 = vmul.f32 %v8165_v57, %v8813_v23 }
 0x150   : > { %1054 = vadd.xlane.f32.xlu1 %v1053_v30  ;;  %1051 = vadd.xlane.f32.xlu0 %v1050_v4 }
 0x151   : > { %v8975_v29 = vpop.xlane.xlu1 %712  ;;  %v8977_v52 = vpop.xlane.xlu0 %709  ;;  %v1065_v4 = vsel %vm449_vm0, %v871_v60, 0.0  ;;  %v1062_v24 = vsel %vm449_vm0, %v870_v0, 0.0 }
 0x152   : > { %13823 = vst [vmem:[#allocation65_spill] sm:$0xff] %v8975_v29  ;;  %13824 = vst [vmem:[#allocation66_spill] sm:$0xff] %v8977_v52  ;;  %v8166_v29 = vld [vmem:[%s8311_s20 + $0x118] sm:$0xff]  ;;  %v8167_v52 = vld [vmem:[%s8311_s20 + $0x110] sm:$0xff] }
 0x153   : > { %v873_v13 = vmul.f32 %v8166_v29, %v8813_v23  ;;  %v872_v3 = vmul.f32 %v8167_v52, %v8813_v23 }
 0x154   : > { %1060 = vadd.xlane.f32.xlu1 %v1059_v22  ;;  %1057 = vadd.xlane.f32.xlu0 %v1056_v58 }
 0x155   : > { %v8985_v33 = vpop.xlane.xlu1 %718  ;;  %v8987_v30 = vpop.xlane.xlu0 %715  ;;  %v1071_v58 = vsel %vm449_vm0, %v873_v13, 0.0  ;;  %v1068_v60 = vsel %vm449_vm0, %v872_v3, 0.0 }
 0x156   : > { %13825 = vst [vmem:[#allocation67_spill] sm:$0xff] %v8985_v33  ;;  %13826 = vst [vmem:[#allocation68_spill] sm:$0xff] %v8987_v30  ;;  %v8168_v30 = vld [vmem:[%s8311_s20 + $0x128] sm:$0xff]  ;;  %v8169_v33 = vld [vmem:[%s8311_s20 + $0x120] sm:$0xff] }
 0x157   : > { %v875_v0 = vmul.f32 %v8168_v30, %v8813_v23  ;;  %v874_v29 = vmul.f32 %v8169_v33, %v8813_v23 }
 0x158   : > { %1066 = vadd.xlane.f32.xlu1 %v1065_v4  ;;  %1063 = vadd.xlane.f32.xlu0 %v1062_v24 }
 0x159   : > { %v8995_v57 = vpop.xlane.xlu1 %724  ;;  %v8997_v22 = vpop.xlane.xlu0 %721  ;;  %v1077_v24 = vsel %vm449_vm0, %v875_v0, 0.0  ;;  %v1074_v13 = vsel %vm449_vm0, %v874_v29, 0.0 }
 0x15a   : > { %13827 = vst [vmem:[#allocation69_spill] sm:$0xff] %v8995_v57  ;;  %13828 = vst [vmem:[#allocation70_spill] sm:$0xff] %v8997_v22  ;;  %v8170_v57 = vld [vmem:[%s8311_s20 + $0x138] sm:$0xff]  ;;  %v8171_v22 = vld [vmem:[%s8311_s20 + $0x130] sm:$0xff] }
 0x15b   : > { %v877_v3 = vmul.f32 %v8170_v57, %v8813_v23  ;;  %v876_v30 = vmul.f32 %v8171_v22, %v8813_v23 }
 0x15c   : > { %1072 = vadd.xlane.f32.xlu1 %v1071_v58  ;;  %1069 = vadd.xlane.f32.xlu0 %v1068_v60 }
 0x15d   : > { %v9005_v52 = vpop.xlane.xlu1 %730  ;;  %v9007_v4 = vpop.xlane.xlu0 %727  ;;  %v1083_v60 = vsel %vm449_vm0, %v877_v3, 0.0  ;;  %v1080_v0 = vsel %vm449_vm0, %v876_v30, 0.0 }
 0x15e   : > { %13829 = vst [vmem:[#allocation71_spill] sm:$0xff] %v9005_v52  ;;  %13830 = vst [vmem:[#allocation72_spill] sm:$0xff] %v9007_v4  ;;  %v8172_v52 = vld [vmem:[%s8311_s20 + $0x148] sm:$0xff]  ;;  %v8173_v4 = vld [vmem:[%s8311_s20 + $0x140] sm:$0xff] }
 0x15f   : > { %v879_v29 = vmul.f32 %v8172_v52, %v8813_v23  ;;  %v878_v57 = vmul.f32 %v8173_v4, %v8813_v23 }
 0x160   : > { %1078 = vadd.xlane.f32.xlu1 %v1077_v24  ;;  %1075 = vadd.xlane.f32.xlu0 %v1074_v13 }
 0x161   : > { %v9015_v33 = vpop.xlane.xlu1 %736  ;;  %v9017_v58 = vpop.xlane.xlu0 %733  ;;  %v1089_v13 = vsel %vm449_vm0, %v879_v29, 0.0  ;;  %v1086_v3 = vsel %vm449_vm0, %v878_v57, 0.0 }
 0x162   : > { %13831 = vst [vmem:[#allocation73_spill] sm:$0xff] %v9015_v33  ;;  %13832 = vst [vmem:[#allocation74_spill] sm:$0xff] %v9017_v58  ;;  %v8174_v33 = vld [vmem:[%s8311_s20 + $0x158] sm:$0xff]  ;;  %v8175_v58 = vld [vmem:[%s8311_s20 + $0x150] sm:$0xff] }
 0x163   : > { %v881_v30 = vmul.f32 %v8174_v33, %v8813_v23  ;;  %v880_v52 = vmul.f32 %v8175_v58, %v8813_v23 }
 0x164   : > { %1084 = vadd.xlane.f32.xlu1 %v1083_v60  ;;  %1081 = vadd.xlane.f32.xlu0 %v1080_v0 }
 0x165   : > { %v9025_v22 = vpop.xlane.xlu1 %742  ;;  %v9027_v24 = vpop.xlane.xlu0 %739  ;;  %v1095_v0 = vsel %vm449_vm0, %v881_v30, 0.0  ;;  %v1092_v29 = vsel %vm449_vm0, %v880_v52, 0.0 }
 0x166   : > { %13833 = vst [vmem:[#allocation75_spill] sm:$0xff] %v9025_v22  ;;  %13834 = vst [vmem:[#allocation76_spill] sm:$0xff] %v9027_v24  ;;  %v8176_v24 = vld [vmem:[%s8311_s20 + $0x168] sm:$0xff]  ;;  %v8177_v22 = vld [vmem:[%s8311_s20 + $0x160] sm:$0xff] }
 0x167   : > { %v883_v57 = vmul.f32 %v8176_v24, %v8813_v23  ;;  %v882_v33 = vmul.f32 %v8177_v22, %v8813_v23 }
 0x168   : > { %1090 = vadd.xlane.f32.xlu1 %v1089_v13  ;;  %1087 = vadd.xlane.f32.xlu0 %v1086_v3 }
 0x169   : > { %v9035_v4 = vpop.xlane.xlu1 %748  ;;  %v9037_v60 = vpop.xlane.xlu0 %745  ;;  %v1101_v3 = vsel %vm449_vm0, %v883_v57, 0.0  ;;  %v1098_v30 = vsel %vm449_vm0, %v882_v33, 0.0 }
 0x16a   : > { %13835 = vst [vmem:[#allocation77_spill] sm:$0xff] %v9035_v4  ;;  %13836 = vst [vmem:[#allocation78_spill] sm:$0xff] %v9037_v60  ;;  %v8178_v4 = vld [vmem:[%s8311_s20 + $0x178] sm:$0xff]  ;;  %v8179_v60 = vld [vmem:[%s8311_s20 + $0x170] sm:$0xff] }
 0x16b   : > { %v885_v52 = vmul.f32 %v8178_v4, %v8813_v23  ;;  %v884_v24 = vmul.f32 %v8179_v60, %v8813_v23 }
 0x16c   : > { %1096 = vadd.xlane.f32.xlu1 %v1095_v0  ;;  %1093 = vadd.xlane.f32.xlu0 %v1092_v29 }
 0x16d   : > { %v9045_v58 = vpop.xlane.xlu1 %754  ;;  %v9047_v13 = vpop.xlane.xlu0 %751  ;;  %v1107_v29 = vsel %vm449_vm0, %v885_v52, 0.0  ;;  %v1104_v57 = vsel %vm449_vm0, %v884_v24, 0.0 }
 0x16e   : > { %13837 = vst [vmem:[#allocation79_spill] sm:$0xff] %v9045_v58  ;;  %13838 = vst [vmem:[#allocation80_spill] sm:$0xff] %v9047_v13  ;;  %v8180_v58 = vld [vmem:[%s8311_s20 + $0x188] sm:$0xff]  ;;  %v8181_v13 = vld [vmem:[%s8311_s20 + $0x180] sm:$0xff] }
 0x16f   : > { %v887_v33 = vmul.f32 %v8180_v58, %v8813_v23  ;;  %v886_v4 = vmul.f32 %v8181_v13, %v8813_v23 }
 0x170   : > { %1102 = vadd.xlane.f32.xlu1 %v1101_v3  ;;  %1099 = vadd.xlane.f32.xlu0 %v1098_v30 }
 0x171   : > { %v9055_v22 = vpop.xlane.xlu1 %760  ;;  %v9057_v0 = vpop.xlane.xlu0 %757  ;;  %v1113_v30 = vsel %vm449_vm0, %v887_v33, 0.0  ;;  %v1110_v52 = vsel %vm449_vm0, %v886_v4, 0.0 }
 0x172   : > { %13839 = vst [vmem:[#allocation81_spill] sm:$0xff] %v9055_v22  ;;  %13840 = vst [vmem:[#allocation82_spill] sm:$0xff] %v9057_v0  ;;  %v8182_v22 = vld [vmem:[%s8311_s20 + $0x198] sm:$0xff]  ;;  %v8183_v0 = vld [vmem:[%s8311_s20 + $0x190] sm:$0xff] }
 0x173   : > { %v889_v24 = vmul.f32 %v8182_v22, %v8813_v23  ;;  %v888_v58 = vmul.f32 %v8183_v0, %v8813_v23 }
 0x174   : > { %1108 = vadd.xlane.f32.xlu1 %v1107_v29  ;;  %1105 = vadd.xlane.f32.xlu0 %v1104_v57 }
 0x175   : > { %v9065_v60 = vpop.xlane.xlu1 %766  ;;  %v9067_v3 = vpop.xlane.xlu0 %763  ;;  %v1119_v57 = vsel %vm449_vm0, %v889_v24, 0.0  ;;  %v1116_v33 = vsel %vm449_vm0, %v888_v58, 0.0 }
 0x176   : > { %13841 = vst [vmem:[#allocation83_spill] sm:$0xff] %v9065_v60  ;;  %13842 = vst [vmem:[#allocation84_spill] sm:$0xff] %v9067_v3  ;;  %v8184_v3 = vld [vmem:[%s8311_s20 + $0x1a8] sm:$0xff]  ;;  %v8185_v60 = vld [vmem:[%s8311_s20 + $0x1a0] sm:$0xff] }
 0x177   : > { %v891_v4 = vmul.f32 %v8184_v3, %v8813_v23  ;;  %v890_v22 = vmul.f32 %v8185_v60, %v8813_v23 }
 0x178   : > { %1114 = vadd.xlane.f32.xlu1 %v1113_v30  ;;  %1111 = vadd.xlane.f32.xlu0 %v1110_v52 }
 0x179   : > { %v9075_v13 = vpop.xlane.xlu1 %772  ;;  %v9077_v29 = vpop.xlane.xlu0 %769  ;;  %v1125_v52 = vsel %vm449_vm0, %v891_v4, 0.0  ;;  %v1122_v24 = vsel %vm449_vm0, %v890_v22, 0.0 }
 0x17a   : > { %13843 = vst [vmem:[#allocation85_spill] sm:$0xff] %v9075_v13  ;;  %13844 = vst [vmem:[#allocation86_spill] sm:$0xff] %v9077_v29  ;;  %v8186_v13 = vld [vmem:[%s8311_s20 + $0x1b8] sm:$0xff]  ;;  %v8187_v29 = vld [vmem:[%s8311_s20 + $0x1b0] sm:$0xff] }
 0x17b   : > { %v893_v58 = vmul.f32 %v8186_v13, %v8813_v23  ;;  %v892_v3 = vmul.f32 %v8187_v29, %v8813_v23 }
 0x17c   : > { %1120 = vadd.xlane.f32.xlu1 %v1119_v57  ;;  %1117 = vadd.xlane.f32.xlu0 %v1116_v33 }
 0x17d   : > { %v9085_v0 = vpop.xlane.xlu1 %778  ;;  %v9087_v30 = vpop.xlane.xlu0 %775  ;;  %v1131_v33 = vsel %vm449_vm0, %v893_v58, 0.0  ;;  %v1128_v4 = vsel %vm449_vm0, %v892_v3, 0.0 }
 0x17e   : > { %13845 = vst [vmem:[#allocation87_spill] sm:$0xff] %v9085_v0  ;;  %13846 = vst [vmem:[#allocation88_spill] sm:$0xff] %v9087_v30  ;;  %v8188_v0 = vld [vmem:[%s8311_s20 + $0x1c8] sm:$0xff]  ;;  %v8189_v30 = vld [vmem:[%s8311_s20 + $0x1c0] sm:$0xff] }
 0x17f   : > { %v895_v22 = vmul.f32 %v8188_v0, %v8813_v23  ;;  %v894_v13 = vmul.f32 %v8189_v30, %v8813_v23 }
 0x180   : > { %1126 = vadd.xlane.f32.xlu1 %v1125_v52  ;;  %1123 = vadd.xlane.f32.xlu0 %v1122_v24 }
 0x181   : > { %v9095_v60 = vpop.xlane.xlu1 %784  ;;  %v9097_v57 = vpop.xlane.xlu0 %781  ;;  %v1137_v24 = vsel %vm449_vm0, %v895_v22, 0.0  ;;  %v1134_v58 = vsel %vm449_vm0, %v894_v13, 0.0 }
 0x182   : > { %13847 = vst [vmem:[#allocation89_spill] sm:$0xff] %v9095_v60  ;;  %13848 = vst [vmem:[#allocation90_spill] sm:$0xff] %v9097_v57  ;;  %v8190_v60 = vld [vmem:[%s8311_s20 + $0x1d8] sm:$0xff]  ;;  %v8191_v57 = vld [vmem:[%s8311_s20 + $0x1d0] sm:$0xff] }
 0x183   : > { %v897_v3 = vmul.f32 %v8190_v60, %v8813_v23  ;;  %v896_v0 = vmul.f32 %v8191_v57, %v8813_v23 }
 0x184   : > { %1132 = vadd.xlane.f32.xlu1 %v1131_v33  ;;  %1129 = vadd.xlane.f32.xlu0 %v1128_v4 }
 0x185   : > { %v9105_v29 = vpop.xlane.xlu1 %790  ;;  %v9107_v52 = vpop.xlane.xlu0 %787  ;;  %v1143_v4 = vsel %vm449_vm0, %v897_v3, 0.0  ;;  %v1140_v22 = vsel %vm449_vm0, %v896_v0, 0.0 }
 0x186   : > { %13849 = vst [vmem:[#allocation91_spill] sm:$0xff] %v9105_v29  ;;  %13850 = vst [vmem:[#allocation92_spill] sm:$0xff] %v9107_v52  ;;  %v8192_v52 = vld [vmem:[%s8311_s20 + $0x1e8] sm:$0xff]  ;;  %v8193_v29 = vld [vmem:[%s8311_s20 + $0x1e0] sm:$0xff] }
 0x187   : > { %v899_v13 = vmul.f32 %v8192_v52, %v8813_v23  ;;  %v898_v60 = vmul.f32 %v8193_v29, %v8813_v23 }
 0x188   : > { %1138 = vadd.xlane.f32.xlu1 %v1137_v24  ;;  %1135 = vadd.xlane.f32.xlu0 %v1134_v58 }
 0x189   : > { %v9115_v30 = vpop.xlane.xlu1 %796  ;;  %v9117_v33 = vpop.xlane.xlu0 %793  ;;  %v1149_v58 = vsel %vm449_vm0, %v899_v13, 0.0  ;;  %v1146_v3 = vsel %vm449_vm0, %v898_v60, 0.0 }
 0x18a   : > { %13851 = vst [vmem:[#allocation93_spill] sm:$0xff] %v9115_v30  ;;  %13852 = vst [vmem:[#allocation94_spill] sm:$0xff] %v9117_v33  ;;  %v8194_v30 = vld [vmem:[%s8311_s20 + $0x1f8] sm:$0xff]  ;;  %v8195_v33 = vld [vmem:[%s8311_s20 + $0x1f0] sm:$0xff] }
 0x18b   : > { %v901_v0 = vmul.f32 %v8194_v30, %v8813_v23  ;;  %v900_v52 = vmul.f32 %v8195_v33, %v8813_v23 }
 0x18c   : > { %1144 = vadd.xlane.f32.xlu1 %v1143_v4  ;;  %1141 = vadd.xlane.f32.xlu0 %v1140_v22 }
 0x18d   : > { %v9125_v57 = vpop.xlane.xlu1 %802  ;;  %v9127_v24 = vpop.xlane.xlu0 %799  ;;  %v1155_v22 = vsel %vm449_vm0, %v901_v0, 0.0  ;;  %v1152_v13 = vsel %vm449_vm0, %v900_v52, 0.0 }
 0x18e   : > { %13853 = vst [vmem:[#allocation95_spill] sm:$0xff] %v9125_v57  ;;  %13854 = vst [vmem:[#allocation96_spill] sm:$0xff] %v9127_v24  ;;  %v8196_v57 = vld [vmem:[%s8311_s20 + $0x208] sm:$0xff]  ;;  %v8197_v24 = vld [vmem:[%s8311_s20 + $0x200] sm:$0xff] }
 0x18f   : > { %v903_v60 = vmul.f32 %v8196_v57, %v8813_v23  ;;  %v902_v30 = vmul.f32 %v8197_v24, %v8813_v23 }
 0x190   : > { %1150 = vadd.xlane.f32.xlu1 %v1149_v58  ;;  %1147 = vadd.xlane.f32.xlu0 %v1146_v3 }
 0x191   : > { %v9135_v29 = vpop.xlane.xlu1 %808  ;;  %v9137_v4 = vpop.xlane.xlu0 %805  ;;  %v1161_v3 = vsel %vm449_vm0, %v903_v60, 0.0  ;;  %v1158_v0 = vsel %vm449_vm0, %v902_v30, 0.0 }
 0x192   : > { %13855 = vst [vmem:[#allocation97_spill] sm:$0xff] %v9135_v29  ;;  %13856 = vst [vmem:[#allocation98_spill] sm:$0xff] %v9137_v4  ;;  %v8198_v29 = vld [vmem:[%s8311_s20 + $0x218] sm:$0xff]  ;;  %v8199_v4 = vld [vmem:[%s8311_s20 + $0x210] sm:$0xff] }
 0x193   : > { %v905_v52 = vmul.f32 %v8198_v29, %v8813_v23  ;;  %v904_v57 = vmul.f32 %v8199_v4, %v8813_v23 }
 0x194   : > { %1156 = vadd.xlane.f32.xlu1 %v1155_v22  ;;  %1153 = vadd.xlane.f32.xlu0 %v1152_v13 }
 0x195   : > { %v9145_v33 = vpop.xlane.xlu1 %814  ;;  %v9147_v58 = vpop.xlane.xlu0 %811  ;;  %v1167_v13 = vsel %vm449_vm0, %v905_v52, 0.0  ;;  %v1164_v60 = vsel %vm449_vm0, %v904_v57, 0.0 }
 0x196   : > { %13857 = vst [vmem:[#allocation99_spill] sm:$0xff] %v9145_v33  ;;  %13858 = vst [vmem:[#allocation100_spill] sm:$0xff] %v9147_v58  ;;  %v8200_v58 = vld [vmem:[%s8311_s20 + $0x228] sm:$0xff]  ;;  %v8201_v33 = vld [vmem:[%s8311_s20 + $0x220] sm:$0xff] }
 0x197   : > { %v907_v30 = vmul.f32 %v8200_v58, %v8813_v23  ;;  %v906_v29 = vmul.f32 %v8201_v33, %v8813_v23 }
 0x198   : > { %1162 = vadd.xlane.f32.xlu1 %v1161_v3  ;;  %1159 = vadd.xlane.f32.xlu0 %v1158_v0 }
 0x199   : > { %v9155_v24 = vpop.xlane.xlu1 %820  ;;  %v9157_v22 = vpop.xlane.xlu0 %817  ;;  %v1173_v0 = vsel %vm449_vm0, %v907_v30, 0.0  ;;  %v1170_v52 = vsel %vm449_vm0, %v906_v29, 0.0 }
 0x19a   : > { %13859 = vst [vmem:[#allocation101_spill] sm:$0xff] %v9155_v24  ;;  %13860 = vst [vmem:[#allocation102_spill] sm:$0xff] %v9157_v22  ;;  %v8202_v24 = vld [vmem:[%s8311_s20 + $0x238] sm:$0xff]  ;;  %v8203_v22 = vld [vmem:[%s8311_s20 + $0x230] sm:$0xff] }
 0x19b   : > { %v909_v57 = vmul.f32 %v8202_v24, %v8813_v23  ;;  %v908_v58 = vmul.f32 %v8203_v22, %v8813_v23 }
 0x19c   : > { %1168 = vadd.xlane.f32.xlu1 %v1167_v13  ;;  %1165 = vadd.xlane.f32.xlu0 %v1164_v60 }
 0x19d   : > { %v9165_v4 = vpop.xlane.xlu1 %826  ;;  %v9167_v3 = vpop.xlane.xlu0 %823  ;;  %v1179_v60 = vsel %vm449_vm0, %v909_v57, 0.0  ;;  %v1176_v30 = vsel %vm449_vm0, %v908_v58, 0.0 }
 0x19e   : > { %13861 = vst [vmem:[#allocation103_spill] sm:$0xff] %v9165_v4  ;;  %13862 = vst [vmem:[#allocation104_spill] sm:$0xff] %v9167_v3  ;;  %v8204_v4 = vld [vmem:[%s8311_s20 + $0x248] sm:$0xff]  ;;  %v8205_v3 = vld [vmem:[%s8311_s20 + $0x240] sm:$0xff] }
 0x19f   : > { %v911_v29 = vmul.f32 %v8204_v4, %v8813_v23  ;;  %v910_v24 = vmul.f32 %v8205_v3, %v8813_v23 }
 0x1a0   : > { %1174 = vadd.xlane.f32.xlu1 %v1173_v0  ;;  %1171 = vadd.xlane.f32.xlu0 %v1170_v52 }
 0x1a1   : > { %v9175_v33 = vpop.xlane.xlu1 %832  ;;  %v9177_v13 = vpop.xlane.xlu0 %829  ;;  %v1185_v52 = vsel %vm449_vm0, %v911_v29, 0.0  ;;  %v1182_v57 = vsel %vm449_vm0, %v910_v24, 0.0 }
 0x1a2   : > { %13863 = vst [vmem:[#allocation105_spill] sm:$0xff] %v9175_v33  ;;  %13864 = vst [vmem:[#allocation106_spill] sm:$0xff] %v9177_v13  ;;  %v8206_v33 = vld [vmem:[%s8311_s20 + $0x258] sm:$0xff]  ;;  %v8207_v13 = vld [vmem:[%s8311_s20 + $0x250] sm:$0xff] }
 0x1a3   : > { %v913_v58 = vmul.f32 %v8206_v33, %v8813_v23  ;;  %v912_v4 = vmul.f32 %v8207_v13, %v8813_v23 }
 0x1a4   : > { %1180 = vadd.xlane.f32.xlu1 %v1179_v60  ;;  %1177 = vadd.xlane.f32.xlu0 %v1176_v30 }
 0x1a5   : > { %v9185_v22 = vpop.xlane.xlu1 %970  ;;  %v9187_v0 = vpop.xlane.xlu0 %967  ;;  %v1191_v30 = vsel %vm449_vm0, %v913_v58, 0.0  ;;  %v1188_v29 = vsel %vm449_vm0, %v912_v4, 0.0 }
 0x1a6   : > { %13865 = vst [vmem:[#allocation107_spill] sm:$0xff] %v9185_v22  ;;  %13866 = vst [vmem:[#allocation108_spill] sm:$0xff] %v9187_v0  ;;  %v8208_v0 = vld [vmem:[%s8311_s20 + $0x268] sm:$0xff]  ;;  %v8209_v22 = vld [vmem:[%s8311_s20 + $0x260] sm:$0xff] }
 0x1a7   : > { %v915_v24 = vmul.f32 %v8208_v0, %v8813_v23  ;;  %v914_v33 = vmul.f32 %v8209_v22, %v8813_v23 }
 0x1a8   : > { %1186 = vadd.xlane.f32.xlu1 %v1185_v52  ;;  %1183 = vadd.xlane.f32.xlu0 %v1182_v57 }
 0x1a9   : > { %v9195_v3 = vpop.xlane.xlu1 %976  ;;  %v9197_v60 = vpop.xlane.xlu0 %973  ;;  %v1197_v57 = vsel %vm449_vm0, %v915_v24, 0.0  ;;  %v1194_v58 = vsel %vm449_vm0, %v914_v33, 0.0 }
 0x1aa   : > { %13867 = vst [vmem:[#allocation109_spill] sm:$0xff] %v9195_v3  ;;  %13868 = vst [vmem:[#allocation110_spill] sm:$0xff] %v9197_v60  ;;  %v8210_v60 = vld [vmem:[%s8311_s20 + $0x278] sm:$0xff]  ;;  %v8211_v3 = vld [vmem:[%s8311_s20 + $0x270] sm:$0xff] }
 0x1ab   : > { %v917_v4 = vmul.f32 %v8210_v60, %v8813_v23  ;;  %v916_v0 = vmul.f32 %v8211_v3, %v8813_v23 }
 0x1ac   : > { %1192 = vadd.xlane.f32.xlu1 %v1191_v30  ;;  %1189 = vadd.xlane.f32.xlu0 %v1188_v29 }
 0x1ad   : > { %v9205_v13 = vpop.xlane.xlu1 %982  ;;  %v9207_v52 = vpop.xlane.xlu0 %979  ;;  %v1203_v29 = vsel %vm449_vm0, %v917_v4, 0.0  ;;  %v1200_v24 = vsel %vm449_vm0, %v916_v0, 0.0 }
 0x1ae   : > { %13869 = vst [vmem:[#allocation111_spill] sm:$0xff] %v9205_v13  ;;  %13870 = vst [vmem:[#allocation112_spill] sm:$0xff] %v9207_v52  ;;  %v8212_v52 = vld [vmem:[%s8311_s20 + $0x288] sm:$0xff]  ;;  %v8213_v13 = vld [vmem:[%s8311_s20 + $0x280] sm:$0xff] }
 0x1af   : > { %v919_v33 = vmul.f32 %v8212_v52, %v8813_v23  ;;  %v918_v60 = vmul.f32 %v8213_v13, %v8813_v23 }
 0x1b0   : > { %1198 = vadd.xlane.f32.xlu1 %v1197_v57  ;;  %1195 = vadd.xlane.f32.xlu0 %v1194_v58 }
 0x1b1   : > { %v9215_v22 = vpop.xlane.xlu1 %988  ;;  %v9217_v30 = vpop.xlane.xlu0 %985  ;;  %v1209_v58 = vsel %vm449_vm0, %v919_v33, 0.0  ;;  %v1206_v4 = vsel %vm449_vm0, %v918_v60, 0.0 }
 0x1b2   : > { %13871 = vst [vmem:[#allocation113_spill] sm:$0xff] %v9215_v22  ;;  %13872 = vst [vmem:[#allocation114_spill] sm:$0xff] %v9217_v30  ;;  %v8214_v30 = vld [vmem:[%s8311_s20 + $0x298] sm:$0xff]  ;;  %v8215_v22 = vld [vmem:[%s8311_s20 + $0x290] sm:$0xff] }
 0x1b3   : > { %v921_v0 = vmul.f32 %v8214_v30, %v8813_v23  ;;  %v920_v52 = vmul.f32 %v8215_v22, %v8813_v23 }
 0x1b4   : > { %1204 = vadd.xlane.f32.xlu1 %v1203_v29  ;;  %1201 = vadd.xlane.f32.xlu0 %v1200_v24 }
 0x1b5   : > { %v9225_v3 = vpop.xlane.xlu1 %994  ;;  %v9227_v57 = vpop.xlane.xlu0 %991  ;;  %v1215_v24 = vsel %vm449_vm0, %v921_v0, 0.0  ;;  %v1212_v33 = vsel %vm449_vm0, %v920_v52, 0.0 }
 0x1b6   : > { %13873 = vst [vmem:[#allocation115_spill] sm:$0xff] %v9225_v3  ;;  %13874 = vst [vmem:[#allocation116_spill] sm:$0xff] %v9227_v57  ;;  %v8216_v57 = vld [vmem:[%s8311_s20 + $0x2a8] sm:$0xff]  ;;  %v8217_v3 = vld [vmem:[%s8311_s20 + $0x2a0] sm:$0xff] }
 0x1b7   : > { %v923_v60 = vmul.f32 %v8216_v57, %v8813_v23  ;;  %v922_v30 = vmul.f32 %v8217_v3, %v8813_v23 }
 0x1b8   : > { %1210 = vadd.xlane.f32.xlu1 %v1209_v58  ;;  %1207 = vadd.xlane.f32.xlu0 %v1206_v4 }
 0x1b9   : > { %v9235_v13 = vpop.xlane.xlu1 %1000  ;;  %v9237_v29 = vpop.xlane.xlu0 %997  ;;  %v1221_v4 = vsel %vm449_vm0, %v923_v60, 0.0  ;;  %v1218_v0 = vsel %vm449_vm0, %v922_v30, 0.0 }
 0x1ba   : > { %13875 = vst [vmem:[#allocation117_spill] sm:$0xff] %v9235_v13  ;;  %13876 = vst [vmem:[#allocation118_spill] sm:$0xff] %v9237_v29  ;;  %v8218_v29 = vld [vmem:[%s8311_s20 + $0x2b8] sm:$0xff]  ;;  %v8219_v13 = vld [vmem:[%s8311_s20 + $0x2b0] sm:$0xff] }
 0x1bb   : > { %v925_v52 = vmul.f32 %v8218_v29, %v8813_v23  ;;  %v924_v57 = vmul.f32 %v8219_v13, %v8813_v23 }
 0x1bc   : > { %1216 = vadd.xlane.f32.xlu1 %v1215_v24  ;;  %1213 = vadd.xlane.f32.xlu0 %v1212_v33 }
 0x1bd   : > { %v9245_v22 = vpop.xlane.xlu1 %1006  ;;  %v9247_v58 = vpop.xlane.xlu0 %1003  ;;  %v1227_v33 = vsel %vm449_vm0, %v925_v52, 0.0  ;;  %v1224_v60 = vsel %vm449_vm0, %v924_v57, 0.0 }
 0x1be   : > { %13877 = vst [vmem:[#allocation119_spill] sm:$0xff] %v9245_v22  ;;  %13878 = vst [vmem:[#allocation120_spill] sm:$0xff] %v9247_v58  ;;  %v8220_v58 = vld [vmem:[%s8311_s20 + $0x2c8] sm:$0xff]  ;;  %v8221_v22 = vld [vmem:[%s8311_s20 + $0x2c0] sm:$0xff] }
 0x1bf   : > { %v927_v30 = vmul.f32 %v8220_v58, %v8813_v23  ;;  %v926_v29 = vmul.f32 %v8221_v22, %v8813_v23 }
 0x1c0   : > { %1222 = vadd.xlane.f32.xlu1 %v1221_v4  ;;  %1219 = vadd.xlane.f32.xlu0 %v1218_v0 }
 0x1c1   : > { %v9255_v3 = vpop.xlane.xlu1 %1012  ;;  %v9257_v24 = vpop.xlane.xlu0 %1009  ;;  %v1233_v0 = vsel %vm449_vm0, %v927_v30, 0.0  ;;  %v1230_v52 = vsel %vm449_vm0, %v926_v29, 0.0 }
 0x1c2   : > { %13879 = vst [vmem:[#allocation121_spill] sm:$0xff] %v9255_v3  ;;  %13880 = vst [vmem:[#allocation122_spill] sm:$0xff] %v9257_v24  ;;  %v8222_v24 = vld [vmem:[%s8311_s20 + $0x2d8] sm:$0xff]  ;;  %v8223_v3 = vld [vmem:[%s8311_s20 + $0x2d0] sm:$0xff] }
 0x1c3   : > { %v929_v57 = vmul.f32 %v8222_v24, %v8813_v23  ;;  %v928_v58 = vmul.f32 %v8223_v3, %v8813_v23 }
 0x1c4   : > { %1228 = vadd.xlane.f32.xlu1 %v1227_v33  ;;  %1225 = vadd.xlane.f32.xlu0 %v1224_v60 }
 0x1c5   : > { %v9265_v13 = vpop.xlane.xlu1 %1018  ;;  %v9267_v4 = vpop.xlane.xlu0 %1015  ;;  %v1239_v60 = vsel %vm449_vm0, %v929_v57, 0.0  ;;  %v1236_v30 = vsel %vm449_vm0, %v928_v58, 0.0 }
 0x1c6   : > { %13881 = vst [vmem:[#allocation123_spill] sm:$0xff] %v9265_v13  ;;  %13882 = vst [vmem:[#allocation124_spill] sm:$0xff] %v9267_v4  ;;  %v8224_v4 = vld [vmem:[%s8311_s20 + $0x2e8] sm:$0xff]  ;;  %v8225_v13 = vld [vmem:[%s8311_s20 + $0x2e0] sm:$0xff] }
 0x1c7   : > { %v931_v29 = vmul.f32 %v8224_v4, %v8813_v23  ;;  %v930_v24 = vmul.f32 %v8225_v13, %v8813_v23  ;;  %v1479_v13 = vand.u32 127, %v13887_v21 }
 0x1c8   : > { %1234 = vadd.xlane.f32.xlu1 %v1233_v0  ;;  %1231 = vadd.xlane.f32.xlu0 %v1230_v52 }
 0x1c9   : > { %v9275_v22 = vpop.xlane.xlu1 %1024  ;;  %v9277_v33 = vpop.xlane.xlu0 %1021  ;;  %v1245_v52 = vsel %vm449_vm0, %v931_v29, 0.0  ;;  %v1242_v57 = vsel %vm449_vm0, %v930_v24, 0.0  ;;  %v8228_v24 = vld [vmem:[%s8311_s20 + $0x308] sm:$0xff]  ;;  %v9307_v21 = vsub.s32 %v1479_v13, %v8300_v1  ;;  %v8231_v13 = vld [vmem:[%s8311_s20 + $0x310] sm:$0xff] }
 0x1ca   : > { %13883 = vst [vmem:[#allocation125_spill] sm:$0xff] %v9275_v22  ;;  %13884 = vst [vmem:[#allocation126_spill] sm:$0xff] %v9277_v33  ;;  %v8226_v33 = vld [vmem:[%s8311_s20 + $0x2f8] sm:$0xff]  ;;  %v8227_v22 = vld [vmem:[%s8311_s20 + $0x2f0] sm:$0xff] }
 0x1cb   : > { %v933_v58 = vmul.f32 %v8226_v33, %v8813_v23  ;;  %v932_v4 = vmul.f32 %v8227_v22, %v8813_v23  ;;  %v935_v33 = vmul.f32 %v8228_v24, %v8813_v23 }
 0x1cc   : > { %1240 = vadd.xlane.f32.xlu1 %v1239_v60  ;;  %1237 = vadd.xlane.f32.xlu0 %v1236_v30 }
 0x1cd   : > { %v9285_v3 = vpop.xlane.xlu1 %1030  ;;  %v9287_v0 = vpop.xlane.xlu0 %1027  ;;  %v1248_v29 = vsel %vm449_vm0, %v932_v4, 0.0  ;;  %v1257_v4 = vsel %vm449_vm0, %v935_v33, 0.0 }
 0x1ce   : > { %13885 = vst [vmem:[#allocation127_spill] sm:$0xff] %v9285_v3  ;;  %13886 = vst [vmem:[#allocation128_spill] sm:$0xff] %v9287_v0  ;;  %v1251_v0 = vsel %vm449_vm0, %v933_v58, 0.0  ;;  %v8229_v3 = vld [vmem:[%s8311_s20 + $0x300] sm:$0xff] }
 0x1cf   : > { %v934_v22 = vmul.f32 %v8229_v3, %v8813_v23 }
 0x1d0   : > { %1246 = vadd.xlane.f32.xlu1 %v1245_v52  ;;  %1243 = vadd.xlane.f32.xlu0 %v1242_v57  ;;  %v1487_v52 = vrot.slane %v8550_v56, %v9307_v21 }
 0x1d1   : > { %v9296_v60 = vpop.xlane.xlu1 %1036  ;;  %v9298_v30 = vpop.xlane.xlu0 %1033  ;;  %v1254_v24 = vsel %vm449_vm0, %v934_v22, 0.0 }
 0x1d2   : > { %13888 = vst [vmem:[#allocation129_spill] sm:$0xff] %v9296_v60  ;;  %13889 = vst [vmem:[#allocation130_spill] sm:$0xff] %v9298_v30  ;;  %v8230_v30 = vld [vmem:[%s8311_s20 + $0x318] sm:$0xff]  ;;  %v936_v60 = vmul.f32 %v8231_v13, %v8813_v23 }
 0x1d3   : > { %v937_v3 = vmul.f32 %v8230_v30, %v8813_v23 }
 0x1d4   : > { %1252 = vadd.xlane.f32.xlu1 %v1251_v0  ;;  %1249 = vadd.xlane.f32.xlu0 %v1248_v29  ;;  %v1483_v0 = vrot.slane %v8540_v48, %v9307_v21  ;;  %v1491_v29 = vrot.slane %v8538_v47, %v9307_v21  ;;  %v1260_v13 = vsel %vm449_vm0, %v936_v60, 0.0  ;;  %v8233_v48 = vld [vmem:[%s8311_s20 + $0x320] sm:$0xff] }
 0x1d5   : > { %v9311_v57 = vpop.xlane.xlu1 %1042  ;;  %v9313_v58 = vpop.xlane.xlu0 %1039  ;;  %v1263_v30 = vsel %vm449_vm0, %v937_v3, 0.0  ;;  %v938_v47 = vmul.f32 %v8233_v48, %v8813_v23 }
 0x1d6   : > { %13890 = vst [vmem:[#allocation131_spill] sm:$0xff] %v9311_v57  ;;  %13891 = vst [vmem:[#allocation132_spill] sm:$0xff] %v9313_v58  ;;  %v1993_v58 = vsel %vm1992_vm1, %v1487_v52, %v1483_v0  ;;  %v8232_v57 = vld [vmem:[%s8311_s20 + $0x328] sm:$0xff]  ;;  %v1495_v52 = vrot.slane %v8548_v55, %v9307_v21 }
 0x1d7   : > { %v939_v56 = vmul.f32 %v8232_v57, %v8813_v23  ;;  %v1266_v0 = vsel %vm449_vm0, %v938_v47, 0.0  ;;  %v8234_v57 = vld [vmem:[%s8311_s20 + $0x338] sm:$0xff]  ;;  %v1523_v47 = vrot.slane %v8590_v28, %v9307_v21 }
 0x1d8   : > { %1258 = vadd.xlane.f32.xlu1 %v1257_v4  ;;  %1255 = vadd.xlane.f32.xlu0 %v1254_v24  ;;  %v1995_v4 = vsel %vm1994_vm2, %v1491_v29, %v1993_v58  ;;  %v941_v48 = vmul.f32 %v8234_v57, %v8813_v23  ;;  %v1499_v58 = vrot.slane %v8560_v2, %v9307_v21 }
 0x1d9   : > { %v9326_v33 = vpop.xlane.xlu1 %1048  ;;  %v9328_v22 = vpop.xlane.xlu0 %1045  ;;  %v1269_v60 = vsel %vm449_vm0, %v939_v56, 0.0  ;;  %v1519_v29 = vrot.slane %v8578_v19, %v9307_v21  ;;  %v1997_v56 = vsel %vm1996_vm3, %v1495_v52, %v1995_v4  ;;  %v1503_v4 = vrot.slane %v8558_v63, %v9307_v21 }
 0x1da   : > { %13892 = vst [vmem:[#allocation133_spill] sm:$0xff] %v9326_v33  ;;  %13893 = vst [vmem:[#allocation134_spill] sm:$0xff] %v9328_v22  ;;  %v8235_v22 = vld [vmem:[%s8311_s20 + $0x330] sm:$0xff]  ;;  %v1275_v57 = vsel %vm449_vm0, %v941_v48, 0.0 }
 0x1db   : > { %v940_v33 = vmul.f32 %v8235_v22, %v8813_v23 }
 0x1dc   : > { %1264 = vadd.xlane.f32.xlu1 %v1263_v30  ;;  %1261 = vadd.xlane.f32.xlu0 %v1260_v13  ;;  %v1515_v30 = vrot.slane %v8580_v20, %v9307_v21  ;;  %v8237_v20 = vld [vmem:[%s8311_s20 + $0x340] sm:$0xff] }
 0x1dd   : > { %v9339_v24 = vpop.xlane.xlu1 %1054  ;;  %v9341_v3 = vpop.xlane.xlu0 %1051  ;;  %v942_v52 = vmul.f32 %v8237_v20, %v8813_v23  ;;  %v1555_v20 = vrot.slane %v8630_v6, %v9307_v21 }
 0x1de   : > { %13894 = vst [vmem:[#allocation135_spill] sm:$0xff] %v9339_v24  ;;  %13895 = vst [vmem:[#allocation136_spill] sm:$0xff] %v9341_v3  ;;  %v1272_v3 = vsel %vm449_vm0, %v940_v33, 0.0  ;;  %v8236_v24 = vld [vmem:[%s8311_s20 + $0x348] sm:$0xff]  ;;  %v1999_v33 = vsel %vm1998_vm4, %v1499_v58, %v1997_v56  ;;  %v2006_v48 = vsel %vm1992_vm1, %v1519_v29, %v1515_v30  ;;  %v8238_v30 = vld [vmem:[%s8311_s20 + $0x358] sm:$0xff] }
 0x1df   : > { %v943_v2 = vmul.f32 %v8236_v24, %v8813_v23  ;;  %v1527_v24 = vrot.slane %v8588_v27, %v9307_v21  ;;  %v1278_v29 = vsel %vm449_vm0, %v942_v52, 0.0  ;;  %v945_v56 = vmul.f32 %v8238_v30, %v8813_v23 }
 0x1e0   : > { %1270 = vadd.xlane.f32.xlu1 %v1269_v60  ;;  %1267 = vadd.xlane.f32.xlu0 %v1266_v0  ;;  %v1551_v60 = vrot.slane %v8618_v53, %v9307_v21  ;;  %v1547_v0 = vrot.slane %v8620_v54, %v9307_v21  ;;  %v8239_v53 = vld [vmem:[%s8311_s20 + $0x350] sm:$0xff] }
 0x1e1   : > { %v9358_v13 = vpop.xlane.xlu1 %1060  ;;  %v9360_v22 = vpop.xlane.xlu0 %1057  ;;  %v1281_v58 = vsel %vm449_vm0, %v943_v2, 0.0  ;;  %v944_v6 = vmul.f32 %v8239_v53, %v8813_v23  ;;  %v1535_v2 = vrot.slane %v8598_v35, %v9307_v21  ;;  %v1563_v53 = vrot.slane %v8640_v16, %v9307_v21 }
 0x1e2   : > { %13896 = vst [vmem:[#allocation137_spill] sm:$0xff] %v9358_v13  ;;  %13897 = vst [vmem:[#allocation138_spill] sm:$0xff] %v9360_v22  ;;  %v2007_v22 = vsel %vm1994_vm2, %v1523_v47, %v2006_v48  ;;  %v1531_v13 = vrot.slane %v8600_v36, %v9307_v21  ;;  %v1507_v47 = vrot.slane %v8570_v12, %v9307_v21 }
 0x1e3   : > { %v2001_v48 = vsel %vm2000_vm5, %v1503_v4, %v1999_v33  ;;  %v2008_v52 = vsel %vm1996_vm3, %v1527_v24, %v2007_v22  ;;  %v1287_v22 = vsel %vm449_vm0, %v945_v56, 0.0  ;;  %v1284_v24 = vsel %vm449_vm0, %v944_v6, 0.0 }
 0x1e4   : > { %1276 = vadd.xlane.f32.xlu1 %v1275_v57  ;;  %1273 = vadd.xlane.f32.xlu0 %v1272_v3  ;;  %v2013_v57 = vsel %vm1992_vm1, %v1551_v60, %v1547_v0  ;;  %v1559_v3 = vrot.slane %v8628_v5, %v9307_v21  ;;  %v1511_v60 = vrot.slane %v8568_v11, %v9307_v21 }
 0x1e5   : > { %v9383_v54 = vpop.xlane.xlu1 %1066  ;;  %v9385_v28 = vpop.xlane.xlu0 %1063  ;;  %v2014_v30 = vsel %vm1994_vm2, %v1555_v20, %v2013_v57  ;;  %v2009_v0 = vsel %vm1998_vm4, %v1531_v13, %v2008_v52  ;;  %v8240_v20 = vld [vmem:[%s8311_s20 + $0x368] sm:$0xff]  ;;  %v1567_v52 = vrot.slane %v8638_v15, %v9307_v21  ;;  %v1579_v56 = vrot.slane %v8660_v38, %v9307_v21 }
 0x1e6   : > { %13898 = vst [vmem:[#allocation139_spill] sm:$0xff] %v9383_v54  ;;  %13899 = vst [vmem:[#allocation140_spill] sm:$0xff] %v9385_v28  ;;  %v1539_v28 = vrot.slane %v8610_v44, %v9307_v21  ;;  %v947_v57 = vmul.f32 %v8240_v20, %v8813_v23  ;;  %v8241_v54 = vld [vmem:[%s8311_s20 + $0x360] sm:$0xff]  ;;  %v1587_v20 = vrot.slane %v8670_v50, %v9307_v21 }
 0x1e7   : > { %v946_v13 = vmul.f32 %v8241_v54, %v8813_v23  ;;  %v2010_v54 = vsel %vm2000_vm5, %v1535_v2, %v2009_v0  ;;  %v8243_v0 = vld [vmem:[%s8311_s20 + $0x370] sm:$0xff] }
 0x1e8   : > { %1282 = vadd.xlane.f32.xlu1 %v1281_v58  ;;  %1279 = vadd.xlane.f32.xlu0 %v1278_v29  ;;  %v2015_v58 = vsel %vm1996_vm3, %v1559_v3, %v2014_v30  ;;  %v1583_v29 = vrot.slane %v8658_v37, %v9307_v21  ;;  %v1543_v3 = vrot.slane %v8608_v43, %v9307_v21  ;;  %v1293_v50 = vsel %vm449_vm0, %v947_v57, 0.0 }
 0x1e9   : > { %v9410_v4 = vpop.xlane.xlu1 %1072  ;;  %v9412_v33 = vpop.xlane.xlu0 %1069  ;;  %v2016_v6 = vsel %vm1998_vm4, %v1563_v53, %v2015_v58  ;;  %v1571_v30 = vrot.slane %v8650_v26, %v9307_v21  ;;  %v1290_v2 = vsel %vm449_vm0, %v946_v13, 0.0  ;;  %v948_v38 = vmul.f32 %v8243_v0, %v8813_v23 }
 0x1ea   : > { %13900 = vst [vmem:[#allocation141_spill] sm:$0xff] %v9410_v4  ;;  %13901 = vst [vmem:[#allocation142_spill] sm:$0xff] %v9412_v33  ;;  %v2003_v33 = vsel %vm2002_vm6, %v1507_v47, %v2001_v48  ;;  %v2011_v4 = vsel %vm2002_vm6, %v1539_v28, %v2010_v54  ;;  %v8242_v47 = vld [vmem:[%s8311_s20 + $0x378] sm:$0xff]  ;;  %v2020_v28 = vsel %vm1992_vm1, %v1583_v29, %v1579_v56 }
 0x1eb   : > { %v949_v48 = vmul.f32 %v8242_v47, %v8813_v23  ;;  %v2017_v57 = vsel %vm2000_vm5, %v1567_v52, %v2016_v6  ;;  %v2021_v13 = vsel %vm1994_vm2, %v1587_v20, %v2020_v28  ;;  %v1595_v54 = vrot.slane %v8680_v62, %v9307_v21  ;;  %v8244_v28 = vld [vmem:[%s8311_s20 + $0x388] sm:$0xff]  ;;  %v8245_v62 = vld [vmem:[%s8311_s20 + $0x380] sm:$0xff] }
 0x1ec   : > { %1288 = vadd.xlane.f32.xlu1 %v1287_v22  ;;  %1285 = vadd.xlane.f32.xlu0 %v1284_v24  ;;  %v1575_v22 = vrot.slane %v8648_v25, %v9307_v21  ;;  %v1591_v24 = vrot.slane %v8668_v49, %v9307_v21  ;;  %v1615_v47 = vrot.slane %v8698_v31, %v9307_v21  ;;  %v1296_v20 = vsel %vm449_vm0, %v948_v38, 0.0 }
 0x1ed   : > { %v9437_v53 = vpop.xlane.xlu1 %1078  ;;  %v9439_v58 = vpop.xlane.xlu0 %1075  ;;  %v1611_v0 = vrot.slane %v8700_v32, %v9307_v21  ;;  %v1619_v29 = vrot.slane %v8710_v46, %v9307_v21  ;;  %v2018_v56 = vsel %vm2002_vm6, %v1571_v30, %v2017_v57  ;;  %v1299_v6 = vsel %vm449_vm0, %v949_v48, 0.0 }
 0x1ee   : > { %13902 = vst [vmem:[#allocation143_spill] sm:$0xff] %v9437_v53  ;;  %13903 = vst [vmem:[#allocation144_spill] sm:$0xff] %v9439_v58  ;;  %v951_v53 = vmul.f32 %v8244_v28, %v8813_v23  ;;  %v950_v32 = vmul.f32 %v8245_v62, %v8813_v23  ;;  %v2022_v46 = vsel %vm1996_vm3, %v1591_v24, %v2021_v13 }
 0x1ef   : > { %v9478_v30 = vsel %vm2004_vm7, %v1511_v60, %v2003_v33  ;;  %v2023_v38 = vsel %vm1998_vm4, %v1595_v54, %v2022_v46  ;;  %v2027_v48 = vsel %vm1992_vm1, %v1615_v47, %v1611_v0  ;;  %v9485_v57 = vsel %vm2004_vm7, %v1575_v22, %v2018_v56  ;;  %v8246_v22 = vld [vmem:[%s8311_s20 + $0x398] sm:$0xff]  ;;  %v8247_v54 = vld [vmem:[%s8311_s20 + $0x390] sm:$0xff] }
 0x1f0   : > { %1294 = vadd.xlane.f32.xlu1 %v1293_v50  ;;  %1291 = vadd.xlane.f32.xlu0 %v1290_v2  ;;  %v9475_v50 = vsel %vm2004_vm7, %v1543_v3, %v2011_v4  ;;  %v1599_v2 = vrot.slane %v8678_v61, %v9307_v21  ;;  %v1603_v62 = vrot.slane %v8690_v18, %v9307_v21  ;;  %v1305_v46 = vsel %vm449_vm0, %v951_v53, 0.0 }
 0x1f1   : > { %v9463_v58 = vpop.xlane.xlu1 %1084  ;;  %v9465_v52 = vpop.xlane.xlu0 %1081  ;;  %v1623_v4 = vrot.slane %v8708_v45, %v9307_v21  ;;  %v2028_v60 = vsel %vm1994_vm2, %v1619_v29, %v2027_v48  ;;  %v1302_v24 = vsel %vm449_vm0, %v950_v32, 0.0  ;;  %v953_v13 = vmul.f32 %v8246_v22, %v8813_v23 }
 0x1f2   : > { %13904 = vst [vmem:[#allocation145_spill] sm:$0xff] %v9463_v58  ;;  %13905 = vst [vmem:[#allocation146_spill] sm:$0xff] %v9465_v52  ;;  %v952_v47 = vmul.f32 %v8247_v54, %v8813_v23  ;;  %v1647_v0 = vrot.slane %v8738_v41, %v9307_v21  ;;  %v1643_v29 = vrot.slane %v8740_v42, %v9307_v21 }
 0x1f3   : > { %v1679_v56 = vrot.slane %v8778_v39, %v9307_v21  ;;  %v1675_v53 = vrot.slane %v8780_v40, %v9307_v21  ;;  %v1607_v32 = vrot.slane %v8688_v17, %v9307_v21  ;;  %v2024_v28 = vsel %vm2000_vm5, %v1599_v2, %v2023_v38  ;;  %v8249_v38 = vld [vmem:[%s8311_s20 + $0x3a0] sm:$0xff] }
 0x1f4   : > { %1300 = vadd.xlane.f32.xlu1 %v1299_v6  ;;  %1297 = vadd.xlane.f32.xlu0 %v1296_v20  ;;  %v1651_v6 = vrot.slane %v8750_v10, %v9307_v21  ;;  %v1683_v20 = vrot.slane %v8791_v59, %v9307_v21  ;;  %v2029_v48 = vsel %vm1996_vm3, %v1623_v4, %v2028_v60  ;;  %v1308_v58 = vsel %vm449_vm0, %v952_v47, 0.0  ;;  %v8248_v59 = vld [vmem:[%s8311_s20 + $0x3a8] sm:$0xff] }
 0x1f5   : > { %v9492_v33 = vpop.xlane.xlu1 %1090  ;;  %v9494_v3 = vpop.xlane.xlu0 %1087  ;;  %v1627_v22 = vrot.slane %v8720_v8, %v9307_v21  ;;  %v2025_v54 = vsel %vm2002_vm6, %v1603_v62, %v2024_v28  ;;  %v955_v2 = vmul.f32 %v8248_v59, %v8813_v23  ;;  %v954_v4 = vmul.f32 %v8249_v38, %v8813_v23  ;;  %v13937_v8 = vld [vmem:[#allocation39_spill] sm:$0xff] }
 0x1f6   : > { %13906 = vst [vmem:[#allocation147_spill] sm:$0xff] %v9492_v33  ;;  %13907 = vst [vmem:[#allocation148_spill] sm:$0xff] %v9494_v3  ;;  %v1311_v33 = vsel %vm449_vm0, %v953_v13, 0.0  ;;  %v2034_v60 = vsel %vm1992_vm1, %v1647_v0, %v1643_v29  ;;  %v2041_v62 = vsel %vm1992_vm1, %v1679_v56, %v1675_v53  ;;  %v1659_v59 = vrot.slane %v8760_v34, %v9307_v21  ;;  %v13917_v34 = vld [vmem:[#allocation35_spill] sm:$0xff] }
 0x1f7   : > { %v2035_v13 = vsel %vm1994_vm2, %v1651_v6, %v2034_v60  ;;  %v2042_v47 = vsel %vm1994_vm2, %v1683_v20, %v2041_v62  ;;  %v1691_v0 = vrot.slane %v8804_v51, %v9307_v21  ;;  %v1631_v29 = vrot.slane %v8718_v7, %v9307_v21  ;;  %v8250_v60 = vld [vmem:[%s8311_s20 + $0x3b8] sm:$0xff]  ;;  %v13916_v51 = vld [vmem:[#allocation34_spill] sm:$0xff] }
 0x1f8   : > { %1306 = vadd.xlane.f32.xlu1 %v1305_v46  ;;  %1303 = vadd.xlane.f32.xlu0 %v1302_v24  ;;  %v1655_v46 = vrot.slane %v8748_v9, %v9307_v21  ;;  %v1687_v24 = vrot.slane %v8789_v14, %v9307_v21  ;;  %v2030_v56 = vsel %vm1998_vm4, %v1627_v22, %v2029_v48  ;;  %v1317_v20 = vsel %vm449_vm0, %v955_v2, 0.0 }
 0x1f9   : > { %v9521_v3 = vpop.xlane.xlu1 %1096  ;;  %v9523_v52 = vpop.xlane.xlu0 %1093  ;;  %v9547_v53 = vsel %vm2004_vm7, %v1607_v32, %v2025_v54  ;;  %v1314_v38 = vsel %vm449_vm0, %v954_v4, 0.0  ;;  %v957_v62 = vmul.f32 %v8250_v60, %v8813_v23  ;;  %v13913_v32 = vld [vmem:[#allocation22_spill] sm:$0xff]  ;;  %v13914_v4 = vld [vmem:[#allocation25_spill] sm:$0xff]  ;;  %v1699_v40 = vrot.slane %v13916_v51, %v9307_v21  ;;  %v8252_v51 = vld [vmem:[%s8311_s20 + $0x3c8] sm:$0xff] }
 0x1fa   : > { %13908 = vst [vmem:[#allocation149_spill] sm:$0xff] %v9521_v3  ;;  %13909 = vst [vmem:[#allocation150_spill] sm:$0xff] %v9523_v52  ;;  %v8251_v52 = vld [vmem:[%s8311_s20 + $0x3b0] sm:$0xff]  ;;  %v1663_v22 = vrot.slane %v13913_v32, %v9307_v21  ;;  %v2036_v54 = vsel %vm1996_vm3, %v1655_v46, %v2035_v13  ;;  %v1667_v60 = vrot.slane %v13914_v4, %v9307_v21 }
 0x1fb   : > { %v956_v48 = vmul.f32 %v8251_v52, %v8813_v23  ;;  %v2037_v2 = vsel %vm1998_vm4, %v1659_v59, %v2036_v54  ;;  %v1711_v46 = vrot.slane %v13917_v34, %v9307_v21  ;;  %v13918_v13 = vld [vmem:[#allocation36_spill] sm:$0xff]  ;;  %v9579_v59 = vsel %vm2127_vm8, %v9478_v30, -inf  ;;  %v8253_v34 = vld [vmem:[%s8311_s20 + $0x3c0] sm:$0xff] }
 0x1fc   : > { %1312 = vadd.xlane.f32.xlu1 %v1311_v33  ;;  %1309 = vadd.xlane.f32.xlu0 %v1308_v58  ;;  %v13912_v58 = vld [vmem:[#allocation19_spill] sm:$0xff]  ;;  %v959_v4 = vmul.f32 %v8252_v51, %v8813_v23  ;;  %v13922_v30 = vld [vmem:[#allocation38_spill] sm:$0xff] }
 0x1fd   : > { %v9549_v6 = vpop.xlane.xlu1 %1102  ;;  %v9551_v28 = vpop.xlane.xlu0 %1099  ;;  %v1635_v33 = vrot.slane %v13912_v58, %v9307_v21  ;;  %v1715_v10 = vrot.slane %v13922_v30, %v9307_v21 }
 0x1fe   : > { %13910 = vst [vmem:[#allocation151_spill] sm:$0xff] %v9549_v6  ;;  %13911 = vst [vmem:[#allocation152_spill] sm:$0xff] %v9551_v28  ;;  %v2043_v28 = vsel %vm1996_vm3, %v1687_v24, %v2042_v47  ;;  %v13915_v6 = vld [vmem:[#allocation31_spill] sm:$0xff]  ;;  %v1707_v24 = vrot.slane %v13918_v13, %v9307_v21  ;;  %v958_v13 = vmul.f32 %v8253_v34, %v8813_v23 }
 0x1ff   : > { %v1695_v52 = vrot.slane %v13915_v6, %v9307_v21  ;;  %v2044_v3 = vsel %vm1998_vm4, %v1691_v0, %v2043_v28  ;;  %v1323_v0 = vsel %vm449_vm0, %v957_v62, 0.0  ;;  %v1320_v28 = vsel %vm449_vm0, %v956_v48, 0.0  ;;  %v13923_v62 = vld [vmem:[#allocation24_spill] sm:$0xff]  ;;  %v13924_v6 = vld [vmem:[#allocation33_spill] sm:$0xff] }
 0x200   : > { %1318 = vadd.xlane.f32.xlu1 %v1317_v20  ;;  %1315 = vadd.xlane.f32.xlu0 %v1314_v38  ;;  %v13921_v20 = vld [vmem:[#allocation18_spill] sm:$0xff]  ;;  %v1671_v48 = vrot.slane %v13923_v62, %v9307_v21  ;;  %v1703_v58 = vrot.slane %v13924_v6, %v9307_v21  ;;  %v2048_v30 = vsel %vm1992_vm1, %v1711_v46, %v1707_v24  ;;  %v8255_v46 = vld [vmem:[%s8311_s20 + $0x3d0] sm:$0xff] }
 0x201   : > { %v9581_v47 = vpop.xlane.xlu1 %1108  ;;  %v9583_v54 = vpop.xlane.xlu0 %1105  ;;  %v1639_v38 = vrot.slane %v13921_v20, %v9307_v21  ;;  %v2045_v34 = vsel %vm2000_vm5, %v1695_v52, %v2044_v3  ;;  %v1326_v3 = vsel %vm449_vm0, %v958_v13, 0.0  ;;  %v960_v24 = vmul.f32 %v8255_v46, %v8813_v23  ;;  %v13930_v13 = vld [vmem:[#allocation40_spill] sm:$0xff]  ;;  %v13932_v46 = vld [vmem:[#allocation51_spill] sm:$0xff] }
 0x202   : > { %13919 = vst [vmem:[#allocation22_spill] sm:$0xff] %v9581_v47  ;;  %13920 = vst [vmem:[#allocation153_spill] sm:$0xff] %v9583_v54  ;;  %v2038_v47 = vsel %vm2000_vm5, %v1663_v22, %v2037_v2  ;;  %v2031_v54 = vsel %vm2000_vm5, %v1631_v29, %v2030_v56  ;;  %v9607_v29 = vsel %vm2127_vm8, %v9475_v50, -inf  ;;  %v2046_v56 = vsel %vm2002_vm6, %v1699_v40, %v2045_v34  ;;  %v13928_v40 = vld [vmem:[#allocation43_spill] sm:$0xff] }
 0x203   : > { %v2039_v51 = vsel %vm2002_vm6, %v1667_v60, %v2038_v47  ;;  %v2032_v42 = vsel %vm2002_vm6, %v1635_v33, %v2031_v54  ;;  %v1329_v33 = vsel %vm449_vm0, %v959_v4, 0.0  ;;  %v8254_v60 = vld [vmem:[%s8311_s20 + $0x3d8] sm:$0xff]  ;;  %v2049_v54 = vsel %vm1994_vm2, %v1715_v10, %v2048_v30  ;;  %v13934_v30 = vld [vmem:[#allocation54_spill] sm:$0xff] }
 0x204   : > { %1324 = vadd.xlane.f32.xlu1 %v1323_v0  ;;  %1321 = vadd.xlane.f32.xlu0 %v1320_v28  ;;  %v961_v52 = vmul.f32 %v8254_v60, %v8813_v23  ;;  %v13927_v47 = vld [vmem:[#allocation37_spill] sm:$0xff]  ;;  %v1743_v0 = vrot.slane %v13928_v40, %v9307_v21  ;;  %v13929_v28 = vld [vmem:[#allocation44_spill] sm:$0xff]  ;;  %v1723_v34 = vrot.slane %v13930_v13, %v9307_v21  ;;  %v13931_v60 = vld [vmem:[#allocation46_spill] sm:$0xff]  ;;  %v1332_v14 = vsel %vm449_vm0, %v960_v24, 0.0 }
 0x205   : > { %v9610_v22 = vpop.xlane.xlu1 %1114  ;;  %v9612_v2 = vpop.xlane.xlu0 %1111  ;;  %v1719_v50 = vrot.slane %v13927_v47, %v9307_v21  ;;  %v1739_v4 = vrot.slane %v13929_v28, %v9307_v21  ;;  %v13933_v47 = vld [vmem:[#allocation52_spill] sm:$0xff]  ;;  %v1779_v40 = vrot.slane %v13934_v30, %v9307_v21  ;;  %v9639_v28 = vsel %vm2127_vm8, %v9485_v57, -inf  ;;  %v8256_v30 = vld [vmem:[%s8311_s20 + $0x3e8] sm:$0xff]  ;;  %v13938_v24 = vld [vmem:[#allocation45_spill] sm:$0xff] }
 0x206   : > { %13925 = vst [vmem:[#allocation18_spill] sm:$0xff] %v9610_v22  ;;  %13926 = vst [vmem:[#allocation154_spill] sm:$0xff] %v9612_v2  ;;  %v1747_v2 = vrot.slane %v13931_v60, %v9307_v21  ;;  %v1775_v22 = vrot.slane %v13932_v46, %v9307_v21  ;;  %v1771_v10 = vrot.slane %v13933_v47, %v9307_v21  ;;  %v1335_v47 = vsel %vm449_vm0, %v961_v52, 0.0 }
 0x207   : > { %v9642_v13 = vsel %vm2004_vm7, %v1671_v48, %v2039_v51  ;;  %v2033_v60 = vsel %vm2004_vm7, %v1639_v38, %v2032_v42  ;;  %v1727_v48 = vrot.slane %v13937_v8, %v9307_v21  ;;  %v2050_v51 = vsel %vm1996_vm3, %v1719_v50, %v2049_v54  ;;  %v13940_v50 = vld [vmem:[#allocation53_spill] sm:$0xff] }
 0x208   : > { %1330 = vadd.xlane.f32.xlu1 %v1329_v33  ;;  %1327 = vadd.xlane.f32.xlu0 %v1326_v3  ;;  %v963_v33 = vmul.f32 %v8256_v30, %v8813_v23  ;;  %v8257_v3 = vld [vmem:[%s8311_s20 + $0x3e0] sm:$0xff]  ;;  %v2055_v42 = vsel %vm1992_vm1, %v1743_v0, %v1739_v4  ;;  %v9660_v38 = vsel %vm2004_vm7, %v1703_v58, %v2046_v56  ;;  %v9674_v58 = vsel %vm2127_vm8, %v9547_v53, -inf  ;;  %v13944_v53 = vld [vmem:[#allocation59_spill] sm:$0xff] }
 0x209   : > { %v9645_v6 = vpop.xlane.xlu1 %1120  ;;  %v9647_v46 = vpop.xlane.xlu0 %1117  ;;  %v962_v57 = vmul.f32 %v8257_v3, %v8813_v23  ;;  %v2051_v52 = vsel %vm1998_vm4, %v1723_v34, %v2050_v51  ;;  %v1751_v30 = vrot.slane %v13938_v24, %v9307_v21  ;;  %v2062_v3 = vsel %vm1992_vm1, %v1775_v22, %v1771_v10  ;;  %v8258_v34 = vld [vmem:[%s8311_s20 + $0x3f8] sm:$0xff]  ;;  %v8259_v51 = vld [vmem:[%s8311_s20 + $0x3f0] sm:$0xff] }
 0x20a   : > { %13935 = vst [vmem:[#allocation155_spill] sm:$0xff] %v9645_v6  ;;  %13936 = vst [vmem:[#allocation156_spill] sm:$0xff] %v9647_v46  ;;  %v2056_v46 = vsel %vm1994_vm2, %v1747_v2, %v2055_v42  ;;  %v13939_v6 = vld [vmem:[#allocation48_spill] sm:$0xff]  ;;  %v1783_v54 = vrot.slane %v13940_v50, %v9307_v21  ;;  %v2063_v0 = vsel %vm1994_vm2, %v1779_v40, %v2062_v3  ;;  %v1341_v22 = vsel %vm449_vm0, %v963_v33, 0.0  ;;  %v13946_v33 = vld [vmem:[#allocation47_spill] sm:$0xff] }
 0x20b   : > { %v1755_v8 = vrot.slane %v13939_v6, %v9307_v21  ;;  %v1338_v2 = vsel %vm449_vm0, %v962_v57, 0.0  ;;  %v965_v10 = vmul.f32 %v8258_v34, %v8813_v23  ;;  %v964_v40 = vmul.f32 %v8259_v51, %v8813_v23  ;;  %v13945_v3 = vld [vmem:[#allocation60_spill] sm:$0xff]  ;;  %v13948_v23 = vld [vmem:[#allocation62_spill] sm:$0xff] }
 0x20c   : > { %1336 = vadd.xlane.f32.xlu1 %v1335_v47  ;;  %1333 = vadd.xlane.f32.xlu0 %v1332_v14  ;;  %v13943_v14 = vld [vmem:[#allocation42_spill] sm:$0xff]  ;;  %v1807_v42 = vrot.slane %v13944_v53, %v9307_v21  ;;  %v1759_v57 = vrot.slane %v13946_v33, %v9307_v21  ;;  %v2057_v6 = vsel %vm1996_vm3, %v1751_v30, %v2056_v46  ;;  %v13947_v34 = vld [vmem:[#allocation56_spill] sm:$0xff]  ;;  %v13950_v46 = vld [vmem:[#allocation67_spill] sm:$0xff] }
 0x20d   : > { %v9676_v56 = vpop.xlane.xlu1 %1126  ;;  %v9678_v4 = vpop.xlane.xlu0 %1123  ;;  %v1731_v47 = vrot.slane %v13943_v14, %v9307_v21  ;;  %v1787_v50 = vrot.slane %v13947_v34, %v9307_v21  ;;  %v1811_v51 = vrot.slane %v13948_v23, %v9307_v21  ;;  %v2058_v14 = vsel %vm1998_vm4, %v1755_v8, %v2057_v6  ;;  %v13949_v53 = vld [vmem:[#allocation50_spill] sm:$0xff]  ;;  %v13951_v30 = vld [vmem:[#allocation68_spill] sm:$0xff] }
 0x20e   : > { %13941 = vst [vmem:[#allocation157_spill] sm:$0xff] %v9676_v56  ;;  %13942 = vst [vmem:[#allocation158_spill] sm:$0xff] %v9678_v4  ;;  %v1803_v56 = vrot.slane %v13945_v3, %v9307_v21  ;;  %v2052_v4 = vsel %vm2000_vm5, %v1727_v48, %v2051_v52  ;;  %v1763_v24 = vrot.slane %v13949_v53, %v9307_v21  ;;  %v9705_v48 = vsel %vm2127_vm8, %v2033_v60, -inf }
 0x20f   : > { %v2064_v3 = vsel %vm1996_vm3, %v1783_v54, %v2063_v0  ;;  %v1839_v52 = vrot.slane %v13950_v46, %v9307_v21  ;;  %v1835_v34 = vrot.slane %v13951_v30, %v9307_v21  ;;  %v1347_v8 = vsel %vm449_vm0, %v965_v10, 0.0  ;;  %v13954_v54 = vld [vmem:[#allocation55_spill] sm:$0xff]  ;;  %v13956_v46 = vld [vmem:[#allocation70_spill] sm:$0xff] }
 0x210   : > { %1342 = vadd.xlane.f32.xlu1 %v1341_v22  ;;  %1339 = vadd.xlane.f32.xlu0 %v1338_v2  ;;  %v1344_v6 = vsel %vm449_vm0, %v964_v40, 0.0  ;;  %v1791_v0 = vrot.slane %v13954_v54, %v9307_v21  ;;  %v2069_v60 = vsel %vm1992_vm1, %v1807_v42, %v1803_v56  ;;  %v13955_v22 = vld [vmem:[#allocation61_spill] sm:$0xff]  ;;  %v1843_v53 = vrot.slane %v13956_v46, %v9307_v21  ;;  %v13958_v40 = vld [vmem:[#allocation64_spill] sm:$0xff] }
 0x211   : > { %v9711_v33 = vpop.xlane.xlu1 %1132  ;;  %v9713_v23 = vpop.xlane.xlu0 %1129  ;;  %v1815_v2 = vrot.slane %v13955_v22, %v9307_v21  ;;  %v2065_v30 = vsel %vm1998_vm4, %v1787_v50, %v2064_v3  ;;  %v2070_v10 = vsel %vm1994_vm2, %v1811_v51, %v2069_v60  ;;  %v1819_v39 = vrot.slane %v13958_v40, %v9307_v21  ;;  %v13959_v54 = vld [vmem:[#allocation41_spill] sm:$0xff] }
 0x212   : > { %13952 = vst [vmem:[#allocation159_spill] sm:$0xff] %v9711_v33  ;;  %13953 = vst [vmem:[#allocation160_spill] sm:$0xff] %v9713_v23  ;;  %v13957_v33 = vld [vmem:[#allocation58_spill] sm:$0xff]  ;;  %v1735_v62 = vrot.slane %v13959_v54, %v9307_v21  ;;  %v2143_v56 = vsel %vm2127_vm8, %v9642_v13, -inf  ;;  %v2053_v42 = vsel %vm2002_vm6, %v1731_v47, %v2052_v4  ;;  %v2059_v50 = vsel %vm2000_vm5, %v1759_v57, %v2058_v14  ;;  %v13960_v3 = vld [vmem:[#allocation49_spill] sm:$0xff] }
 0x213   : > { %v1795_v23 = vrot.slane %v13957_v33, %v9307_v21  ;;  %v1767_v46 = vrot.slane %v13960_v3, %v9307_v21  ;;  %v2076_v51 = vsel %vm1992_vm1, %v1839_v52, %v1835_v34  ;;  %v13961_v60 = vld [vmem:[#allocation69_spill] sm:$0xff]  ;;  %v2071_v13 = vsel %vm1996_vm3, %v1815_v2, %v2070_v10  ;;  %v13964_v14 = vld [vmem:[#allocation72_spill] sm:$0xff] }
 0x214   : > { %1348 = vadd.xlane.f32.xlu1 %v1347_v8  ;;  %1345 = vadd.xlane.f32.xlu0 %v1344_v6  ;;  %v1847_v40 = vrot.slane %v13961_v60, %v9307_v21  ;;  %v2060_v8 = vsel %vm2002_vm6, %v1763_v24, %v2059_v50  ;;  %v2077_v4 = vsel %vm1994_vm2, %v1843_v53, %v2076_v51  ;;  %v13965_v34 = vld [vmem:[#allocation57_spill] sm:$0xff]  ;;  %v13966_v6 = vld [vmem:[#allocation63_spill] sm:$0xff]  ;;  %v13967_v24 = vld [vmem:[#allocation66_spill] sm:$0xff] }
 0x215   : > { %v9741_v33 = vpop.xlane.xlu1 %1138  ;;  %v9743_v22 = vpop.xlane.xlu0 %1135  ;;  %v1851_v47 = vrot.slane %v13964_v14, %v9307_v21  ;;  %v2066_v57 = vsel %vm2000_vm5, %v1791_v0, %v2065_v30  ;;  %v1799_v52 = vrot.slane %v13965_v34, %v9307_v21  ;;  %v1823_v60 = vrot.slane %v13966_v6, %v9307_v21  ;;  %v13968_v53 = vld [vmem:[#allocation75_spill] sm:$0xff]  ;;  %v13969_v50 = vld [vmem:[#allocation76_spill] sm:$0xff] }
 0x216   : > { %13962 = vst [vmem:[#allocation41_spill] sm:$0xff] %v9741_v33  ;;  %13963 = vst [vmem:[#allocation49_spill] sm:$0xff] %v9743_v22  ;;  %v2072_v33 = vsel %vm1998_vm4, %v1819_v39, %v2071_v13  ;;  %v2067_v22 = vsel %vm2002_vm6, %v1795_v23, %v2066_v57  ;;  %v1827_v2 = vrot.slane %v13967_v24, %v9307_v21  ;;  %v2146_v30 = vsel %vm2127_vm8, %v9660_v38, -inf  ;;  %v13970_v39 = vld [vmem:[#allocation71_spill] sm:$0xff]  ;;  %v13971_v13 = vld [vmem:[#allocation78_spill] sm:$0xff] }
 0x217   : > { %v1871_v10 = vrot.slane %v13968_v53, %v9307_v21  ;;  %v1867_v51 = vrot.slane %v13969_v50, %v9307_v21  ;;  %v1855_v0 = vrot.slane %v13970_v39, %v9307_v21  ;;  %v2078_v23 = vsel %vm1996_vm3, %v1847_v40, %v2077_v4  ;;  %v13975_v38 = vld [vmem:[#allocation84_spill] sm:$0xff]  ;;  %v13976_v40 = vld [vmem:[#allocation65_spill] sm:$0xff] }
 0x218   : > { %2132 = vmax.xlane.f32.xlu1 %v9607_v29  ;;  %2129 = vmax.xlane.f32.xlu0 %v9579_v59  ;;  %v1875_v57 = vrot.slane %v13971_v13, %v9307_v21  ;;  %v2054_v50 = vsel %vm2004_vm7, %v1735_v62, %v2053_v42  ;;  %v2079_v29 = vsel %vm1998_vm4, %v1851_v47, %v2078_v23  ;;  %v13974_v59 = vld [vmem:[#allocation83_spill] sm:$0xff]  ;;  %v13977_v13 = vld [vmem:[#allocation86_spill] sm:$0xff]  ;;  %v13978_v47 = vld [vmem:[#allocation77_spill] sm:$0xff] }
 0x219   : > { %v9772_v14 = vpop.xlane.xlu1 %1144  ;;  %v9774_v24 = vpop.xlane.xlu0 %1141  ;;  %v1903_v53 = vrot.slane %v13974_v59, %v9307_v21  ;;  %v1899_v6 = vrot.slane %v13975_v38, %v9307_v21  ;;  %v2061_v39 = vsel %vm2004_vm7, %v1767_v46, %v2060_v8  ;;  %v1831_v4 = vrot.slane %v13976_v40, %v9307_v21  ;;  %v13979_v38 = vld [vmem:[#allocation74_spill] sm:$0xff] }
 0x21a   : > { %13972 = vst [vmem:[#allocation161_spill] sm:$0xff] %v9772_v14  ;;  %13973 = vst [vmem:[#allocation162_spill] sm:$0xff] %v9774_v24  ;;  %v1907_v14 = vrot.slane %v13977_v13, %v9307_v21  ;;  %v2068_v24 = vsel %vm2004_vm7, %v1799_v52, %v2067_v22  ;;  %v2073_v62 = vsel %vm2000_vm5, %v1823_v60, %v2072_v33  ;;  %v2149_v46 = vsel %vm2127_vm8, %v2054_v50, -inf  ;;  %v13980_v33 = vld [vmem:[#allocation80_spill] sm:$0xff]  ;;  %v13983_v50 = vld [vmem:[#allocation85_spill] sm:$0xff] }
 0x21b   : > { %v2083_v42 = vsel %vm1992_vm1, %v1871_v10, %v1867_v51  ;;  %v1879_v23 = vrot.slane %v13978_v47, %v9307_v21  ;;  %v2074_v8 = vsel %vm2002_vm6, %v1827_v2, %v2073_v62  ;;  %v1859_v13 = vrot.slane %v13979_v38, %v9307_v21  ;;  %v13984_v2 = vld [vmem:[#allocation91_spill] sm:$0xff]  ;;  %v13985_v38 = vld [vmem:[#allocation92_spill] sm:$0xff] }
 0x21c   : > { %2138 = vmax.xlane.f32.xlu1 %v9674_v58  ;;  %2135 = vmax.xlane.f32.xlu0 %v9639_v28  ;;  %v2084_v22 = vsel %vm1994_vm2, %v1875_v57, %v2083_v42  ;;  %v1883_v60 = vrot.slane %v13980_v33, %v9307_v21  ;;  %v2080_v58 = vsel %vm2000_vm5, %v1855_v0, %v2079_v29  ;;  %v13986_v42 = vld [vmem:[#allocation73_spill] sm:$0xff]  ;;  %v13988_v0 = vld [vmem:[#allocation94_spill] sm:$0xff]  ;;  %v13989_v29 = vld [vmem:[#allocation99_spill] sm:$0xff] }
 0x21d   : > { %v9801_v52 = vpop.xlane.xlu1 %1150  ;;  %v9803_v10 = vpop.xlane.xlu0 %1147  ;;  %v2090_v28 = vsel %vm1992_vm1, %v1903_v53, %v1899_v6  ;;  %v1911_v51 = vrot.slane %v13983_v50, %v9307_v21  ;;  %v1935_v62 = vrot.slane %v13984_v2, %v9307_v21  ;;  %v1931_v57 = vrot.slane %v13985_v38, %v9307_v21  ;;  %v13990_v2 = vld [vmem:[#allocation100_spill] sm:$0xff] }
 0x21e   : > { %13981 = vst [vmem:[#allocation163_spill] sm:$0xff] %v9801_v52  ;;  %13982 = vst [vmem:[#allocation164_spill] sm:$0xff] %v9803_v10  ;;  %v1863_v33 = vrot.slane %v13986_v42, %v9307_v21  ;;  %v2091_v52 = vsel %vm1994_vm2, %v1907_v14, %v2090_v28  ;;  %v13987_v10 = vld [vmem:[#allocation88_spill] sm:$0xff]  ;;  %v1939_v6 = vrot.slane %v13988_v0, %v9307_v21  ;;  %v2152_v38 = vsel %vm2127_vm8, %v2061_v39, -inf  ;;  %v13991_v14 = vld [vmem:[#allocation79_spill] sm:$0xff] }
 0x21f   : > { %v1915_v59 = vrot.slane %v13987_v10, %v9307_v21  ;;  %v2085_v53 = vsel %vm1996_vm3, %v1879_v23, %v2084_v22  ;;  %v1967_v50 = vrot.slane %v13989_v29, %v9307_v21  ;;  %v1963_v47 = vrot.slane %v13990_v2, %v9307_v21  ;;  %v13992_v0 = vld [vmem:[#allocation102_spill] sm:$0xff] }
 0x220   : > { %2144 = vmax.xlane.f32.xlu1 %v2143_v56  ;;  %2141 = vmax.xlane.f32.xlu0 %v9705_v48  ;;  %v1887_v28 = vrot.slane %v13991_v14, %v9307_v21  ;;  %v2086_v10 = vsel %vm1998_vm4, %v1883_v60, %v2085_v53  ;;  %v1971_v42 = vrot.slane %v13992_v0, %v9307_v21  ;;  %v13995_v56 = vld [vmem:[#allocation82_spill] sm:$0xff]  ;;  %v13996_v48 = vld [vmem:[#allocation87_spill] sm:$0xff] }
 0x221   : > { %v9832_v23 = vpop.xlane.xlu1 %1156  ;;  %v9834_v22 = vpop.xlane.xlu0 %1153  ;;  %v2081_v29 = vsel %vm2002_vm6, %v1859_v13, %v2080_v58  ;;  %v1891_v2 = vrot.slane %v13995_v56, %v9307_v21  ;;  %v1919_v39 = vrot.slane %v13996_v48, %v9307_v21  ;;  %v2092_v40 = vsel %vm1996_vm3, %v1911_v51, %v2091_v52  ;;  %v13997_v53 = vld [vmem:[#allocation90_spill] sm:$0xff]  ;;  %v13999_v58 = vld [vmem:[#allocation96_spill] sm:$0xff]  ;;  %v14000_v48 = vld [vmem:[#allocation101_spill] sm:$0xff] }
 0x222   : > { %13993 = vst [vmem:[#allocation165_spill] sm:$0xff] %v9832_v23  ;;  %13994 = vst [vmem:[#allocation166_spill] sm:$0xff] %v9834_v22  ;;  %v2097_v14 = vsel %vm1992_vm1, %v1935_v62, %v1931_v57  ;;  %v2093_v60 = vsel %vm1998_vm4, %v1915_v59, %v2092_v40  ;;  %v1923_v0 = vrot.slane %v13997_v53, %v9307_v21  ;;  %v13998_v23 = vld [vmem:[#allocation93_spill] sm:$0xff]  ;;  %v2155_v59 = vsel %vm2127_vm8, %v2068_v24, -inf  ;;  %v14001_v51 = vld [vmem:[#allocation104_spill] sm:$0xff] }
 0x223   : > { %v1943_v22 = vrot.slane %v13998_v23, %v9307_v21  ;;  %v2098_v13 = vsel %vm1994_vm2, %v1939_v6, %v2097_v14  ;;  %v1947_v56 = vrot.slane %v13999_v58, %v9307_v21  ;;  %v2104_v34 = vsel %vm1992_vm1, %v1967_v50, %v1963_v47  ;;  %v14004_v50 = vld [vmem:[#allocation81_spill] sm:$0xff] }
 0x224   : > { %v1975_v52 = vrot.slane %v14000_v48, %v9307_v21  ;;  %2150 = vmax.xlane.f32.xlu1 %v2149_v46  ;;  %2147 = vmax.xlane.f32.xlu0 %v2146_v30  ;;  %v2105_v40 = vsel %vm1994_vm2, %v1971_v42, %v2104_v34  ;;  %v1979_v62 = vrot.slane %v14001_v51, %v9307_v21  ;;  %v14005_v46 = vld [vmem:[#allocation89_spill] sm:$0xff] }
 0x225   : > { %v9858_v57 = vpop.xlane.xlu1 %1162  ;;  %v9860_v6 = vpop.xlane.xlu0 %1159  ;;  %v2075_v14 = vsel %vm2004_vm7, %v1831_v4, %v2074_v8  ;;  %v2087_v47 = vsel %vm2000_vm5, %v1887_v28, %v2086_v10  ;;  %v1895_v48 = vrot.slane %v14004_v50, %v9307_v21  ;;  %v2082_v30 = vsel %vm2004_vm7, %v1863_v33, %v2081_v29  ;;  %v14007_v10 = vld [vmem:[#allocation103_spill] sm:$0xff] }
 0x226   : > { %14002 = vst [vmem:[#allocation90_spill] sm:$0xff] %v9858_v57  ;;  %14003 = vst [vmem:[#allocation93_spill] sm:$0xff] %v9860_v6  ;;  %v2094_v24 = vsel %vm2000_vm5, %v1919_v39, %v2093_v60  ;;  %v2088_v34 = vsel %vm2002_vm6, %v1891_v2, %v2087_v47  ;;  %v1927_v42 = vrot.slane %v14005_v46, %v9307_v21  ;;  %v14006_v57 = vld [vmem:[#allocation95_spill] sm:$0xff]  ;;  %v14008_v2 = vld [vmem:[#allocation98_spill] sm:$0xff] }
 0x227   : > { %v1951_v51 = vrot.slane %v14006_v57, %v9307_v21  ;;  %v2099_v6 = vsel %vm1996_vm3, %v1943_v22, %v2098_v13  ;;  %v2095_v4 = vsel %vm2002_vm6, %v1923_v0, %v2094_v24  ;;  %v1983_v28 = vrot.slane %v14007_v10, %v9307_v21  ;;  %v14009_v60 = vld [vmem:[#allocation106_spill] sm:$0xff] }
 0x228   : > { %v2100_v8 = vsel %vm1998_vm4, %v1947_v56, %v2099_v6  ;;  %v2106_v33 = vsel %vm1996_vm3, %v1975_v52, %v2105_v40  ;;  %2156 = vmax.xlane.f32.xlu1 %v2155_v59  ;;  %2153 = vmax.xlane.f32.xlu0 %v2152_v38  ;;  %v1955_v29 = vrot.slane %v14008_v2, %v9307_v21  ;;  %v2158_v56 = vsel %vm2127_vm8, %v2075_v14, -inf  ;;  %v14012_v40 = vld [vmem:[#allocation97_spill] sm:$0xff] }
 0x229   : > { %v2107_v39 = vsel %vm1998_vm4, %v1979_v62, %v2106_v33  ;;  %v1987_v47 = vrot.slane %v14009_v60, %v9307_v21  ;;  %v9884_v22 = vpop.xlane.xlu1 %1168  ;;  %v9886_v0 = vpop.xlane.xlu0 %1165  ;;  %v2161_v13 = vsel %vm2127_vm8, %v2082_v30, -inf  ;;  %v2096_v52 = vsel %vm2004_vm7, %v1927_v42, %v2095_v4  ;;  %v14013_v6 = vld [vmem:[#allocation105_spill] sm:$0xff] }
 0x22a   : > { %14010 = vst [vmem:[#allocation96_spill] sm:$0xff] %v9884_v22  ;;  %14011 = vst [vmem:[#allocation81_spill] sm:$0xff] %v9886_v0  ;;  %v2089_v38 = vsel %vm2004_vm7, %v1895_v48, %v2088_v34  ;;  %v2101_v59 = vsel %vm2000_vm5, %v1951_v51, %v2100_v8  ;;  %v1959_v62 = vrot.slane %v14012_v40, %v9307_v21  ;;  %v2167_v51 = vsel %vm2127_vm8, %v2096_v52, -inf }
 0x22b   : > { %v1991_v24 = vrot.slane %v14013_v6, %v9307_v21  ;;  %v2108_v33 = vsel %vm2000_vm5, %v1983_v28, %v2107_v39  ;;  %v2102_v48 = vsel %vm2002_vm6, %v1955_v29, %v2101_v59  ;;  %v2164_v34 = vsel %vm2127_vm8, %v2089_v38, -inf }
 0x22c   : > { %2162 = vmax.xlane.f32.xlu1 %v2161_v13  ;;  %2159 = vmax.xlane.f32.xlu0 %v2158_v56  ;;  %v2109_v30 = vsel %vm2002_vm6, %v1987_v47, %v2108_v33  ;;  %v2103_v4 = vsel %vm2004_vm7, %v1959_v62, %v2102_v48 }
 0x22d   : > { %v9898_v0 = vpop.xlane.xlu1 %1174  ;;  %v9900_v14 = vpop.xlane.xlu0 %1171  ;;  %v2110_v42 = vsel %vm2004_vm7, %v1991_v24, %v2109_v30  ;;  %v2170_v47 = vsel %vm2127_vm8, %v2103_v4, -inf }
 0x22e   : > { %14014 = vst [vmem:[#allocation89_spill] sm:$0xff] %v9898_v0  ;;  %14015 = vst [vmem:[#allocation95_spill] sm:$0xff] %v9900_v14  ;;  %v2173_v39 = vsel %vm2127_vm8, %v2110_v42, -inf }
 0x230   : > { %2168 = vmax.xlane.f32.xlu1 %v2167_v51  ;;  %2165 = vmax.xlane.f32.xlu0 %v2164_v34 }
 0x231   : > { %v9908_v8 = vpop.xlane.xlu1 %1180  ;;  %v9910_v28 = vpop.xlane.xlu0 %1177 }
 0x232   : > { %14016 = vst [vmem:[#allocation98_spill] sm:$0xff] %v9908_v8  ;;  %14017 = vst [vmem:[#allocation106_spill] sm:$0xff] %v9910_v28  ;;  %v14082_v8 = vld [vmem:[#allocation3_spill] sm:$0xff] }
 0x234   : > { %2174 = vmax.xlane.f32.xlu1 %v2173_v39  ;;  %2171 = vmax.xlane.f32.xlu0 %v2170_v47 }
 0x235   : > { %v9914_v29 = vpop.xlane.xlu1 %1186  ;;  %v9916_v56 = vpop.xlane.xlu0 %1183 }
 0x236   : > { %14018 = vst [vmem:[#allocation97_spill] sm:$0xff] %v9914_v29  ;;  %14019 = vst [vmem:[#allocation167_spill] sm:$0xff] %v9916_v56 }
 0x239   : > { %v9918_v13 = vpop.xlane.xlu1 %1192  ;;  %v9920_v52 = vpop.xlane.xlu0 %1189 }
 0x23a   : > { %14020 = vst [vmem:[#allocation168_spill] sm:$0xff] %v9918_v13  ;;  %14021 = vst [vmem:[#allocation169_spill] sm:$0xff] %v9920_v52 }
 0x23d   : > { %v9922_v38 = vpop.xlane.xlu1 %1198  ;;  %v9924_v59 = vpop.xlane.xlu0 %1195 }
 0x23e   : > { %14022 = vst [vmem:[#allocation170_spill] sm:$0xff] %v9922_v38  ;;  %14023 = vst [vmem:[#allocation171_spill] sm:$0xff] %v9924_v59 }
 0x241   : > { %v9926_v62 = vpop.xlane.xlu1 %1204  ;;  %v9928_v24 = vpop.xlane.xlu0 %1201 }
 0x242   : > { %14024 = vst [vmem:[#allocation172_spill] sm:$0xff] %v9926_v62  ;;  %14025 = vst [vmem:[#allocation173_spill] sm:$0xff] %v9928_v24  ;;  %v10050_v62 = vsub.s32 5, %v8300_v1 }
 0x245   : > { %v9930_v33 = vpop.xlane.xlu1 %1210  ;;  %v9932_v30 = vpop.xlane.xlu0 %1207 }
 0x246   : > { %14026 = vst [vmem:[#allocation174_spill] sm:$0xff] %v9930_v33  ;;  %14027 = vst [vmem:[#allocation175_spill] sm:$0xff] %v9932_v30  ;;  %v10047_v33 = vsub.s32 4, %v8300_v1 }
 0x249   : > { %v9934_v48 = vpop.xlane.xlu1 %1216  ;;  %v9936_v51 = vpop.xlane.xlu0 %1213 }
 0x24a   : > { %14028 = vst [vmem:[#allocation176_spill] sm:$0xff] %v9934_v48  ;;  %14029 = vst [vmem:[#allocation177_spill] sm:$0xff] %v9936_v51 }
 0x24d   : > { %v9938_v34 = vpop.xlane.xlu1 %1222  ;;  %v9940_v42 = vpop.xlane.xlu0 %1219 }
 0x24e   : > { %14030 = vst [vmem:[#allocation178_spill] sm:$0xff] %v9938_v34  ;;  %14031 = vst [vmem:[#allocation179_spill] sm:$0xff] %v9940_v42  ;;  %v14079_v34 = vld [vmem:[#allocation5_spill] sm:$0xff] }
 0x24f   : > { %14081 = vst [vmem:[#allocation5_spill] sm:$0xff] %v10050_v62 }
 0x251   : > { %v9942_v4 = vpop.xlane.xlu1 %1228  ;;  %v9944_v39 = vpop.xlane.xlu0 %1225 }
 0x252   : > { %14032 = vst [vmem:[#allocation180_spill] sm:$0xff] %v9942_v4  ;;  %14033 = vst [vmem:[#allocation181_spill] sm:$0xff] %v9944_v39 }
 0x255   : > { %v9946_v47 = vpop.xlane.xlu1 %1234  ;;  %v9948_v59 = vpop.xlane.xlu0 %1231 }
 0x256   : > { %14034 = vst [vmem:[#allocation182_spill] sm:$0xff] %v9946_v47  ;;  %14035 = vst [vmem:[#allocation183_spill] sm:$0xff] %v9948_v59 }
 0x259   : > { %v9950_v24 = vpop.xlane.xlu1 %1240  ;;  %v9952_v52 = vpop.xlane.xlu0 %1237 }
 0x25a   : > { %14036 = vst [vmem:[#allocation184_spill] sm:$0xff] %v9950_v24  ;;  %14037 = vst [vmem:[#allocation185_spill] sm:$0xff] %v9952_v52 }
 0x25d   : > { %v9954_v30 = vpop.xlane.xlu1 %1246  ;;  %v9956_v56 = vpop.xlane.xlu0 %1243 }
 0x25e   : > { %14038 = vst [vmem:[#allocation186_spill] sm:$0xff] %v9954_v30  ;;  %14039 = vst [vmem:[#allocation187_spill] sm:$0xff] %v9956_v56 }
 0x261   : > { %v9958_v51 = vpop.xlane.xlu1 %1252  ;;  %v9960_v28 = vpop.xlane.xlu0 %1249 }
 0x262   : > { %14040 = vst [vmem:[#allocation188_spill] sm:$0xff] %v9958_v51  ;;  %14041 = vst [vmem:[#allocation189_spill] sm:$0xff] %v9960_v28  ;;  %v8268_v28 = vmov 0  }
 0x263   : > { %7842 = vset.pattern.permute.xlu1 %v8268_v28  ;;  %7841 = vset.pattern.permute.xlu0 %v8268_v28 }
 0x265   : > { %v9962_v42 = vpop.xlane.xlu1 %1258  ;;  %v9964_v14 = vpop.xlane.xlu0 %1255 }
 0x266   : > { %14042 = vst [vmem:[#allocation190_spill] sm:$0xff] %v9962_v42  ;;  %14043 = vst [vmem:[#allocation191_spill] sm:$0xff] %v9964_v14 }
 0x269   : > { %v9966_v39 = vpop.xlane.xlu1 %1264  ;;  %v9968_v47 = vpop.xlane.xlu0 %1261 }
 0x26a   : > { %14044 = vst [vmem:[#allocation192_spill] sm:$0xff] %v9966_v39  ;;  %14045 = vst [vmem:[#allocation193_spill] sm:$0xff] %v9968_v47 }
 0x26d   : > { %v9970_v59 = vpop.xlane.xlu1 %1270  ;;  %v9972_v24 = vpop.xlane.xlu0 %1267 }
 0x26e   : > { %14046 = vst [vmem:[#allocation194_spill] sm:$0xff] %v9970_v59  ;;  %14047 = vst [vmem:[#allocation195_spill] sm:$0xff] %v9972_v24 }
 0x271   : > { %v9974_v52 = vpop.xlane.xlu1 %1276  ;;  %v9976_v30 = vpop.xlane.xlu0 %1273 }
 0x272   : > { %14048 = vst [vmem:[#allocation196_spill] sm:$0xff] %v9974_v52  ;;  %14049 = vst [vmem:[#allocation197_spill] sm:$0xff] %v9976_v30 }
 0x275   : > { %v9978_v56 = vpop.xlane.xlu1 %1282  ;;  %v9980_v51 = vpop.xlane.xlu0 %1279 }
 0x276   : > { %14050 = vst [vmem:[#allocation198_spill] sm:$0xff] %v9978_v56  ;;  %14051 = vst [vmem:[#allocation199_spill] sm:$0xff] %v9980_v51 }
 0x279   : > { %v9982_v14 = vpop.xlane.xlu1 %1288  ;;  %v9984_v39 = vpop.xlane.xlu0 %1285 }
 0x27a   : > { %14052 = vst [vmem:[#allocation200_spill] sm:$0xff] %v9982_v14  ;;  %14053 = vst [vmem:[#allocation201_spill] sm:$0xff] %v9984_v39 }
 0x27d   : > { %v9986_v47 = vpop.xlane.xlu1 %1294  ;;  %v9988_v59 = vpop.xlane.xlu0 %1291 }
 0x27e   : > { %14054 = vst [vmem:[#allocation202_spill] sm:$0xff] %v9986_v47  ;;  %14055 = vst [vmem:[#allocation203_spill] sm:$0xff] %v9988_v59 }
 0x281   : > { %v9990_v24 = vpop.xlane.xlu1 %1300  ;;  %v9992_v52 = vpop.xlane.xlu0 %1297 }
 0x282   : > { %14056 = vst [vmem:[#allocation204_spill] sm:$0xff] %v9990_v24  ;;  %14057 = vst [vmem:[#allocation205_spill] sm:$0xff] %v9992_v52 }
 0x285   : > { %v9994_v30 = vpop.xlane.xlu1 %1306  ;;  %v9996_v56 = vpop.xlane.xlu0 %1303 }
 0x286   : > { %14058 = vst [vmem:[#allocation206_spill] sm:$0xff] %v9994_v30  ;;  %14059 = vst [vmem:[#allocation207_spill] sm:$0xff] %v9996_v56 }
 0x289   : > { %v9998_v51 = vpop.xlane.xlu1 %1312  ;;  %v10000_v42 = vpop.xlane.xlu0 %1309 }
 0x28a   : > { %14060 = vst [vmem:[#allocation208_spill] sm:$0xff] %v9998_v51  ;;  %14061 = vst [vmem:[#allocation209_spill] sm:$0xff] %v10000_v42 }
 0x28d   : > { %v10002_v28 = vpop.xlane.xlu1 %1318  ;;  %v10004_v14 = vpop.xlane.xlu0 %1315 }
 0x28e   : > { %14062 = vst [vmem:[#allocation210_spill] sm:$0xff] %v10002_v28  ;;  %14063 = vst [vmem:[#allocation211_spill] sm:$0xff] %v10004_v14 }
 0x291   : > { %v10006_v39 = vpop.xlane.xlu1 %1324  ;;  %v10008_v47 = vpop.xlane.xlu0 %1321 }
 0x292   : > { %14064 = vst [vmem:[#allocation212_spill] sm:$0xff] %v10006_v39  ;;  %14065 = vst [vmem:[#allocation213_spill] sm:$0xff] %v10008_v47  ;;  %v10029_v39 = vsub.s32 2, %v8300_v1 }
 0x294   : > { %14074 = vst [vmem:[#allocation222_spill] sm:$0xff] %v10029_v39 }
 0x295   : > { %v10010_v59 = vpop.xlane.xlu1 %1330  ;;  %v10012_v24 = vpop.xlane.xlu0 %1327 }
 0x296   : > { %14066 = vst [vmem:[#allocation214_spill] sm:$0xff] %v10010_v59  ;;  %14067 = vst [vmem:[#allocation215_spill] sm:$0xff] %v10012_v24  ;;  %v14075_v59 = vld [vmem:[#allocation2_spill] sm:$0xff] }
 0x297   : > { %v14076_v24 = vld [vmem:[#allocation30_spill] sm:$0xff] }
 0x299   : > { %v10014_v52 = vpop.xlane.xlu1 %1336  ;;  %v10016_v30 = vpop.xlane.xlu0 %1333 }
 0x29a   : > { %14068 = vst [vmem:[#allocation216_spill] sm:$0xff] %v10014_v52  ;;  %14069 = vst [vmem:[#allocation217_spill] sm:$0xff] %v10016_v30 }
 0x29d   : > { %v10018_v56 = vpop.xlane.xlu1 %1342  ;;  %v10020_v51 = vpop.xlane.xlu0 %1339 }
 0x29e   : > { %14070 = vst [vmem:[#allocation218_spill] sm:$0xff] %v10018_v56  ;;  %14071 = vst [vmem:[#allocation219_spill] sm:$0xff] %v10020_v51  ;;  %v10038_v56 = vsub.s32 3, %v8300_v1  ;;  %v14078_v51 = vld [vmem:[#allocation4_spill] sm:$0xff] }
 0x29f   : > { %14080 = vst [vmem:[#allocation4_spill] sm:$0xff] %v10047_v33 }
 0x2a0   : > { %14077 = vst [vmem:[#allocation223_spill] sm:$0xff] %v10038_v56 }
 0x2a1   : > { %v10022_v42 = vpop.xlane.xlu0 %1345  ;;  %v10024_v28 = vpop.xlane.xlu1 %1348 }
 0x2a2   : > { %14072 = vst [vmem:[#allocation220_spill] sm:$0xff] %v10022_v42  ;;  %14073 = vst [vmem:[#allocation221_spill] sm:$0xff] %v10024_v28 }
 0x2a5   : > { %v10026_v14 = vpop.xlane.xlu0 %2129  ;;  %v10031_v47 = vpop.xlane.xlu1 %2132 }
 0x2a6   : > { %v2195_v52 = vrot.slane %v10026_v14, %v14075_v59  ;;  %v2199_v30 = vrot.slane %v10026_v14, %v14076_v24  ;;  %v2231_v42 = vrot.slane %v10031_v47, %v14076_v24  ;;  %v2203_v28 = vrot.slane %v10026_v14, %v10029_v39 }
 0x2a7   : > { %v2239_v38 = vrot.slane %v10031_v47, %v10038_v56  ;;  %v2207_v29 = vrot.slane %v10026_v14, %v10038_v56 }
 0x2a8   : > { %v2832_v4 = vsub.f32 %v14078_v51, %v2195_v52  ;;  %v2833_v48 = vsub.f32 %v14079_v34, %v2199_v30  ;;  %v2841_v13 = vsub.f32 %v8578_v19, %v2231_v42  ;;  %v2834_v0 = vsub.f32 %v14082_v8, %v2203_v28 }
 0x2a9   : > { %v10059_v30 = vsub.s32 7, %v8300_v1  ;;  %v2247_v51 = vrot.slane %v10031_v47, %v10050_v62  ;;  %v2843_v34 = vsub.f32 %v8588_v27, %v2239_v38  ;;  %v2211_v19 = vrot.slane %v10026_v14, %v10047_v33 }
 0x2aa   : > { %v2960_v22 = vmul.f32 1.442695, %v2832_v4  ;;  %v2962_v52 = vmul.f32 1.442695, %v2833_v48  ;;  %v2978_v6 = vmul.f32 1.442695, %v2841_v13  ;;  %v2835_v42 = vsub.f32 %v8548_v55, %v2207_v29  ;;  %v10076_v55 = vpop.xlane.xlu0 %2135 }
 0x2ab   : > { %14083 = vst [vmem:[#allocation3_spill] sm:$0xff] %v10059_v30  ;;  %v2964_v10 = vmul.f32 1.442695, %v2834_v0  ;;  %v10068_v8 = vsub.s32 6, %v8300_v1  ;;  %v2255_v48 = vrot.slane %v10031_v47, %v10059_v30  ;;  %v2845_v4 = vsub.f32 %v8598_v35, %v2247_v51 }
 0x2ac   : > { %7843 = vpow2.f32 %v2960_v22  ;;  %v2982_v28 = vmul.f32 1.442695, %v2843_v34  ;;  %v2215_v27 = vrot.slane %v10026_v14, %v10050_v62  ;;  %v14085_v22 = vld [vmem:[#allocation6_spill] sm:$0xff]  ;;  %v2966_v38 = vmul.f32 1.442695, %v2835_v42 }
 0x2ad   : > { %7845 = vpow2.f32 %v2962_v52  ;;  %14084 = vst [vmem:[#allocation224_spill] sm:$0xff] %v10068_v8  ;;  %v2836_v13 = vsub.f32 %v14085_v22, %v2211_v19  ;;  %v2847_v0 = vsub.f32 %v8608_v43, %v2255_v48  ;;  %v2986_v1 = vmul.f32 1.442695, %v2845_v4  ;;  %v14088_v19 = vld [vmem:[#allocation9_spill] sm:$0xff] }
 0x2ae   : > { %7847 = vpow2.f32 %v2978_v6  ;;  %v2263_v29 = vrot.slane %v10076_v55, %v14076_v24  ;;  %v2219_v35 = vrot.slane %v10026_v14, %v10068_v8  ;;  %v2837_v6 = vsub.f32 %v8558_v63, %v2215_v27 }
 0x2af   : > { %7849 = vpow2.f32 %v2964_v10  ;;  %v2968_v52 = vmul.f32 1.442695, %v2836_v13  ;;  %v2990_v43 = vmul.f32 1.442695, %v2847_v0  ;;  %v2271_v34 = vrot.slane %v10076_v55, %v10038_v56 }
 0x2b0   : > { %7851 = vpow2.f32 %v2982_v28  ;;  %v2849_v42 = vsub.f32 %v14088_v19, %v2263_v29  ;;  %v2223_v63 = vrot.slane %v10026_v14, %v10059_v30  ;;  %v2838_v48 = vsub.f32 %v8570_v12, %v2219_v35  ;;  %v10120_v19 = vpop.xlane.xlu1 %2138 }
 0x2b1   : > { %7853 = vpow2.f32 %v2966_v38  ;;  %v2970_v4 = vmul.f32 1.442695, %v2837_v6  ;;  %v2279_v22 = vrot.slane %v10076_v55, %v10050_v62  ;;  %v2851_v13 = vsub.f32 %v8628_v5, %v2271_v34 }
 0x2b2   : > { %7855 = vpow2.f32 %v2986_v1  ;;  %v2994_v38 = vmul.f32 1.442695, %v2849_v42  ;;  %v2227_v12 = vrot.slane %v10031_v47, %v14075_v59  ;;  %v2839_v14 = vsub.f32 %v8568_v11, %v2223_v63 }
 0x2b3   : > { %7857 = vpow2.f32 %v2968_v52  ;;  %v2972_v0 = vmul.f32 1.442695, %v2838_v48  ;;  %v2287_v35 = vrot.slane %v10076_v55, %v10059_v30  ;;  %v2853_v5 = vsub.f32 %v8638_v15, %v2279_v22  ;;  %v14093_v52 = vld [vmem:[#allocation7_spill] sm:$0xff] }
 0x2b4   : > { %7859 = vpow2.f32 %v2990_v43  ;;  %v2998_v6 = vmul.f32 1.442695, %v2851_v13  ;;  %v2235_v11 = vrot.slane %v10031_v47, %v10029_v39  ;;  %v2840_v43 = vsub.f32 %v14093_v52, %v2227_v12  ;;  %v14096_v13 = vld [vmem:[#allocation8_spill] sm:$0xff] }
 0x2b5   : > { %7861 = vpow2.f32 %v2970_v4  ;;  %v2974_v34 = vmul.f32 1.442695, %v2839_v14  ;;  %v2295_v15 = vrot.slane %v10120_v19, %v14076_v24  ;;  %v2855_v48 = vsub.f32 %v8648_v25, %v2287_v35 }
 0x2b6   : > { %v10084_v51 = vpop.eup %7843  ;;  %7863 = vpow2.f32 %v2994_v38  ;;  %v3002_v4 = vmul.f32 1.442695, %v2853_v5  ;;  %v2243_v22 = vrot.slane %v10031_v47, %v10047_v33  ;;  %v2842_v38 = vsub.f32 %v14096_v13, %v2235_v11 }
 0x2b7   : > { %14086 = vst [vmem:[#allocation6_spill] sm:$0xff] %v10084_v51  ;;  %v10086_v10 = vpop.eup %7845  ;;  %3345 = vperm.xlu0 %7841, %v10084_v51   ;;  %7865 = vpow2.f32 %v2972_v0  ;;  %v2976_v12 = vmul.f32 1.442695, %v2840_v43  ;;  %v2303_v25 = vrot.slane %v10120_v19, %v10038_v56  ;;  %v2857_v35 = vsub.f32 %v8658_v37, %v2295_v15 }
 0x2b8   : > { %14087 = vst [vmem:[#allocation225_spill] sm:$0xff] %v10086_v10  ;;  %3348 = vperm.xlu1 %7842, %v10086_v10   ;;  %v10096_v28 = vpop.eup %7847  ;;  %7867 = vpow2.f32 %v2998_v6  ;;  %v3006_v5 = vmul.f32 1.442695, %v2855_v48  ;;  %v2251_v6 = vrot.slane %v10031_v47, %v10068_v8  ;;  %v2844_v11 = vsub.f32 %v8600_v36, %v2243_v22 }
 0x2b9   : > { %14089 = vst [vmem:[#allocation9_spill] sm:$0xff] %v10096_v28  ;;  %v10098_v27 = vpop.eup %7849  ;;  %7869 = vpow2.f32 %v2974_v34  ;;  %v2980_v52 = vmul.f32 1.442695, %v2842_v38  ;;  %v2311_v37 = vrot.slane %v10120_v19, %v10050_v62  ;;  %v2859_v15 = vsub.f32 %v8668_v49, %v2303_v25 }
 0x2ba   : > { %14090 = vst [vmem:[#allocation226_spill] sm:$0xff] %v10098_v27  ;;  %v10108_v1 = vpop.eup %7851  ;;  %7871 = vpow2.f32 %v3002_v4  ;;  %v3010_v48 = vmul.f32 1.442695, %v2857_v35  ;;  %v2846_v47 = vsub.f32 %v8610_v44, %v2251_v6  ;;  %v2984_v36 = vmul.f32 1.442695, %v2844_v11  ;;  %v14103_v35 = vld [vmem:[#allocation10_spill] sm:$0xff]  ;;  %v10170_v6 = vpop.xlane.xlu0 %2141 }
 0x2bb   : > { %3372 = vperm.xlu0 %7841, %v10096_v28   ;;  %14091 = vst [vmem:[#allocation227_spill] sm:$0xff] %v10108_v1  ;;  %v10110_v29 = vpop.eup %7853  ;;  %7873 = vpow2.f32 %v2976_v12  ;;  %v2259_v4 = vrot.slane %v10076_v55, %v14075_v59  ;;  %v2319_v49 = vrot.slane %v10120_v19, %v10059_v30  ;;  %v2861_v38 = vsub.f32 %v8678_v61, %v2311_v37 }
 0x2bc   : > { %3351 = vperm.xlu1 %7842, %v10098_v27   ;;  %14092 = vst [vmem:[#allocation228_spill] sm:$0xff] %v10110_v29  ;;  %v10122_v42 = vpop.eup %7855  ;;  %7875 = vpow2.f32 %v3006_v5  ;;  %v3014_v12 = vmul.f32 1.442695, %v2859_v15  ;;  %v2988_v44 = vmul.f32 1.442695, %v2846_v47  ;;  %v2267_v25 = vrot.slane %v10076_v55, %v10029_v39  ;;  %v14106_v47 = vld [vmem:[#allocation11_spill] sm:$0xff] }
 0x2bd   : > { %14094 = vst [vmem:[#allocation7_spill] sm:$0xff] %v10122_v42  ;;  %v10124_v63 = vpop.eup %7857  ;;  %7877 = vpow2.f32 %v2980_v52  ;;  %v2848_v5 = vsub.f32 %v14103_v35, %v2259_v4  ;;  %v2863_v61 = vsub.f32 %v8688_v17, %v2319_v49  ;;  %v3018_v37 = vmul.f32 1.442695, %v2861_v38 }
 0x2be   : > { %14095 = vst [vmem:[#allocation229_spill] sm:$0xff] %v10124_v63  ;;  %v10134_v14 = vpop.eup %7859  ;;  %7879 = vpow2.f32 %v3010_v48  ;;  %v2327_v15 = vrot.slane %v10170_v6, %v14076_v24  ;;  %v2275_v48 = vrot.slane %v10076_v55, %v10047_v33  ;;  %v2335_v49 = vrot.slane %v10170_v6, %v10038_v56 }
 0x2bf   : > { %3378 = vperm.xlu0 %7841, %v10108_v1   ;;  %14097 = vst [vmem:[#allocation8_spill] sm:$0xff] %v10134_v14  ;;  %v10136_v0 = vpop.eup %7861  ;;  %7881 = vpow2.f32 %v2984_v36  ;;  %v2850_v36 = vsub.f32 %v14106_v47, %v2267_v25  ;;  %v2992_v4 = vmul.f32 1.442695, %v2848_v5  ;;  %v3022_v17 = vmul.f32 1.442695, %v2863_v61 }
 0x2c0   : > { %3354 = vperm.xlu1 %7842, %v10110_v29   ;;  %14098 = vst [vmem:[#allocation230_spill] sm:$0xff] %v10136_v0  ;;  %v10146_v43 = vpop.eup %7863  ;;  %7883 = vpow2.f32 %v3014_v12  ;;  %v2865_v38 = vsub.f32 %v8698_v31, %v2327_v15  ;;  %v2283_v12 = vrot.slane %v10076_v55, %v10068_v8  ;;  %v2343_v61 = vrot.slane %v10170_v6, %v10050_v62 }
 0x2c1   : > { %14099 = vst [vmem:[#allocation231_spill] sm:$0xff] %v10146_v43  ;;  %v10148_v34 = vpop.eup %7865  ;;  %7885 = vpow2.f32 %v2988_v44  ;;  %v2852_v44 = vsub.f32 %v8640_v16, %v2275_v48  ;;  %v2996_v25 = vmul.f32 1.442695, %v2850_v36  ;;  %v2867_v31 = vsub.f32 %v8708_v45, %v2335_v49  ;;  %v14113_v49 = vld [vmem:[#allocation12_spill] sm:$0xff] }
 0x2c2   : > { %14100 = vst [vmem:[#allocation232_spill] sm:$0xff] %v10148_v34  ;;  %v10158_v22 = vpop.eup %7867  ;;  %7887 = vpow2.f32 %v3018_v37  ;;  %v3026_v37 = vmul.f32 1.442695, %v2865_v38  ;;  %v2291_v16 = vrot.slane %v10120_v19, %v14075_v59  ;;  %v2854_v55 = vsub.f32 %v8650_v26, %v2283_v12 }
 0x2c3   : > { %3384 = vperm.xlu0 %7841, %v10122_v42   ;;  %14101 = vst [vmem:[#allocation233_spill] sm:$0xff] %v10158_v22  ;;  %v10160_v13 = vpop.eup %7869  ;;  %7889 = vpow2.f32 %v2992_v4  ;;  %v3000_v15 = vmul.f32 1.442695, %v2852_v44  ;;  %v2351_v4 = vrot.slane %v10170_v6, %v10059_v30  ;;  %v2869_v45 = vsub.f32 %v8718_v7, %v2343_v61  ;;  %v10220_v44 = vpop.xlane.xlu1 %2144 }
 0x2c4   : > { %3357 = vperm.xlu1 %7842, %v10124_v63   ;;  %14102 = vst [vmem:[#allocation234_spill] sm:$0xff] %v10160_v13  ;;  %v10172_v11 = vpop.eup %7871  ;;  %7891 = vpow2.f32 %v3022_v17  ;;  %v3030_v17 = vmul.f32 1.442695, %v2867_v31  ;;  %v2299_v26 = vrot.slane %v10120_v19, %v10029_v39  ;;  %v2856_v38 = vsub.f32 %v14113_v49, %v2291_v16  ;;  %v14116_v16 = vld [vmem:[#allocation13_spill] sm:$0xff] }
 0x2c5   : > { %14104 = vst [vmem:[#allocation10_spill] sm:$0xff] %v10172_v11  ;;  %v10174_v52 = vpop.eup %7873  ;;  %7893 = vpow2.f32 %v2996_v25  ;;  %v3004_v12 = vmul.f32 1.442695, %v2854_v55  ;;  %v2359_v7 = vrot.slane %v10220_v44, %v14076_v24  ;;  %v2871_v61 = vsub.f32 %v13921_v20, %v2351_v4 }
 0x2c6   : > { %14105 = vst [vmem:[#allocation235_spill] sm:$0xff] %v10174_v52  ;;  %v10184_v35 = vpop.eup %7875  ;;  %7895 = vpow2.f32 %v3026_v37  ;;  %v3034_v31 = vmul.f32 1.442695, %v2869_v45  ;;  %v2307_v37 = vrot.slane %v10120_v19, %v10047_v33  ;;  %v2858_v55 = vsub.f32 %v14116_v16, %v2299_v26  ;;  %v14119_v26 = vld [vmem:[#allocation14_spill] sm:$0xff] }
 0x2c7   : > { %3390 = vperm.xlu0 %7841, %v10134_v14   ;;  %14107 = vst [vmem:[#allocation11_spill] sm:$0xff] %v10184_v35  ;;  %7897 = vpow2.f32 %v3000_v15  ;;  %v3008_v15 = vmul.f32 1.442695, %v2856_v38  ;;  %v2367_v20 = vrot.slane %v10220_v44, %v10038_v56  ;;  %v2873_v4 = vsub.f32 %v8738_v41, %v2359_v7 }
 0x2c8   : > { %3360 = vperm.xlu1 %7842, %v10136_v0   ;;  %7899 = vpow2.f32 %v3030_v17  ;;  %v3038_v45 = vmul.f32 1.442695, %v2871_v61  ;;  %v2315_v17 = vrot.slane %v10120_v19, %v10068_v8  ;;  %v2860_v38 = vsub.f32 %v14119_v26, %v2307_v37 }
 0x2c9   : > { %7901 = vpow2.f32 %v3004_v12  ;;  %v3012_v12 = vmul.f32 1.442695, %v2858_v55  ;;  %v2375_v41 = vrot.slane %v10220_v44, %v10050_v62  ;;  %v2875_v7 = vsub.f32 %v8748_v9, %v2367_v20 }
 0x2ca   : > { %7903 = vpow2.f32 %v3034_v31  ;;  %v3042_v61 = vmul.f32 1.442695, %v2873_v4  ;;  %v2862_v19 = vsub.f32 %v8690_v18, %v2315_v17  ;;  %v3016_v31 = vmul.f32 1.442695, %v2860_v38  ;;  %v14124_v17 = vld [vmem:[#allocation15_spill] sm:$0xff]  ;;  %v10270_v38 = vpop.xlane.xlu0 %2147 }
 0x2cb   : > { %3396 = vperm.xlu0 %7841, %v10146_v43   ;;  %7905 = vpow2.f32 %v3008_v15  ;;  %v2323_v37 = vrot.slane %v10170_v6, %v14075_v59  ;;  %v2383_v9 = vrot.slane %v10220_v44, %v10059_v30  ;;  %v2877_v20 = vsub.f32 %v13913_v32, %v2375_v41  ;;  %v14127_v32 = vld [vmem:[#allocation24_spill] sm:$0xff] }
 0x2cc   : > { %3363 = vperm.xlu1 %7842, %v10148_v34   ;;  %v10186_v34 = vpop.eup %7877  ;;  %7907 = vpow2.f32 %v3038_v45  ;;  %v3046_v4 = vmul.f32 1.442695, %v2875_v7  ;;  %v3020_v18 = vmul.f32 1.442695, %v2862_v19  ;;  %v2331_v45 = vrot.slane %v10170_v6, %v10029_v39 }
 0x2cd   : > { %14108 = vst [vmem:[#allocation236_spill] sm:$0xff] %v10186_v34  ;;  %v10196_v5 = vpop.eup %7879  ;;  %7909 = vpow2.f32 %v3012_v12  ;;  %v2864_v26 = vsub.f32 %v14124_v17, %v2323_v37  ;;  %v2879_v41 = vsub.f32 %v14127_v32, %v2383_v9  ;;  %v3050_v7 = vmul.f32 1.442695, %v2877_v20 }
 0x2ce   : > { %14109 = vst [vmem:[#allocation237_spill] sm:$0xff] %v10196_v5  ;;  %v10198_v47 = vpop.eup %7881  ;;  %7911 = vpow2.f32 %v3042_v61  ;;  %v2391_v61 = vrot.slane %v10270_v38, %v14076_v24  ;;  %v2339_v19 = vrot.slane %v10170_v6, %v10047_v33  ;;  %v2399_v20 = vrot.slane %v10270_v38, %v10038_v56 }
 0x2cf   : > { %3402 = vperm.xlu0 %7841, %v10158_v22   ;;  %14110 = vst [vmem:[#allocation238_spill] sm:$0xff] %v10198_v47  ;;  %v10208_v48 = vpop.eup %7883  ;;  %7913 = vpow2.f32 %v3016_v31  ;;  %v14128_v31 = vld [vmem:[#allocation16_spill] sm:$0xff]  ;;  %v3024_v17 = vmul.f32 1.442695, %v2864_v26  ;;  %v3054_v9 = vmul.f32 1.442695, %v2879_v41  ;;  %v2407_v41 = vrot.slane %v10270_v38, %v10050_v62 }
 0x2d0   : > { %3366 = vperm.xlu1 %7842, %v10160_v13   ;;  %14111 = vst [vmem:[#allocation239_spill] sm:$0xff] %v10208_v48  ;;  %v10210_v36 = vpop.eup %7885  ;;  %7915 = vpow2.f32 %v3046_v4  ;;  %v2866_v37 = vsub.f32 %v14128_v31, %v2331_v45  ;;  %v14131_v4 = vld [vmem:[#allocation26_spill] sm:$0xff]  ;;  %v14132_v45 = vld [vmem:[#allocation17_spill] sm:$0xff] }
 0x2d1   : > { %14112 = vst [vmem:[#allocation240_spill] sm:$0xff] %v10210_v36  ;;  %v10222_v25 = vpop.eup %7887  ;;  %7917 = vpow2.f32 %v3020_v18  ;;  %v2881_v32 = vsub.f32 %v14131_v4, %v2391_v61  ;;  %v2347_v18 = vrot.slane %v10170_v6, %v10068_v8  ;;  %v2868_v26 = vsub.f32 %v14132_v45, %v2339_v19  ;;  %v14136_v19 = vld [vmem:[#allocation19_spill] sm:$0xff] }
 0x2d2   : > { %14114 = vst [vmem:[#allocation12_spill] sm:$0xff] %v10222_v25  ;;  %7919 = vpow2.f32 %v3050_v7  ;;  %v3028_v31 = vmul.f32 1.442695, %v2866_v37  ;;  %v14135_v7 = vld [vmem:[#allocation28_spill] sm:$0xff]  ;;  %v2355_v6 = vrot.slane %v10220_v44, %v14075_v59 }
 0x2d3   : > { %3408 = vperm.xlu0 %7841, %v10172_v11   ;;  %v2883_v61 = vsub.f32 %v14135_v7, %v2399_v20  ;;  %v3058_v4 = vmul.f32 1.442695, %v2881_v32  ;;  %v2870_v37 = vsub.f32 %v14136_v19, %v2347_v18  ;;  %v14139_v20 = vld [vmem:[#allocation31_spill] sm:$0xff]  ;;  %v2363_v18 = vrot.slane %v10220_v44, %v10029_v39 }
 0x2d4   : > { %3369 = vperm.xlu1 %7842, %v10174_v52   ;;  %v2885_v32 = vsub.f32 %v14139_v20, %v2407_v41 }
 0x2d5   : > { %v3062_v7 = vmul.f32 1.442695, %v2883_v61  ;;  %v3036_v19 = vmul.f32 1.442695, %v2870_v37  ;;  %v14143_v61 = vld [vmem:[#allocation33_spill] sm:$0xff] }
 0x2d6   : > { %v3066_v20 = vmul.f32 1.442695, %v2885_v32  ;;  %v14144_v37 = vld [vmem:[#allocation21_spill] sm:$0xff] }
 0x2d7   : > { %3414 = vperm.xlu0 %7841, %v10184_v35  }
 0x2d8   : > { %3375 = vperm.xlu1 %7842, %v10186_v34  }
 0x2db   : > { %3420 = vperm.xlu0 %7841, %v10196_v5  }
 0x2dc   : > { %3381 = vperm.xlu1 %7842, %v10198_v47   ;;  %v10224_v47 = vpop.eup %7889  ;;  %7921 = vpow2.f32 %v3024_v17  ;;  %v3032_v17 = vmul.f32 1.442695, %v2868_v26 }
 0x2dd   : > { %14115 = vst [vmem:[#allocation241_spill] sm:$0xff] %v10224_v47  ;;  %v10234_v49 = vpop.eup %7891  ;;  %7923 = vpow2.f32 %v3054_v9  ;;  %v2415_v9 = vrot.slane %v10270_v38, %v10059_v30 }
 0x2de   : > { %14117 = vst [vmem:[#allocation13_spill] sm:$0xff] %v10234_v49 }
 0x2df   : > { %3426 = vperm.xlu0 %7841, %v10208_v48  }
 0x2e0   : > { %3387 = vperm.xlu1 %7842, %v10210_v36   ;;  %v10236_v36 = vpop.eup %7893  ;;  %7925 = vpow2.f32 %v3028_v31  ;;  %v14140_v31 = vld [vmem:[#allocation20_spill] sm:$0xff] }
 0x2e1   : > { %14118 = vst [vmem:[#allocation242_spill] sm:$0xff] %v10236_v36  ;;  %v10246_v16 = vpop.eup %7895  ;;  %7927 = vpow2.f32 %v3058_v4  ;;  %v2872_v26 = vsub.f32 %v14140_v31, %v2355_v6  ;;  %v2887_v4 = vsub.f32 %v14143_v61, %v2415_v9  ;;  %v2371_v6 = vrot.slane %v10220_v44, %v10047_v33 }
 0x2e2   : > { %14120 = vst [vmem:[#allocation14_spill] sm:$0xff] %v10246_v16 }
 0x2e3   : > { %3432 = vperm.xlu0 %7841, %v10222_v25   ;;  %v3040_v31 = vmul.f32 1.442695, %v2872_v26  ;;  %v3070_v61 = vmul.f32 1.442695, %v2887_v4  ;;  %v14148_v26 = vld [vmem:[#allocation23_spill] sm:$0xff] }
 0x2e4   : > { %3393 = vperm.xlu1 %7842, %v10224_v47   ;;  %v10248_v47 = vpop.eup %7897  ;;  %7929 = vpow2.f32 %v3032_v17  ;;  %v2874_v17 = vsub.f32 %v14144_v37, %v2363_v18  ;;  %v2379_v18 = vrot.slane %v10220_v44, %v10068_v8  ;;  %v14152_v44 = vld [vmem:[#allocation25_spill] sm:$0xff] }
 0x2e5   : > { %14121 = vst [vmem:[#allocation243_spill] sm:$0xff] %v10248_v47  ;;  %v10258_v55 = vpop.eup %7899  ;;  %7931 = vpow2.f32 %v3062_v7  ;;  %v14147_v7 = vld [vmem:[#allocation35_spill] sm:$0xff] }
 0x2e6   : > { %14122 = vst [vmem:[#allocation244_spill] sm:$0xff] %v10258_v55  ;;  %v10260_v15 = vpop.eup %7901  ;;  %7933 = vpow2.f32 %v3036_v19  ;;  %v2876_v19 = vsub.f32 %v14148_v26, %v2371_v6  ;;  %v3044_v37 = vmul.f32 1.442695, %v2874_v17  ;;  %v2387_v17 = vrot.slane %v10270_v38, %v14075_v59 }
 0x2e7   : > { %3438 = vperm.xlu0 %7841, %v10234_v49   ;;  %14123 = vst [vmem:[#allocation245_spill] sm:$0xff] %v10260_v15  ;;  %v10272_v12 = vpop.eup %7903  ;;  %7935 = vpow2.f32 %v3066_v20  ;;  %v14151_v20 = vld [vmem:[#allocation37_spill] sm:$0xff] }
 0x2e8   : > { %3399 = vperm.xlu1 %7842, %v10236_v36   ;;  %14125 = vst [vmem:[#allocation15_spill] sm:$0xff] %v10272_v12  ;;  %v3048_v6 = vmul.f32 1.442695, %v2876_v19  ;;  %v2395_v19 = vrot.slane %v10270_v38, %v10029_v39 }
 0x2eb   : > { %3444 = vperm.xlu0 %7841, %v10246_v16  }
 0x2ec   : > { %3405 = vperm.xlu1 %7842, %v10248_v47   ;;  %v10274_v47 = vpop.eup %7905  ;;  %7937 = vpow2.f32 %v3040_v31 }
 0x2ed   : > { %14126 = vst [vmem:[#allocation246_spill] sm:$0xff] %v10274_v47 }
 0x2ef   : > { %3450 = vperm.xlu0 %7841, %v10258_v55  }
 0x2f0   : > { %3411 = vperm.xlu1 %7842, %v10260_v15   ;;  %v10284_v15 = vpop.eup %7907  ;;  %7939 = vpow2.f32 %v3070_v61 }
 0x2f1   : > { %14129 = vst [vmem:[#allocation24_spill] sm:$0xff] %v10284_v15  ;;  %v10286_v36 = vpop.eup %7909  ;;  %7941 = vpow2.f32 %v3044_v37  ;;  %v14156_v37 = vld [vmem:[#allocation27_spill] sm:$0xff] }
 0x2f2   : > { %14130 = vst [vmem:[#allocation16_spill] sm:$0xff] %v10286_v36 }
 0x2f3   : > { %3456 = vperm.xlu0 %7841, %v10272_v12  }
 0x2f4   : > { %3417 = vperm.xlu1 %7842, %v10274_v47   ;;  %v10296_v47 = vpop.eup %7911 }
 0x2f5   : > { %14133 = vst [vmem:[#allocation26_spill] sm:$0xff] %v10296_v47  ;;  %v10298_v34 = vpop.eup %7913 }
 0x2f6   : > { %14134 = vst [vmem:[#allocation17_spill] sm:$0xff] %v10298_v34  ;;  %v10308_v45 = vpop.eup %7915 }
 0x2f7   : > { %3462 = vperm.xlu0 %7841, %v10284_v15   ;;  %14137 = vst [vmem:[#allocation28_spill] sm:$0xff] %v10308_v45 }
 0x2f8   : > { %3423 = vperm.xlu1 %7842, %v10286_v36   ;;  %v10310_v36 = vpop.eup %7917 }
 0x2f9   : > { %14138 = vst [vmem:[#allocation19_spill] sm:$0xff] %v10310_v36  ;;  %v10322_v52 = vpop.eup %7919 }
 0x2fa   : > { %14141 = vst [vmem:[#allocation31_spill] sm:$0xff] %v10322_v52  ;;  %v10324_v63 = vpop.eup %7921 }
 0x2fb   : > { %3468 = vperm.xlu0 %7841, %v10296_v47   ;;  %14142 = vst [vmem:[#allocation20_spill] sm:$0xff] %v10324_v63 }
 0x2fc   : > { %3429 = vperm.xlu1 %7842, %v10298_v34   ;;  %v10320_v34 = vpop.xlane.xlu1 %2150 }
 0x2fd   : > { %v2423_v41 = vrot.slane %v10320_v34, %v14076_v24  ;;  %v2431_v9 = vrot.slane %v10320_v34, %v10038_v56 }
 0x2ff   : > { %3474 = vperm.xlu0 %7841, %v10308_v45   ;;  %v2889_v32 = vsub.f32 %v14147_v7, %v2423_v41  ;;  %v2439_v41 = vrot.slane %v10320_v34, %v10050_v62  ;;  %v2891_v4 = vsub.f32 %v14151_v20, %v2431_v9  ;;  %v2447_v9 = vrot.slane %v10320_v34, %v10059_v30 }
 0x300   : > { %3435 = vperm.xlu1 %7842, %v10310_v36   ;;  %v10334_v36 = vpop.eup %7923 }
 0x301   : > { %14145 = vst [vmem:[#allocation33_spill] sm:$0xff] %v10334_v36  ;;  %v10336_v27 = vpop.eup %7925  ;;  %v3074_v7 = vmul.f32 1.442695, %v2889_v32  ;;  %v14155_v32 = vld [vmem:[#allocation39_spill] sm:$0xff]  ;;  %v3078_v20 = vmul.f32 1.442695, %v2891_v4 }
 0x302   : > { %14146 = vst [vmem:[#allocation21_spill] sm:$0xff] %v10336_v27  ;;  %v2893_v61 = vsub.f32 %v14155_v32, %v2439_v41  ;;  %v2895_v41 = vsub.f32 %v13959_v54, %v2447_v9 }
 0x303   : > { %3480 = vperm.xlu0 %7841, %v10322_v52   ;;  %7943 = vpow2.f32 %v3074_v7  ;;  %v2403_v7 = vrot.slane %v10270_v38, %v10047_v33 }
 0x304   : > { %3441 = vperm.xlu1 %7842, %v10324_v63   ;;  %v10346_v63 = vpop.eup %7927  ;;  %7945 = vpow2.f32 %v3048_v6  ;;  %v3082_v4 = vmul.f32 1.442695, %v2893_v61  ;;  %v14159_v6 = vld [vmem:[#allocation29_spill] sm:$0xff]  ;;  %v3086_v54 = vmul.f32 1.442695, %v2895_v41  ;;  %v14162_v61 = vld [vmem:[#allocation43_spill] sm:$0xff] }
 0x305   : > { %14149 = vst [vmem:[#allocation35_spill] sm:$0xff] %v10346_v63  ;;  %v10348_v10 = vpop.eup %7929  ;;  %7947 = vpow2.f32 %v3078_v20 }
 0x306   : > { %14150 = vst [vmem:[#allocation23_spill] sm:$0xff] %v10348_v10  ;;  %v10358_v31 = vpop.eup %7931 }
 0x307   : > { %3486 = vperm.xlu0 %7841, %v10334_v36   ;;  %14153 = vst [vmem:[#allocation37_spill] sm:$0xff] %v10358_v31  ;;  %v10360_v26 = vpop.eup %7933 }
 0x308   : > { %3447 = vperm.xlu1 %7842, %v10336_v27   ;;  %v2878_v27 = vsub.f32 %v14152_v44, %v2379_v18  ;;  %14154 = vst [vmem:[#allocation25_spill] sm:$0xff] %v10360_v26  ;;  %v2880_v44 = vsub.f32 %v14156_v37, %v2387_v17  ;;  %v2882_v17 = vsub.f32 %v14159_v6, %v2395_v19  ;;  %v14163_v19 = vld [vmem:[#allocation32_spill] sm:$0xff] }
 0x30a   : > { %v3052_v18 = vmul.f32 1.442695, %v2878_v27  ;;  %v3056_v32 = vmul.f32 1.442695, %v2880_v44  ;;  %v2884_v44 = vsub.f32 %v14163_v19, %v2403_v7  ;;  %v3060_v6 = vmul.f32 1.442695, %v2882_v17 }
 0x30b   : > { %3492 = vperm.xlu0 %7841, %v10346_v63   ;;  %v10372_v63 = vpop.eup %7935  ;;  %v14167_v7 = vld [vmem:[#allocation34_spill] sm:$0xff] }
 0x30c   : > { %3453 = vperm.xlu1 %7842, %v10348_v10   ;;  %v10370_v10 = vpop.xlane.xlu0 %2153  ;;  %14157 = vst [vmem:[#allocation39_spill] sm:$0xff] %v10372_v63  ;;  %7949 = vpow2.f32 %v3052_v18  ;;  %v2411_v18 = vrot.slane %v10270_v38, %v10068_v8  ;;  %v2419_v38 = vrot.slane %v10320_v34, %v14075_v59 }
 0x30d   : > { %v2455_v27 = vrot.slane %v10370_v10, %v14076_v24  ;;  %7951 = vpow2.f32 %v3082_v4  ;;  %v2463_v9 = vrot.slane %v10370_v10, %v10038_v56  ;;  %v2471_v41 = vrot.slane %v10370_v10, %v10050_v62  ;;  %v14166_v4 = vld [vmem:[#allocation45_spill] sm:$0xff] }
 0x30e   : > { %7953 = vpow2.f32 %v3056_v32  ;;  %v2886_v17 = vsub.f32 %v14167_v7, %v2411_v18  ;;  %v3064_v32 = vmul.f32 1.442695, %v2884_v44  ;;  %v2427_v18 = vrot.slane %v10320_v34, %v10029_v39 }
 0x30f   : > { %3498 = vperm.xlu0 %7841, %v10358_v31   ;;  %v10374_v31 = vpop.eup %7937  ;;  %v2897_v20 = vsub.f32 %v14162_v61, %v2455_v27  ;;  %7955 = vpow2.f32 %v3086_v54  ;;  %v2899_v27 = vsub.f32 %v14166_v4, %v2463_v9  ;;  %v2479_v54 = vrot.slane %v10370_v10, %v10059_v30  ;;  %v14170_v9 = vld [vmem:[#allocation47_spill] sm:$0xff] }
 0x310   : > { %3459 = vperm.xlu1 %7842, %v10360_v26   ;;  %14158 = vst [vmem:[#allocation27_spill] sm:$0xff] %v10374_v31  ;;  %v10384_v37 = vpop.eup %7939  ;;  %7957 = vpow2.f32 %v3060_v6  ;;  %v14171_v6 = vld [vmem:[#allocation36_spill] sm:$0xff]  ;;  %v3068_v7 = vmul.f32 1.442695, %v2886_v17  ;;  %v14174_v17 = vld [vmem:[#allocation38_spill] sm:$0xff] }
 0x311   : > { %14160 = vst [vmem:[#allocation29_spill] sm:$0xff] %v10384_v37  ;;  %v10386_v26 = vpop.eup %7941  ;;  %v3090_v61 = vmul.f32 1.442695, %v2897_v20  ;;  %v2901_v20 = vsub.f32 %v14170_v9, %v2471_v41  ;;  %v3094_v4 = vmul.f32 1.442695, %v2899_v27  ;;  %v2888_v44 = vsub.f32 %v14171_v6, %v2419_v38 }
 0x312   : > { %14161 = vst [vmem:[#allocation247_spill] sm:$0xff] %v10386_v26  ;;  %v2903_v27 = vsub.f32 %v13960_v3, %v2479_v54  ;;  %v2435_v38 = vrot.slane %v10320_v34, %v10047_v33  ;;  %v14177_v54 = vld [vmem:[#allocation51_spill] sm:$0xff] }
 0x313   : > { %3504 = vperm.xlu0 %7841, %v10372_v63   ;;  %7959 = vpow2.f32 %v3090_v61  ;;  %v3098_v61 = vmul.f32 1.442695, %v2901_v20  ;;  %v3072_v9 = vmul.f32 1.442695, %v2888_v44  ;;  %v14178_v44 = vld [vmem:[#allocation40_spill] sm:$0xff] }
 0x314   : > { %3465 = vperm.xlu1 %7842, %v10374_v31   ;;  %v10396_v31 = vpop.eup %7943  ;;  %7961 = vpow2.f32 %v3064_v32  ;;  %v2890_v32 = vsub.f32 %v14174_v17, %v2427_v18  ;;  %v2443_v18 = vrot.slane %v10320_v34, %v10068_v8  ;;  %v14182_v34 = vld [vmem:[#allocation42_spill] sm:$0xff] }
 0x315   : > { %14164 = vst [vmem:[#allocation43_spill] sm:$0xff] %v10396_v31  ;;  %v10398_v63 = vpop.eup %7945  ;;  %7963 = vpow2.f32 %v3094_v4  ;;  %v3102_v4 = vmul.f32 1.442695, %v2903_v27 }
 0x316   : > { %14165 = vst [vmem:[#allocation32_spill] sm:$0xff] %v10398_v63  ;;  %v10408_v19 = vpop.eup %7947  ;;  %7965 = vpow2.f32 %v3068_v7  ;;  %v2892_v7 = vsub.f32 %v14178_v44, %v2435_v38  ;;  %v3076_v17 = vmul.f32 1.442695, %v2890_v32  ;;  %v2894_v38 = vsub.f32 %v14182_v34, %v2443_v18 }
 0x317   : > { %3510 = vperm.xlu0 %7841, %v10384_v37   ;;  %14168 = vst [vmem:[#allocation45_spill] sm:$0xff] %v10408_v19  ;;  %7967 = vpow2.f32 %v3098_v61  ;;  %v14181_v61 = vld [vmem:[#allocation53_spill] sm:$0xff] }
 0x318   : > { %3471 = vperm.xlu1 %7842, %v10386_v26   ;;  %v10410_v26 = vpop.eup %7949  ;;  %7969 = vpow2.f32 %v3072_v9  ;;  %v3080_v32 = vmul.f32 1.442695, %v2892_v7  ;;  %v2451_v9 = vrot.slane %v10370_v10, %v14075_v59  ;;  %v3084_v7 = vmul.f32 1.442695, %v2894_v38 }
 0x319   : > { %14169 = vst [vmem:[#allocation34_spill] sm:$0xff] %v10410_v26  ;;  %7971 = vpow2.f32 %v3102_v4 }
 0x31a   : > { %7973 = vpow2.f32 %v3076_v17  ;;  %v2459_v17 = vrot.slane %v10370_v10, %v10029_v39 }
 0x31b   : > { %3516 = vperm.xlu0 %7841, %v10396_v31   ;;  %v10422_v31 = vpop.eup %7951 }
 0x31c   : > { %3477 = vperm.xlu1 %7842, %v10398_v63   ;;  %v10420_v63 = vpop.xlane.xlu1 %2156  ;;  %14172 = vst [vmem:[#allocation47_spill] sm:$0xff] %v10422_v31 }
 0x31d   : > { %v2487_v41 = vrot.slane %v10420_v63, %v14076_v24  ;;  %v2495_v3 = vrot.slane %v10420_v63, %v10038_v56 }
 0x31f   : > { %3522 = vperm.xlu0 %7841, %v10408_v19   ;;  %v10424_v19 = vpop.eup %7953  ;;  %v2905_v20 = vsub.f32 %v14177_v54, %v2487_v41  ;;  %v2503_v41 = vrot.slane %v10420_v63, %v10050_v62  ;;  %v2907_v27 = vsub.f32 %v14181_v61, %v2495_v3  ;;  %v2511_v3 = vrot.slane %v10420_v63, %v10059_v30  ;;  %v14186_v61 = vld [vmem:[#allocation44_spill] sm:$0xff] }
 0x320   : > { %3483 = vperm.xlu1 %7842, %v10410_v26   ;;  %14173 = vst [vmem:[#allocation36_spill] sm:$0xff] %v10424_v19  ;;  %v10434_v6 = vpop.eup %7955  ;;  %v10436_v26 = vpop.xlane.xlu0 %2159  ;;  %v2896_v34 = vsub.f32 %v14186_v61, %v2451_v9  ;;  %v14190_v9 = vld [vmem:[#allocation46_spill] sm:$0xff] }
 0x321   : > { %14175 = vst [vmem:[#allocation38_spill] sm:$0xff] %v10434_v6  ;;  %v10440_v37 = vpop.xlane.xlu1 %2162  ;;  %v3106_v54 = vmul.f32 1.442695, %v2905_v20  ;;  %v14185_v20 = vld [vmem:[#allocation55_spill] sm:$0xff]  ;;  %v3110_v18 = vmul.f32 1.442695, %v2907_v27  ;;  %v2519_v38 = vrot.slane %v10436_v26, %v14076_v24 }
 0x322   : > { %v2909_v4 = vsub.f32 %v14185_v20, %v2503_v41  ;;  %v14189_v41 = vld [vmem:[#allocation57_spill] sm:$0xff]  ;;  %v2898_v20 = vsub.f32 %v14190_v9, %v2459_v17  ;;  %v3088_v61 = vmul.f32 1.442695, %v2896_v34  ;;  %v2475_v17 = vrot.slane %v10370_v10, %v10068_v8  ;;  %v14194_v34 = vld [vmem:[#allocation48_spill] sm:$0xff] }
 0x323   : > { %3528 = vperm.xlu0 %7841, %v10422_v31   ;;  %v10438_v31 = vpop.eup %7957  ;;  %7975 = vpow2.f32 %v3106_v54  ;;  %v2911_v27 = vsub.f32 %v14189_v41, %v2511_v3 }
 0x324   : > { %3489 = vperm.xlu1 %7842, %v10424_v19   ;;  %14176 = vst [vmem:[#allocation248_spill] sm:$0xff] %v10438_v31  ;;  %v10450_v19 = vpop.eup %7959  ;;  %7977 = vpow2.f32 %v3080_v32  ;;  %v3114_v54 = vmul.f32 1.442695, %v2909_v4  ;;  %v2467_v32 = vrot.slane %v10370_v10, %v10047_v33 }
 0x325   : > { %14179 = vst [vmem:[#allocation51_spill] sm:$0xff] %v10450_v19  ;;  %v10452_v36 = vpop.eup %7961  ;;  %v10464_v44 = vpop.xlane.xlu1 %2168  ;;  %7979 = vpow2.f32 %v3110_v18  ;;  %v3118_v4 = vmul.f32 1.442695, %v2911_v27  ;;  %v2527_v18 = vrot.slane %v10436_v26, %v10038_v56 }
 0x326   : > { %14180 = vst [vmem:[#allocation40_spill] sm:$0xff] %v10452_v36  ;;  %7981 = vpow2.f32 %v3084_v7  ;;  %v14193_v7 = vld [vmem:[#allocation59_spill] sm:$0xff]  ;;  %v2900_v9 = vsub.f32 %v14194_v34, %v2467_v32  ;;  %v2483_v32 = vrot.slane %v10420_v63, %v14075_v59 }
 0x327   : > { %3534 = vperm.xlu0 %7841, %v10434_v6   ;;  %7983 = vpow2.f32 %v3114_v54  ;;  %v2913_v41 = vsub.f32 %v14193_v7, %v2519_v38  ;;  %v2535_v38 = vrot.slane %v10436_v26, %v10050_v62  ;;  %v14197_v7 = vld [vmem:[#allocation61_spill] sm:$0xff] }
 0x328   : > { %3495 = vperm.xlu1 %7842, %v10438_v31   ;;  %v10458_v31 = vpop.xlane.xlu0 %2165  ;;  %7985 = vpow2.f32 %v3088_v61  ;;  %v2915_v10 = vsub.f32 %v14197_v7, %v2527_v18  ;;  %v3096_v34 = vmul.f32 1.442695, %v2900_v9  ;;  %v2543_v18 = vrot.slane %v10436_v26, %v10059_v30 }
 0x329   : > { %v10484_v45 = vpop.xlane.xlu1 %2174  ;;  %7987 = vpow2.f32 %v3118_v4 }
 0x32b   : > { %3540 = vperm.xlu0 %7841, %v10450_v19   ;;  %v10466_v19 = vpop.eup %7963 }
 0x32c   : > { %3501 = vperm.xlu1 %7842, %v10452_v36   ;;  %14183 = vst [vmem:[#allocation53_spill] sm:$0xff] %v10466_v19  ;;  %v10468_v6 = vpop.eup %7965  ;;  %v10480_v52 = vpop.xlane.xlu0 %2171 }
 0x32d   : > { %14184 = vst [vmem:[#allocation42_spill] sm:$0xff] %v10468_v6  ;;  %v10478_v36 = vpop.eup %7967 }
 0x32e   : > { %14187 = vst [vmem:[#allocation55_spill] sm:$0xff] %v10478_v36 }
 0x32f   : > { %3546 = vperm.xlu0 %7841, %v10466_v19   ;;  %v10482_v19 = vpop.eup %7969 }
 0x330   : > { %3507 = vperm.xlu1 %7842, %v10468_v6   ;;  %14188 = vst [vmem:[#allocation44_spill] sm:$0xff] %v10482_v19  ;;  %v10494_v6 = vpop.eup %7971 }
 0x331   : > { %14191 = vst [vmem:[#allocation57_spill] sm:$0xff] %v10494_v6 }
 0x333   : > { %3552 = vperm.xlu0 %7841, %v10478_v36   ;;  %v10498_v36 = vpop.eup %7973 }
 0x334   : > { %3513 = vperm.xlu1 %7842, %v10482_v19   ;;  %14192 = vst [vmem:[#allocation46_spill] sm:$0xff] %v10498_v36  ;;  %v3092_v19 = vmul.f32 1.442695, %v2898_v20  ;;  %v10510_v15 = vpop.eup %7975  ;;  %v14198_v20 = vld [vmem:[#allocation50_spill] sm:$0xff] }
 0x335   : > { %14195 = vst [vmem:[#allocation59_spill] sm:$0xff] %v10510_v15  ;;  %v10514_v54 = vpop.eup %7977  ;;  %v2902_v61 = vsub.f32 %v14198_v20, %v2475_v17  ;;  %v14202_v17 = vld [vmem:[#allocation52_spill] sm:$0xff] }
 0x336   : > { %v10496_v47 = vpop.permute.xlu0 %3345  ;;  %14196 = vst [vmem:[#allocation48_spill] sm:$0xff] %v10514_v54  ;;  %7989 = vpow2.f32 %v3092_v19  ;;  %v2491_v19 = vrot.slane %v10420_v63, %v10029_v39  ;;  %v2904_v9 = vsub.f32 %v14202_v17, %v2483_v32  ;;  %v2499_v32 = vrot.slane %v10420_v63, %v10047_v33 }
 0x337   : > { %v10500_v3 = vpop.permute.xlu1 %3348  ;;  %3558 = vperm.xlu0 %7841, %v10494_v6   ;;  %v10526_v6 = vpop.eup %7979  ;;  %v3100_v20 = vmul.f32 1.442695, %v2902_v61  ;;  %v14207_v61 = vld [vmem:[#allocation54_spill] sm:$0xff] }
 0x338   : > { %3519 = vperm.xlu1 %7842, %v10498_v36   ;;  %v3122_v36 = vmul.f32 1.442695, %v2913_v41  ;;  %14199 = vst [vmem:[#allocation61_spill] sm:$0xff] %v10526_v6  ;;  %v10530_v4 = vpop.eup %7981  ;;  %v14201_v41 = vld [vmem:[#allocation63_spill] sm:$0xff]  ;;  %v3104_v17 = vmul.f32 1.442695, %v2904_v9 }
 0x339   : > { %14200 = vst [vmem:[#allocation50_spill] sm:$0xff] %v10530_v4  ;;  %v2917_v7 = vsub.f32 %v14201_v41, %v2535_v38  ;;  %v10542_v16 = vpop.eup %7983  ;;  %v14206_v38 = vld [vmem:[#allocation65_spill] sm:$0xff]  ;;  %v14212_v9 = vld [vmem:[#allocation56_spill] sm:$0xff] }
 0x33a   : > { %v10512_v12 = vpop.permute.xlu0 %3372  ;;  %7991 = vpow2.f32 %v3122_v36  ;;  %14203 = vst [vmem:[#allocation63_spill] sm:$0xff] %v10542_v16  ;;  %v2551_v36 = vrot.slane %v10440_v37, %v14076_v24 }
 0x33b   : > { %v10516_v27 = vpop.permute.xlu1 %3351  ;;  %3564 = vperm.xlu0 %7841, %v10510_v15   ;;  %7993 = vpow2.f32 %v3096_v34  ;;  %v3130_v41 = vmul.f32 1.442695, %v2917_v7  ;;  %v2906_v34 = vsub.f32 %v14207_v61, %v2491_v19  ;;  %v2507_v19 = vrot.slane %v10420_v63, %v10068_v8 }
 0x33c   : > { %3525 = vperm.xlu1 %7842, %v10514_v54   ;;  %v3126_v54 = vmul.f32 1.442695, %v2915_v10  ;;  %v2919_v10 = vsub.f32 %v14206_v38, %v2543_v18  ;;  %v14211_v18 = vld [vmem:[#allocation67_spill] sm:$0xff] }
 0x33d   : > { %v2921_v7 = vsub.f32 %v14211_v18, %v2551_v36  ;;  %v3108_v61 = vmul.f32 1.442695, %v2906_v34  ;;  %v2567_v36 = vrot.slane %v10440_v37, %v10050_v62  ;;  %v2515_v18 = vrot.slane %v10436_v26, %v14075_v59 }
 0x33e   : > { %v10528_v55 = vpop.permute.xlu0 %3378  ;;  %7995 = vpow2.f32 %v3126_v54  ;;  %v2559_v54 = vrot.slane %v10440_v37, %v10038_v56  ;;  %v3134_v38 = vmul.f32 1.442695, %v2919_v10  ;;  %v14216_v10 = vld [vmem:[#allocation69_spill] sm:$0xff] }
 0x33f   : > { %v10532_v15 = vpop.permute.xlu1 %3354  ;;  %3570 = vperm.xlu0 %7841, %v10526_v6   ;;  %v10546_v6 = vpop.eup %7985  ;;  %7997 = vpow2.f32 %v3100_v20  ;;  %v2908_v20 = vsub.f32 %v14212_v9, %v2499_v32  ;;  %v3138_v63 = vmul.f32 1.442695, %v2921_v7  ;;  %v14217_v32 = vld [vmem:[#allocation58_spill] sm:$0xff]  ;;  %v14221_v7 = vld [vmem:[#allocation71_spill] sm:$0xff] }
 0x340   : > { %3531 = vperm.xlu1 %7842, %v10530_v4   ;;  %14204 = vst [vmem:[#allocation52_spill] sm:$0xff] %v10546_v6  ;;  %v10558_v4 = vpop.eup %7987  ;;  %7999 = vpow2.f32 %v3130_v41  ;;  %v2923_v41 = vsub.f32 %v14216_v10, %v2559_v54  ;;  %v2910_v34 = vsub.f32 %v14217_v32, %v2507_v19  ;;  %v2575_v54 = vrot.slane %v10440_v37, %v10059_v30  ;;  %v14222_v10 = vld [vmem:[#allocation60_spill] sm:$0xff] }
 0x341   : > { %14208 = vst [vmem:[#allocation65_spill] sm:$0xff] %v10558_v4  ;;  %8001 = vpow2.f32 %v3104_v17  ;;  %v3112_v17 = vmul.f32 1.442695, %v2908_v20  ;;  %v2912_v32 = vsub.f32 %v14222_v10, %v2515_v18  ;;  %v14226_v18 = vld [vmem:[#allocation62_spill] sm:$0xff] }
 0x342   : > { %v10544_v49 = vpop.permute.xlu0 %3384  ;;  %8003 = vpow2.f32 %v3134_v38  ;;  %v2925_v38 = vsub.f32 %v14221_v7, %v2567_v36  ;;  %v3142_v19 = vmul.f32 1.442695, %v2923_v41  ;;  %v3116_v20 = vmul.f32 1.442695, %v2910_v34  ;;  %v14225_v36 = vld [vmem:[#allocation73_spill] sm:$0xff] }
 0x343   : > { %v10548_v25 = vpop.permute.xlu1 %3357  ;;  %3576 = vperm.xlu0 %7841, %v10542_v16   ;;  %v10562_v16 = vpop.eup %7989  ;;  %8005 = vpow2.f32 %v3108_v61  ;;  %v2523_v61 = vrot.slane %v10436_v26, %v10029_v39  ;;  %v2927_v41 = vsub.f32 %v14225_v36, %v2575_v54  ;;  %v2583_v34 = vrot.slane %v10458_v31, %v14076_v24 }
 0x344   : > { %14205 = vst [vmem:[#allocation249_spill] sm:$0xff] %v10548_v25  ;;  %3537 = vperm.xlu1 %7842, %v10546_v6   ;;  %14209 = vst [vmem:[#allocation54_spill] sm:$0xff] %v10562_v16  ;;  %v10574_v6 = vpop.eup %7991  ;;  %8007 = vpow2.f32 %v3138_v63  ;;  %v3146_v63 = vmul.f32 1.442695, %v2925_v38  ;;  %v3120_v10 = vmul.f32 1.442695, %v2912_v32 }
 0x345   : > { %14213 = vst [vmem:[#allocation67_spill] sm:$0xff] %v10574_v6  ;;  %8009 = vpow2.f32 %v3112_v17  ;;  %v2531_v17 = vrot.slane %v10436_v26, %v10047_v33  ;;  %v2914_v7 = vsub.f32 %v14226_v18, %v2523_v61  ;;  %v3150_v38 = vmul.f32 1.442695, %v2927_v41  ;;  %v14230_v32 = vld [vmem:[#allocation64_spill] sm:$0xff] }
 0x346   : > { %v10560_v48 = vpop.permute.xlu0 %3390  ;;  %8011 = vpow2.f32 %v3142_v19  ;;  %v2591_v19 = vrot.slane %v10458_v31, %v10038_v56  ;;  %v2539_v61 = vrot.slane %v10436_v26, %v10068_v8 }
 0x347   : > { %v10564_v5 = vpop.permute.xlu1 %3360  ;;  %3582 = vperm.xlu0 %7841, %v10558_v4   ;;  %v10578_v4 = vpop.eup %7993  ;;  %8013 = vpow2.f32 %v3116_v20  ;;  %v14229_v20 = vld [vmem:[#allocation75_spill] sm:$0xff]  ;;  %v2916_v18 = vsub.f32 %v14230_v32, %v2531_v17  ;;  %v2547_v17 = vrot.slane %v10440_v37, %v14075_v59 }
 0x348   : > { %14210 = vst [vmem:[#allocation250_spill] sm:$0xff] %v10564_v5  ;;  %3543 = vperm.xlu1 %7842, %v10562_v16   ;;  %14214 = vst [vmem:[#allocation56_spill] sm:$0xff] %v10578_v4  ;;  %v10590_v9 = vpop.eup %7995  ;;  %8015 = vpow2.f32 %v3146_v63  ;;  %v2929_v36 = vsub.f32 %v14229_v20, %v2583_v34  ;;  %v2599_v34 = vrot.slane %v10458_v31, %v10050_v62  ;;  %v14233_v20 = vld [vmem:[#allocation77_spill] sm:$0xff] }
 0x349   : > { %14218 = vst [vmem:[#allocation69_spill] sm:$0xff] %v10590_v9  ;;  %8017 = vpow2.f32 %v3120_v10  ;;  %v2931_v26 = vsub.f32 %v14233_v20, %v2591_v19  ;;  %v3128_v32 = vmul.f32 1.442695, %v2916_v18  ;;  %v2607_v19 = vrot.slane %v10458_v31, %v10059_v30 }
 0x34a   : > { %v10576_v35 = vpop.permute.xlu0 %3396  ;;  %8019 = vpow2.f32 %v3150_v38 }
 0x34b   : > { %v10580_v11 = vpop.permute.xlu1 %3363  ;;  %3588 = vperm.xlu0 %7841, %v10574_v6   ;;  %v10594_v6 = vpop.eup %7997 }
 0x34c   : > { %14215 = vst [vmem:[#allocation251_spill] sm:$0xff] %v10580_v11  ;;  %3549 = vperm.xlu1 %7842, %v10578_v4   ;;  %14219 = vst [vmem:[#allocation58_spill] sm:$0xff] %v10594_v6  ;;  %v10606_v4 = vpop.eup %7999 }
 0x34d   : > { %14223 = vst [vmem:[#allocation71_spill] sm:$0xff] %v10606_v4 }
 0x34e   : > { %v10592_v16 = vpop.permute.xlu0 %3402 }
 0x34f   : > { %v10596_v22 = vpop.permute.xlu1 %3366  ;;  %3594 = vperm.xlu0 %7841, %v10590_v9   ;;  %v10610_v9 = vpop.eup %8001 }
 0x350   : > { %14220 = vst [vmem:[#allocation252_spill] sm:$0xff] %v10596_v22  ;;  %3555 = vperm.xlu1 %7842, %v10594_v6   ;;  %14224 = vst [vmem:[#allocation60_spill] sm:$0xff] %v10610_v9  ;;  %v10622_v6 = vpop.eup %8003 }
 0x351   : > { %14227 = vst [vmem:[#allocation73_spill] sm:$0xff] %v10622_v6 }
 0x352   : > { %v10608_v43 = vpop.permute.xlu0 %3408 }
 0x353   : > { %v10612_v14 = vpop.permute.xlu1 %3369  ;;  %3600 = vperm.xlu0 %7841, %v10606_v4   ;;  %v10626_v4 = vpop.eup %8005 }
 0x354   : > { %3561 = vperm.xlu1 %7842, %v10610_v9   ;;  %14228 = vst [vmem:[#allocation62_spill] sm:$0xff] %v10626_v4  ;;  %v3124_v9 = vmul.f32 1.442695, %v2914_v7  ;;  %v10638_v1 = vpop.eup %8007  ;;  %v14234_v7 = vld [vmem:[#allocation66_spill] sm:$0xff] }
 0x355   : > { %14231 = vst [vmem:[#allocation75_spill] sm:$0xff] %v10638_v1  ;;  %v10642_v63 = vpop.eup %8009  ;;  %v2918_v10 = vsub.f32 %v14234_v7, %v2539_v61  ;;  %v14239_v61 = vld [vmem:[#allocation68_spill] sm:$0xff] }
 0x356   : > { %v10624_v42 = vpop.permute.xlu0 %3414  ;;  %14232 = vst [vmem:[#allocation64_spill] sm:$0xff] %v10642_v63  ;;  %8021 = vpow2.f32 %v3124_v9  ;;  %v2555_v9 = vrot.slane %v10440_v37, %v10029_v39  ;;  %v2920_v18 = vsub.f32 %v14239_v61, %v2547_v17  ;;  %v2563_v17 = vrot.slane %v10440_v37, %v10047_v33 }
 0x357   : > { %v10628_v54 = vpop.permute.xlu1 %3375  ;;  %3606 = vperm.xlu0 %7841, %v10622_v6   ;;  %v10654_v6 = vpop.eup %8011  ;;  %v3132_v7 = vmul.f32 1.442695, %v2918_v10  ;;  %v14243_v10 = vld [vmem:[#allocation70_spill] sm:$0xff] }
 0x358   : > { %3567 = vperm.xlu1 %7842, %v10626_v4   ;;  %v3154_v4 = vmul.f32 1.442695, %v2929_v36  ;;  %14235 = vst [vmem:[#allocation77_spill] sm:$0xff] %v10654_v6  ;;  %v10658_v38 = vpop.eup %8013  ;;  %v14238_v36 = vld [vmem:[#allocation79_spill] sm:$0xff] }
 0x359   : > { %14237 = vst [vmem:[#allocation253_spill] sm:$0xff] %v10658_v38  ;;  %v2933_v20 = vsub.f32 %v14238_v36, %v2599_v34  ;;  %v10670_v0 = vpop.eup %8015  ;;  %v2935_v34 = vsub.f32 %v14004_v50, %v2607_v19  ;;  %v3136_v36 = vmul.f32 1.442695, %v2920_v18  ;;  %v2623_v50 = vrot.slane %v10464_v44, %v10038_v56  ;;  %v14248_v18 = vld [vmem:[#allocation72_spill] sm:$0xff] }
 0x35a   : > { %v10640_v28 = vpop.permute.xlu0 %3420  ;;  %8023 = vpow2.f32 %v3154_v4  ;;  %14240 = vst [vmem:[#allocation79_spill] sm:$0xff] %v10670_v0  ;;  %v2615_v4 = vrot.slane %v10464_v44, %v14076_v24 }
 0x35b   : > { %v10644_v41 = vpop.permute.xlu1 %3381  ;;  %3612 = vperm.xlu0 %7841, %v10638_v1   ;;  %8025 = vpow2.f32 %v3128_v32  ;;  %v2922_v32 = vsub.f32 %v14243_v10, %v2555_v9  ;;  %v2571_v9 = vrot.slane %v10440_v37, %v10068_v8 }
 0x35c   : > { %3573 = vperm.xlu1 %7842, %v10642_v63   ;;  %v3158_v63 = vmul.f32 1.442695, %v2931_v26  ;;  %v3162_v26 = vmul.f32 1.442695, %v2933_v20  ;;  %v3166_v20 = vmul.f32 1.442695, %v2935_v34 }
 0x35d   : > { %v3140_v10 = vmul.f32 1.442695, %v2922_v32  ;;  %v14251_v34 = vld [vmem:[#allocation85_spill] sm:$0xff] }
 0x35e   : > { %v10656_v13 = vpop.permute.xlu0 %3426  ;;  %8027 = vpow2.f32 %v3158_v63  ;;  %v14247_v63 = vld [vmem:[#allocation83_spill] sm:$0xff] }
 0x35f   : > { %14236 = vst [vmem:[#allocation66_spill] sm:$0xff] %v10656_v13  ;;  %v10660_v1 = vpop.permute.xlu1 %3387  ;;  %3618 = vperm.xlu0 %7841, %v10654_v6   ;;  %v10674_v6 = vpop.eup %8017  ;;  %8029 = vpow2.f32 %v3132_v7  ;;  %v2937_v19 = vsub.f32 %v14247_v63, %v2615_v4  ;;  %v2924_v7 = vsub.f32 %v14248_v18, %v2563_v17  ;;  %v2631_v4 = vrot.slane %v10464_v44, %v10050_v62  ;;  %v14252_v17 = vld [vmem:[#allocation74_spill] sm:$0xff] }
 0x360   : > { %3579 = vperm.xlu1 %7842, %v10658_v38   ;;  %14242 = vst [vmem:[#allocation254_spill] sm:$0xff] %v10674_v6  ;;  %v10686_v61 = vpop.eup %8019  ;;  %8031 = vpow2.f32 %v3162_v26  ;;  %v2939_v26 = vsub.f32 %v14251_v34, %v2623_v50  ;;  %v2926_v32 = vsub.f32 %v14252_v17, %v2571_v9  ;;  %v2579_v63 = vrot.slane %v10458_v31, %v14075_v59  ;;  %v14256_v34 = vld [vmem:[#allocation76_spill] sm:$0xff] }
 0x361   : > { %14244 = vst [vmem:[#allocation70_spill] sm:$0xff] %v10686_v61  ;;  %8033 = vpow2.f32 %v3136_v36  ;;  %v3170_v37 = vmul.f32 1.442695, %v2937_v19  ;;  %v3144_v36 = vmul.f32 1.442695, %v2924_v7  ;;  %v2639_v50 = vrot.slane %v10464_v44, %v10059_v30  ;;  %v14255_v19 = vld [vmem:[#allocation87_spill] sm:$0xff] }
 0x362   : > { %v10672_v29 = vpop.permute.xlu0 %3432  ;;  %8035 = vpow2.f32 %v3166_v20  ;;  %v2941_v20 = vsub.f32 %v14255_v19, %v2631_v4  ;;  %v3174_v9 = vmul.f32 1.442695, %v2939_v26  ;;  %v3148_v7 = vmul.f32 1.442695, %v2926_v32 }
 0x363   : > { %14241 = vst [vmem:[#allocation68_spill] sm:$0xff] %v10672_v29  ;;  %v10676_v51 = vpop.permute.xlu1 %3393  ;;  %3624 = vperm.xlu0 %7841, %v10670_v0   ;;  %v10690_v0 = vpop.eup %8021  ;;  %8037 = vpow2.f32 %v3140_v10  ;;  %v2587_v10 = vrot.slane %v10458_v31, %v10029_v39  ;;  %v2928_v17 = vsub.f32 %v14256_v34, %v2579_v63  ;;  %v2943_v4 = vsub.f32 %v14005_v46, %v2639_v50 }
 0x364   : > { %3585 = vperm.xlu1 %7842, %v10674_v6   ;;  %14246 = vst [vmem:[#allocation256_spill] sm:$0xff] %v10690_v0  ;;  %v10702_v6 = vpop.eup %8023  ;;  %8039 = vpow2.f32 %v3170_v37  ;;  %v3178_v26 = vmul.f32 1.442695, %v2941_v20  ;;  %v2647_v37 = vrot.slane %v10480_v52, %v14076_v24  ;;  %v2595_v32 = vrot.slane %v10458_v31, %v10047_v33 }
 0x365   : > { %14249 = vst [vmem:[#allocation83_spill] sm:$0xff] %v10702_v6  ;;  %8041 = vpow2.f32 %v3144_v36  ;;  %v14259_v36 = vld [vmem:[#allocation78_spill] sm:$0xff]  ;;  %v3152_v19 = vmul.f32 1.442695, %v2928_v17  ;;  %v3182_v50 = vmul.f32 1.442695, %v2943_v4  ;;  %v2655_v20 = vrot.slane %v10480_v52, %v10038_v56 }
 0x366   : > { %v10688_v38 = vpop.permute.xlu0 %3438  ;;  %8043 = vpow2.f32 %v3174_v9  ;;  %v2930_v63 = vsub.f32 %v14259_v36, %v2587_v10  ;;  %v14262_v9 = vld [vmem:[#allocation91_spill] sm:$0xff]  ;;  %v2603_v10 = vrot.slane %v10458_v31, %v10068_v8  ;;  %v14263_v17 = vld [vmem:[#allocation80_spill] sm:$0xff] }
 0x367   : > { %14245 = vst [vmem:[#allocation255_spill] sm:$0xff] %v10688_v38  ;;  %v10692_v29 = vpop.permute.xlu1 %3399  ;;  %3630 = vperm.xlu0 %7841, %v10686_v61   ;;  %v10706_v61 = vpop.eup %8025  ;;  %8045 = vpow2.f32 %v3148_v7  ;;  %v2945_v7 = vsub.f32 %v14262_v9, %v2647_v37  ;;  %v2932_v36 = vsub.f32 %v14263_v17, %v2595_v32  ;;  %v2663_v37 = vrot.slane %v10480_v52, %v10050_v62 }
 0x368   : > { %3591 = vperm.xlu1 %7842, %v10690_v0   ;;  %14250 = vst [vmem:[#allocation72_spill] sm:$0xff] %v10706_v61  ;;  %v10718_v18 = vpop.eup %8027  ;;  %8047 = vpow2.f32 %v3178_v26  ;;  %v2947_v31 = vsub.f32 %v13998_v23, %v2655_v20  ;;  %v2611_v32 = vrot.slane %v10464_v44, %v14075_v59  ;;  %v2671_v23 = vrot.slane %v10480_v52, %v10059_v30 }
 0x369   : > { %14253 = vst [vmem:[#allocation85_spill] sm:$0xff] %v10718_v18  ;;  %8049 = vpow2.f32 %v3152_v19  ;;  %v3186_v9 = vmul.f32 1.442695, %v2945_v7  ;;  %v3160_v17 = vmul.f32 1.442695, %v2932_v36  ;;  %v2949_v20 = vsub.f32 %v14006_v57, %v2663_v37 }
 0x36a   : > { %v10704_v38 = vpop.permute.xlu0 %3444  ;;  %8051 = vpow2.f32 %v3182_v50  ;;  %v3190_v7 = vmul.f32 1.442695, %v2947_v31  ;;  %v2951_v57 = vsub.f32 %v14012_v40, %v2671_v23  ;;  %v2627_v31 = vrot.slane %v10464_v44, %v10047_v33 }
 0x36b   : > { %v10708_v22 = vpop.permute.xlu1 %3405  ;;  %3636 = vperm.xlu0 %7841, %v10702_v6   ;;  %v10722_v6 = vpop.eup %8029  ;;  %v3194_v37 = vmul.f32 1.442695, %v2949_v20  ;;  %v2635_v23 = vrot.slane %v10464_v44, %v10068_v8  ;;  %v14277_v20 = vld [vmem:[#allocation88_spill] sm:$0xff] }
 0x36c   : > { %3597 = vperm.xlu1 %7842, %v10706_v61   ;;  %14254 = vst [vmem:[#allocation74_spill] sm:$0xff] %v10722_v6  ;;  %v10734_v61 = vpop.eup %8031  ;;  %v3198_v40 = vmul.f32 1.442695, %v2951_v57 }
 0x36d   : > { %14257 = vst [vmem:[#allocation87_spill] sm:$0xff] %v10734_v61  ;;  %v2942_v57 = vsub.f32 %v13997_v53, %v2635_v23  ;;  %v2651_v53 = vrot.slane %v10480_v52, %v10029_v39  ;;  %v14282_v23 = vld [vmem:[#allocation92_spill] sm:$0xff] }
 0x36e   : > { %v10720_v0 = vpop.permute.xlu0 %3450 }
 0x36f   : > { %v10724_v11 = vpop.permute.xlu1 %3411  ;;  %3642 = vperm.xlu0 %7841, %v10718_v18   ;;  %v10738_v18 = vpop.eup %8033 }
 0x370   : > { %3603 = vperm.xlu1 %7842, %v10722_v6   ;;  %14258 = vst [vmem:[#allocation76_spill] sm:$0xff] %v10738_v18  ;;  %v10750_v34 = vpop.eup %8035 }
 0x371   : > { %14260 = vst [vmem:[#allocation78_spill] sm:$0xff] %v10750_v34 }
 0x372   : > { %v10736_v13 = vpop.permute.xlu0 %3456 }
 0x373   : > { %v10740_v5 = vpop.permute.xlu1 %3417  ;;  %3648 = vperm.xlu0 %7841, %v10734_v61   ;;  %v10754_v61 = vpop.eup %8037 }
 0x374   : > { %3609 = vperm.xlu1 %7842, %v10738_v18   ;;  %14261 = vst [vmem:[#allocation257_spill] sm:$0xff] %v10754_v61  ;;  %v3156_v18 = vmul.f32 1.442695, %v2930_v63  ;;  %v10766_v24 = vpop.eup %8039  ;;  %v14266_v63 = vld [vmem:[#allocation82_spill] sm:$0xff] }
 0x375   : > { %14264 = vst [vmem:[#allocation91_spill] sm:$0xff] %v10766_v24  ;;  %v10770_v26 = vpop.eup %8041  ;;  %v2934_v19 = vsub.f32 %v14266_v63, %v2603_v10  ;;  %v14269_v10 = vld [vmem:[#allocation84_spill] sm:$0xff] }
 0x376   : > { %v10752_v6 = vpop.permute.xlu0 %3462  ;;  %14265 = vst [vmem:[#allocation80_spill] sm:$0xff] %v10770_v26  ;;  %8053 = vpow2.f32 %v3156_v18  ;;  %v2619_v18 = vrot.slane %v10464_v44, %v10029_v39  ;;  %v2936_v36 = vsub.f32 %v14269_v10, %v2611_v32 }
 0x377   : > { %v10756_v46 = vpop.permute.xlu1 %3423  ;;  %3654 = vperm.xlu0 %7841, %v10750_v34   ;;  %8055 = vpow2.f32 %v3186_v9  ;;  %v3164_v63 = vmul.f32 1.442695, %v2934_v19  ;;  %v14273_v9 = vld [vmem:[#allocation86_spill] sm:$0xff] }
 0x378   : > { %3615 = vperm.xlu1 %7842, %v10754_v61   ;;  %v10782_v61 = vpop.eup %8043  ;;  %8057 = vpow2.f32 %v3160_v17  ;;  %v2938_v32 = vsub.f32 %v14273_v9, %v2619_v18  ;;  %v3168_v19 = vmul.f32 1.442695, %v2936_v36 }
 0x379   : > { %14267 = vst [vmem:[#allocation82_spill] sm:$0xff] %v10782_v61  ;;  %v10786_v50 = vpop.eup %8045  ;;  %8059 = vpow2.f32 %v3190_v7  ;;  %v2940_v7 = vsub.f32 %v14277_v20, %v2627_v31 }
 0x37a   : > { %v10768_v25 = vpop.permute.xlu0 %3468  ;;  %14268 = vst [vmem:[#allocation258_spill] sm:$0xff] %v10786_v50  ;;  %8061 = vpow2.f32 %v3164_v63  ;;  %v3172_v18 = vmul.f32 1.442695, %v2938_v32 }
 0x37b   : > { %v10772_v4 = vpop.permute.xlu1 %3429  ;;  %3660 = vperm.xlu0 %7841, %v10766_v24   ;;  %8063 = vpow2.f32 %v3194_v37  ;;  %v3176_v44 = vmul.f32 1.442695, %v2940_v7  ;;  %v2643_v37 = vrot.slane %v10480_v52, %v14075_v59 }
 0x37c   : > { %3621 = vperm.xlu1 %7842, %v10770_v26   ;;  %v10798_v26 = vpop.eup %8047  ;;  %8065 = vpow2.f32 %v3168_v19 }
 0x37d   : > { %14270 = vst [vmem:[#allocation84_spill] sm:$0xff] %v10798_v26  ;;  %8067 = vpow2.f32 %v3198_v40  ;;  %v3180_v40 = vmul.f32 1.442695, %v2942_v57  ;;  %v2944_v7 = vsub.f32 %v14282_v23, %v2643_v37  ;;  %v2659_v57 = vrot.slane %v10480_v52, %v10047_v33 }
 0x37e   : > { %v10784_v34 = vpop.permute.xlu0 %3474  ;;  %8069 = vpow2.f32 %v3172_v18 }
 0x37f   : > { %v10788_v24 = vpop.permute.xlu1 %3435  ;;  %3666 = vperm.xlu0 %7841, %v10782_v61   ;;  %v10802_v61 = vpop.eup %8049  ;;  %8071 = vpow2.f32 %v3176_v44  ;;  %v14285_v44 = vld [vmem:[#allocation94_spill] sm:$0xff] }
 0x380   : > { %3627 = vperm.xlu1 %7842, %v10786_v50   ;;  %14272 = vst [vmem:[#allocation260_spill] sm:$0xff] %v10802_v61  ;;  %v10812_v17 = vpop.eup %8051  ;;  %8073 = vpow2.f32 %v3180_v40  ;;  %v2667_v40 = vrot.slane %v10480_v52, %v10068_v8 }
 0x381   : > { %14274 = vst [vmem:[#allocation86_spill] sm:$0xff] %v10812_v17  ;;  %v10816_v50 = vpop.eup %8053 }
 0x382   : > { %v10800_v62 = vpop.permute.xlu0 %3480  ;;  %14276 = vst [vmem:[#allocation262_spill] sm:$0xff] %v10816_v50  ;;  %v10825_v36 = vpop.eup %8055 }
 0x383   : > { %14271 = vst [vmem:[#allocation259_spill] sm:$0xff] %v10800_v62  ;;  %v10804_v30 = vpop.permute.xlu1 %3441  ;;  %3672 = vperm.xlu0 %7841, %v10798_v26   ;;  %14278 = vst [vmem:[#allocation88_spill] sm:$0xff] %v10825_v36  ;;  %v10829_v9 = vpop.eup %8057 }
 0x384   : > { %3633 = vperm.xlu1 %7842, %v10802_v61   ;;  %14279 = vst [vmem:[#allocation263_spill] sm:$0xff] %v10829_v9  ;;  %v10838_v31 = vpop.eup %8059 }
 0x385   : > { %14280 = vst [vmem:[#allocation264_spill] sm:$0xff] %v10838_v31  ;;  %v10842_v19 = vpop.eup %8061 }
 0x386   : > { %v10814_v10 = vpop.permute.xlu0 %3486  ;;  %14281 = vst [vmem:[#allocation265_spill] sm:$0xff] %v10842_v19  ;;  %v10851_v18 = vpop.eup %8063 }
 0x387   : > { %14275 = vst [vmem:[#allocation261_spill] sm:$0xff] %v10814_v10  ;;  %v10818_v26 = vpop.permute.xlu1 %3447  ;;  %3678 = vperm.xlu0 %7841, %v10812_v17   ;;  %14283 = vst [vmem:[#allocation92_spill] sm:$0xff] %v10851_v18 }
 0x388   : > { %3639 = vperm.xlu1 %7842, %v10816_v50   ;;  %v10855_v50 = vpop.eup %8065 }
 0x389   : > { %14284 = vst [vmem:[#allocation266_spill] sm:$0xff] %v10855_v50  ;;  %v10864_v37 = vpop.eup %8067 }
 0x38a   : > { %v10827_v63 = vpop.permute.xlu0 %3492  ;;  %14286 = vst [vmem:[#allocation94_spill] sm:$0xff] %v10864_v37  ;;  %v10868_v17 = vpop.eup %8069 }
 0x38b   : > { %v10831_v61 = vpop.permute.xlu1 %3453  ;;  %3684 = vperm.xlu0 %7841, %v10825_v36   ;;  %14287 = vst [vmem:[#allocation267_spill] sm:$0xff] %v10868_v17 }
 0x38c   : > { %3645 = vperm.xlu1 %7842, %v10829_v9  }
 0x38e   : > { %v10840_v32 = vpop.permute.xlu0 %3498 }
 0x38f   : > { %v10844_v20 = vpop.permute.xlu1 %3459  ;;  %3690 = vperm.xlu0 %7841, %v10838_v31   ;;  %v3184_v31 = vmul.f32 1.442695, %v2944_v7 }
 0x390   : > { %3651 = vperm.xlu1 %7842, %v10842_v19   ;;  %v2946_v19 = vsub.f32 %v14285_v44, %v2651_v53  ;;  %v10879_v44 = vpop.eup %8071 }
 0x391   : > { %8075 = vpow2.f32 %v3184_v31  ;;  %14288 = vst [vmem:[#allocation268_spill] sm:$0xff] %v10879_v44 }
 0x392   : > { %v10853_v9 = vpop.permute.xlu0 %3504  ;;  %v3188_v53 = vmul.f32 1.442695, %v2946_v19  ;;  %v2683_v19 = vrot.slane %v10484_v45, %v10029_v39 }
 0x393   : > { %v10857_v36 = vpop.permute.xlu1 %3465  ;;  %3696 = vperm.xlu0 %7841, %v10851_v18  }
 0x394   : > { %3657 = vperm.xlu1 %7842, %v10855_v50   ;;  %v2948_v50 = vsub.f32 %v13999_v58, %v2659_v57  ;;  %8077 = vpow2.f32 %v3188_v53  ;;  %v10889_v58 = vpop.eup %8073  ;;  %v14290_v57 = vld [vmem:[#allocation100_spill] sm:$0xff] }
 0x395   : > { %14289 = vst [vmem:[#allocation269_spill] sm:$0xff] %v10889_v58 }
 0x396   : > { %v10866_v23 = vpop.permute.xlu0 %3510  ;;  %v3192_v10 = vmul.f32 1.442695, %v2948_v50  ;;  %v3771_v50 = vrot.slane %v10628_v54, %v9307_v21 }
 0x397   : > { %v10870_v56 = vpop.permute.xlu1 %3471  ;;  %3702 = vperm.xlu0 %7841, %v10864_v37   ;;  %v2675_v37 = vrot.slane %v10484_v45, %v14075_v59  ;;  %v3767_v59 = vrot.slane %v10512_v12, %v9307_v21  ;;  %v3779_v12 = vrot.slane %v10644_v41, %v9307_v21 }
 0x398   : > { %3663 = vperm.xlu1 %7842, %v10868_v17   ;;  %v2950_v17 = vsub.f32 %v14008_v2, %v2667_v40  ;;  %8079 = vpow2.f32 %v3192_v10  ;;  %v3763_v2 = vrot.slane %v10612_v14, %v9307_v21  ;;  %v14293_v10 = vld [vmem:[#allocation102_spill] sm:$0xff] }
 0x39a   : > { %v10877_v7 = vpop.permute.xlu0 %3516  ;;  %v3196_v62 = vmul.f32 1.442695, %v2950_v17  ;;  %v2954_v17 = vsub.f32 %v14293_v10, %v2683_v19  ;;  %v4247_v54 = vsel %vm1992_vm1, %v3767_v59, %v3763_v2  ;;  %v3799_v59 = vrot.slane %v10576_v35, %v9307_v21  ;;  %v14295_v2 = vld [vmem:[#allocation104_spill] sm:$0xff] }
 0x39b   : > { %v10881_v18 = vpop.permute.xlu1 %3477  ;;  %v10903_v53 = vpop.eup %8075  ;;  %v3811_v35 = vrot.slane %v10708_v22, %v9307_v21 }
 0x39c   : > { %3669 = vperm.xlu1 %7842, %v10879_v44   ;;  %v2952_v44 = vsub.f32 %v14290_v57, %v2675_v37  ;;  %14292 = vst [vmem:[#allocation270_spill] sm:$0xff] %v10903_v53  ;;  %v2691_v37 = vrot.slane %v10484_v45, %v10047_v33  ;;  %8081 = vpow2.f32 %v3196_v62  ;;  %v3795_v57 = vrot.slane %v10676_v51, %v9307_v21 }
 0x39d   : > { %v3775_v62 = vrot.slane %v10528_v55, %v9307_v21  ;;  %v2699_v51 = vrot.slane %v10484_v45, %v10068_v8 }
 0x39e   : > { %v10887_v52 = vpop.permute.xlu0 %3522  ;;  %v3200_v14 = vmul.f32 1.442695, %v2952_v44  ;;  %v10923_v19 = vpop.eup %8077  ;;  %v4254_v10 = vsel %vm1992_vm1, %v3799_v59, %v3795_v57 }
 0x39f   : > { %v10891_v31 = vpop.permute.xlu1 %3483  ;;  %14294 = vst [vmem:[#allocation102_spill] sm:$0xff] %v10923_v19  ;;  %v2958_v57 = vsub.f32 %v14009_v60, %v2699_v51 }
 0x3a0   : > { %3675 = vperm.xlu1 %7842, %v10889_v58   ;;  %v4248_v58 = vsel %vm1994_vm2, %v3771_v50, %v4247_v54  ;;  %v2956_v50 = vsub.f32 %v14295_v2, %v2691_v37  ;;  %8083 = vpow2.f32 %v3200_v14  ;;  %v3787_v14 = vrot.slane %v10660_v1, %v9307_v21 }
 0x3a1   : > { %v4249_v41 = vsel %vm1996_vm3, %v3775_v62, %v4248_v58  ;;  %v3807_v58 = vrot.slane %v10592_v16, %v9307_v21  ;;  %v3875_v2 = vrot.slane %v10831_v61, %v9307_v21 }
 0x3a2   : > { %v10901_v40 = vpop.permute.xlu0 %3528  ;;  %v4250_v54 = vsel %vm1998_vm4, %v3779_v12, %v4249_v41  ;;  %v10943_v37 = vpop.eup %8079  ;;  %v3863_v12 = vrot.slane %v10704_v38, %v9307_v21 }
 0x3a3   : > { %14291 = vst [vmem:[#allocation100_spill] sm:$0xff] %v10901_v40  ;;  %v10907_v39 = vpop.permute.xlu1 %3489  ;;  %v3803_v40 = vrot.slane %v10692_v29, %v9307_v21  ;;  %v3204_v29 = vmul.f32 1.442695, %v2954_v17  ;;  %14296 = vst [vmem:[#allocation104_spill] sm:$0xff] %v10943_v37  ;;  %v3783_v17 = vrot.slane %v10544_v49, %v9307_v21  ;;  %v3815_v49 = vrot.slane %v10608_v43, %v9307_v21 }
 0x3a4   : > { %3681 = vperm.xlu1 %7842, %v10903_v53   ;;  %v3859_v53 = vrot.slane %v10804_v30, %v9307_v21  ;;  %v3208_v30 = vmul.f32 1.442695, %v2956_v50  ;;  %v3923_v38 = vrot.slane %v10907_v39, %v9307_v21  ;;  %v3871_v39 = vrot.slane %v10720_v0, %v9307_v21 }
 0x3a5   : > { %v4255_v55 = vsel %vm1994_vm2, %v3803_v40, %v4254_v10  ;;  %v3867_v40 = vrot.slane %v10818_v26, %v9307_v21  ;;  %8085 = vpow2.f32 %v3204_v29  ;;  %v4251_v1 = vsel %vm2000_vm5, %v3783_v17, %v4250_v54 }
 0x3a6   : > { %v10921_v33 = vpop.permute.xlu0 %3534  ;;  %v4256_v16 = vsel %vm1996_vm3, %v3807_v58, %v4255_v55  ;;  %v3819_v26 = vrot.slane %v10724_v11, %v9307_v21  ;;  %v4268_v60 = vsel %vm1992_vm1, %v3863_v12, %v3859_v53  ;;  %v10969_v51 = vpop.eup %8081  ;;  %v4252_v41 = vsel %vm2002_vm6, %v3787_v14, %v4251_v1 }
 0x3a7   : > { %v3496_v44 = vpop.permute.xlu1 %3495  ;;  %v4257_v62 = vsel %vm1998_vm4, %v3811_v35, %v4256_v16  ;;  %14297 = vst [vmem:[#allocation271_spill] sm:$0xff] %v10969_v51  ;;  %v4269_v43 = vsel %vm1994_vm2, %v3867_v40, %v4268_v60  ;;  %v3791_v11 = vrot.slane %v10560_v48, %v9307_v21  ;;  %v3927_v53 = vrot.slane %v10827_v63, %v9307_v21 }
 0x3a8   : > { %3687 = vperm.xlu1 %7842, %v10923_v19   ;;  %v3931_v50 = vrot.slane %v3496_v44, %v9307_v21  ;;  %8087 = vpow2.f32 %v3208_v30  ;;  %v3212_v10 = vmul.f32 1.442695, %v2958_v57  ;;  %v4258_v61 = vsel %vm2000_vm5, %v3815_v49, %v4257_v62 }
 0x3a9   : > { %v4270_v44 = vsel %vm1996_vm3, %v3871_v39, %v4269_v43  ;;  %v4282_v54 = vsel %vm1992_vm1, %v3927_v53, %v3923_v38  ;;  %v4253_v48 = vsel %vm2004_vm7, %v3791_v11, %v4252_v41  ;;  %v4259_v35 = vsel %vm2002_vm6, %v3819_v26, %v4258_v61 }
 0x3aa   : > { %v10941_v8 = vpop.permute.xlu0 %3540  ;;  %v10990_v0 = vpop.eup %8083  ;;  %v4271_v63 = vsel %vm1998_vm4, %v3875_v2, %v4270_v44  ;;  %v3883_v17 = vrot.slane %v10844_v20, %v9307_v21  ;;  %v4283_v58 = vsel %vm1994_vm2, %v3931_v50, %v4282_v54  ;;  %v3823_v57 = vrot.slane %v10624_v42, %v9307_v21 }
 0x3ab   : > { %v3502_v22 = vpop.permute.xlu1 %3501  ;;  %14298 = vst [vmem:[#allocation272_spill] sm:$0xff] %v10990_v0  ;;  %v3879_v30 = vrot.slane %v10736_v13, %v9307_v21  ;;  %v3935_v12 = vrot.slane %v10840_v32, %v9307_v21  ;;  %8089 = vpow2.f32 %v3212_v10  ;;  %v4371_v20 = vsel %vm2127_vm8, %v4253_v48, 0.0 }
 0x3ac   : > { %3693 = vperm.xlu1 %7842, %v10943_v37   ;;  %v3939_v14 = vrot.slane %v3502_v22, %v9307_v21  ;;  %v4260_v16 = vsel %vm2004_vm7, %v3823_v57, %v4259_v35  ;;  %v3887_v60 = vrot.slane %v10752_v6, %v9307_v21  ;;  %v3943_v38 = vrot.slane %v10853_v9, %v9307_v21 }
 0x3ad   : > { %v4284_v49 = vsel %vm1996_vm3, %v3935_v12, %v4283_v58  ;;  %v4272_v1 = vsel %vm2000_vm5, %v3879_v30, %v4271_v63  ;;  %v4374_v43 = vsel %vm2127_vm8, %v4260_v16, 0.0  ;;  %v3951_v9 = vrot.slane %v10866_v23, %v9307_v21 }
 0x3ae   : > { %v10967_v59 = vpop.permute.xlu0 %3546  ;;  %v4285_v13 = vsel %vm1998_vm4, %v3939_v14, %v4284_v49  ;;  %v4273_v26 = vsel %vm2002_vm6, %v3883_v17, %v4272_v1  ;;  %v3991_v17 = vrot.slane %v10941_v8, %v9307_v21 }
 0x3af   : > { %v3508_v29 = vpop.permute.xlu1 %3507  ;;  %v11010_v42 = vpop.eup %8085  ;;  %v4274_v50 = vsel %vm2004_vm7, %v3887_v60, %v4273_v26 }
 0x3b0   : > { %3699 = vperm.xlu1 %7842, %v10969_v51   ;;  %14299 = vst [vmem:[#allocation273_spill] sm:$0xff] %v11010_v42  ;;  %v3947_v62 = vrot.slane %v3508_v29, %v9307_v21  ;;  %v4286_v29 = vsel %vm2000_vm5, %v3943_v38, %v4285_v13  ;;  %v4380_v39 = vsel %vm2127_vm8, %v4274_v50, 0.0  ;;  %v14420_v51 = vld [vmem:[#allocation67_spill] sm:$0xff] }
 0x3b2   : > { %v10986_v55 = vpop.permute.xlu0 %3552  ;;  %v11027_v41 = vpop.eup %8087  ;;  %v4287_v6 = vsel %vm2002_vm6, %v3947_v62, %v4286_v29  ;;  %v3735_v29 = vrot.slane %v10500_v3, %v9307_v21  ;;  %v3831_v3 = vrot.slane %v10640_v28, %v9307_v21 }
 0x3b3   : > { %v10997_v40 = vpop.permute.xlu1 %3513  ;;  %14300 = vst [vmem:[#allocation274_spill] sm:$0xff] %v11027_v41  ;;  %v4288_v10 = vsel %vm2004_vm7, %v3951_v9, %v4287_v6  ;;  %v4007_v62 = vrot.slane %v10986_v55, %v9307_v21  ;;  %v3731_v6 = vrot.slane %v10496_v47, %v9307_v21  ;;  %v3827_v55 = vrot.slane %v10740_v5, %v9307_v21 }
 0x3b4   : > { %3705 = vperm.xlu1 %7842, %v10990_v0   ;;  %v4386_v54 = vsel %vm2127_vm8, %v4288_v10, 0.0  ;;  %v3743_v47 = vrot.slane %v10532_v15, %v9307_v21  ;;  %v3891_v5 = vrot.slane %v10857_v36, %v9307_v21  ;;  %v3843_v15 = vrot.slane %v10772_v4, %v9307_v21 }
 0x3b5   : > { %v11039_v61 = vpop.eup %8089  ;;  %v3895_v36 = vrot.slane %v10768_v25, %v9307_v21 }
 0x3b6   : > { %4372 = vadd.xlane.f32.xlu0 %v4371_v20  ;;  %v3559_v22 = vpop.permute.xlu0 %3558  ;;  %14301 = vst [vmem:[#allocation275_spill] sm:$0xff] %v11039_v61  ;;  %v3999_v20 = vrot.slane %v10967_v59, %v9307_v21 }
 0x3b7   : > { %v11014_v32 = vpop.permute.xlu1 %3519  ;;  %v4015_v38 = vrot.slane %v3559_v22, %v9307_v21  ;;  %v3835_v22 = vrot.slane %v10756_v46, %v9307_v21  ;;  %v4261_v46 = vsel %vm1992_vm1, %v3831_v3, %v3827_v55  ;;  %v4275_v4 = vsel %vm1992_vm1, %v3895_v36, %v3891_v5 }
 0x3b8   : > { %3711 = vperm.xlu1 %7842, %v11010_v42  }
 0x3ba   : > { %4375 = vadd.xlane.f32.xlu0 %v4374_v43  ;;  %v11023_v2 = vpop.permute.xlu0 %3564 }
 0x3bb   : > { %v11029_v11 = vpop.permute.xlu1 %3525 }
 0x3bc   : > { %3717 = vperm.xlu1 %7842, %v11027_v41  }
 0x3be   : > { %4381 = vadd.xlane.f32.xlu0 %v4380_v39  ;;  %v11036_v53 = vpop.permute.xlu0 %3570 }
 0x3bf   : > { %v11041_v44 = vpop.permute.xlu1 %3531 }
 0x3c0   : > { %3723 = vperm.xlu1 %7842, %v11039_v61  }
 0x3c2   : > { %4387 = vadd.xlane.f32.xlu0 %v4386_v54  ;;  %v11045_v48 = vpop.permute.xlu0 %3576  ;;  %v3739_v54 = vrot.slane %v10516_v27, %v9307_v21 }
 0x3c3   : > { %v3538_v23 = vpop.permute.xlu1 %3537 }
 0x3c4   : > { %v3987_v35 = vrot.slane %v3538_v23, %v9307_v21 }
 0x3c6   : > { %v11048_v63 = vpop.permute.xlu0 %3582  ;;  %v4296_v57 = vsel %vm1992_vm1, %v3991_v17, %v3987_v35  ;;  %v4240_v35 = vsel %vm1992_vm1, %v3735_v29, %v3731_v6  ;;  %v3899_v17 = vrot.slane %v10870_v56, %v9307_v21 }
 0x3c7   : > { %v3544_v58 = vpop.permute.xlu1 %3543 }
 0x3c8   : > { %v3995_v14 = vrot.slane %v3544_v58, %v9307_v21  ;;  %v14302_v58 = vld [vmem:[#allocation249_spill] sm:$0xff] }
 0x3c9   : > { %v3747_v28 = vrot.slane %v14302_v58, %v9307_v21 }
 0x3ca   : > { %v4297_v30 = vsel %vm1994_vm2, %v3995_v14, %v4296_v57  ;;  %v11055_v12 = vpop.permute.xlu0 %3588  ;;  %v4262_v14 = vsel %vm1994_vm2, %v3835_v22, %v4261_v46  ;;  %v4241_v57 = vsel %vm1994_vm2, %v3739_v54, %v4240_v35  ;;  %v3963_v22 = vrot.slane %v11014_v32, %v9307_v21  ;;  %v14307_v54 = vld [vmem:[#allocation68_spill] sm:$0xff] }
 0x3cb   : > { %v3550_v49 = vpop.permute.xlu1 %3549  ;;  %v4298_v1 = vsel %vm1996_vm3, %v3999_v20, %v4297_v30  ;;  %v14303_v30 = vld [vmem:[#allocation250_spill] sm:$0xff]  ;;  %v3847_v3 = vrot.slane %v14307_v54, %v9307_v21 }
 0x3cc   : > { %v4003_v16 = vrot.slane %v3550_v49, %v9307_v21  ;;  %v3751_v20 = vrot.slane %v14303_v30, %v9307_v21  ;;  %v14304_v49 = vld [vmem:[#allocation66_spill] sm:$0xff] }
 0x3cd   : > { %v3839_v56 = vrot.slane %v14304_v49, %v9307_v21 }
 0x3ce   : > { %v4299_v13 = vsel %vm1998_vm4, %v4003_v16, %v4298_v1  ;;  %v11062_v8 = vpop.permute.xlu0 %3594  ;;  %v4242_v16 = vsel %vm1996_vm3, %v3743_v47, %v4241_v57  ;;  %v14305_v1 = vld [vmem:[#allocation251_spill] sm:$0xff]  ;;  %v3967_v57 = vrot.slane %v10887_v52, %v9307_v21 }
 0x3cf   : > { %v3556_v26 = vpop.permute.xlu1 %3555  ;;  %v4300_v43 = vsel %vm2000_vm5, %v4007_v62, %v4299_v13  ;;  %v3755_v13 = vrot.slane %v14305_v1, %v9307_v21  ;;  %v14306_v62 = vld [vmem:[#allocation252_spill] sm:$0xff]  ;;  %v4263_v25 = vsel %vm1996_vm3, %v3839_v56, %v4262_v14  ;;  %v4243_v6 = vsel %vm1998_vm4, %v3747_v28, %v4242_v16 }
 0x3d0   : > { %v4011_v60 = vrot.slane %v3556_v26, %v9307_v21  ;;  %v3759_v26 = vrot.slane %v14306_v62, %v9307_v21  ;;  %v4264_v55 = vsel %vm1998_vm4, %v3843_v15, %v4263_v25  ;;  %v3971_v28 = vrot.slane %v11029_v11, %v9307_v21  ;;  %v14308_v15 = vld [vmem:[#allocation259_spill] sm:$0xff] }
 0x3d1   : > { %v4265_v58 = vsel %vm2000_vm5, %v3847_v3, %v4264_v55  ;;  %v3911_v36 = vrot.slane %v14308_v15, %v9307_v21  ;;  %v4023_v56 = vrot.slane %v11023_v2, %v9307_v21  ;;  %v3979_v2 = vrot.slane %v11041_v44, %v9307_v21 }
 0x3d2   : > { %v11069_v59 = vpop.permute.xlu0 %3600  ;;  %v4301_v50 = vsel %vm2002_vm6, %v4011_v60, %v4300_v43  ;;  %v3907_v43 = vrot.slane %v10881_v18, %v9307_v21  ;;  %v3851_v18 = vrot.slane %v10788_v24, %v9307_v21  ;;  %v3915_v24 = vrot.slane %v10891_v31, %v9307_v21  ;;  %v14309_v31 = vld [vmem:[#allocation255_spill] sm:$0xff] }
 0x3d3   : > { %v11078_v9 = vpop.permute.xlu1 %3561  ;;  %v4302_v39 = vsel %vm2004_vm7, %v4015_v38, %v4301_v50  ;;  %v4276_v38 = vsel %vm1994_vm2, %v3899_v17, %v4275_v4  ;;  %v3955_v50 = vrot.slane %v10997_v40, %v9307_v21  ;;  %v3959_v40 = vrot.slane %v10877_v7, %v9307_v21 }
 0x3d4   : > { %v4392_v10 = vsel %vm2127_vm8, %v4302_v39, 0.0  ;;  %v3903_v39 = vrot.slane %v10784_v34, %v9307_v21  ;;  %v4019_v14 = vrot.slane %v11078_v9, %v9307_v21  ;;  %v3855_v49 = vrot.slane %v14309_v31, %v9307_v21 }
 0x3d5   : > { %4393 = vadd.xlane.f32.xlu0 %v4392_v10  ;;  %v4244_v10 = vsel %vm2000_vm5, %v3751_v20, %v4243_v6  ;;  %v4289_v32 = vsel %vm1992_vm1, %v3959_v40, %v3955_v50  ;;  %v4266_v20 = vsel %vm2002_vm6, %v3851_v18, %v4265_v58  ;;  %v14311_v6 = vld [vmem:[#allocation100_spill] sm:$0xff]  ;;  %v4055_v44 = vrot.slane %v11055_v12, %v9307_v21 }
 0x3d6   : > { %v11092_v23 = vpop.permute.xlu0 %3606  ;;  %v4277_v47 = vsel %vm1996_vm3, %v3903_v39, %v4276_v38  ;;  %v4245_v34 = vsel %vm2002_vm6, %v3755_v13, %v4244_v10  ;;  %v4290_v7 = vsel %vm1994_vm2, %v3963_v22, %v4289_v32  ;;  %v4267_v62 = vsel %vm2004_vm7, %v3855_v49, %v4266_v20 }
 0x3d7   : > { %v3568_v27 = vpop.permute.xlu1 %3567  ;;  %v4278_v35 = vsel %vm1998_vm4, %v3907_v43, %v4277_v47  ;;  %v4246_v17 = vsel %vm2004_vm7, %v3759_v26, %v4245_v34  ;;  %v4291_v9 = vsel %vm1996_vm3, %v3967_v57, %v4290_v7  ;;  %v14310_v43 = vld [vmem:[#allocation261_spill] sm:$0xff]  ;;  %v3975_v55 = vrot.slane %v14311_v6, %v9307_v21 }
 0x3d8   : > { %v4027_v30 = vrot.slane %v3568_v27, %v9307_v21  ;;  %v4368_v1 = vsel %vm2127_vm8, %v4246_v17, 0.0  ;;  %v4279_v13 = vsel %vm2000_vm5, %v3911_v36, %v4278_v35  ;;  %v4292_v52 = vsel %vm1998_vm4, %v3971_v28, %v4291_v9 }
 0x3d9   : > { %v4303_v27 = vsel %vm1992_vm1, %v4023_v56, %v4019_v14  ;;  %v4280_v26 = vsel %vm2002_vm6, %v3915_v24, %v4279_v13  ;;  %v3919_v50 = vrot.slane %v14310_v43, %v9307_v21  ;;  %v4031_v39 = vrot.slane %v11036_v53, %v9307_v21 }
 0x3da   : > { %v11116_v60 = vpop.permute.xlu0 %3612  ;;  %v4304_v4 = vsel %vm1994_vm2, %v4027_v30, %v4303_v27  ;;  %v4377_v54 = vsel %vm2127_vm8, %v4267_v62, 0.0  ;;  %v4293_v40 = vsel %vm2000_vm5, %v3975_v55, %v4292_v52  ;;  %v3983_v35 = vrot.slane %v10921_v33, %v9307_v21 }
 0x3db   : > { %v3574_v29 = vpop.permute.xlu1 %3573  ;;  %v4281_v18 = vsel %vm2004_vm7, %v3919_v50, %v4280_v26  ;;  %v4294_v12 = vsel %vm2002_vm6, %v3979_v2, %v4293_v40  ;;  %v4039_v32 = vrot.slane %v11045_v48, %v9307_v21  ;;  %v4063_v58 = vrot.slane %v11062_v8, %v9307_v21 }
 0x3dc   : > { %v4035_v25 = vrot.slane %v3574_v29, %v9307_v21  ;;  %v4305_v29 = vsel %vm1996_vm3, %v4031_v39, %v4304_v4  ;;  %v4383_v7 = vsel %vm2127_vm8, %v4281_v18, 0.0  ;;  %v4295_v14 = vsel %vm2004_vm7, %v3983_v35, %v4294_v12 }
 0x3dd   : > { %v4047_v36 = vrot.slane %v11048_v63, %v9307_v21  ;;  %v4071_v57 = vrot.slane %v11069_v59, %v9307_v21  ;;  %v4389_v20 = vsel %vm2127_vm8, %v4295_v14, 0.0  ;;  %v4079_v56 = vrot.slane %v11092_v23, %v9307_v21 }
 0x3de   : > { %v11138_v5 = vpop.permute.xlu0 %3618  ;;  %v4306_v47 = vsel %vm1998_vm4, %v4035_v25, %v4305_v29  ;;  %v4087_v62 = vrot.slane %v11116_v60, %v9307_v21 }
 0x3df   : > { %v3580_v46 = vpop.permute.xlu1 %3579  ;;  %v4307_v15 = vsel %vm2000_vm5, %v4039_v32, %v4306_v47 }
 0x3e0   : > { %v4043_v53 = vrot.slane %v3580_v46, %v9307_v21 }
 0x3e2   : > { %v11162_v11 = vpop.permute.xlu0 %3624  ;;  %v4308_v48 = vsel %vm2002_vm6, %v4043_v53, %v4307_v15 }
 0x3e3   : > { %v3586_v16 = vpop.permute.xlu1 %3585  ;;  %v4309_v49 = vsel %vm2004_vm7, %v4047_v36, %v4308_v48  ;;  %v4103_v60 = vrot.slane %v11162_v11, %v9307_v21 }
 0x3e4   : > { %4369 = vadd.xlane.f32.xlu1 %v4368_v1  ;;  %v4051_v38 = vrot.slane %v3586_v16, %v9307_v21  ;;  %v4395_v13 = vsel %vm2127_vm8, %v4309_v49, 0.0 }
 0x3e6   : > { %v11182_v22 = vpop.permute.xlu0 %3630  ;;  %v4310_v34 = vsel %vm1992_vm1, %v4055_v44, %v4051_v38  ;;  %v4095_v38 = vrot.slane %v11138_v5, %v9307_v21 }
 0x3e7   : > { %v3592_v10 = vpop.permute.xlu1 %3591 }
 0x3e8   : > { %v4059_v3 = vrot.slane %v3592_v10, %v9307_v21  ;;  %4378 = vadd.xlane.f32.xlu1 %v4377_v54  ;;  %v4111_v54 = vrot.slane %v11182_v22, %v9307_v21 }
 0x3ea   : > { %v4311_v17 = vsel %vm1994_vm2, %v4059_v3, %v4310_v34  ;;  %v3637_v28 = vpop.permute.xlu0 %3636 }
 0x3eb   : > { %v3598_v24 = vpop.permute.xlu1 %3597  ;;  %v4312_v33 = vsel %vm1996_vm3, %v4063_v58, %v4311_v17  ;;  %v4119_v11 = vrot.slane %v3637_v28, %v9307_v21 }
 0x3ec   : > { %v4067_v46 = vrot.slane %v3598_v24, %v9307_v21  ;;  %4384 = vadd.xlane.f32.xlu1 %v4383_v7 }
 0x3ee   : > { %v4313_v8 = vsel %vm1998_vm4, %v4067_v46, %v4312_v33  ;;  %v3643_v16 = vpop.permute.xlu0 %3642 }
 0x3ef   : > { %v3604_v30 = vpop.permute.xlu1 %3603  ;;  %v4314_v9 = vsel %vm2000_vm5, %v4071_v57, %v4313_v8  ;;  %v4127_v17 = vrot.slane %v3643_v16, %v9307_v21 }
 0x3f0   : > { %v4075_v31 = vrot.slane %v3604_v30, %v9307_v21  ;;  %4390 = vadd.xlane.f32.xlu1 %v4389_v20 }
 0x3f2   : > { %v4315_v63 = vsel %vm2002_vm6, %v4075_v31, %v4314_v9  ;;  %v3649_v26 = vpop.permute.xlu0 %3648 }
 0x3f3   : > { %v3610_v1 = vpop.permute.xlu1 %3609  ;;  %v4316_v59 = vsel %vm2004_vm7, %v4079_v56, %v4315_v63  ;;  %v4135_v14 = vrot.slane %v3649_v26, %v9307_v21 }
 0x3f4   : > { %4396 = vadd.xlane.f32.xlu1 %v4395_v13  ;;  %v4398_v52 = vsel %vm2127_vm8, %v4316_v59, 0.0  ;;  %v4083_v27 = vrot.slane %v3610_v1, %v9307_v21 }
 0x3f5   : > { %4399 = vadd.xlane.f32.xlu0 %v4398_v52 }
 0x3f6   : > { %v4317_v4 = vsel %vm1992_vm1, %v4087_v62, %v4083_v27  ;;  %v3655_v55 = vpop.permute.xlu0 %3654 }
 0x3f7   : > { %v3616_v23 = vpop.permute.xlu1 %3615  ;;  %v4143_v48 = vrot.slane %v3655_v55, %v9307_v21 }
 0x3f8   : > { %v4091_v2 = vrot.slane %v3616_v23, %v9307_v21 }
 0x3fa   : > { %v4318_v25 = vsel %vm1994_vm2, %v4091_v2, %v4317_v4  ;;  %v3661_v40 = vpop.permute.xlu0 %3660 }
 0x3fb   : > { %v3622_v43 = vpop.permute.xlu1 %3621  ;;  %v4319_v6 = vsel %vm1996_vm3, %v4095_v38, %v4318_v25  ;;  %v4151_v56 = vrot.slane %v3661_v40, %v9307_v21 }
 0x3fc   : > { %v4099_v50 = vrot.slane %v3622_v43, %v9307_v21 }
 0x3fe   : > { %v4320_v39 = vsel %vm1998_vm4, %v4099_v50, %v4319_v6  ;;  %v3667_v35 = vpop.permute.xlu0 %3666 }
 0x3ff   : > { %v3628_v44 = vpop.permute.xlu1 %3627  ;;  %v4321_v29 = vsel %vm2000_vm5, %v4103_v60, %v4320_v39  ;;  %v4159_v13 = vrot.slane %v3667_v35, %v9307_v21 }
 0x400   : > { %v4107_v10 = vrot.slane %v3628_v44, %v9307_v21 }
 0x402   : > { %v4322_v5 = vsel %vm2002_vm6, %v4107_v10, %v4321_v29  ;;  %v3673_v15 = vpop.permute.xlu0 %3672 }
 0x403   : > { %v3634_v3 = vpop.permute.xlu1 %3633  ;;  %v4323_v18 = vsel %vm2004_vm7, %v4111_v54, %v4322_v5  ;;  %v4167_v26 = vrot.slane %v3673_v15, %v9307_v21 }
 0x404   : > { %v4401_v47 = vsel %vm2127_vm8, %v4323_v18, 0.0  ;;  %v4115_v53 = vrot.slane %v3634_v3, %v9307_v21 }
 0x405   : > { %4402 = vadd.xlane.f32.xlu1 %v4401_v47 }
 0x406   : > { %v4324_v22 = vsel %vm1992_vm1, %v4119_v11, %v4115_v53  ;;  %v3679_v49 = vpop.permute.xlu0 %3678 }
 0x407   : > { %v3640_v34 = vpop.permute.xlu1 %3639  ;;  %v4175_v25 = vrot.slane %v3679_v49, %v9307_v21 }
 0x408   : > { %v4123_v12 = vrot.slane %v3640_v34, %v9307_v21 }
 0x40a   : > { %v4325_v32 = vsel %vm1994_vm2, %v4123_v12, %v4324_v22  ;;  %v3685_v52 = vpop.permute.xlu0 %3684 }
 0x40b   : > { %v3646_v58 = vpop.permute.xlu1 %3645  ;;  %v4326_v7 = vsel %vm1996_vm3, %v4127_v17, %v4325_v32  ;;  %v4183_v44 = vrot.slane %v3685_v52, %v9307_v21 }
 0x40c   : > { %v4131_v24 = vrot.slane %v3646_v58, %v9307_v21 }
 0x40e   : > { %v4327_v46 = vsel %vm1998_vm4, %v4131_v24, %v4326_v7  ;;  %v3691_v43 = vpop.permute.xlu0 %3690  ;;  %v14312_v7 = vld [vmem:[#allocation30_spill] sm:$0xff] }
 0x40f   : > { %v3652_v28 = vpop.permute.xlu1 %3651  ;;  %v4328_v36 = vsel %vm2000_vm5, %v4135_v14, %v4327_v46  ;;  %v4191_v18 = vrot.slane %v3691_v43, %v9307_v21  ;;  %v2679_v46 = vrot.slane %v10484_v45, %v14312_v7 }
 0x410   : > { %v4139_v33 = vrot.slane %v3652_v28, %v9307_v21  ;;  %v14313_v28 = vld [vmem:[#allocation223_spill] sm:$0xff] }
 0x411   : > { %v2687_v15 = vrot.slane %v10484_v45, %v14313_v28 }
 0x412   : > { %v4329_v8 = vsel %vm2002_vm6, %v4139_v33, %v4328_v36  ;;  %v3697_v54 = vpop.permute.xlu0 %3696  ;;  %v14314_v33 = vld [vmem:[#allocation99_spill] sm:$0xff]  ;;  %v14315_v36 = vld [vmem:[#allocation5_spill] sm:$0xff] }
 0x413   : > { %v3658_v57 = vpop.permute.xlu1 %3657  ;;  %v4330_v30 = vsel %vm2004_vm7, %v4143_v48, %v4329_v8  ;;  %v4199_v12 = vrot.slane %v3697_v54, %v9307_v21  ;;  %v2953_v48 = vsub.f32 %v14314_v33, %v2679_v46  ;;  %v2695_v8 = vrot.slane %v10484_v45, %v14315_v36  ;;  %v14329_v33 = vld [vmem:[#allocation8_spill] sm:$0xff] }
 0x414   : > { %v4404_v20 = vsel %vm2127_vm8, %v4330_v30, 0.0  ;;  %v4147_v31 = vrot.slane %v3658_v57, %v9307_v21  ;;  %v14316_v57 = vld [vmem:[#allocation101_spill] sm:$0xff] }
 0x415   : > { %4405 = vadd.xlane.f32.xlu0 %v4404_v20  ;;  %v2955_v30 = vsub.f32 %v14316_v57, %v2687_v15  ;;  %v3202_v20 = vmul.f32 1.442695, %v2953_v48  ;;  %v14330_v57 = vld [vmem:[#allocation231_spill] sm:$0xff] }
 0x416   : > { %v4331_v63 = vsel %vm1992_vm1, %v4151_v56, %v4147_v31  ;;  %v3703_v11 = vpop.permute.xlu0 %3702  ;;  %v14317_v31 = vld [vmem:[#allocation3_spill] sm:$0xff] }
 0x417   : > { %v3664_v9 = vpop.permute.xlu1 %3663  ;;  %v4207_v32 = vrot.slane %v3703_v11, %v9307_v21  ;;  %v2703_v49 = vrot.slane %v10484_v45, %v14317_v31  ;;  %v14318_v56 = vld [vmem:[#allocation103_spill] sm:$0xff]  ;;  %8091 = vpow2.f32 %v3202_v20 }
 0x418   : > { %v4155_v16 = vrot.slane %v3664_v9, %v9307_v21  ;;  %v2957_v9 = vsub.f32 %v14318_v56, %v2695_v8 }
 0x41a   : > { %v4332_v1 = vsel %vm1994_vm2, %v4155_v16, %v4331_v63  ;;  %v3206_v16 = vmul.f32 1.442695, %v2955_v30  ;;  %v14319_v63 = vld [vmem:[#allocation105_spill] sm:$0xff] }
 0x41b   : > { %v3670_v59 = vpop.permute.xlu1 %3669  ;;  %v4333_v62 = vsel %vm1996_vm3, %v4159_v13, %v4332_v1  ;;  %v2959_v1 = vsub.f32 %v14319_v63, %v2703_v49  ;;  %v3210_v13 = vmul.f32 1.442695, %v2957_v9  ;;  %v14331_v49 = vld [vmem:[#allocation233_spill] sm:$0xff] }
 0x41c   : > { %v4163_v27 = vrot.slane %v3670_v59, %v9307_v21  ;;  %8093 = vpow2.f32 %v3206_v16  ;;  %v14332_v16 = vld [vmem:[#allocation10_spill] sm:$0xff] }
 0x41d   : > { %8095 = vpow2.f32 %v3210_v13  ;;  %v3214_v59 = vmul.f32 1.442695, %v2959_v1 }
 0x41e   : > { %v4334_v23 = vsel %vm1998_vm4, %v4163_v27, %v4333_v62 }
 0x41f   : > { %v3676_v2 = vpop.permute.xlu1 %3675  ;;  %v4335_v38 = vsel %vm2000_vm5, %v4167_v26, %v4334_v23  ;;  %8097 = vpow2.f32 %v3214_v59 }
 0x420   : > { %v4171_v4 = vrot.slane %v3676_v2, %v9307_v21 }
 0x421   : > { %v11303_v52 = vpop.eup %8091 }
 0x422   : > { %v4336_v50 = vsel %vm2002_vm6, %v4171_v4, %v4335_v38 }
 0x423   : > { %v3682_v6 = vpop.permute.xlu1 %3681  ;;  %v4337_v55 = vsel %vm2004_vm7, %v4175_v25, %v4336_v50  ;;  %v14320_v50 = vld [vmem:[#allocation2_spill] sm:$0xff] }
 0x424   : > { %v4407_v39 = vsel %vm2127_vm8, %v4337_v55, 0.0  ;;  %v4179_v60 = vrot.slane %v3682_v6, %v9307_v21  ;;  %v14321_v55 = vld [vmem:[#allocation6_spill] sm:$0xff] }
 0x425   : > { %4408 = vadd.xlane.f32.xlu1 %v4407_v39 }
 0x426   : > { %v4338_v5 = vsel %vm1992_vm1, %v4183_v44, %v4179_v60  ;;  %v11306_v27 = vpop.eup %8093  ;;  %v14323_v44 = vld [vmem:[#allocation228_spill] sm:$0xff] }
 0x427   : > { %v3688_v10 = vpop.permute.xlu1 %3687  ;;  %v11309_v45 = vpop.eup %8095 }
 0x428   : > { %v4187_v29 = vrot.slane %v3688_v10, %v9307_v21 }
 0x429   : > { %v11312_v62 = vpop.eup %8097 }
 0x42a   : > { %v4339_v3 = vsel %vm1994_vm2, %v4187_v29, %v4338_v5  ;;  %v14324_v29 = vld [vmem:[#allocation230_spill] sm:$0xff] }
 0x42b   : > { %v3694_v40 = vpop.permute.xlu1 %3693  ;;  %v4340_v53 = vsel %vm1996_vm3, %v4191_v18, %v4339_v3 }
 0x42c   : > { %v4195_v47 = vrot.slane %v3694_v40, %v9307_v21 }
 0x42e   : > { %v4341_v34 = vsel %vm1998_vm4, %v4195_v47, %v4340_v53  ;;  %v14325_v47 = vld [vmem:[#allocation234_spill] sm:$0xff] }
 0x42f   : > { %v3700_v22 = vpop.permute.xlu1 %3699  ;;  %v4342_v17 = vsel %vm2000_vm5, %v4199_v12, %v4341_v34  ;;  %v14326_v34 = vld [vmem:[#allocation9_spill] sm:$0xff] }
 0x430   : > { %v4203_v35 = vrot.slane %v3700_v22, %v9307_v21 }
 0x432   : > { %v4343_v58 = vsel %vm2002_vm6, %v4203_v35, %v4342_v17  ;;  %v14327_v35 = vld [vmem:[#allocation227_spill] sm:$0xff] }
 0x433   : > { %v4344_v24 = vsel %vm2004_vm7, %v4207_v32, %v4343_v58  ;;  %v11315_v23 = vpop.permute.xlu1 %3705  ;;  %v14328_v58 = vld [vmem:[#allocation7_spill] sm:$0xff] }
 0x434   : > { %v4410_v14 = vsel %vm2127_vm8, %v4344_v24, 0.0 }
 0x435   : > { %4411 = vadd.xlane.f32.xlu0 %v4410_v14 }
 0x437   : > { %v11317_v26 = vpop.permute.xlu1 %3711 }
 0x43b   : > { %v11319_v2 = vpop.permute.xlu1 %3717 }
 0x43f   : > { %v11321_v4 = vpop.permute.xlu1 %3723 }
 0x443   : > { %v4373_v38 = vpop.xlane.xlu0 %4372 }
 0x447   : > { %v4376_v40 = vpop.xlane.xlu0 %4375 }
 0x44b   : > { %3708 = vperm.xlu0 %7841, %v11303_v52   ;;  %v4382_v59 = vpop.xlane.xlu0 %4381 }
 0x44f   : > { %3714 = vperm.xlu0 %7841, %v11306_v27  }
 0x453   : > { %3720 = vperm.xlu0 %7841, %v11309_v45  }
 0x457   : > { %3726 = vperm.xlu0 %7841, %v11312_v62  }
 0x471   : > { %v4370_v25 = vpop.xlane.xlu1 %4369 }
 0x472   : > { %8099 = vrcp.f32 %v4370_v25  ;;  %v14333_v25 = vld [vmem:[#allocation11_spill] sm:$0xff] }
 0x473   : > { %8101 = vrcp.f32 %v4373_v38 }
 0x474   : > { %8103 = vrcp.f32 %v4376_v40  ;;  %v4388_v40 = vpop.xlane.xlu0 %4387 }
 0x475   : > { %v4379_v15 = vpop.xlane.xlu1 %4378 }
 0x476   : > { %8105 = vrcp.f32 %v4379_v15 }
 0x477   : > { %8107 = vrcp.f32 %v4382_v59 }
 0x47c   : > { %v11323_v43 = vpop.eup %8099 }
 0x47d   : > { %v4451_v6 = vrot.slane %v11323_v43, %v14320_v50  ;;  %v4463_v60 = vrot.slane %v11323_v43, %v14313_v28  ;;  %v4471_v54 = vrot.slane %v11323_v43, %v14315_v36  ;;  %v4479_v3 = vrot.slane %v11323_v43, %v14317_v31  ;;  %v11344_v18 = vpop.eup %8101 }
 0x47e   : > { %v4487_v11 = vrot.slane %v11344_v18, %v14312_v7  ;;  %v4495_v22 = vrot.slane %v11344_v18, %v14313_v28  ;;  %v4503_v17 = vrot.slane %v11344_v18, %v14315_v36  ;;  %v4511_v46 = vrot.slane %v11344_v18, %v14317_v31  ;;  %v11370_v14 = vpop.eup %8103 }
 0x47f   : > { %v11328_v39 = vmul.f32 %v14321_v55, %v4451_v6  ;;  %v11334_v10 = vmul.f32 %v14323_v44, %v4463_v60  ;;  %v11340_v5 = vmul.f32 %v14324_v29, %v4471_v54  ;;  %v11348_v53 = vmul.f32 %v14325_v47, %v4479_v3  ;;  %v14334_v55 = vld [vmem:[#allocation237_spill] sm:$0xff]  ;;  %v14336_v54 = vld [vmem:[#allocation239_spill] sm:$0xff]  ;;  %v14338_v47 = vld [vmem:[#allocation12_spill] sm:$0xff] }
 0x480   : > { %v11354_v12 = vmul.f32 %v14326_v34, %v4487_v11  ;;  %v11360_v32 = vmul.f32 %v14327_v35, %v4495_v22  ;;  %v11366_v24 = vmul.f32 %v14328_v58, %v4503_v17  ;;  %v11374_v48 = vmul.f32 %v14329_v33, %v4511_v46  ;;  %v11396_v13 = vpop.eup %8105  ;;  %v11425_v35 = vpop.xlane.xlu0 %4393  ;;  %v14340_v58 = vld [vmem:[#allocation13_spill] sm:$0xff] }
 0x481   : > { %14322 = vst [vmem:[#allocation249_spill] sm:$0xff] %v11328_v39  ;;  %5345 = vperm.xlu0 %7841, %v11328_v39   ;;  %v4519_v8 = vrot.slane %v11370_v14, %v14312_v7  ;;  %v4527_v20 = vrot.slane %v11370_v14, %v14313_v28  ;;  %v4535_v9 = vrot.slane %v11370_v14, %v14315_v36  ;;  %v11422_v22 = vpop.eup %8107  ;;  %v4385_v17 = vpop.xlane.xlu1 %4384 }
 0x482   : > { %v4543_v1 = vrot.slane %v11370_v14, %v14317_v31  ;;  %v4551_v6 = vrot.slane %v11396_v13, %v14312_v7  ;;  %v4559_v44 = vrot.slane %v11396_v13, %v14313_v28  ;;  %v4567_v3 = vrot.slane %v11396_v13, %v14315_v36 }
 0x483   : > { %v11380_v30 = vmul.f32 %v14330_v57, %v4519_v8  ;;  %v11386_v56 = vmul.f32 %v14331_v49, %v4527_v20  ;;  %v11392_v63 = vmul.f32 %v14332_v16, %v4535_v9  ;;  %v4575_v34 = vrot.slane %v11396_v13, %v14317_v31  ;;  %v14342_v8 = vld [vmem:[#allocation14_spill] sm:$0xff]  ;;  %v14344_v9 = vld [vmem:[#allocation244_spill] sm:$0xff] }
 0x484   : > { %v11400_v38 = vmul.f32 %v14333_v25, %v4543_v1  ;;  %v11406_v60 = vmul.f32 %v14334_v55, %v4551_v6  ;;  %v11412_v29 = vmul.f32 %v14336_v54, %v4559_v44  ;;  %v11418_v11 = vmul.f32 %v14338_v47, %v4567_v3  ;;  %v11433_v33 = vpop.xlane.xlu0 %4399  ;;  %v14346_v25 = vld [vmem:[#allocation15_spill] sm:$0xff] }
 0x485   : > { %5354 = vperm.xlu0 %7841, %v11334_v10   ;;  %v11428_v46 = vmul.f32 %v14340_v58, %v4575_v34  ;;  %v4583_v15 = vrot.slane %v11422_v22, %v14312_v7  ;;  %8109 = vrcp.f32 %v4385_v17  ;;  %v4591_v20 = vrot.slane %v11422_v22, %v14313_v28  ;;  %v14348_v34 = vld [vmem:[#allocation24_spill] sm:$0xff] }
 0x486   : > { %14335 = vst [vmem:[#allocation250_spill] sm:$0xff] %v11406_v60  ;;  %14337 = vst [vmem:[#allocation66_spill] sm:$0xff] %v11412_v29  ;;  %v4599_v1 = vrot.slane %v11422_v22, %v14315_v36  ;;  %v4607_v55 = vrot.slane %v11422_v22, %v14317_v31  ;;  %v4211_v3 = vrot.slane %v11315_v23, %v9307_v21  ;;  %8111 = vrcp.f32 %v4388_v40  ;;  %v14350_v23 = vld [vmem:[#allocation26_spill] sm:$0xff] }
 0x487   : > { %14339 = vst [vmem:[#allocation251_spill] sm:$0xff] %v11418_v11  ;;  %14341 = vst [vmem:[#allocation252_spill] sm:$0xff] %v11428_v46  ;;  %v11436_v57 = vmul.f32 %v14342_v8, %v4583_v15  ;;  %v11444_v16 = vmul.f32 %v14344_v9, %v4591_v20  ;;  %v4219_v8 = vrot.slane %v11317_v26, %v9307_v21 }
 0x488   : > { %v11452_v6 = vmul.f32 %v14346_v25, %v4599_v1  ;;  %v11463_v17 = vmul.f32 %v14348_v34, %v4607_v55 }
 0x489   : > { %5360 = vperm.xlu0 %7841, %v11340_v5   ;;  %14343 = vst [vmem:[#allocation68_spill] sm:$0xff] %v11436_v57  ;;  %14345 = vst [vmem:[#allocation259_spill] sm:$0xff] %v11444_v16 }
 0x48a   : > { %14347 = vst [vmem:[#allocation255_spill] sm:$0xff] %v11452_v6  ;;  %14349 = vst [vmem:[#allocation261_spill] sm:$0xff] %v11463_v17 }
 0x48d   : > { %5366 = vperm.xlu0 %7841, %v11348_v53  }
 0x48f   : > { %v11456_v44 = vpop.eup %8109 }
 0x490   : > { %v4615_v58 = vrot.slane %v11456_v44, %v14312_v7  ;;  %v4623_v25 = vrot.slane %v11456_v44, %v14313_v28 }
 0x491   : > { %5372 = vperm.xlu0 %7841, %v11354_v12  }
 0x492   : > { %v11473_v1 = vmul.f32 %v14350_v23, %v4615_v58  ;;  %v4631_v58 = vrot.slane %v11456_v44, %v14315_v36  ;;  %v14354_v23 = vld [vmem:[#allocation31_spill] sm:$0xff] }
 0x494   : > { %14351 = vst [vmem:[#allocation100_spill] sm:$0xff] %v11473_v1 }
 0x495   : > { %5378 = vperm.xlu0 %7841, %v11360_v32  }
 0x499   : > { %5384 = vperm.xlu0 %7841, %v11366_v24  }
 0x49d   : > { %5390 = vperm.xlu0 %7841, %v11374_v48  }
 0x4a1   : > { %5396 = vperm.xlu0 %7841, %v11380_v30  }
 0x4a2   : > { %v11441_v49 = vpop.xlane.xlu0 %4405 }
 0x4a5   : > { %5402 = vperm.xlu0 %7841, %v11386_v56  }
 0x4a9   : > { %5408 = vperm.xlu0 %7841, %v11392_v63  }
 0x4ad   : > { %5414 = vperm.xlu0 %7841, %v11400_v38  }
 0x4b1   : > { %5420 = vperm.xlu0 %7841, %v11406_v60  }
 0x4b5   : > { %5426 = vperm.xlu0 %7841, %v11412_v29   ;;  %v14464_v29 = vld [vmem:[#allocation78_spill] sm:$0xff] }
 0x4b9   : > { %5432 = vperm.xlu0 %7841, %v11418_v11  }
 0x4bd   : > { %5438 = vperm.xlu0 %7841, %v11428_v46   ;;  %v14452_v46 = vld [vmem:[#allocation83_spill] sm:$0xff] }
 0x4c1   : > { %5444 = vperm.xlu0 %7841, %v11436_v57  }
 0x4c2   : > { %v11449_v59 = vpop.xlane.xlu0 %4411 }
 0x4c5   : > { %5450 = vperm.xlu0 %7841, %v11444_v16  }
 0x4c9   : > { %5456 = vperm.xlu0 %7841, %v11452_v6  }
 0x4ca   : > { %v3709_v54 = vpop.permute.xlu0 %3708 }
 0x4cb   : > { %v4215_v47 = vrot.slane %v3709_v54, %v9307_v21 }
 0x4cd   : > { %v4345_v15 = vsel %vm1992_vm1, %v4215_v47, %v4211_v3  ;;  %5462 = vperm.xlu0 %7841, %v11463_v17   ;;  %v4227_v3 = vrot.slane %v11319_v2, %v9307_v21  ;;  %v14352_v47 = vld [vmem:[#allocation28_spill] sm:$0xff]  ;;  %v14432_v17 = vld [vmem:[#allocation73_spill] sm:$0xff] }
 0x4ce   : > { %v3715_v20 = vpop.permute.xlu0 %3714  ;;  %v4346_v55 = vsel %vm1994_vm2, %v4219_v8, %v4345_v15  ;;  %v11484_v34 = vmul.f32 %v14352_v47, %v4623_v25  ;;  %v4235_v8 = vrot.slane %v11321_v4, %v9307_v21  ;;  %v4639_v25 = vrot.slane %v11456_v44, %v14317_v31  ;;  %v4391_v4 = vpop.xlane.xlu1 %4390  ;;  %v14356_v47 = vld [vmem:[#allocation33_spill] sm:$0xff] }
 0x4cf   : > { %v4223_v9 = vrot.slane %v3715_v20, %v9307_v21  ;;  %8113 = vrcp.f32 %v4391_v4 }
 0x4d0   : > { %14353 = vst [vmem:[#allocation30_spill] sm:$0xff] %v11484_v34  ;;  %8115 = vrcp.f32 %v11425_v35  ;;  %v14375_v35 = vld [vmem:[#allocation224_spill] sm:$0xff] }
 0x4d1   : > { %v4347_v54 = vsel %vm1996_vm3, %v4223_v9, %v4346_v55  ;;  %5468 = vperm.xlu0 %7841, %v11473_v1   ;;  %v11495_v55 = vmul.f32 %v14354_v23, %v4631_v58 }
 0x4d2   : > { %v3721_v26 = vpop.permute.xlu0 %3720  ;;  %v4348_v20 = vsel %vm1998_vm4, %v4227_v3, %v4347_v54 }
 0x4d3   : > { %v4231_v40 = vrot.slane %v3721_v26, %v9307_v21  ;;  %14355 = vst [vmem:[#allocation223_spill] sm:$0xff] %v11495_v55  ;;  %v11499_v26 = vpop.eup %8111 }
 0x4d4   : > { %v4647_v58 = vrot.slane %v11499_v26, %v14312_v7  ;;  %v4671_v4 = vrot.slane %v11499_v26, %v14317_v31 }
 0x4d5   : > { %v4349_v15 = vsel %vm2000_vm5, %v4231_v40, %v4348_v20  ;;  %5474 = vperm.xlu0 %7841, %v11484_v34   ;;  %v11506_v20 = vmul.f32 %v14356_v47, %v4639_v25  ;;  %v4663_v25 = vrot.slane %v11499_v26, %v14315_v36 }
 0x4d6   : > { %v3727_v9 = vpop.permute.xlu0 %3726  ;;  %v4350_v54 = vsel %vm2002_vm6, %v4235_v8, %v4349_v15  ;;  %v4655_v15 = vrot.slane %v11499_v26, %v14313_v28  ;;  %v14360_v8 = vld [vmem:[#allocation37_spill] sm:$0xff] }
 0x4d7   : > { %v4239_v2 = vrot.slane %v3727_v9, %v9307_v21  ;;  %14357 = vst [vmem:[#allocation99_spill] sm:$0xff] %v11506_v20  ;;  %v14358_v9 = vld [vmem:[#allocation35_spill] sm:$0xff] }
 0x4d8   : > { %v11512_v23 = vmul.f32 %v14358_v9, %v4647_v58  ;;  %v14364_v58 = vld [vmem:[#allocation225_spill] sm:$0xff] }
 0x4d9   : > { %5480 = vperm.xlu0 %7841, %v11495_v55   ;;  %v4351_v3 = vsel %vm2004_vm7, %v4239_v2, %v4350_v54  ;;  %v11518_v2 = vmul.f32 %v14360_v8, %v4655_v15  ;;  %v4455_v54 = vrot.slane %v11323_v43, %v14312_v7  ;;  %v11530_v47 = vpop.eup %8113  ;;  %v14365_v15 = vld [vmem:[#allocation222_spill] sm:$0xff]  ;;  %v14400_v55 = vld [vmem:[#allocation57_spill] sm:$0xff] }
 0x4da   : > { %v4413_v40 = vsel %vm2127_vm8, %v4351_v3, 0.0  ;;  %14359 = vst [vmem:[#allocation5_spill] sm:$0xff] %v11512_v23  ;;  %v14362_v3 = vld [vmem:[#allocation39_spill] sm:$0xff]  ;;  %v4459_v8 = vrot.slane %v11323_v43, %v14365_v15 }
 0x4db   : > { %4414 = vadd.xlane.f32.xlu1 %v4413_v40  ;;  %14361 = vst [vmem:[#allocation101_spill] sm:$0xff] %v11518_v2  ;;  %v11526_v40 = vmul.f32 %v14362_v3, %v4663_v25  ;;  %v11534_v9 = vmul.f32 %v14364_v58, %v4455_v54  ;;  %v4679_v25 = vrot.slane %v11530_v47, %v14312_v7  ;;  %v14368_v3 = vld [vmem:[#allocation226_spill] sm:$0xff]  ;;  %v14370_v54 = vld [vmem:[#allocation4_spill] sm:$0xff] }
 0x4dc   : > { %v4467_v58 = vrot.slane %v11323_v43, %v14370_v54 }
 0x4dd   : > { %5486 = vperm.xlu0 %7841, %v11506_v20   ;;  %14363 = vst [vmem:[#allocation3_spill] sm:$0xff] %v11526_v40 }
 0x4e1   : > { %5492 = vperm.xlu0 %7841, %v11512_v23   ;;  %v14371_v23 = vld [vmem:[#allocation43_spill] sm:$0xff] }
 0x4e2   : > { %v11552_v61 = vmul.f32 %v14371_v23, %v4679_v25  ;;  %v4695_v23 = vrot.slane %v11530_v47, %v14315_v36  ;;  %v14378_v25 = vld [vmem:[#allocation232_spill] sm:$0xff] }
 0x4e4   : > { %14372 = vst [vmem:[#allocation2_spill] sm:$0xff] %v11552_v61 }
 0x4e5   : > { %5498 = vperm.xlu0 %7841, %v11518_v2   ;;  %v14366_v2 = vld [vmem:[#allocation29_spill] sm:$0xff] }
 0x4e6   : > { %v11539_v39 = vmul.f32 %v14366_v2, %v4671_v4  ;;  %v4687_v2 = vrot.slane %v11530_v47, %v14313_v28  ;;  %v14373_v4 = vld [vmem:[#allocation229_spill] sm:$0xff] }
 0x4e8   : > { %14367 = vst [vmem:[#allocation103_spill] sm:$0xff] %v11539_v39 }
 0x4e9   : > { %5504 = vperm.xlu0 %7841, %v11526_v40   ;;  %v11547_v40 = vmul.f32 %v14368_v3, %v4459_v8  ;;  %v4475_v8 = vrot.slane %v11323_v43, %v14375_v35  ;;  %v14376_v3 = vld [vmem:[#allocation45_spill] sm:$0xff]  ;;  %v4703_v43 = vrot.slane %v11530_v47, %v14317_v31 }
 0x4ea   : > { %v11564_v41 = vmul.f32 %v14376_v3, %v4687_v2  ;;  %v11580_v2 = vpop.eup %8115  ;;  %v14382_v3 = vld [vmem:[#allocation235_spill] sm:$0xff] }
 0x4eb   : > { %14369 = vst [vmem:[#allocation105_spill] sm:$0xff] %v11547_v40 }
 0x4ec   : > { %5348 = vperm.xlu1 %7842, %v11534_v9   ;;  %14377 = vst [vmem:[#allocation228_spill] sm:$0xff] %v11564_v41 }
 0x4ed   : > { %5510 = vperm.xlu0 %7841, %v11539_v39   ;;  %v11559_v39 = vmul.f32 %v14373_v4, %v4467_v58  ;;  %v4483_v58 = vrot.slane %v11344_v18, %v14320_v50  ;;  %v14380_v4 = vld [vmem:[#allocation47_spill] sm:$0xff] }
 0x4ef   : > { %14374 = vst [vmem:[#allocation6_spill] sm:$0xff] %v11559_v39 }
 0x4f0   : > { %5351 = vperm.xlu1 %7842, %v11547_v40   ;;  %v11571_v40 = vmul.f32 %v14378_v25, %v4475_v8  ;;  %v4491_v8 = vrot.slane %v11344_v18, %v14365_v15  ;;  %v4397_v25 = vpop.xlane.xlu1 %4396 }
 0x4f1   : > { %5516 = vperm.xlu0 %7841, %v11552_v61   ;;  %v11576_v61 = vmul.f32 %v14380_v4, %v4695_v23  ;;  %v4711_v23 = vrot.slane %v11580_v2, %v14312_v7  ;;  %8117 = vrcp.f32 %v4397_v25  ;;  %v14386_v4 = vld [vmem:[#allocation236_spill] sm:$0xff] }
 0x4f2   : > { %14379 = vst [vmem:[#allocation230_spill] sm:$0xff] %v11571_v40  ;;  %8119 = vrcp.f32 %v11433_v33 }
 0x4f3   : > { %14381 = vst [vmem:[#allocation234_spill] sm:$0xff] %v11576_v61 }
 0x4f4   : > { %5357 = vperm.xlu1 %7842, %v11559_v39   ;;  %v14384_v39 = vld [vmem:[#allocation38_spill] sm:$0xff]  ;;  %v4403_v34 = vpop.xlane.xlu1 %4402 }
 0x4f5   : > { %5522 = vperm.xlu0 %7841, %v11564_v41   ;;  %v11585_v41 = vmul.f32 %v14382_v3, %v4483_v58  ;;  %v11590_v20 = vmul.f32 %v14384_v39, %v4703_v43  ;;  %v4499_v58 = vrot.slane %v11344_v18, %v14370_v54  ;;  %v14388_v3 = vld [vmem:[#allocation51_spill] sm:$0xff]  ;;  %v4719_v39 = vrot.slane %v11580_v2, %v14313_v28 }
 0x4f6   : > { %8121 = vrcp.f32 %v4403_v34 }
 0x4f7   : > { %14383 = vst [vmem:[#allocation9_spill] sm:$0xff] %v11585_v41  ;;  %14385 = vst [vmem:[#allocation227_spill] sm:$0xff] %v11590_v20  ;;  %8123 = vrcp.f32 %v11441_v49 }
 0x4f8   : > { %5363 = vperm.xlu1 %7842, %v11571_v40   ;;  %v11602_v40 = vmul.f32 %v14388_v3, %v4711_v23  ;;  %v4727_v23 = vrot.slane %v11580_v2, %v14315_v36  ;;  %v4409_v16 = vpop.xlane.xlu1 %4408 }
 0x4f9   : > { %5528 = vperm.xlu0 %7841, %v11576_v61   ;;  %v11597_v61 = vmul.f32 %v14386_v4, %v4491_v8  ;;  %v4507_v8 = vrot.slane %v11344_v18, %v14375_v35  ;;  %v14392_v4 = vld [vmem:[#allocation53_spill] sm:$0xff]  ;;  %8125 = vrcp.f32 %v4409_v16 }
 0x4fa   : > { %14389 = vst [vmem:[#allocation8_spill] sm:$0xff] %v11602_v40  ;;  %8127 = vrcp.f32 %v11449_v59 }
 0x4fb   : > { %14387 = vst [vmem:[#allocation7_spill] sm:$0xff] %v11597_v61 }
 0x4fc   : > { %5369 = vperm.xlu1 %7842, %v11585_v41   ;;  %v11616_v41 = vmul.f32 %v14392_v4, %v4719_v39  ;;  %v4735_v39 = vrot.slane %v11580_v2, %v14317_v31  ;;  %v11634_v4 = vpop.eup %8117 }
 0x4fd   : > { %5534 = vperm.xlu0 %7841, %v11590_v20   ;;  %v14390_v20 = vld [vmem:[#allocation238_spill] sm:$0xff] }
 0x4fe   : > { %v11611_v25 = vmul.f32 %v14390_v20, %v4499_v58  ;;  %14393 = vst [vmem:[#allocation233_spill] sm:$0xff] %v11616_v41  ;;  %v4515_v20 = vrot.slane %v11370_v14, %v14320_v50  ;;  %v14396_v58 = vld [vmem:[#allocation55_spill] sm:$0xff] }
 0x4ff   : > { %v11630_v18 = vmul.f32 %v14396_v58, %v4727_v23  ;;  %v11646_v23 = vmul.f32 %v14400_v55, %v4735_v39  ;;  %v4743_v58 = vrot.slane %v11634_v4, %v14312_v7  ;;  %v4751_v39 = vrot.slane %v11634_v4, %v14313_v28 }
 0x500   : > { %5375 = vperm.xlu1 %7842, %v11597_v61   ;;  %v11607_v43 = vpop.permute.xlu0 %5345  ;;  %14391 = vst [vmem:[#allocation231_spill] sm:$0xff] %v11611_v25  ;;  %v14394_v61 = vld [vmem:[#allocation240_spill] sm:$0xff] }
 0x501   : > { %5540 = vperm.xlu0 %7841, %v11602_v40   ;;  %v11625_v40 = vmul.f32 %v14394_v61, %v4507_v8  ;;  %14397 = vst [vmem:[#allocation11_spill] sm:$0xff] %v11630_v18  ;;  %v4523_v8 = vrot.slane %v11370_v14, %v14365_v15  ;;  %14401 = vst [vmem:[#allocation239_spill] sm:$0xff] %v11646_v23 }
 0x503   : > { %14395 = vst [vmem:[#allocation10_spill] sm:$0xff] %v11625_v40 }
 0x504   : > { %5381 = vperm.xlu1 %7842, %v11611_v25   ;;  %v11621_v3 = vpop.permute.xlu0 %5354 }
 0x505   : > { %5546 = vperm.xlu0 %7841, %v11616_v41   ;;  %v14398_v41 = vld [vmem:[#allocation241_spill] sm:$0xff] }
 0x506   : > { %v11641_v61 = vmul.f32 %v14398_v41, %v4515_v20  ;;  %v4531_v20 = vrot.slane %v11370_v14, %v14370_v54 }
 0x508   : > { %5387 = vperm.xlu1 %7842, %v11625_v40   ;;  %v11637_v25 = vpop.permute.xlu0 %5360  ;;  %14399 = vst [vmem:[#allocation237_spill] sm:$0xff] %v11641_v61  ;;  %v14404_v40 = vld [vmem:[#allocation59_spill] sm:$0xff] }
 0x509   : > { %5552 = vperm.xlu0 %7841, %v11630_v18   ;;  %v14402_v18 = vld [vmem:[#allocation242_spill] sm:$0xff]  ;;  %v11661_v55 = vmul.f32 %v14404_v40, %v4743_v58  ;;  %v4759_v40 = vrot.slane %v11634_v4, %v14315_v36 }
 0x50a   : > { %v11656_v41 = vmul.f32 %v14402_v18, %v4523_v8  ;;  %v4539_v18 = vrot.slane %v11370_v14, %v14375_v35  ;;  %v14408_v8 = vld [vmem:[#allocation61_spill] sm:$0xff] }
 0x50b   : > { %14405 = vst [vmem:[#allocation13_spill] sm:$0xff] %v11661_v55  ;;  %v11675_v0 = vmul.f32 %v14408_v8, %v4751_v39  ;;  %v4767_v39 = vrot.slane %v11634_v4, %v14317_v31  ;;  %v11693_v8 = vpop.eup %8119 }
 0x50c   : > { %5393 = vperm.xlu1 %7842, %v11641_v61   ;;  %v11651_v42 = vpop.permute.xlu0 %5366  ;;  %14403 = vst [vmem:[#allocation12_spill] sm:$0xff] %v11656_v41  ;;  %v4775_v1 = vrot.slane %v11693_v8, %v14312_v7 }
 0x50d   : > { %5558 = vperm.xlu0 %7841, %v11646_v23   ;;  %v14406_v23 = vld [vmem:[#allocation243_spill] sm:$0xff]  ;;  %14409 = vst [vmem:[#allocation244_spill] sm:$0xff] %v11675_v0 }
 0x50e   : > { %v11670_v33 = vmul.f32 %v14406_v23, %v4531_v20  ;;  %v4547_v23 = vrot.slane %v11396_v13, %v14320_v50  ;;  %v14412_v20 = vld [vmem:[#allocation63_spill] sm:$0xff]  ;;  %v11719_v37 = vmul.f32 %v14420_v51, %v4775_v1  ;;  %v4791_v51 = vrot.slane %v11693_v8, %v14315_v36 }
 0x50f   : > { %v11689_v14 = vmul.f32 %v14412_v20, %v4759_v40  ;;  %v14416_v40 = vld [vmem:[#allocation65_spill] sm:$0xff] }
 0x510   : > { %5399 = vperm.xlu1 %7842, %v11656_v41   ;;  %v11666_v61 = vpop.permute.xlu0 %5372  ;;  %14407 = vst [vmem:[#allocation14_spill] sm:$0xff] %v11670_v33  ;;  %v14410_v41 = vld [vmem:[#allocation245_spill] sm:$0xff]  ;;  %v11705_v20 = vmul.f32 %v14416_v40, %v4767_v39  ;;  %14421 = vst [vmem:[#allocation33_spill] sm:$0xff] %v11719_v37  ;;  %v4783_v39 = vrot.slane %v11693_v8, %v14313_v28 }
 0x511   : > { %5564 = vperm.xlu0 %7841, %v11661_v55   ;;  %v11684_v55 = vmul.f32 %v14410_v41, %v4539_v18  ;;  %14413 = vst [vmem:[#allocation24_spill] sm:$0xff] %v11689_v14  ;;  %v4555_v18 = vrot.slane %v11396_v13, %v14365_v15 }
 0x512   : > { %14417 = vst [vmem:[#allocation28_spill] sm:$0xff] %v11705_v20 }
 0x513   : > { %14411 = vst [vmem:[#allocation15_spill] sm:$0xff] %v11684_v55 }
 0x514   : > { %5405 = vperm.xlu1 %7842, %v11670_v33   ;;  %v11680_v58 = vpop.permute.xlu0 %5378 }
 0x515   : > { %5570 = vperm.xlu0 %7841, %v11675_v0   ;;  %v14414_v0 = vld [vmem:[#allocation246_spill] sm:$0xff] }
 0x516   : > { %v11700_v41 = vmul.f32 %v14414_v0, %v4547_v23  ;;  %v4563_v23 = vrot.slane %v11396_v13, %v14370_v54 }
 0x518   : > { %5411 = vperm.xlu1 %7842, %v11684_v55   ;;  %v11696_v33 = vpop.permute.xlu0 %5384  ;;  %14415 = vst [vmem:[#allocation26_spill] sm:$0xff] %v11700_v41 }
 0x519   : > { %5576 = vperm.xlu0 %7841, %v11689_v14   ;;  %v14418_v14 = vld [vmem:[#allocation16_spill] sm:$0xff] }
 0x51a   : > { %v11714_v0 = vmul.f32 %v14418_v14, %v4555_v18  ;;  %v4571_v14 = vrot.slane %v11396_v13, %v14375_v35  ;;  %v14424_v18 = vld [vmem:[#allocation69_spill] sm:$0xff] }
 0x51c   : > { %5417 = vperm.xlu1 %7842, %v11700_v41   ;;  %v11710_v55 = vpop.permute.xlu0 %5390  ;;  %14419 = vst [vmem:[#allocation31_spill] sm:$0xff] %v11714_v0  ;;  %v11733_v41 = vmul.f32 %v14424_v18, %v4783_v39  ;;  %v4799_v39 = vrot.slane %v11693_v8, %v14317_v31  ;;  %v11751_v18 = vpop.eup %8121 }
 0x51d   : > { %5582 = vperm.xlu0 %7841, %v11705_v20   ;;  %v14422_v20 = vld [vmem:[#allocation17_spill] sm:$0xff] }
 0x51e   : > { %v11728_v34 = vmul.f32 %v14422_v20, %v4563_v23  ;;  %14425 = vst [vmem:[#allocation37_spill] sm:$0xff] %v11733_v41  ;;  %v4579_v20 = vrot.slane %v11422_v22, %v14320_v50  ;;  %v14428_v23 = vld [vmem:[#allocation71_spill] sm:$0xff] }
 0x51f   : > { %v11747_v13 = vmul.f32 %v14428_v23, %v4791_v51  ;;  %v11763_v51 = vmul.f32 %v14432_v17, %v4799_v39  ;;  %v4807_v23 = vrot.slane %v11751_v18, %v14312_v7  ;;  %v4815_v39 = vrot.slane %v11751_v18, %v14313_v28 }
 0x520   : > { %5423 = vperm.xlu1 %7842, %v11714_v0   ;;  %v11724_v40 = vpop.permute.xlu0 %5396  ;;  %14423 = vst [vmem:[#allocation35_spill] sm:$0xff] %v11728_v34  ;;  %v14426_v0 = vld [vmem:[#allocation19_spill] sm:$0xff] }
 0x521   : > { %5588 = vperm.xlu0 %7841, %v11719_v37   ;;  %v11742_v37 = vmul.f32 %v14426_v0, %v4571_v14  ;;  %14429 = vst [vmem:[#allocation225_spill] sm:$0xff] %v11747_v13  ;;  %v4587_v14 = vrot.slane %v11422_v22, %v14365_v15  ;;  %14433 = vst [vmem:[#allocation29_spill] sm:$0xff] %v11763_v51 }
 0x523   : > { %14427 = vst [vmem:[#allocation39_spill] sm:$0xff] %v11742_v37 }
 0x524   : > { %5429 = vperm.xlu1 %7842, %v11728_v34   ;;  %v11738_v1 = vpop.permute.xlu0 %5402 }
 0x525   : > { %5594 = vperm.xlu0 %7841, %v11733_v41   ;;  %v14430_v41 = vld [vmem:[#allocation20_spill] sm:$0xff] }
 0x526   : > { %v11758_v0 = vmul.f32 %v14430_v41, %v4579_v20  ;;  %v4595_v20 = vrot.slane %v11422_v22, %v14370_v54 }
 0x528   : > { %5435 = vperm.xlu1 %7842, %v11742_v37   ;;  %v11754_v34 = vpop.permute.xlu0 %5408  ;;  %14431 = vst [vmem:[#allocation222_spill] sm:$0xff] %v11758_v0  ;;  %v14436_v37 = vld [vmem:[#allocation75_spill] sm:$0xff] }
 0x529   : > { %5600 = vperm.xlu0 %7841, %v11747_v13   ;;  %v14434_v13 = vld [vmem:[#allocation21_spill] sm:$0xff]  ;;  %v11778_v17 = vmul.f32 %v14436_v37, %v4807_v23  ;;  %v4823_v37 = vrot.slane %v11751_v18, %v14315_v36 }
 0x52a   : > { %v11773_v41 = vmul.f32 %v14434_v13, %v4587_v14  ;;  %v4603_v13 = vrot.slane %v11422_v22, %v14375_v35  ;;  %v14440_v14 = vld [vmem:[#allocation77_spill] sm:$0xff] }
 0x52b   : > { %14437 = vst [vmem:[#allocation4_spill] sm:$0xff] %v11778_v17  ;;  %v11792_v19 = vmul.f32 %v14440_v14, %v4815_v39  ;;  %v4831_v39 = vrot.slane %v11751_v18, %v14317_v31  ;;  %v11810_v14 = vpop.eup %8123 }
 0x52c   : > { %5441 = vperm.xlu1 %7842, %v11758_v0   ;;  %v11768_v6 = vpop.permute.xlu0 %5414  ;;  %14435 = vst [vmem:[#allocation226_spill] sm:$0xff] %v11773_v41  ;;  %v4839_v57 = vrot.slane %v11810_v14, %v14312_v7 }
 0x52d   : > { %5606 = vperm.xlu0 %7841, %v11763_v51   ;;  %v14438_v51 = vld [vmem:[#allocation23_spill] sm:$0xff]  ;;  %14441 = vst [vmem:[#allocation229_spill] sm:$0xff] %v11792_v19 }
 0x52e   : > { %v11787_v49 = vmul.f32 %v14438_v51, %v4595_v20  ;;  %v4611_v51 = vrot.slane %v11456_v44, %v14320_v50  ;;  %v14444_v20 = vld [vmem:[#allocation79_spill] sm:$0xff]  ;;  %v11836_v11 = vmul.f32 %v14452_v46, %v4839_v57  ;;  %v4855_v46 = vrot.slane %v11810_v14, %v14315_v36 }
 0x52f   : > { %v11806_v22 = vmul.f32 %v14444_v20, %v4823_v37  ;;  %v14448_v37 = vld [vmem:[#allocation70_spill] sm:$0xff] }
 0x530   : > { %5447 = vperm.xlu1 %7842, %v11773_v41   ;;  %v11783_v0 = vpop.permute.xlu0 %5420  ;;  %14439 = vst [vmem:[#allocation43_spill] sm:$0xff] %v11787_v49  ;;  %v14442_v41 = vld [vmem:[#allocation25_spill] sm:$0xff]  ;;  %v11822_v20 = vmul.f32 %v14448_v37, %v4831_v39  ;;  %14453 = vst [vmem:[#allocation38_spill] sm:$0xff] %v11836_v11  ;;  %v4847_v39 = vrot.slane %v11810_v14, %v14313_v28 }
 0x531   : > { %5612 = vperm.xlu0 %7841, %v11778_v17   ;;  %v11801_v17 = vmul.f32 %v14442_v41, %v4603_v13  ;;  %14445 = vst [vmem:[#allocation45_spill] sm:$0xff] %v11806_v22  ;;  %v4619_v13 = vrot.slane %v11456_v44, %v14365_v15 }
 0x532   : > { %14449 = vst [vmem:[#allocation47_spill] sm:$0xff] %v11822_v20 }
 0x533   : > { %14443 = vst [vmem:[#allocation224_spill] sm:$0xff] %v11801_v17 }
 0x534   : > { %5453 = vperm.xlu1 %7842, %v11787_v49   ;;  %v11797_v23 = vpop.permute.xlu0 %5426 }
 0x535   : > { %5618 = vperm.xlu0 %7841, %v11792_v19   ;;  %v14446_v19 = vld [vmem:[#allocation27_spill] sm:$0xff] }
 0x536   : > { %v11817_v41 = vmul.f32 %v14446_v19, %v4611_v51  ;;  %v4627_v51 = vrot.slane %v11456_v44, %v14370_v54 }
 0x538   : > { %5459 = vperm.xlu1 %7842, %v11801_v17   ;;  %v11813_v49 = vpop.permute.xlu0 %5432  ;;  %14447 = vst [vmem:[#allocation232_spill] sm:$0xff] %v11817_v41 }
 0x539   : > { %5624 = vperm.xlu0 %7841, %v11806_v22   ;;  %v14450_v22 = vld [vmem:[#allocation247_spill] sm:$0xff] }
 0x53a   : > { %v11831_v19 = vmul.f32 %v14450_v22, %v4619_v13  ;;  %v4635_v22 = vrot.slane %v11456_v44, %v14375_v35  ;;  %v14456_v13 = vld [vmem:[#allocation85_spill] sm:$0xff] }
 0x53c   : > { %5465 = vperm.xlu1 %7842, %v11817_v41   ;;  %v11827_v17 = vpop.permute.xlu0 %5438  ;;  %14451 = vst [vmem:[#allocation235_spill] sm:$0xff] %v11831_v19  ;;  %v11850_v41 = vmul.f32 %v14456_v13, %v4847_v39  ;;  %v4863_v39 = vrot.slane %v11810_v14, %v14317_v31  ;;  %v11868_v13 = vpop.eup %8125 }
 0x53d   : > { %5630 = vperm.xlu0 %7841, %v11822_v20   ;;  %v14454_v20 = vld [vmem:[#allocation32_spill] sm:$0xff] }
 0x53e   : > { %v11845_v16 = vmul.f32 %v14454_v20, %v4627_v51  ;;  %14457 = vst [vmem:[#allocation51_spill] sm:$0xff] %v11850_v41  ;;  %v4643_v20 = vrot.slane %v11499_v26, %v14320_v50  ;;  %v14460_v51 = vld [vmem:[#allocation87_spill] sm:$0xff] }
 0x53f   : > { %v11864_v44 = vmul.f32 %v14460_v51, %v4855_v46  ;;  %v11880_v46 = vmul.f32 %v14464_v29, %v4863_v39  ;;  %v4871_v51 = vrot.slane %v11868_v13, %v14312_v7  ;;  %v4879_v39 = vrot.slane %v11868_v13, %v14313_v28 }
 0x540   : > { %5471 = vperm.xlu1 %7842, %v11831_v19   ;;  %v11841_v37 = vpop.permute.xlu0 %5444  ;;  %14455 = vst [vmem:[#allocation236_spill] sm:$0xff] %v11845_v16  ;;  %v14458_v19 = vld [vmem:[#allocation34_spill] sm:$0xff] }
 0x541   : > { %5636 = vperm.xlu0 %7841, %v11836_v11   ;;  %v11859_v11 = vmul.f32 %v14458_v19, %v4635_v22  ;;  %14461 = vst [vmem:[#allocation53_spill] sm:$0xff] %v11864_v44  ;;  %v4651_v22 = vrot.slane %v11499_v26, %v14365_v15  ;;  %14465 = vst [vmem:[#allocation55_spill] sm:$0xff] %v11880_v46 }
 0x543   : > { %14459 = vst [vmem:[#allocation238_spill] sm:$0xff] %v11859_v11 }
 0x544   : > { %5477 = vperm.xlu1 %7842, %v11845_v16   ;;  %v11855_v57 = vpop.permute.xlu0 %5450 }
 0x545   : > { %5642 = vperm.xlu0 %7841, %v11850_v41   ;;  %v14462_v41 = vld [vmem:[#allocation36_spill] sm:$0xff] }
 0x546   : > { %v11875_v19 = vmul.f32 %v14462_v41, %v4643_v20  ;;  %v4659_v20 = vrot.slane %v11499_v26, %v14370_v54 }
 0x548   : > { %5483 = vperm.xlu1 %7842, %v11859_v11   ;;  %v11871_v16 = vpop.permute.xlu0 %5456  ;;  %14463 = vst [vmem:[#allocation240_spill] sm:$0xff] %v11875_v19  ;;  %v14469_v11 = vld [vmem:[#allocation91_spill] sm:$0xff] }
 0x549   : > { %5648 = vperm.xlu0 %7841, %v11864_v44   ;;  %v14467_v44 = vld [vmem:[#allocation248_spill] sm:$0xff]  ;;  %v11895_v29 = vmul.f32 %v14469_v11, %v4871_v51  ;;  %v4887_v11 = vrot.slane %v11868_v13, %v14315_v36 }
 0x54a   : > { %v11890_v41 = vmul.f32 %v14467_v44, %v4651_v22  ;;  %v4667_v44 = vrot.slane %v11499_v26, %v14375_v35  ;;  %v14474_v22 = vld [vmem:[#allocation82_spill] sm:$0xff] }
 0x54b   : > { %14470 = vst [vmem:[#allocation242_spill] sm:$0xff] %v11895_v29 }
 0x54c   : > { %5489 = vperm.xlu1 %7842, %v11875_v19   ;;  %v11885_v60 = vpop.permute.xlu0 %5462  ;;  %14468 = vst [vmem:[#allocation57_spill] sm:$0xff] %v11890_v41 }
 0x54d   : > { %14466 = vst [vmem:[#allocation241_spill] sm:$0xff] %v11885_v60  ;;  %5654 = vperm.xlu0 %7841, %v11880_v46   ;;  %v14472_v46 = vld [vmem:[#allocation40_spill] sm:$0xff]  ;;  %v11909_v60 = vmul.f32 %v14474_v22, %v4879_v39  ;;  %v4895_v39 = vrot.slane %v11868_v13, %v14317_v31  ;;  %v11927_v22 = vpop.eup %8127 }
 0x54e   : > { %v11904_v59 = vmul.f32 %v14472_v46, %v4659_v20  ;;  %v4675_v46 = vrot.slane %v11530_v47, %v14320_v50  ;;  %v14479_v20 = vld [vmem:[#allocation84_spill] sm:$0xff] }
 0x54f   : > { %14475 = vst [vmem:[#allocation61_spill] sm:$0xff] %v11909_v60  ;;  %v11923_v26 = vmul.f32 %v14479_v20, %v4887_v11  ;;  %v4903_v20 = vrot.slane %v11927_v22, %v14312_v7 }
 0x550   : > { %5495 = vperm.xlu1 %7842, %v11890_v41   ;;  %v11900_v19 = vpop.permute.xlu0 %5468  ;;  %14473 = vst [vmem:[#allocation243_spill] sm:$0xff] %v11904_v59  ;;  %v14477_v41 = vld [vmem:[#allocation42_spill] sm:$0xff] }
 0x551   : > { %14471 = vst [vmem:[#allocation59_spill] sm:$0xff] %v11900_v19  ;;  %5660 = vperm.xlu0 %7841, %v11895_v29   ;;  %v11918_v29 = vmul.f32 %v14477_v41, %v4667_v44  ;;  %14480 = vst [vmem:[#allocation246_spill] sm:$0xff] %v11923_v26  ;;  %v4683_v44 = vrot.slane %v11530_v47, %v14365_v15 }
 0x553   : > { %14478 = vst [vmem:[#allocation63_spill] sm:$0xff] %v11918_v29 }
 0x554   : > { %5501 = vperm.xlu1 %7842, %v11904_v59   ;;  %v11914_v51 = vpop.permute.xlu0 %5474 }
 0x555   : > { %14476 = vst [vmem:[#allocation245_spill] sm:$0xff] %v11914_v51  ;;  %5666 = vperm.xlu0 %7841, %v11909_v60   ;;  %v14482_v60 = vld [vmem:[#allocation44_spill] sm:$0xff]  ;;  %v14484_v51 = vld [vmem:[#allocation86_spill] sm:$0xff] }
 0x556   : > { %v11934_v41 = vmul.f32 %v14482_v60, %v4675_v46  ;;  %v11939_v11 = vmul.f32 %v14484_v51, %v4895_v39  ;;  %v4691_v60 = vrot.slane %v11530_v47, %v14370_v54  ;;  %v14489_v46 = vld [vmem:[#allocation88_spill] sm:$0xff]  ;;  %v4911_v51 = vrot.slane %v11927_v22, %v14313_v28 }
 0x558   : > { %5507 = vperm.xlu1 %7842, %v11918_v29   ;;  %v11930_v59 = vpop.permute.xlu0 %5480  ;;  %14483 = vst [vmem:[#allocation16_spill] sm:$0xff] %v11934_v41  ;;  %14485 = vst [vmem:[#allocation67_spill] sm:$0xff] %v11939_v11  ;;  %v14487_v29 = vld [vmem:[#allocation46_spill] sm:$0xff] }
 0x559   : > { %14481 = vst [vmem:[#allocation65_spill] sm:$0xff] %v11930_v59  ;;  %5672 = vperm.xlu0 %7841, %v11923_v26   ;;  %v11948_v26 = vmul.f32 %v14487_v29, %v4683_v44  ;;  %v11953_v59 = vmul.f32 %v14489_v46, %v4903_v20  ;;  %v4699_v29 = vrot.slane %v11530_v47, %v14375_v35  ;;  %v14494_v44 = vld [vmem:[#allocation264_spill] sm:$0xff] }
 0x55a   : > { %v4919_v20 = vrot.slane %v11927_v22, %v14315_v36  ;;  %v14499_v47 = vld [vmem:[#allocation92_spill] sm:$0xff] }
 0x55b   : > { %14488 = vst [vmem:[#allocation69_spill] sm:$0xff] %v11948_v26  ;;  %14490 = vst [vmem:[#allocation19_spill] sm:$0xff] %v11953_v59 }
 0x55c   : > { %5513 = vperm.xlu1 %7842, %v11934_v41   ;;  %v11944_v19 = vpop.permute.xlu0 %5486  ;;  %v14492_v41 = vld [vmem:[#allocation48_spill] sm:$0xff] }
 0x55d   : > { %14486 = vst [vmem:[#allocation17_spill] sm:$0xff] %v11944_v19  ;;  %5678 = vperm.xlu0 %7841, %v11939_v11   ;;  %v11962_v11 = vmul.f32 %v14492_v41, %v4691_v60  ;;  %v11967_v19 = vmul.f32 %v14494_v44, %v4911_v51  ;;  %v4707_v41 = vrot.slane %v11580_v2, %v14320_v50 }
 0x55e   : > { %v11981_v60 = vmul.f32 %v14499_v47, %v4919_v20  ;;  %v4927_v51 = vrot.slane %v11927_v22, %v14317_v31 }
 0x55f   : > { %14493 = vst [vmem:[#allocation20_spill] sm:$0xff] %v11962_v11  ;;  %14495 = vst [vmem:[#allocation73_spill] sm:$0xff] %v11967_v19 }
 0x560   : > { %5519 = vperm.xlu1 %7842, %v11948_v26   ;;  %v11958_v39 = vpop.permute.xlu0 %5492  ;;  %v14497_v26 = vld [vmem:[#allocation50_spill] sm:$0xff]  ;;  %14500 = vst [vmem:[#allocation23_spill] sm:$0xff] %v11981_v60 }
 0x561   : > { %14491 = vst [vmem:[#allocation71_spill] sm:$0xff] %v11958_v39  ;;  %5684 = vperm.xlu0 %7841, %v11953_v59   ;;  %v11976_v59 = vmul.f32 %v14497_v26, %v4699_v29  ;;  %v4715_v29 = vrot.slane %v11580_v2, %v14365_v15 }
 0x563   : > { %14498 = vst [vmem:[#allocation75_spill] sm:$0xff] %v11976_v59 }
 0x564   : > { %5525 = vperm.xlu1 %7842, %v11962_v11   ;;  %v11972_v46 = vpop.permute.xlu0 %5498 }
 0x565   : > { %14496 = vst [vmem:[#allocation21_spill] sm:$0xff] %v11972_v46  ;;  %5690 = vperm.xlu0 %7841, %v11967_v19   ;;  %v14502_v19 = vld [vmem:[#allocation52_spill] sm:$0xff]  ;;  %v14504_v46 = vld [vmem:[#allocation94_spill] sm:$0xff] }
 0x566   : > { %v11990_v26 = vmul.f32 %v14502_v19, %v4707_v41  ;;  %v11995_v20 = vmul.f32 %v14504_v46, %v4927_v51  ;;  %v4723_v41 = vrot.slane %v11580_v2, %v14370_v54  ;;  %v5731_v46 = vrot.slane %v11607_v43, %v9307_v21 }
 0x568   : > { %5531 = vperm.xlu1 %7842, %v11976_v59   ;;  %v4415_v44 = vpop.xlane.xlu1 %4414  ;;  %v11986_v11 = vpop.permute.xlu0 %5504  ;;  %14503 = vst [vmem:[#allocation25_spill] sm:$0xff] %v11990_v26  ;;  %14505 = vst [vmem:[#allocation79_spill] sm:$0xff] %v11995_v20 }
 0x569   : > { %14501 = vst [vmem:[#allocation77_spill] sm:$0xff] %v11986_v11  ;;  %8129 = vrcp.f32 %v4415_v44  ;;  %5696 = vperm.xlu0 %7841, %v11981_v60   ;;  %v14507_v60 = vld [vmem:[#allocation54_spill] sm:$0xff] }
 0x56a   : > { %v12005_v19 = vmul.f32 %v14507_v60, %v4715_v29  ;;  %v14509_v29 = vld [vmem:[#allocation56_spill] sm:$0xff] }
 0x56c   : > { %5537 = vperm.xlu1 %7842, %v11990_v26   ;;  %v5349_v47 = vpop.permute.xlu1 %5348  ;;  %v11998_v39 = vpop.permute.xlu0 %5510  ;;  %14508 = vst [vmem:[#allocation70_spill] sm:$0xff] %v12005_v19 }
 0x56d   : > { %14506 = vst [vmem:[#allocation27_spill] sm:$0xff] %v11998_v39  ;;  %5702 = vperm.xlu0 %7841, %v11995_v20   ;;  %v5735_v44 = vrot.slane %v5349_v47, %v9307_v21  ;;  %v5743_v47 = vrot.slane %v11621_v3, %v9307_v21  ;;  %v12019_v20 = vmul.f32 %v14509_v29, %v4723_v41 }
 0x56e   : > { %v4731_v39 = vrot.slane %v11580_v2, %v14375_v35  ;;  %v4739_v2 = vrot.slane %v11634_v4, %v14320_v50 }
 0x56f   : > { %v6240_v60 = vsel %vm1992_vm1, %v5735_v44, %v5731_v46 }
 0x570   : > { %5543 = vperm.xlu1 %7842, %v12005_v19   ;;  %v5352_v51 = vpop.permute.xlu1 %5351  ;;  %v12012_v26 = vpop.permute.xlu0 %5516 }
 0x571   : > { %v5739_v59 = vrot.slane %v5352_v51, %v9307_v21 }
 0x573   : > { %v12023_v11 = vpop.eup %8129  ;;  %v6241_v43 = vsel %vm1994_vm2, %v5739_v59, %v6240_v60  ;;  %v14510_v59 = vld [vmem:[#allocation58_spill] sm:$0xff] }
 0x574   : > { %5549 = vperm.xlu1 %7842, %v12019_v20   ;;  %v5358_v51 = vpop.permute.xlu1 %5357  ;;  %v6242_v3 = vsel %vm1996_vm3, %v5743_v47, %v6241_v43  ;;  %v12030_v19 = vpop.permute.xlu0 %5522  ;;  %v4935_v44 = vrot.slane %v12023_v11, %v14312_v7  ;;  %v12038_v46 = vmul.f32 %v14510_v59, %v4731_v39  ;;  %v4943_v47 = vrot.slane %v12023_v11, %v14313_v28 }
 0x575   : > { %v5747_v41 = vrot.slane %v5358_v51, %v9307_v21  ;;  %v5751_v7 = vrot.slane %v11637_v25, %v9307_v21  ;;  %v4747_v28 = vrot.slane %v11634_v4, %v14365_v15 }
 0x576   : > { %v12041_v60 = vmul.f32 %v11303_v52, %v4935_v44  ;;  %v14512_v52 = vld [vmem:[#allocation60_spill] sm:$0xff] }
 0x577   : > { %v6243_v29 = vsel %vm1998_vm4, %v5747_v41, %v6242_v3  ;;  %v12055_v44 = vmul.f32 %v14512_v52, %v4739_v2  ;;  %v5759_v3 = vrot.slane %v11651_v42, %v9307_v21  ;;  %v12070_v41 = vmul.f32 %v11306_v27, %v4943_v47 }
 0x578   : > { %14511 = vst [vmem:[#allocation247_spill] sm:$0xff] %v12041_v60  ;;  %5555 = vperm.xlu1 %7842, %v12038_v46   ;;  %v5364_v43 = vpop.permute.xlu1 %5363  ;;  %5708 = vperm.xlu0 %7841, %v12041_v60   ;;  %v12051_v51 = vpop.permute.xlu0 %5528  ;;  %v6244_v25 = vsel %vm2000_vm5, %v5751_v7, %v6243_v29  ;;  %v4951_v2 = vrot.slane %v12023_v11, %v14315_v36  ;;  %v14514_v29 = vld [vmem:[#allocation62_spill] sm:$0xff]  ;;  %v14564_v60 = vld [vmem:[#allocation268_spill] sm:$0xff] }
 0x579   : > { %v5755_v39 = vrot.slane %v5364_v43, %v9307_v21  ;;  %14513 = vst [vmem:[#allocation83_spill] sm:$0xff] %v12070_v41  ;;  %v4755_v27 = vrot.slane %v11634_v4, %v14370_v54  ;;  %v12086_v36 = vmul.f32 %v14514_v29, %v4747_v28  ;;  %v4763_v28 = vrot.slane %v11634_v4, %v14375_v35 }
 0x57a   : > { %v12089_v7 = vmul.f32 %v11309_v45, %v4951_v2  ;;  %v5775_v45 = vrot.slane %v11680_v58, %v9307_v21  ;;  %v14516_v2 = vld [vmem:[#allocation64_spill] sm:$0xff] }
 0x57b   : > { %v6245_v59 = vsel %vm2002_vm6, %v5755_v39, %v6244_v25  ;;  %v4959_v39 = vrot.slane %v12023_v11, %v14317_v31 }
 0x57c   : > { %v6246_v43 = vsel %vm2004_vm7, %v5759_v3, %v6245_v59  ;;  %5561 = vperm.xlu1 %7842, %v12055_v44   ;;  %v5370_v42 = vpop.permute.xlu1 %5369  ;;  %5714 = vperm.xlu0 %7841, %v12070_v41   ;;  %v12078_v52 = vpop.permute.xlu0 %5534  ;;  %14515 = vst [vmem:[#allocation32_spill] sm:$0xff] %v12089_v7  ;;  %v5767_v3 = vrot.slane %v11666_v61, %v9307_v21  ;;  %v14563_v41 = vld [vmem:[#allocation245_spill] sm:$0xff] }
 0x57d   : > { %6368 = vst.msk [vmem:[%s12066_s27] sm:$0xff] %vm2127_vm8, %v6246_v43  ;;  %v5763_v47 = vrot.slane %v5370_v42, %v9307_v21  ;;  %v12106_v42 = vmul.f32 %v14516_v2, %v4755_v27  ;;  %v12109_v61 = vmul.f32 %v11312_v62, %v4959_v39  ;;  %v4771_v27 = vrot.slane %v11693_v8, %v14320_v50  ;;  %v14518_v62 = vld [vmem:[#allocation107_spill] sm:$0xff] }
 0x57e   : > { %v6385_v39 = vmul.f32 %v11534_v9, %v14518_v62  ;;  %v5791_v9 = vrot.slane %v11710_v55, %v9307_v21 }
 0x57f   : > { %v6247_v31 = vsel %vm1992_vm1, %v5767_v3, %v5763_v47  ;;  %v14517_v47 = vld [vmem:[#allocation253_spill] sm:$0xff] }
 0x580   : > { %5567 = vperm.xlu1 %7842, %v12086_v36   ;;  %v5376_v25 = vpop.permute.xlu1 %5375  ;;  %5720 = vperm.xlu0 %7841, %v12089_v7   ;;  %v12097_v59 = vpop.permute.xlu0 %5540  ;;  %v12121_v3 = vmul.f32 %v14517_v47, %v4763_v28  ;;  %v4779_v47 = vrot.slane %v11693_v8, %v14365_v15 }
 0x581   : > { %v5771_v43 = vrot.slane %v5376_v25, %v9307_v21 }
 0x583   : > { %v6248_v29 = vsel %vm1994_vm2, %v5771_v43, %v6247_v31 }
 0x584   : > { %5573 = vperm.xlu1 %7842, %v12106_v42   ;;  %v5382_v7 = vpop.permute.xlu1 %5381  ;;  %v6249_v25 = vsel %vm1996_vm3, %v5775_v45, %v6248_v29  ;;  %5726 = vperm.xlu0 %7841, %v12109_v61   ;;  %v12115_v4 = vpop.permute.xlu0 %5546  ;;  %v5783_v45 = vrot.slane %v11696_v33, %v9307_v21  ;;  %v14519_v29 = vld [vmem:[#allocation254_spill] sm:$0xff] }
 0x585   : > { %v5779_v58 = vrot.slane %v5382_v7, %v9307_v21  ;;  %v12133_v28 = vmul.f32 %v14519_v29, %v4771_v27 }
 0x587   : > { %v6250_v43 = vsel %vm1998_vm4, %v5779_v58, %v6249_v25  ;;  %v14520_v58 = vld [vmem:[#allocation109_spill] sm:$0xff] }
 0x588   : > { %5579 = vperm.xlu1 %7842, %v12121_v3   ;;  %v5388_v31 = vpop.permute.xlu1 %5387  ;;  %6644 = vperm.xlu0 %7841, %v6385_v39   ;;  %v12129_v7 = vpop.permute.xlu0 %5552  ;;  %v6251_v25 = vsel %vm2000_vm5, %v5783_v45, %v6250_v43  ;;  %v6387_v33 = vmul.f32 %v11334_v10, %v14520_v58  ;;  %v14521_v43 = vld [vmem:[#allocation256_spill] sm:$0xff]  ;;  %v14522_v10 = vld [vmem:[#allocation111_spill] sm:$0xff] }
 0x589   : > { %v5787_v2 = vrot.slane %v5388_v31, %v9307_v21  ;;  %v12151_v45 = vmul.f32 %v14521_v43, %v4779_v47  ;;  %v6389_v29 = vmul.f32 %v11340_v5, %v14522_v10  ;;  %v5807_v5 = vrot.slane %v11738_v1, %v9307_v21 }
 0x58b   : > { %v6252_v62 = vsel %vm2002_vm6, %v5787_v2, %v6251_v25  ;;  %v4787_v2 = vrot.slane %v11693_v8, %v14370_v54 }
 0x58c   : > { %v6253_v39 = vsel %vm2004_vm7, %v5791_v9, %v6252_v62  ;;  %5585 = vperm.xlu1 %7842, %v12133_v28   ;;  %v5394_v31 = vpop.permute.xlu1 %5393  ;;  %6650 = vperm.xlu0 %7841, %v6387_v33   ;;  %v12145_v27 = vpop.permute.xlu0 %5558  ;;  %v5799_v9 = vrot.slane %v11724_v40, %v9307_v21  ;;  %v14523_v62 = vld [vmem:[#allocation113_spill] sm:$0xff]  ;;  %v4795_v40 = vrot.slane %v11693_v8, %v14375_v35 }
 0x58d   : > { %6369 = vst.msk [vmem:[%s12066_s27 + $0x8] sm:$0xff] %vm2127_vm8, %v6253_v39  ;;  %v5795_v55 = vrot.slane %v5394_v31, %v9307_v21  ;;  %v6391_v47 = vmul.f32 %v11348_v53, %v14523_v62  ;;  %v14524_v31 = vld [vmem:[#allocation72_spill] sm:$0xff]  ;;  %v14525_v62 = vld [vmem:[#allocation74_spill] sm:$0xff]  ;;  %v4803_v8 = vrot.slane %v11751_v18, %v14320_v50 }
 0x58e   : > { %v12169_v43 = vmul.f32 %v14524_v31, %v4787_v2  ;;  %v14527_v2 = vld [vmem:[#allocation115_spill] sm:$0xff] }
 0x58f   : > { %v6254_v39 = vsel %vm1992_vm1, %v5799_v9, %v5795_v55  ;;  %v12180_v55 = vmul.f32 %v14525_v62, %v4795_v40  ;;  %v6393_v9 = vmul.f32 %v11354_v12, %v14527_v2  ;;  %v14528_v40 = vld [vmem:[#allocation117_spill] sm:$0xff] }
 0x590   : > { %5591 = vperm.xlu1 %7842, %v12151_v45   ;;  %v5400_v25 = vpop.permute.xlu1 %5399  ;;  %6656 = vperm.xlu0 %7841, %v6389_v29   ;;  %v12160_v58 = vpop.permute.xlu0 %5564  ;;  %v6395_v12 = vmul.f32 %v11360_v32, %v14528_v40  ;;  %v5831_v40 = vrot.slane %v11783_v0, %v9307_v21  ;;  %v4827_v0 = vrot.slane %v11751_v18, %v14375_v35 }
 0x591   : > { %v5803_v33 = vrot.slane %v5400_v25, %v9307_v21  ;;  %14526 = vst [vmem:[#allocation85_spill] sm:$0xff] %v12180_v55 }
 0x593   : > { %v6255_v10 = vsel %vm1994_vm2, %v5803_v33, %v6254_v39  ;;  %v5815_v39 = vrot.slane %v11754_v34, %v9307_v21  ;;  %v4811_v34 = vrot.slane %v11751_v18, %v14365_v15 }
 0x594   : > { %5597 = vperm.xlu1 %7842, %v12169_v43   ;;  %v5406_v29 = vpop.permute.xlu1 %5405  ;;  %v6256_v25 = vsel %vm1996_vm3, %v5807_v5, %v6255_v10  ;;  %6662 = vperm.xlu0 %7841, %v6391_v47   ;;  %v12176_v53 = vpop.permute.xlu0 %5570  ;;  %v5823_v10 = vrot.slane %v11768_v6, %v9307_v21 }
 0x595   : > { %v5811_v1 = vrot.slane %v5406_v29, %v9307_v21 }
 0x597   : > { %v6257_v33 = vsel %vm1998_vm4, %v5811_v1, %v6256_v25  ;;  %v14529_v25 = vld [vmem:[#allocation76_spill] sm:$0xff] }
 0x598   : > { %5603 = vperm.xlu1 %7842, %v12180_v55   ;;  %v5412_v47 = vpop.permute.xlu1 %5411  ;;  %6668 = vperm.xlu0 %7841, %v6393_v9   ;;  %v12190_v5 = vpop.permute.xlu0 %5576  ;;  %v6258_v29 = vsel %vm2000_vm5, %v5815_v39, %v6257_v33  ;;  %v12199_v1 = vmul.f32 %v14529_v25, %v4803_v8  ;;  %v14531_v33 = vld [vmem:[#allocation257_spill] sm:$0xff]  ;;  %v14533_v39 = vld [vmem:[#allocation119_spill] sm:$0xff] }
 0x599   : > { %v5819_v31 = vrot.slane %v5412_v47, %v9307_v21  ;;  %v12212_v8 = vmul.f32 %v14531_v33, %v4811_v34  ;;  %v6397_v47 = vmul.f32 %v11366_v24, %v14533_v39  ;;  %v14534_v25 = vld [vmem:[#allocation121_spill] sm:$0xff]  ;;  %v5839_v24 = vrot.slane %v11797_v23, %v9307_v21 }
 0x59a   : > { %14530 = vst [vmem:[#allocation34_spill] sm:$0xff] %v12199_v1  ;;  %v6399_v34 = vmul.f32 %v11374_v48, %v14534_v25  ;;  %v5847_v25 = vrot.slane %v11813_v49, %v9307_v21  ;;  %v4843_v49 = vrot.slane %v11810_v14, %v14365_v15 }
 0x59b   : > { %v6259_v62 = vsel %vm2002_vm6, %v5819_v31, %v6258_v29  ;;  %14532 = vst [vmem:[#allocation87_spill] sm:$0xff] %v12212_v8  ;;  %v4819_v31 = vrot.slane %v11751_v18, %v14370_v54  ;;  %v4835_v18 = vrot.slane %v11810_v14, %v14320_v50 }
 0x59c   : > { %v6260_v2 = vsel %vm2004_vm7, %v5823_v10, %v6259_v62  ;;  %5609 = vperm.xlu1 %7842, %v12199_v1   ;;  %v5418_v9 = vpop.permute.xlu1 %5417  ;;  %6674 = vperm.xlu0 %7841, %v6395_v12   ;;  %v12206_v32 = vpop.permute.xlu0 %5582 }
 0x59d   : > { %6370 = vst.msk [vmem:[%s12066_s27 + $0x10] sm:$0xff] %vm2127_vm8, %v6260_v2  ;;  %v5827_v6 = vrot.slane %v5418_v9, %v9307_v21  ;;  %v14535_v2 = vld [vmem:[#allocation80_spill] sm:$0xff] }
 0x59e   : > { %v12230_v9 = vmul.f32 %v14535_v2, %v4819_v31  ;;  %v14539_v31 = vld [vmem:[#allocation123_spill] sm:$0xff]  ;;  %v14540_v2 = vld [vmem:[#allocation125_spill] sm:$0xff] }
 0x59f   : > { %v6261_v62 = vsel %vm1992_vm1, %v5831_v40, %v5827_v6  ;;  %v6401_v40 = vmul.f32 %v11380_v30, %v14539_v31  ;;  %v6403_v30 = vmul.f32 %v11386_v56, %v14540_v2 }
 0x5a0   : > { %5615 = vperm.xlu1 %7842, %v12212_v8   ;;  %v5424_v12 = vpop.permute.xlu1 %5423  ;;  %6680 = vperm.xlu0 %7841, %v6397_v47   ;;  %v12221_v10 = vpop.permute.xlu0 %5588  ;;  %14536 = vst [vmem:[#allocation36_spill] sm:$0xff] %v12230_v9  ;;  %v14581_v8 = vld [vmem:[#allocation104_spill] sm:$0xff] }
 0x5a1   : > { %v5835_v29 = vrot.slane %v5424_v12, %v9307_v21  ;;  %v14537_v12 = vld [vmem:[#allocation258_spill] sm:$0xff] }
 0x5a2   : > { %v12241_v6 = vmul.f32 %v14537_v12, %v4827_v0  ;;  %v5855_v0 = vrot.slane %v11827_v17, %v9307_v21 }
 0x5a3   : > { %v6262_v33 = vsel %vm1994_vm2, %v5835_v29, %v6261_v62 }
 0x5a4   : > { %5621 = vperm.xlu1 %7842, %v12230_v9   ;;  %v5430_v39 = vpop.permute.xlu1 %5429  ;;  %v6263_v47 = vsel %vm1996_vm3, %v5839_v24, %v6262_v33  ;;  %6686 = vperm.xlu0 %7841, %v6399_v34   ;;  %v12237_v48 = vpop.permute.xlu0 %5594  ;;  %14538 = vst [vmem:[#allocation78_spill] sm:$0xff] %v12241_v6  ;;  %v14580_v9 = vld [vmem:[#allocation21_spill] sm:$0xff] }
 0x5a5   : > { %v5843_v23 = vrot.slane %v5430_v39, %v9307_v21  ;;  %v14541_v39 = vld [vmem:[#allocation260_spill] sm:$0xff] }
 0x5a7   : > { %v6264_v29 = vsel %vm1998_vm4, %v5843_v23, %v6263_v47  ;;  %v12260_v47 = vmul.f32 %v14541_v39, %v4835_v18 }
 0x5a8   : > { %5627 = vperm.xlu1 %7842, %v12241_v6   ;;  %v5436_v34 = vpop.permute.xlu1 %5435  ;;  %6692 = vperm.xlu0 %7841, %v6401_v40   ;;  %v12251_v24 = vpop.permute.xlu0 %5600  ;;  %v6265_v33 = vsel %vm2000_vm5, %v5847_v25, %v6264_v29  ;;  %v14543_v40 = vld [vmem:[#allocation262_spill] sm:$0xff]  ;;  %v14545_v29 = vld [vmem:[#allocation127_spill] sm:$0xff] }
 0x5a9   : > { %v5851_v62 = vrot.slane %v5436_v34, %v9307_v21  ;;  %14542 = vst [vmem:[#allocation248_spill] sm:$0xff] %v12260_v47  ;;  %v12273_v18 = vmul.f32 %v14543_v40, %v4843_v49  ;;  %v6405_v25 = vmul.f32 %v11392_v63, %v14545_v29  ;;  %v4851_v34 = vrot.slane %v11810_v14, %v14370_v54 }
 0x5aa   : > { %v5871_v63 = vrot.slane %v11855_v57, %v9307_v21 }
 0x5ab   : > { %v6266_v23 = vsel %vm2002_vm6, %v5851_v62, %v6265_v33  ;;  %14544 = vst [vmem:[#allocation91_spill] sm:$0xff] %v12273_v18  ;;  %v5863_v62 = vrot.slane %v11841_v37, %v9307_v21  ;;  %v14546_v33 = vld [vmem:[#allocation129_spill] sm:$0xff]  ;;  %v4859_v37 = vrot.slane %v11810_v14, %v14375_v35  ;;  %v4867_v14 = vrot.slane %v11868_v13, %v14320_v50 }
 0x5ac   : > { %v6267_v12 = vsel %vm2004_vm7, %v5855_v0, %v6266_v23  ;;  %5633 = vperm.xlu1 %7842, %v12260_v47   ;;  %v5442_v31 = vpop.permute.xlu1 %5441  ;;  %6698 = vperm.xlu0 %7841, %v6403_v30   ;;  %v12267_v56 = vpop.permute.xlu0 %5606  ;;  %v6407_v39 = vmul.f32 %v11400_v38, %v14546_v33  ;;  %v14547_v23 = vld [vmem:[#allocation263_spill] sm:$0xff]  ;;  %v5879_v33 = vrot.slane %v11871_v16, %v9307_v21 }
 0x5ad   : > { %6371 = vst.msk [vmem:[%s12066_s27 + $0x18] sm:$0xff] %vm2127_vm8, %v6267_v12  ;;  %v5859_v17 = vrot.slane %v5442_v31, %v9307_v21  ;;  %v12291_v12 = vmul.f32 %v14547_v23, %v4851_v34  ;;  %v14551_v34 = vld [vmem:[#allocation131_spill] sm:$0xff]  ;;  %v14553_v23 = vld [vmem:[#allocation133_spill] sm:$0xff]  ;;  %v4875_v16 = vrot.slane %v11868_v13, %v14365_v15 }
 0x5af   : > { %v6268_v49 = vsel %vm1992_vm1, %v5863_v62, %v5859_v17  ;;  %14548 = vst [vmem:[#allocation40_spill] sm:$0xff] %v12291_v12  ;;  %v14552_v62 = vld [vmem:[#allocation250_spill] sm:$0xff] }
 0x5b0   : > { %5639 = vperm.xlu1 %7842, %v12273_v18   ;;  %v5448_v2 = vpop.permute.xlu1 %5447  ;;  %6704 = vperm.xlu0 %7841, %v6405_v25   ;;  %v12282_v30 = vpop.permute.xlu0 %5612  ;;  %v14549_v25 = vld [vmem:[#allocation265_spill] sm:$0xff] }
 0x5b1   : > { %v5867_v0 = vrot.slane %v5448_v2, %v9307_v21  ;;  %v12302_v17 = vmul.f32 %v14549_v25, %v4859_v37  ;;  %v6409_v2 = vmul.f32 %v14552_v62, %v14551_v34  ;;  %v14554_v37 = vld [vmem:[#allocation66_spill] sm:$0xff] }
 0x5b3   : > { %v6269_v31 = vsel %vm1994_vm2, %v5867_v0, %v6268_v49  ;;  %14550 = vst [vmem:[#allocation82_spill] sm:$0xff] %v12302_v17 }
 0x5b4   : > { %5645 = vperm.xlu1 %7842, %v12291_v12   ;;  %v5454_v40 = vpop.permute.xlu1 %5453  ;;  %v6270_v29 = vsel %vm1996_vm3, %v5871_v63, %v6269_v31  ;;  %6710 = vperm.xlu0 %7841, %v6407_v39   ;;  %v12298_v38 = vpop.permute.xlu0 %5618  ;;  %v6411_v31 = vmul.f32 %v14554_v37, %v14553_v23  ;;  %v14558_v37 = vld [vmem:[#allocation135_spill] sm:$0xff] }
 0x5b5   : > { %v5875_v57 = vrot.slane %v5454_v40, %v9307_v21  ;;  %v14555_v40 = vld [vmem:[#allocation241_spill] sm:$0xff] }
 0x5b6   : > { %v5887_v25 = vrot.slane %v14555_v40, %v9307_v21  ;;  %v14559_v40 = vld [vmem:[#allocation251_spill] sm:$0xff] }
 0x5b7   : > { %v6271_v0 = vsel %vm1998_vm4, %v5875_v57, %v6270_v29  ;;  %v14556_v57 = vld [vmem:[#allocation266_spill] sm:$0xff] }
 0x5b8   : > { %5651 = vperm.xlu1 %7842, %v12302_v17   ;;  %v5460_v39 = vpop.permute.xlu1 %5459  ;;  %6716 = vperm.xlu0 %7841, %v6409_v2   ;;  %v12312_v63 = vpop.permute.xlu0 %5624  ;;  %v6272_v29 = vsel %vm2000_vm5, %v5879_v33, %v6271_v0  ;;  %v12321_v34 = vmul.f32 %v14556_v57, %v4867_v14  ;;  %v14557_v33 = vld [vmem:[#allocation267_spill] sm:$0xff]  ;;  %v6413_v57 = vmul.f32 %v14559_v40, %v14558_v37 }
 0x5b9   : > { %v5883_v49 = vrot.slane %v5460_v39, %v9307_v21  ;;  %v12334_v14 = vmul.f32 %v14557_v33, %v4875_v16  ;;  %v14562_v16 = vld [vmem:[#allocation252_spill] sm:$0xff]  ;;  %v5903_v37 = vrot.slane %v14563_v41, %v9307_v21 }
 0x5bb   : > { %v6273_v62 = vsel %vm2002_vm6, %v5883_v49, %v6272_v29  ;;  %v4883_v49 = vrot.slane %v11868_v13, %v14370_v54 }
 0x5bc   : > { %v6274_v2 = vsel %vm2004_vm7, %v5887_v25, %v6273_v62  ;;  %5657 = vperm.xlu1 %7842, %v12321_v34   ;;  %v5466_v39 = vpop.permute.xlu1 %5465  ;;  %6722 = vperm.xlu0 %7841, %v6411_v31   ;;  %v12328_v23 = vpop.permute.xlu0 %5630  ;;  %v14560_v25 = vld [vmem:[#allocation59_spill] sm:$0xff] }
 0x5bd   : > { %6372 = vst.msk [vmem:[%s12066_s27 + $0x20] sm:$0xff] %vm2127_vm8, %v6274_v2  ;;  %v5891_v0 = vrot.slane %v5466_v39, %v9307_v21  ;;  %v5895_v29 = vrot.slane %v14560_v25, %v9307_v21  ;;  %v14561_v39 = vld [vmem:[#allocation137_spill] sm:$0xff]  ;;  %v12352_v17 = vmul.f32 %v14564_v60, %v4883_v49  ;;  %v4891_v25 = vrot.slane %v11868_v13, %v14375_v35  ;;  %v14566_v60 = vld [vmem:[#allocation139_spill] sm:$0xff]  ;;  %v14567_v49 = vld [vmem:[#allocation68_spill] sm:$0xff] }
 0x5be   : > { %v6415_v33 = vmul.f32 %v14562_v16, %v14561_v39  ;;  %v14565_v16 = vld [vmem:[#allocation269_spill] sm:$0xff]  ;;  %v4899_v13 = vrot.slane %v11927_v22, %v14320_v50 }
 0x5bf   : > { %v6275_v40 = vsel %vm1992_vm1, %v5895_v29, %v5891_v0  ;;  %v12363_v0 = vmul.f32 %v14565_v16, %v4891_v25  ;;  %v6417_v29 = vmul.f32 %v14567_v49, %v14566_v60  ;;  %v14569_v25 = vld [vmem:[#allocation141_spill] sm:$0xff] }
 0x5c0   : > { %5663 = vperm.xlu1 %7842, %v12334_v14   ;;  %v5472_v31 = vpop.permute.xlu1 %5471  ;;  %6728 = vperm.xlu0 %7841, %v6413_v57   ;;  %v12343_v62 = vpop.permute.xlu0 %5636  ;;  %v14571_v60 = vld [vmem:[#allocation17_spill] sm:$0xff] }
 0x5c1   : > { %v5899_v2 = vrot.slane %v5472_v31, %v9307_v21  ;;  %v5919_v49 = vrot.slane %v14571_v60, %v9307_v21  ;;  %v14576_v60 = vld [vmem:[#allocation255_spill] sm:$0xff] }
 0x5c3   : > { %v6276_v57 = vsel %vm1994_vm2, %v5899_v2, %v6275_v40  ;;  %v14568_v40 = vld [vmem:[#allocation65_spill] sm:$0xff] }
 0x5c4   : > { %5669 = vperm.xlu1 %7842, %v12352_v17   ;;  %v5478_v12 = vpop.permute.xlu1 %5477  ;;  %v6277_v31 = vsel %vm1996_vm3, %v5903_v37, %v6276_v57  ;;  %6734 = vperm.xlu0 %7841, %v6415_v33   ;;  %v12359_v39 = vpop.permute.xlu0 %5642  ;;  %v5911_v18 = vrot.slane %v14568_v40, %v9307_v21  ;;  %v14570_v57 = vld [vmem:[#allocation259_spill] sm:$0xff]  ;;  %v4907_v40 = vrot.slane %v11927_v22, %v14365_v15 }
 0x5c5   : > { %v5907_v41 = vrot.slane %v5478_v12, %v9307_v21  ;;  %v6419_v16 = vmul.f32 %v14570_v57, %v14569_v25  ;;  %v14575_v57 = vld [vmem:[#allocation143_spill] sm:$0xff] }
 0x5c7   : > { %v6278_v2 = vsel %vm1998_vm4, %v5907_v41, %v6277_v31  ;;  %v14572_v41 = vld [vmem:[#allocation270_spill] sm:$0xff] }
 0x5c8   : > { %5675 = vperm.xlu1 %7842, %v12363_v0   ;;  %v5484_v33 = vpop.permute.xlu1 %5483  ;;  %6740 = vperm.xlu0 %7841, %v6417_v29   ;;  %v12373_v12 = vpop.permute.xlu0 %5648  ;;  %v6279_v31 = vsel %vm2000_vm5, %v5911_v18, %v6278_v2  ;;  %v12382_v47 = vmul.f32 %v14572_v41, %v4899_v13  ;;  %v14573_v2 = vld [vmem:[#allocation102_spill] sm:$0xff]  ;;  %v6421_v41 = vmul.f32 %v14576_v60, %v14575_v57 }
 0x5c9   : > { %v5915_v37 = vrot.slane %v5484_v33, %v9307_v21  ;;  %v12395_v13 = vmul.f32 %v14573_v2, %v4907_v40  ;;  %v14579_v40 = vld [vmem:[#allocation261_spill] sm:$0xff]  ;;  %v5935_v57 = vrot.slane %v14580_v9, %v9307_v21 }
 0x5cb   : > { %v6280_v29 = vsel %vm2002_vm6, %v5915_v37, %v6279_v31  ;;  %14574 = vst [vmem:[#allocation42_spill] sm:$0xff] %v12395_v13  ;;  %v4915_v37 = vrot.slane %v11927_v22, %v14370_v54 }
 0x5cc   : > { %v6281_v6 = vsel %vm2004_vm7, %v5919_v49, %v6280_v29  ;;  %5681 = vperm.xlu1 %7842, %v12382_v47   ;;  %v5490_v33 = vpop.permute.xlu1 %5489  ;;  %6746 = vperm.xlu0 %7841, %v6419_v16   ;;  %v12389_v25 = vpop.permute.xlu0 %5654  ;;  %v14577_v49 = vld [vmem:[#allocation71_spill] sm:$0xff] }
 0x5cd   : > { %6373 = vst.msk [vmem:[%s12066_s27 + $0x28] sm:$0xff] %vm2127_vm8, %v6281_v6  ;;  %v5923_v18 = vrot.slane %v5490_v33, %v9307_v21  ;;  %v5927_v31 = vrot.slane %v14577_v49, %v9307_v21  ;;  %v14578_v33 = vld [vmem:[#allocation145_spill] sm:$0xff]  ;;  %v12413_v1 = vmul.f32 %v14581_v8, %v4915_v37  ;;  %v4923_v49 = vrot.slane %v11927_v22, %v14375_v35  ;;  %v14585_v8 = vld [vmem:[#allocation147_spill] sm:$0xff]  ;;  %v14586_v37 = vld [vmem:[#allocation100_spill] sm:$0xff] }
 0x5ce   : > { %v6423_v2 = vmul.f32 %v14579_v40, %v14578_v33  ;;  %v14583_v40 = vld [vmem:[#allocation271_spill] sm:$0xff]  ;;  %v4931_v22 = vrot.slane %v12023_v11, %v14320_v50 }
 0x5cf   : > { %v6282_v60 = vsel %vm1992_vm1, %v5927_v31, %v5923_v18  ;;  %14582 = vst [vmem:[#allocation84_spill] sm:$0xff] %v12413_v1  ;;  %v12424_v18 = vmul.f32 %v14583_v40, %v4923_v49  ;;  %v6425_v31 = vmul.f32 %v14586_v37, %v14585_v8  ;;  %v14588_v49 = vld [vmem:[#allocation149_spill] sm:$0xff]  ;;  %v14590_v8 = vld [vmem:[#allocation27_spill] sm:$0xff] }
 0x5d0   : > { %5687 = vperm.xlu1 %7842, %v12395_v13   ;;  %v5496_v16 = vpop.permute.xlu1 %5495  ;;  %6752 = vperm.xlu0 %7841, %v6421_v41   ;;  %v12404_v29 = vpop.permute.xlu0 %5660  ;;  %v5951_v50 = vrot.slane %v14590_v8, %v9307_v21  ;;  %v14594_v8 = vld [vmem:[#allocation223_spill] sm:$0xff] }
 0x5d1   : > { %v5931_v6 = vrot.slane %v5496_v16, %v9307_v21  ;;  %14584 = vst [vmem:[#allocation44_spill] sm:$0xff] %v12424_v18 }
 0x5d3   : > { %v6283_v41 = vsel %vm1994_vm2, %v5931_v6, %v6282_v60  ;;  %v14587_v60 = vld [vmem:[#allocation77_spill] sm:$0xff] }
 0x5d4   : > { %5693 = vperm.xlu1 %7842, %v12413_v1   ;;  %v5502_v13 = vpop.permute.xlu1 %5501  ;;  %v6284_v16 = vsel %vm1996_vm3, %v5935_v57, %v6283_v41  ;;  %6758 = vperm.xlu0 %7841, %v6423_v2   ;;  %v12420_v33 = vpop.permute.xlu0 %5666  ;;  %v5943_v1 = vrot.slane %v14587_v60, %v9307_v21  ;;  %v14589_v41 = vld [vmem:[#allocation30_spill] sm:$0xff]  ;;  %v4939_v60 = vrot.slane %v12023_v11, %v14365_v15 }
 0x5d5   : > { %v5939_v9 = vrot.slane %v5502_v13, %v9307_v21  ;;  %v6427_v40 = vmul.f32 %v14589_v41, %v14588_v49  ;;  %v14593_v41 = vld [vmem:[#allocation151_spill] sm:$0xff] }
 0x5d6   : > { %v6429_v15 = vmul.f32 %v14594_v8, %v14593_v41 }
 0x5d7   : > { %v6285_v6 = vsel %vm1998_vm4, %v5939_v9, %v6284_v16  ;;  %v14591_v9 = vld [vmem:[#allocation272_spill] sm:$0xff] }
 0x5d8   : > { %5699 = vperm.xlu1 %7842, %v12424_v18   ;;  %v5508_v2 = vpop.permute.xlu1 %5507  ;;  %6764 = vperm.xlu0 %7841, %v6425_v31   ;;  %v12434_v13 = vpop.permute.xlu0 %5672  ;;  %v6286_v16 = vsel %vm2000_vm5, %v5943_v1, %v6285_v6  ;;  %v12443_v37 = vmul.f32 %v14591_v9, %v4931_v22  ;;  %v14592_v6 = vld [vmem:[#allocation273_spill] sm:$0xff]  ;;  %v14595_v9 = vld [vmem:[#allocation22_spill] sm:$0xff] }
 0x5d9   : > { %v5947_v57 = vrot.slane %v5508_v2, %v9307_v21  ;;  %v12456_v22 = vmul.f32 %v14592_v6, %v4939_v60  ;;  %v14596_v60 = vld [vmem:[#allocation99_spill] sm:$0xff] }
 0x5db   : > { %v6287_v31 = vsel %vm2002_vm6, %v5947_v57, %v6286_v16  ;;  %v4947_v57 = vrot.slane %v12023_v11, %v14370_v54  ;;  %v14597_v54 = vld [vmem:[#allocation274_spill] sm:$0xff] }
 0x5dc   : > { %v6288_v18 = vsel %vm2004_vm7, %v5951_v50, %v6287_v31  ;;  %5705 = vperm.xlu1 %7842, %v12443_v37   ;;  %v5514_v2 = vpop.permute.xlu1 %5513  ;;  %6770 = vperm.xlu0 %7841, %v6427_v40   ;;  %v12450_v49 = vpop.permute.xlu0 %5678  ;;  %v5959_v50 = vrot.slane %v12012_v26, %v9307_v21  ;;  %v6431_v31 = vmul.f32 %v14596_v60, %v14595_v9  ;;  %v14598_v60 = vld [vmem:[#allocation275_spill] sm:$0xff] }
 0x5dd   : > { %6374 = vst.msk [vmem:[%s12066_s27 + $0x30] sm:$0xff] %vm2127_vm8, %v6288_v18  ;;  %v5955_v1 = vrot.slane %v5514_v2, %v9307_v21  ;;  %v5967_v2 = vrot.slane %v12030_v19, %v9307_v21  ;;  %v12474_v41 = vmul.f32 %v14597_v54, %v4947_v57  ;;  %v4955_v26 = vrot.slane %v12023_v11, %v14375_v35 }
 0x5de   : > { %v5975_v11 = vrot.slane %v12051_v51, %v9307_v21 }
 0x5df   : > { %v6289_v6 = vsel %vm1992_vm1, %v5959_v50, %v5955_v1  ;;  %v12483_v19 = vmul.f32 %v14598_v60, %v4955_v26  ;;  %v14599_v1 = vld [vmem:[#allocation18_spill] sm:$0xff]  ;;  %v14600_v50 = vld [vmem:[#allocation5_spill] sm:$0xff]  ;;  %v14601_v26 = vld [vmem:[#allocation108_spill] sm:$0xff] }
 0x5e0   : > { %5711 = vperm.xlu1 %7842, %v12456_v22   ;;  %v5520_v40 = vpop.permute.xlu1 %5519  ;;  %6776 = vperm.xlu0 %7841, %v6429_v15   ;;  %v12466_v16 = vpop.permute.xlu0 %5684  ;;  %v6433_v57 = vmul.f32 %v14600_v50, %v14599_v1 }
 0x5e1   : > { %v5963_v18 = vrot.slane %v5520_v40, %v9307_v21 }
 0x5e3   : > { %v6290_v8 = vsel %vm1994_vm2, %v5963_v18, %v6289_v6 }
 0x5e4   : > { %5717 = vperm.xlu1 %7842, %v12474_v41   ;;  %v5526_v15 = vpop.permute.xlu1 %5525  ;;  %v6291_v40 = vsel %vm1996_vm3, %v5967_v2, %v6290_v8  ;;  %6782 = vperm.xlu0 %7841, %v6431_v31   ;;  %v12488_v35 = vpop.permute.xlu0 %5690  ;;  %v5983_v2 = vrot.slane %v12078_v52, %v9307_v21  ;;  %v14602_v8 = vld [vmem:[#allocation249_spill] sm:$0xff] }
 0x5e5   : > { %v5971_v9 = vrot.slane %v5526_v15, %v9307_v21  ;;  %v6384_v15 = vmul.f32 %v14602_v8, %v14601_v26  ;;  %v14607_v26 = vld [vmem:[#allocation157_spill] sm:$0xff]  ;;  %v14608_v8 = vld [vmem:[#allocation3_spill] sm:$0xff] }
 0x5e6   : > { %v6437_v55 = vmul.f32 %v14608_v8, %v14607_v26  ;;  %v14614_v8 = vld [vmem:[#allocation230_spill] sm:$0xff] }
 0x5e7   : > { %v6292_v54 = vsel %vm1998_vm4, %v5971_v9, %v6291_v40  ;;  %v14603_v40 = vld [vmem:[#allocation155_spill] sm:$0xff]  ;;  %v14604_v9 = vld [vmem:[#allocation101_spill] sm:$0xff] }
 0x5e8   : > { %5723 = vperm.xlu1 %7842, %v12483_v19   ;;  %v5532_v18 = vpop.permute.xlu1 %5531  ;;  %6788 = vperm.xlu0 %7841, %v6433_v57   ;;  %v6293_v6 = vsel %vm2000_vm5, %v5975_v11, %v6292_v54  ;;  %v6435_v60 = vmul.f32 %v14604_v9, %v14603_v40  ;;  %v12505_v57 = vpop.permute.xlu0 %5696  ;;  %v14605_v54 = vld [vmem:[#allocation110_spill] sm:$0xff]  ;;  %v14606_v11 = vld [vmem:[#allocation105_spill] sm:$0xff]  ;;  %v14609_v9 = vld [vmem:[#allocation112_spill] sm:$0xff] }
 0x5e9   : > { %v5979_v31 = vrot.slane %v5532_v18, %v9307_v21  ;;  %v6386_v18 = vmul.f32 %v14606_v11, %v14605_v54 }
 0x5eb   : > { %v6294_v1 = vsel %vm2002_vm6, %v5979_v31, %v6293_v6  ;;  %v5991_v31 = vrot.slane %v12097_v59, %v9307_v21 }
 0x5ec   : > { %v6295_v51 = vsel %vm2004_vm7, %v5983_v2, %v6294_v1  ;;  %6641 = vperm.xlu1 %7842, %v6384_v15   ;;  %v5538_v50 = vpop.permute.xlu1 %5537  ;;  %6794 = vperm.xlu0 %7841, %v6435_v60   ;;  %v5999_v15 = vrot.slane %v12115_v4, %v9307_v21  ;;  %v14610_v60 = vld [vmem:[#allocation6_spill] sm:$0xff]  ;;  %v12522_v11 = vpop.permute.xlu0 %5702 }
 0x5ed   : > { %6375 = vst.msk [vmem:[%s12066_s27 + $0x38] sm:$0xff] %vm2127_vm8, %v6295_v51  ;;  %v5987_v52 = vrot.slane %v5538_v50, %v9307_v21  ;;  %v6388_v1 = vmul.f32 %v14610_v60, %v14609_v9  ;;  %v14611_v51 = vld [vmem:[#allocation159_spill] sm:$0xff]  ;;  %v14613_v4 = vld [vmem:[#allocation114_spill] sm:$0xff] }
 0x5ee   : > { %v14612_v50 = vld [vmem:[#allocation103_spill] sm:$0xff] }
 0x5ef   : > { %v6296_v40 = vsel %vm1992_vm1, %v5991_v31, %v5987_v52  ;;  %v6439_v54 = vmul.f32 %v14612_v50, %v14611_v51  ;;  %v6390_v52 = vmul.f32 %v14614_v8, %v14613_v4  ;;  %v14615_v31 = vld [vmem:[#allocation41_spill] sm:$0xff] }
 0x5f0   : > { %6647 = vperm.xlu1 %7842, %v6386_v18   ;;  %v5544_v2 = vpop.permute.xlu1 %5543  ;;  %6800 = vperm.xlu0 %7841, %v6437_v55  }
 0x5f1   : > { %v5995_v6 = vrot.slane %v5544_v2, %v9307_v21  ;;  %v14616_v2 = vld [vmem:[#allocation2_spill] sm:$0xff] }
 0x5f2   : > { %v6441_v9 = vmul.f32 %v14616_v2, %v14615_v31  ;;  %v14621_v2 = vld [vmem:[#allocation118_spill] sm:$0xff] }
 0x5f3   : > { %v6297_v59 = vsel %vm1994_vm2, %v5995_v6, %v6296_v40  ;;  %v6007_v6 = vrot.slane %v12129_v7, %v9307_v21 }
 0x5f4   : > { %6653 = vperm.xlu1 %7842, %v6388_v1   ;;  %v5550_v18 = vpop.permute.xlu1 %5549  ;;  %v6298_v55 = vsel %vm1996_vm3, %v5999_v15, %v6297_v59  ;;  %6806 = vperm.xlu0 %7841, %v6439_v54   ;;  %v6015_v1 = vrot.slane %v12145_v27, %v9307_v21  ;;  %v14617_v54 = vld [vmem:[#allocation116_spill] sm:$0xff]  ;;  %v14618_v59 = vld [vmem:[#allocation9_spill] sm:$0xff] }
 0x5f5   : > { %v6003_v26 = vrot.slane %v5550_v18, %v9307_v21  ;;  %v6392_v18 = vmul.f32 %v14618_v59, %v14617_v54 }
 0x5f7   : > { %v6299_v60 = vsel %vm1998_vm4, %v6003_v26, %v6298_v55  ;;  %v12532_v51 = vpop.permute.xlu0 %5708  ;;  %v14619_v55 = vld [vmem:[#allocation161_spill] sm:$0xff]  ;;  %v14620_v26 = vld [vmem:[#allocation228_spill] sm:$0xff] }
 0x5f8   : > { %6659 = vperm.xlu1 %7842, %v6390_v52   ;;  %v5556_v40 = vpop.permute.xlu1 %5555  ;;  %6812 = vperm.xlu0 %7841, %v6441_v9   ;;  %v6300_v50 = vsel %vm2000_vm5, %v6007_v6, %v6299_v60  ;;  %v6443_v4 = vmul.f32 %v14620_v26, %v14619_v55  ;;  %v14622_v9 = vld [vmem:[#allocation7_spill] sm:$0xff]  ;;  %v14625_v26 = vld [vmem:[#allocation120_spill] sm:$0xff] }
 0x5f9   : > { %v6011_v15 = vrot.slane %v5556_v40, %v9307_v21  ;;  %v6394_v60 = vmul.f32 %v14622_v9, %v14621_v2  ;;  %v14623_v6 = vld [vmem:[#allocation163_spill] sm:$0xff]  ;;  %v14624_v40 = vld [vmem:[#allocation234_spill] sm:$0xff] }
 0x5fa   : > { %v6445_v54 = vmul.f32 %v14624_v40, %v14623_v6 }
 0x5fb   : > { %v6301_v8 = vsel %vm2002_vm6, %v6011_v15, %v6300_v50  ;;  %v12545_v31 = vpop.permute.xlu0 %5714  ;;  %v6023_v15 = vrot.slane %v12160_v58, %v9307_v21 }
 0x5fc   : > { %v6302_v7 = vsel %vm2004_vm7, %v6015_v1, %v6301_v8  ;;  %6665 = vperm.xlu1 %7842, %v6392_v18   ;;  %v5562_v52 = vpop.permute.xlu1 %5561  ;;  %6818 = vperm.xlu0 %7841, %v6443_v4   ;;  %v6031_v18 = vrot.slane %v12176_v53, %v9307_v21  ;;  %v14626_v4 = vld [vmem:[#allocation231_spill] sm:$0xff]  ;;  %v14629_v53 = vld [vmem:[#allocation122_spill] sm:$0xff] }
 0x5fd   : > { %6376 = vst.msk [vmem:[%s12066_s27 + $0x40] sm:$0xff] %vm2127_vm8, %v6302_v7  ;;  %v6019_v27 = vrot.slane %v5562_v52, %v9307_v21  ;;  %v6396_v8 = vmul.f32 %v14626_v4, %v14625_v26  ;;  %v14627_v7 = vld [vmem:[#allocation165_spill] sm:$0xff]  ;;  %v14628_v52 = vld [vmem:[#allocation227_spill] sm:$0xff] }
 0x5fe   : > { %v6447_v2 = vmul.f32 %v14628_v52, %v14627_v7 }
 0x5ff   : > { %v12555_v59 = vpop.permute.xlu0 %5720  ;;  %v6303_v55 = vsel %vm1992_vm1, %v6023_v15, %v6019_v27  ;;  %v14631_v15 = vld [vmem:[#allocation90_spill] sm:$0xff] }
 0x600   : > { %6671 = vperm.xlu1 %7842, %v6394_v60   ;;  %v5568_v1 = vpop.permute.xlu1 %5567  ;;  %6824 = vperm.xlu0 %7841, %v6445_v54   ;;  %v14630_v54 = vld [vmem:[#allocation10_spill] sm:$0xff] }
 0x601   : > { %v6027_v50 = vrot.slane %v5568_v1, %v9307_v21  ;;  %v6398_v27 = vmul.f32 %v14630_v54, %v14629_v53  ;;  %v14632_v1 = vld [vmem:[#allocation8_spill] sm:$0xff] }
 0x602   : > { %v6449_v26 = vmul.f32 %v14632_v1, %v14631_v15  ;;  %v14637_v1 = vld [vmem:[#allocation126_spill] sm:$0xff] }
 0x603   : > { %v6304_v9 = vsel %vm1994_vm2, %v6027_v50, %v6303_v55  ;;  %v12568_v6 = vpop.permute.xlu0 %5726  ;;  %v6039_v50 = vrot.slane %v12190_v5, %v9307_v21 }
 0x604   : > { %6677 = vperm.xlu1 %7842, %v6396_v8   ;;  %v5574_v58 = vpop.permute.xlu1 %5573  ;;  %v6305_v60 = vsel %vm1996_vm3, %v6031_v18, %v6304_v9  ;;  %6830 = vperm.xlu0 %7841, %v6447_v2   ;;  %v6047_v8 = vrot.slane %v12206_v32, %v9307_v21  ;;  %v14633_v2 = vld [vmem:[#allocation124_spill] sm:$0xff]  ;;  %v14634_v9 = vld [vmem:[#allocation237_spill] sm:$0xff] }
 0x605   : > { %v6035_v40 = vrot.slane %v5574_v58, %v9307_v21  ;;  %v6400_v58 = vmul.f32 %v14634_v9, %v14633_v2 }
 0x607   : > { %v6306_v4 = vsel %vm1998_vm4, %v6035_v40, %v6305_v60  ;;  %v12577_v7 = vpop.permute.xlu0 %6644  ;;  %v14635_v60 = vld [vmem:[#allocation96_spill] sm:$0xff]  ;;  %v14636_v40 = vld [vmem:[#allocation233_spill] sm:$0xff] }
 0x608   : > { %6683 = vperm.xlu1 %7842, %v6398_v27   ;;  %v5580_v55 = vpop.permute.xlu1 %5579  ;;  %6836 = vperm.xlu0 %7841, %v6449_v26   ;;  %v6307_v52 = vsel %vm2000_vm5, %v6039_v50, %v6306_v4  ;;  %v6451_v53 = vmul.f32 %v14636_v40, %v14635_v60  ;;  %v14638_v26 = vld [vmem:[#allocation12_spill] sm:$0xff]  ;;  %v14639_v50 = vld [vmem:[#allocation89_spill] sm:$0xff] }
 0x609   : > { %v6043_v18 = vrot.slane %v5580_v55, %v9307_v21  ;;  %v6402_v4 = vmul.f32 %v14638_v26, %v14637_v1  ;;  %v14640_v55 = vld [vmem:[#allocation11_spill] sm:$0xff]  ;;  %v14641_v40 = vld [vmem:[#allocation128_spill] sm:$0xff] }
 0x60a   : > { %v6453_v2 = vmul.f32 %v14640_v55, %v14639_v50 }
 0x60b   : > { %v6308_v54 = vsel %vm2002_vm6, %v6043_v18, %v6307_v52  ;;  %v12590_v15 = vpop.permute.xlu0 %6650  ;;  %v6055_v18 = vrot.slane %v12221_v10, %v9307_v21 }
 0x60c   : > { %v6309_v5 = vsel %vm2004_vm7, %v6047_v8, %v6308_v54  ;;  %6689 = vperm.xlu1 %7842, %v6400_v58   ;;  %v5586_v27 = vpop.permute.xlu1 %5585  ;;  %6842 = vperm.xlu0 %7841, %v6451_v53   ;;  %v6063_v58 = vrot.slane %v12237_v48, %v9307_v21  ;;  %v14642_v53 = vld [vmem:[#allocation14_spill] sm:$0xff] }
 0x60d   : > { %6377 = vst.msk [vmem:[%s12066_s27 + $0x48] sm:$0xff] %vm2127_vm8, %v6309_v5  ;;  %v6051_v32 = vrot.slane %v5586_v27, %v9307_v21  ;;  %v6404_v54 = vmul.f32 %v14642_v53, %v14641_v40  ;;  %v14643_v5 = vld [vmem:[#allocation98_spill] sm:$0xff]  ;;  %v14644_v27 = vld [vmem:[#allocation239_spill] sm:$0xff] }
 0x60e   : > { %v6455_v1 = vmul.f32 %v14644_v27, %v14643_v5  ;;  %v14645_v48 = vld [vmem:[#allocation130_spill] sm:$0xff] }
 0x60f   : > { %v12600_v9 = vpop.permute.xlu0 %6656  ;;  %v6310_v60 = vsel %vm1992_vm1, %v6055_v18, %v6051_v32  ;;  %v14647_v18 = vld [vmem:[#allocation97_spill] sm:$0xff] }
 0x610   : > { %6695 = vperm.xlu1 %7842, %v6402_v4   ;;  %v5592_v8 = vpop.permute.xlu1 %5591  ;;  %6848 = vperm.xlu0 %7841, %v6453_v2   ;;  %v14646_v2 = vld [vmem:[#allocation15_spill] sm:$0xff] }
 0x611   : > { %v6059_v52 = vrot.slane %v5592_v8, %v9307_v21  ;;  %v6406_v32 = vmul.f32 %v14646_v2, %v14645_v48  ;;  %v14648_v8 = vld [vmem:[#allocation13_spill] sm:$0xff] }
 0x612   : > { %v6457_v40 = vmul.f32 %v14648_v8, %v14647_v18  ;;  %v14653_v8 = vld [vmem:[#allocation134_spill] sm:$0xff] }
 0x613   : > { %v6311_v26 = vsel %vm1994_vm2, %v6059_v52, %v6310_v60  ;;  %v12613_v50 = vpop.permute.xlu0 %6662  ;;  %v6071_v52 = vrot.slane %v12251_v24, %v9307_v21 }
 0x614   : > { %6701 = vperm.xlu1 %7842, %v6404_v54   ;;  %v5598_v10 = vpop.permute.xlu1 %5597  ;;  %v6312_v4 = vsel %vm1996_vm3, %v6063_v58, %v6311_v26  ;;  %6854 = vperm.xlu0 %7841, %v6455_v1   ;;  %v6079_v54 = vrot.slane %v12267_v56, %v9307_v21  ;;  %v14649_v1 = vld [vmem:[#allocation132_spill] sm:$0xff]  ;;  %v14650_v26 = vld [vmem:[#allocation26_spill] sm:$0xff] }
 0x615   : > { %v6067_v55 = vrot.slane %v5598_v10, %v9307_v21  ;;  %v6408_v10 = vmul.f32 %v14650_v26, %v14649_v1 }
 0x617   : > { %v6313_v53 = vsel %vm1998_vm4, %v6067_v55, %v6312_v4  ;;  %v12622_v5 = vpop.permute.xlu0 %6668  ;;  %v14651_v4 = vld [vmem:[#allocation168_spill] sm:$0xff] }
 0x618   : > { %6707 = vperm.xlu1 %7842, %v6406_v32   ;;  %v5604_v60 = vpop.permute.xlu1 %5603  ;;  %6860 = vperm.xlu0 %7841, %v6457_v40   ;;  %v6314_v27 = vsel %vm2000_vm5, %v6071_v52, %v6313_v53  ;;  %v14652_v55 = vld [vmem:[#allocation244_spill] sm:$0xff]  ;;  %v14654_v40 = vld [vmem:[#allocation31_spill] sm:$0xff]  ;;  %v14655_v52 = vld [vmem:[#allocation170_spill] sm:$0xff] }
 0x619   : > { %v6075_v58 = vrot.slane %v5604_v60, %v9307_v21  ;;  %v6459_v48 = vmul.f32 %v14652_v55, %v14651_v4  ;;  %v6410_v53 = vmul.f32 %v14654_v40, %v14653_v8  ;;  %v14656_v60 = vld [vmem:[#allocation24_spill] sm:$0xff] }
 0x61a   : > { %v6461_v1 = vmul.f32 %v14656_v60, %v14655_v52  ;;  %v14657_v55 = vld [vmem:[#allocation136_spill] sm:$0xff] }
 0x61b   : > { %v6315_v2 = vsel %vm2002_vm6, %v6075_v58, %v6314_v27  ;;  %v12635_v18 = vpop.permute.xlu0 %6674  ;;  %v6087_v58 = vrot.slane %v12282_v30, %v9307_v21 }
 0x61c   : > { %v6316_v24 = vsel %vm2004_vm7, %v6079_v54, %v6315_v2  ;;  %6713 = vperm.xlu1 %7842, %v6408_v10   ;;  %v5610_v32 = vpop.permute.xlu1 %5609  ;;  %6866 = vperm.xlu0 %7841, %v6459_v48   ;;  %v6095_v10 = vrot.slane %v12298_v38, %v9307_v21  ;;  %v14658_v48 = vld [vmem:[#allocation35_spill] sm:$0xff]  ;;  %v14661_v38 = vld [vmem:[#allocation138_spill] sm:$0xff] }
 0x61d   : > { %6378 = vst.msk [vmem:[%s12066_s27 + $0x50] sm:$0xff] %vm2127_vm8, %v6316_v24  ;;  %v6083_v56 = vrot.slane %v5610_v32, %v9307_v21  ;;  %v6412_v2 = vmul.f32 %v14658_v48, %v14657_v55  ;;  %v14659_v24 = vld [vmem:[#allocation172_spill] sm:$0xff] }
 0x61e   : > { %v14660_v32 = vld [vmem:[#allocation28_spill] sm:$0xff] }
 0x61f   : > { %v12645_v26 = vpop.permute.xlu0 %6680  ;;  %v6317_v4 = vsel %vm1992_vm1, %v6087_v58, %v6083_v56  ;;  %v6463_v8 = vmul.f32 %v14660_v32, %v14659_v24  ;;  %v14663_v58 = vld [vmem:[#allocation174_spill] sm:$0xff] }
 0x620   : > { %6719 = vperm.xlu1 %7842, %v6410_v53   ;;  %v5616_v54 = vpop.permute.xlu1 %5615  ;;  %6872 = vperm.xlu0 %7841, %v6461_v1   ;;  %v14662_v1 = vld [vmem:[#allocation39_spill] sm:$0xff] }
 0x621   : > { %v6091_v27 = vrot.slane %v5616_v54, %v9307_v21  ;;  %v6414_v56 = vmul.f32 %v14662_v1, %v14661_v38  ;;  %v14664_v54 = vld [vmem:[#allocation33_spill] sm:$0xff] }
 0x622   : > { %v6465_v55 = vmul.f32 %v14664_v54, %v14663_v58  ;;  %v14669_v54 = vld [vmem:[#allocation142_spill] sm:$0xff] }
 0x623   : > { %v6318_v40 = vsel %vm1994_vm2, %v6091_v27, %v6317_v4  ;;  %v12658_v52 = vpop.permute.xlu0 %6686  ;;  %v6103_v27 = vrot.slane %v12312_v63, %v9307_v21 }
 0x624   : > { %6725 = vperm.xlu1 %7842, %v6412_v2   ;;  %v5622_v30 = vpop.permute.xlu1 %5621  ;;  %v6319_v53 = vsel %vm1996_vm3, %v6095_v10, %v6318_v40  ;;  %6878 = vperm.xlu0 %7841, %v6463_v8   ;;  %v6111_v2 = vrot.slane %v12328_v23, %v9307_v21  ;;  %v14665_v8 = vld [vmem:[#allocation140_spill] sm:$0xff]  ;;  %v14666_v40 = vld [vmem:[#allocation222_spill] sm:$0xff] }
 0x625   : > { %v6099_v60 = vrot.slane %v5622_v30, %v9307_v21  ;;  %v6416_v30 = vmul.f32 %v14666_v40, %v14665_v8 }
 0x627   : > { %v6320_v48 = vsel %vm1998_vm4, %v6099_v60, %v6319_v53  ;;  %v12667_v24 = vpop.permute.xlu0 %6692  ;;  %v14667_v53 = vld [vmem:[#allocation176_spill] sm:$0xff]  ;;  %v14668_v60 = vld [vmem:[#allocation37_spill] sm:$0xff] }
 0x628   : > { %6731 = vperm.xlu1 %7842, %v6414_v56   ;;  %v5628_v4 = vpop.permute.xlu1 %5627  ;;  %6884 = vperm.xlu0 %7841, %v6465_v55   ;;  %v6321_v32 = vsel %vm2000_vm5, %v6103_v27, %v6320_v48  ;;  %v6467_v38 = vmul.f32 %v14668_v60, %v14667_v53  ;;  %v14670_v55 = vld [vmem:[#allocation226_spill] sm:$0xff]  ;;  %v14673_v60 = vld [vmem:[#allocation144_spill] sm:$0xff] }
 0x629   : > { %v6107_v10 = vrot.slane %v5628_v4, %v9307_v21  ;;  %v6418_v48 = vmul.f32 %v14670_v55, %v14669_v54  ;;  %v14671_v27 = vld [vmem:[#allocation178_spill] sm:$0xff]  ;;  %v14672_v4 = vld [vmem:[#allocation225_spill] sm:$0xff] }
 0x62a   : > { %v6469_v8 = vmul.f32 %v14672_v4, %v14671_v27 }
 0x62b   : > { %v6322_v1 = vsel %vm2002_vm6, %v6107_v10, %v6321_v32  ;;  %v12680_v58 = vpop.permute.xlu0 %6698  ;;  %v6119_v10 = vrot.slane %v12343_v62, %v9307_v21 }
 0x62c   : > { %v6323_v63 = vsel %vm2004_vm7, %v6111_v2, %v6322_v1  ;;  %6737 = vperm.xlu1 %7842, %v6416_v30   ;;  %v5634_v56 = vpop.permute.xlu1 %5633  ;;  %6890 = vperm.xlu0 %7841, %v6467_v38   ;;  %v6127_v30 = vrot.slane %v12359_v39, %v9307_v21  ;;  %v14674_v38 = vld [vmem:[#allocation43_spill] sm:$0xff]  ;;  %v14677_v39 = vld [vmem:[#allocation146_spill] sm:$0xff] }
 0x62d   : > { %6379 = vst.msk [vmem:[%s12066_s27 + $0x58] sm:$0xff] %vm2127_vm8, %v6323_v63  ;;  %v6115_v23 = vrot.slane %v5634_v56, %v9307_v21  ;;  %v6420_v1 = vmul.f32 %v14674_v38, %v14673_v60  ;;  %v14675_v63 = vld [vmem:[#allocation180_spill] sm:$0xff]  ;;  %v14676_v56 = vld [vmem:[#allocation29_spill] sm:$0xff] }
 0x62e   : > { %v6471_v54 = vmul.f32 %v14676_v56, %v14675_v63 }
 0x62f   : > { %v12690_v40 = vpop.permute.xlu0 %6704  ;;  %v6324_v53 = vsel %vm1992_vm1, %v6119_v10, %v6115_v23  ;;  %v14679_v10 = vld [vmem:[#allocation182_spill] sm:$0xff] }
 0x630   : > { %6743 = vperm.xlu1 %7842, %v6418_v48   ;;  %v5640_v2 = vpop.permute.xlu1 %5639  ;;  %6896 = vperm.xlu0 %7841, %v6469_v8   ;;  %v14678_v8 = vld [vmem:[#allocation224_spill] sm:$0xff] }
 0x631   : > { %v6123_v32 = vrot.slane %v5640_v2, %v9307_v21  ;;  %v6422_v23 = vmul.f32 %v14678_v8, %v14677_v39  ;;  %v14680_v2 = vld [vmem:[#allocation4_spill] sm:$0xff] }
 0x632   : > { %v6473_v60 = vmul.f32 %v14680_v2, %v14679_v10  ;;  %v14685_v2 = vld [vmem:[#allocation150_spill] sm:$0xff] }
 0x633   : > { %v6325_v55 = vsel %vm1994_vm2, %v6123_v32, %v6324_v53  ;;  %v12703_v27 = vpop.permute.xlu0 %6710  ;;  %v6135_v32 = vrot.slane %v12373_v12, %v9307_v21 }
 0x634   : > { %6749 = vperm.xlu1 %7842, %v6420_v1   ;;  %v5646_v62 = vpop.permute.xlu1 %5645  ;;  %v6326_v48 = vsel %vm1996_vm3, %v6127_v30, %v6325_v55  ;;  %6902 = vperm.xlu0 %7841, %v6471_v54   ;;  %v6143_v1 = vrot.slane %v12389_v25, %v9307_v21  ;;  %v14681_v54 = vld [vmem:[#allocation148_spill] sm:$0xff] }
 0x635   : > { %v6131_v4 = vrot.slane %v5646_v62, %v9307_v21  ;;  %v14682_v55 = vld [vmem:[#allocation232_spill] sm:$0xff] }
 0x636   : > { %v6424_v62 = vmul.f32 %v14682_v55, %v14681_v54 }
 0x637   : > { %v6327_v38 = vsel %vm1998_vm4, %v6131_v4, %v6326_v48  ;;  %v12712_v63 = vpop.permute.xlu0 %6716  ;;  %v14683_v48 = vld [vmem:[#allocation184_spill] sm:$0xff]  ;;  %v14684_v4 = vld [vmem:[#allocation229_spill] sm:$0xff] }
 0x638   : > { %6755 = vperm.xlu1 %7842, %v6422_v23   ;;  %v5652_v53 = vpop.permute.xlu1 %5651  ;;  %6908 = vperm.xlu0 %7841, %v6473_v60   ;;  %v6328_v56 = vsel %vm2000_vm5, %v6135_v32, %v6327_v38  ;;  %v6475_v39 = vmul.f32 %v14684_v4, %v14683_v48  ;;  %v14686_v60 = vld [vmem:[#allocation235_spill] sm:$0xff]  ;;  %v14687_v32 = vld [vmem:[#allocation186_spill] sm:$0xff]  ;;  %v14689_v4 = vld [vmem:[#allocation152_spill] sm:$0xff] }
 0x639   : > { %v6139_v30 = vrot.slane %v5652_v53, %v9307_v21  ;;  %v6426_v38 = vmul.f32 %v14686_v60, %v14685_v2  ;;  %v14688_v53 = vld [vmem:[#allocation45_spill] sm:$0xff] }
 0x63a   : > { %v6477_v54 = vmul.f32 %v14688_v53, %v14687_v32 }
 0x63b   : > { %v6329_v8 = vsel %vm2002_vm6, %v6139_v30, %v6328_v56  ;;  %v12725_v10 = vpop.permute.xlu0 %6722  ;;  %v6151_v30 = vrot.slane %v12404_v29, %v9307_v21 }
 0x63c   : > { %v6330_v12 = vsel %vm2004_vm7, %v6143_v1, %v6329_v8  ;;  %6761 = vperm.xlu1 %7842, %v6424_v62   ;;  %v5658_v23 = vpop.permute.xlu1 %5657  ;;  %6914 = vperm.xlu0 %7841, %v6475_v39   ;;  %v6159_v62 = vrot.slane %v12420_v33, %v9307_v21  ;;  %v14690_v39 = vld [vmem:[#allocation236_spill] sm:$0xff]  ;;  %v14693_v33 = vld [vmem:[#allocation153_spill] sm:$0xff] }
 0x63d   : > { %6380 = vst.msk [vmem:[%s12066_s27 + $0x60] sm:$0xff] %vm2127_vm8, %v6330_v12  ;;  %v6147_v25 = vrot.slane %v5658_v23, %v9307_v21  ;;  %v6428_v8 = vmul.f32 %v14690_v39, %v14689_v4  ;;  %v14691_v12 = vld [vmem:[#allocation188_spill] sm:$0xff]  ;;  %v14692_v23 = vld [vmem:[#allocation47_spill] sm:$0xff] }
 0x63e   : > { %v6479_v2 = vmul.f32 %v14692_v23, %v14691_v12 }
 0x63f   : > { %v12735_v55 = vpop.permute.xlu0 %6728  ;;  %v6331_v48 = vsel %vm1992_vm1, %v6151_v30, %v6147_v25  ;;  %v14695_v30 = vld [vmem:[#allocation190_spill] sm:$0xff] }
 0x640   : > { %6767 = vperm.xlu1 %7842, %v6426_v38   ;;  %v5664_v1 = vpop.permute.xlu1 %5663  ;;  %6920 = vperm.xlu0 %7841, %v6477_v54   ;;  %v14694_v54 = vld [vmem:[#allocation238_spill] sm:$0xff] }
 0x641   : > { %v6155_v56 = vrot.slane %v5664_v1, %v9307_v21  ;;  %v6430_v25 = vmul.f32 %v14694_v54, %v14693_v33  ;;  %v14696_v1 = vld [vmem:[#allocation38_spill] sm:$0xff] }
 0x642   : > { %v6481_v4 = vmul.f32 %v14696_v1, %v14695_v30  ;;  %v14701_v1 = vld [vmem:[#allocation156_spill] sm:$0xff] }
 0x643   : > { %v6332_v60 = vsel %vm1994_vm2, %v6155_v56, %v6331_v48  ;;  %v12748_v32 = vpop.permute.xlu0 %6734  ;;  %v6167_v56 = vrot.slane %v12434_v13, %v9307_v21 }
 0x644   : > { %6773 = vperm.xlu1 %7842, %v6428_v8   ;;  %v5670_v29 = vpop.permute.xlu1 %5669  ;;  %v6333_v38 = vsel %vm1996_vm3, %v6159_v62, %v6332_v60  ;;  %6926 = vperm.xlu0 %7841, %v6479_v2   ;;  %v6175_v8 = vrot.slane %v12450_v49, %v9307_v21  ;;  %v14697_v2 = vld [vmem:[#allocation154_spill] sm:$0xff]  ;;  %v14698_v60 = vld [vmem:[#allocation240_spill] sm:$0xff] }
 0x645   : > { %v6163_v53 = vrot.slane %v5670_v29, %v9307_v21  ;;  %v6432_v29 = vmul.f32 %v14698_v60, %v14697_v2 }
 0x647   : > { %v6334_v39 = vsel %vm1998_vm4, %v6163_v53, %v6333_v38  ;;  %v12757_v12 = vpop.permute.xlu0 %6740  ;;  %v14699_v38 = vld [vmem:[#allocation192_spill] sm:$0xff]  ;;  %v14700_v53 = vld [vmem:[#allocation51_spill] sm:$0xff] }
 0x648   : > { %6779 = vperm.xlu1 %7842, %v6430_v25   ;;  %v5676_v48 = vpop.permute.xlu1 %5675  ;;  %6932 = vperm.xlu0 %7841, %v6481_v4   ;;  %v6335_v23 = vsel %vm2000_vm5, %v6167_v56, %v6334_v39  ;;  %v6483_v33 = vmul.f32 %v14700_v53, %v14699_v38  ;;  %v14702_v4 = vld [vmem:[#allocation57_spill] sm:$0xff]  ;;  %v14703_v56 = vld [vmem:[#allocation194_spill] sm:$0xff] }
 0x649   : > { %v6171_v62 = vrot.slane %v5676_v48, %v9307_v21  ;;  %v6434_v39 = vmul.f32 %v14702_v4, %v14701_v1  ;;  %v14704_v48 = vld [vmem:[#allocation53_spill] sm:$0xff]  ;;  %v14705_v53 = vld [vmem:[#allocation158_spill] sm:$0xff] }
 0x64a   : > { %v6485_v2 = vmul.f32 %v14704_v48, %v14703_v56  ;;  %v14709_v48 = vld [vmem:[#allocation63_spill] sm:$0xff] }
 0x64b   : > { %v6336_v54 = vsel %vm2002_vm6, %v6171_v62, %v6335_v23  ;;  %v12770_v30 = vpop.permute.xlu0 %6746  ;;  %v6183_v62 = vrot.slane %v12466_v16, %v9307_v21 }
 0x64c   : > { %v6337_v13 = vsel %vm2004_vm7, %v6175_v8, %v6336_v54  ;;  %6785 = vperm.xlu1 %7842, %v6432_v29   ;;  %v5682_v25 = vpop.permute.xlu1 %5681  ;;  %6938 = vperm.xlu0 %7841, %v6483_v33   ;;  %v6191_v29 = vrot.slane %v12488_v35, %v9307_v21  ;;  %v14706_v33 = vld [vmem:[#allocation243_spill] sm:$0xff]  ;;  %v14708_v35 = vld [vmem:[#allocation160_spill] sm:$0xff] }
 0x64d   : > { %6381 = vst.msk [vmem:[%s12066_s27 + $0x68] sm:$0xff] %vm2127_vm8, %v6337_v13  ;;  %v6179_v49 = vrot.slane %v5682_v25, %v9307_v21  ;;  %v6436_v54 = vmul.f32 %v14706_v33, %v14705_v53  ;;  %v14707_v13 = vld [vmem:[#allocation199_spill] sm:$0xff]  ;;  %v6207_v53 = vrot.slane %v12522_v11, %v9307_v21 }
 0x64e   : > { %v6488_v25 = vmul.f32 %v12321_v34, %v14707_v13 }
 0x64f   : > { %v12780_v60 = vpop.permute.xlu0 %6752  ;;  %v6338_v38 = vsel %vm1992_vm1, %v6183_v62, %v6179_v49  ;;  %v6438_v49 = vmul.f32 %v14709_v48, %v14708_v35  ;;  %v14714_v35 = vld [vmem:[#allocation162_spill] sm:$0xff]  ;;  %v14715_v48 = vld [vmem:[#allocation69_spill] sm:$0xff] }
 0x650   : > { %6791 = vperm.xlu1 %7842, %v6434_v39   ;;  %v5688_v8 = vpop.permute.xlu1 %5687  ;;  %6944 = vperm.xlu0 %7841, %v6485_v2   ;;  %v14710_v2 = vld [vmem:[#allocation207_spill] sm:$0xff] }
 0x651   : > { %v6187_v23 = vrot.slane %v5688_v8, %v9307_v21  ;;  %v6496_v62 = vmul.f32 %v12382_v47, %v14710_v2  ;;  %v14712_v47 = vld [vmem:[#allocation16_spill] sm:$0xff]  ;;  %v14716_v2 = vld [vmem:[#allocation201_spill] sm:$0xff] }
 0x653   : > { %v6339_v1 = vsel %vm1994_vm2, %v6187_v23, %v6338_v38  ;;  %v12793_v4 = vpop.permute.xlu0 %6758  ;;  %v6199_v23 = vrot.slane %v12505_v57, %v9307_v21 }
 0x654   : > { %6797 = vperm.xlu1 %7842, %v6436_v54   ;;  %v5694_v16 = vpop.permute.xlu1 %5693  ;;  %v6340_v39 = vsel %vm1996_vm3, %v6191_v29, %v6339_v1  ;;  %6953 = vperm.xlu0 %7841, %v6488_v25   ;;  %v14711_v54 = vld [vmem:[#allocation49_spill] sm:$0xff]  ;;  %v14713_v25 = vld [vmem:[#allocation215_spill] sm:$0xff] }
 0x655   : > { %v6195_v56 = vrot.slane %v5694_v16, %v9307_v21  ;;  %v6440_v13 = vmul.f32 %v14712_v47, %v14711_v54  ;;  %v6504_v1 = vmul.f32 %v12443_v37, %v14713_v25  ;;  %v14718_v54 = vld [vmem:[#allocation20_spill] sm:$0xff] }
 0x657   : > { %v6341_v8 = vsel %vm1998_vm4, %v6195_v56, %v6340_v39  ;;  %v12802_v34 = vpop.permute.xlu0 %6764 }
 0x658   : > { %6803 = vperm.xlu1 %7842, %v6438_v49   ;;  %v5700_v38 = vpop.permute.xlu1 %5699  ;;  %6977 = vperm.xlu0 %7841, %v6496_v62   ;;  %v6342_v33 = vsel %vm2000_vm5, %v6199_v23, %v6341_v8  ;;  %v6442_v49 = vmul.f32 %v14715_v48, %v14714_v35  ;;  %v6490_v62 = vmul.f32 %v12334_v14, %v14716_v2  ;;  %v14722_v35 = vld [vmem:[#allocation208_spill] sm:$0xff]  ;;  %v14723_v48 = vld [vmem:[#allocation73_spill] sm:$0xff] }
 0x659   : > { %v6203_v29 = vrot.slane %v5700_v38, %v9307_v21  ;;  %v6215_v8 = vrot.slane %v12532_v51, %v9307_v21 }
 0x65b   : > { %v6343_v16 = vsel %vm2002_vm6, %v6203_v29, %v6342_v33  ;;  %v12815_v39 = vpop.permute.xlu0 %6770  ;;  %v6223_v29 = vrot.slane %v12545_v31, %v9307_v21  ;;  %v14717_v33 = vld [vmem:[#allocation164_spill] sm:$0xff]  ;;  %v14720_v31 = vld [vmem:[#allocation166_spill] sm:$0xff] }
 0x65c   : > { %v6344_v57 = vsel %vm2004_vm7, %v6207_v53, %v6343_v16  ;;  %6809 = vperm.xlu1 %7842, %v6440_v13   ;;  %v5706_v56 = vpop.permute.xlu1 %5705  ;;  %7001 = vperm.xlu0 %7841, %v6504_v1   ;;  %v6444_v47 = vmul.f32 %v14718_v54, %v14717_v33  ;;  %v14719_v13 = vld [vmem:[#allocation217_spill] sm:$0xff] }
 0x65d   : > { %6382 = vst.msk [vmem:[%s12066_s27 + $0x70] sm:$0xff] %vm2127_vm8, %v6344_v57  ;;  %v6211_v11 = vrot.slane %v5706_v56, %v9307_v21  ;;  %v6506_v14 = vmul.f32 %v12456_v22, %v14719_v13  ;;  %v14721_v56 = vld [vmem:[#allocation75_spill] sm:$0xff]  ;;  %v14725_v33 = vld [vmem:[#allocation25_spill] sm:$0xff] }
 0x65f   : > { %v12825_v37 = vpop.permute.xlu0 %6776  ;;  %v6345_v53 = vsel %vm1992_vm1, %v6215_v8, %v6211_v11  ;;  %v6446_v11 = vmul.f32 %v14721_v56, %v14720_v31  ;;  %v14729_v31 = vld [vmem:[#allocation219_spill] sm:$0xff] }
 0x660   : > { %6815 = vperm.xlu1 %7842, %v6442_v49   ;;  %v5712_v23 = vpop.permute.xlu1 %5711  ;;  %6959 = vperm.xlu0 %7841, %v6490_v62   ;;  %v6499_v49 = vmul.f32 %v14723_v48, %v14722_v35  ;;  %v6231_v62 = vrot.slane %v12555_v59, %v9307_v21  ;;  %v6508_v56 = vmul.f32 %v12474_v41, %v14729_v31  ;;  %v14730_v35 = vld [vmem:[#allocation95_spill] sm:$0xff] }
 0x661   : > { %v6219_v38 = vrot.slane %v5712_v23, %v9307_v21  ;;  %v6452_v48 = vmul.f32 %v12019_v20, %v14730_v35  ;;  %v14735_v20 = vld [vmem:[#allocation167_spill] sm:$0xff] }
 0x663   : > { %v6346_v25 = vsel %vm1994_vm2, %v6219_v38, %v6345_v53  ;;  %v12838_v1 = vpop.permute.xlu0 %6782  ;;  %v6239_v38 = vrot.slane %v12568_v6, %v9307_v21  ;;  %v14724_v53 = vld [vmem:[#allocation93_spill] sm:$0xff] }
 0x664   : > { %6821 = vperm.xlu1 %7842, %v6444_v47   ;;  %v5718_v51 = vpop.permute.xlu1 %5717  ;;  %v6347_v16 = vsel %vm1996_vm3, %v6223_v29, %v6346_v25  ;;  %7007 = vperm.xlu0 %7841, %v6506_v14   ;;  %v6448_v54 = vmul.f32 %v14725_v33, %v14724_v53  ;;  %v14726_v47 = vld [vmem:[#allocation203_spill] sm:$0xff]  ;;  %v14727_v6 = vld [vmem:[#allocation81_spill] sm:$0xff] }
 0x665   : > { %v6227_v57 = vrot.slane %v5718_v51, %v9307_v21  ;;  %v6492_v13 = vmul.f32 %v12352_v17, %v14726_v47  ;;  %v6456_v47 = vmul.f32 %v12055_v44, %v14735_v20  ;;  %v14740_v44 = vld [vmem:[#allocation171_spill] sm:$0xff] }
 0x667   : > { %v6348_v2 = vsel %vm1998_vm4, %v6227_v57, %v6347_v16  ;;  %v12847_v22 = vpop.permute.xlu0 %6788  ;;  %v14728_v16 = vld [vmem:[#allocation70_spill] sm:$0xff] }
 0x668   : > { %6827 = vperm.xlu1 %7842, %v6446_v11   ;;  %v5724_v8 = vpop.permute.xlu1 %5723  ;;  %6986 = vperm.xlu0 %7841, %v6499_v49   ;;  %v6349_v29 = vsel %vm2000_vm5, %v6231_v62, %v6348_v2  ;;  %v6450_v57 = vmul.f32 %v14728_v16, %v14727_v6  ;;  %v14731_v49 = vld [vmem:[#allocation210_spill] sm:$0xff]  ;;  %v14732_v2 = vld [vmem:[#allocation23_spill] sm:$0xff]  ;;  %v14738_v16 = vld [vmem:[#allocation204_spill] sm:$0xff] }
 0x669   : > { %v6235_v23 = vrot.slane %v5724_v8, %v9307_v21  ;;  %v6501_v62 = vmul.f32 %v14732_v2, %v14731_v49 }
 0x66b   : > { %v6350_v14 = vsel %vm2002_vm6, %v6235_v23, %v6349_v29  ;;  %v12860_v25 = vpop.permute.xlu0 %6794  ;;  %v14734_v29 = vld [vmem:[#allocation205_spill] sm:$0xff] }
 0x66c   : > { %v6351_v59 = vsel %vm2004_vm7, %v6239_v38, %v6350_v14  ;;  %6833 = vperm.xlu1 %7842, %v6448_v54   ;;  %v12863_v51 = vpop.permute.xlu1 %6641  ;;  %6965 = vperm.xlu0 %7841, %v6492_v13   ;;  %v14733_v38 = vld [vmem:[#allocation106_spill] sm:$0xff]  ;;  %v6494_v53 = vmul.f32 %v12363_v0, %v14734_v29  ;;  %v14736_v13 = vld [vmem:[#allocation220_spill] sm:$0xff] }
 0x66d   : > { %6383 = vst.msk [vmem:[%s12066_s27 + $0x78] sm:$0xff] %vm2127_vm8, %v6351_v59  ;;  %v6454_v41 = vmul.f32 %v12038_v46, %v14733_v38  ;;  %v6510_v14 = vmul.f32 %v12483_v19, %v14736_v13  ;;  %v14737_v46 = vld [vmem:[#allocation169_spill] sm:$0xff] }
 0x66e   : > { %v6458_v0 = vmul.f32 %v12086_v36, %v14737_v46  ;;  %v14741_v19 = vld [vmem:[#allocation221_spill] sm:$0xff] }
 0x66f   : > { %v12871_v11 = vpop.permute.xlu0 %6800  ;;  %v6511_v49 = vmul.f32 %v12109_v61, %v14741_v19  ;;  %v14742_v36 = vld [vmem:[#allocation173_spill] sm:$0xff] }
 0x670   : > { %6839 = vperm.xlu1 %7842, %v6450_v57   ;;  %v12873_v17 = vpop.permute.xlu1 %6647  ;;  %7013 = vperm.xlu0 %7841, %v6508_v56   ;;  %v14739_v57 = vld [vmem:[#allocation67_spill] sm:$0xff]  ;;  %v6462_v38 = vmul.f32 %v12121_v3, %v14742_v36  ;;  %v14744_v61 = vld [vmem:[#allocation177_spill] sm:$0xff] }
 0x671   : > { %v6495_v31 = vmul.f32 %v14739_v57, %v14738_v16  ;;  %v6466_v13 = vmul.f32 %v12151_v45, %v14744_v61  ;;  %v7063_v16 = vrot.slane %v12622_v5, %v9307_v21  ;;  %v14745_v57 = vld [vmem:[#allocation179_spill] sm:$0xff]  ;;  %v7071_v5 = vrot.slane %v12635_v18, %v9307_v21  ;;  %v14747_v36 = vld [vmem:[#allocation85_spill] sm:$0xff] }
 0x673   : > { %v12879_v8 = vpop.permute.xlu0 %6806 }
 0x674   : > { %6845 = vperm.xlu1 %7842, %v6452_v48   ;;  %v12881_v23 = vpop.permute.xlu1 %6653  ;;  %6992 = vperm.xlu0 %7841, %v6501_v62   ;;  %v6460_v48 = vmul.f32 %v12106_v42, %v14740_v44 }
 0x677   : > { %v12887_v33 = vpop.permute.xlu0 %6812 }
 0x678   : > { %6851 = vperm.xlu1 %7842, %v6454_v41   ;;  %v12889_v54 = vpop.permute.xlu1 %6659  ;;  %6971 = vperm.xlu0 %7841, %v6494_v53   ;;  %v14743_v53 = vld [vmem:[#allocation175_spill] sm:$0xff] }
 0x679   : > { %v6464_v20 = vmul.f32 %v12133_v28, %v14743_v53  ;;  %v6468_v28 = vmul.f32 %v12169_v43, %v14745_v57  ;;  %v7095_v43 = vrot.slane %v12667_v24, %v9307_v21  ;;  %v7079_v24 = vrot.slane %v12645_v26, %v9307_v21 }
 0x67b   : > { %v12895_v59 = vpop.permute.xlu0 %6818 }
 0x67c   : > { %6857 = vperm.xlu1 %7842, %v6456_v47   ;;  %v6666_v6 = vpop.permute.xlu1 %6665  ;;  %7019 = vperm.xlu0 %7841, %v6510_v14  }
 0x67d   : > { %v7059_v14 = vrot.slane %v6666_v6, %v9307_v21 }
 0x67f   : > { %v12901_v56 = vpop.permute.xlu0 %6824 }
 0x680   : > { %6863 = vperm.xlu1 %7842, %v6458_v0   ;;  %v6672_v35 = vpop.permute.xlu1 %6671  ;;  %6974 = vperm.xlu0 %7841, %v6495_v31   ;;  %v7543_v31 = vsel %vm1992_vm1, %v7063_v16, %v7059_v14  ;;  %v14749_v16 = vld [vmem:[#allocation34_spill] sm:$0xff] }
 0x681   : > { %v7067_v3 = vrot.slane %v6672_v35, %v9307_v21 }
 0x683   : > { %v12907_v2 = vpop.permute.xlu0 %6830  ;;  %v7544_v45 = vsel %vm1994_vm2, %v7067_v3, %v7543_v31  ;;  %v7103_v3 = vrot.slane %v12680_v58, %v9307_v21  ;;  %v7087_v58 = vrot.slane %v12658_v52, %v9307_v21  ;;  %v7119_v52 = vrot.slane %v12703_v27, %v9307_v21 }
 0x684   : > { %6869 = vperm.xlu1 %7842, %v6460_v48   ;;  %v6678_v62 = vpop.permute.xlu1 %6677  ;;  %7022 = vperm.xlu0 %7841, %v6511_v49   ;;  %v14746_v49 = vld [vmem:[#allocation181_spill] sm:$0xff]  ;;  %v7545_v53 = vsel %vm1996_vm3, %v7071_v5, %v7544_v45  ;;  %v14751_v5 = vld [vmem:[#allocation87_spill] sm:$0xff] }
 0x685   : > { %v7075_v6 = vrot.slane %v6678_v62, %v9307_v21 }
 0x687   : > { %v12911_v41 = vpop.permute.xlu0 %6836  ;;  %v7546_v62 = vsel %vm1998_vm4, %v7075_v6, %v7545_v53 }
 0x688   : > { %6875 = vperm.xlu1 %7842, %v6462_v38   ;;  %v6684_v29 = vpop.permute.xlu1 %6683  ;;  %v6470_v38 = vmul.f32 %v14747_v36, %v14746_v49 }
 0x689   : > { %v7083_v61 = vrot.slane %v6684_v29, %v9307_v21  ;;  %v7547_v29 = vsel %vm2000_vm5, %v7079_v24, %v7546_v62 }
 0x68b   : > { %v12915_v47 = vpop.permute.xlu0 %6842  ;;  %v7548_v26 = vsel %vm2002_vm6, %v7083_v61, %v7547_v29  ;;  %v14753_v61 = vld [vmem:[#allocation36_spill] sm:$0xff]  ;;  %v14756_v29 = vld [vmem:[#allocation191_spill] sm:$0xff] }
 0x68c   : > { %6881 = vperm.xlu1 %7842, %v6464_v20   ;;  %v6690_v42 = vpop.permute.xlu1 %6689  ;;  %v7549_v36 = vsel %vm2004_vm7, %v7087_v58, %v7548_v26 }
 0x68d   : > { %v7091_v44 = vrot.slane %v6690_v42, %v9307_v21  ;;  %v7667_v62 = vsel %vm2127_vm8, %v7549_v36, 0.0 }
 0x68f   : > { %v12920_v46 = vpop.permute.xlu0 %6848  ;;  %v7550_v20 = vsel %vm1992_vm1, %v7095_v43, %v7091_v44 }
 0x690   : > { %6887 = vperm.xlu1 %7842, %v6466_v13   ;;  %v6696_v0 = vpop.permute.xlu1 %6695 }
 0x691   : > { %v7099_v35 = vrot.slane %v6696_v0, %v9307_v21  ;;  %v14748_v0 = vld [vmem:[#allocation183_spill] sm:$0xff] }
 0x692   : > { %v6472_v57 = vmul.f32 %v14749_v16, %v14748_v0  ;;  %v14754_v0 = vld [vmem:[#allocation189_spill] sm:$0xff]  ;;  %v14755_v16 = vld [vmem:[#allocation78_spill] sm:$0xff] }
 0x693   : > { %v12929_v48 = vpop.permute.xlu0 %6854  ;;  %v7551_v13 = vsel %vm1994_vm2, %v7099_v35, %v7550_v20  ;;  %v7111_v35 = vrot.slane %v12690_v40, %v9307_v21  ;;  %v14752_v40 = vld [vmem:[#allocation187_spill] sm:$0xff] }
 0x694   : > { %6893 = vperm.xlu1 %7842, %v6468_v28   ;;  %v6702_v19 = vpop.permute.xlu1 %6701  ;;  %v7552_v28 = vsel %vm1996_vm3, %v7103_v3, %v7551_v13  ;;  %v6476_v13 = vmul.f32 %v14753_v61, %v14752_v40  ;;  %v14760_v40 = vld [vmem:[#allocation195_spill] sm:$0xff]  ;;  %v14761_v61 = vld [vmem:[#allocation40_spill] sm:$0xff] }
 0x695   : > { %v7107_v18 = vrot.slane %v6702_v19, %v9307_v21  ;;  %v14750_v19 = vld [vmem:[#allocation185_spill] sm:$0xff] }
 0x696   : > { %v6474_v43 = vmul.f32 %v14751_v5, %v14750_v19  ;;  %v14758_v19 = vld [vmem:[#allocation193_spill] sm:$0xff]  ;;  %v14759_v5 = vld [vmem:[#allocation91_spill] sm:$0xff] }
 0x697   : > { %v12942_v42 = vpop.permute.xlu0 %6860  ;;  %v7553_v44 = vsel %vm1998_vm4, %v7107_v18, %v7552_v28 }
 0x698   : > { %6899 = vperm.xlu1 %7842, %v6470_v38   ;;  %v6708_v14 = vpop.permute.xlu1 %6707  ;;  %v7554_v38 = vsel %vm2000_vm5, %v7111_v35, %v7553_v44  ;;  %v14757_v44 = vld [vmem:[#allocation248_spill] sm:$0xff] }
 0x699   : > { %v7115_v45 = vrot.slane %v6708_v14, %v9307_v21 }
 0x69b   : > { %v12955_v31 = vpop.permute.xlu0 %6866  ;;  %v7555_v20 = vsel %vm2002_vm6, %v7115_v45, %v7554_v38  ;;  %v6480_v45 = vmul.f32 %v14757_v44, %v14756_v29  ;;  %v7159_v38 = vrot.slane %v12757_v12, %v9307_v21  ;;  %v14762_v29 = vld [vmem:[#allocation197_spill] sm:$0xff]  ;;  %v14763_v44 = vld [vmem:[#allocation82_spill] sm:$0xff] }
 0x69c   : > { %6905 = vperm.xlu1 %7842, %v6472_v57   ;;  %v12960_v6 = vpop.permute.xlu1 %6713  ;;  %v7556_v14 = vsel %vm2004_vm7, %v7119_v52, %v7555_v20  ;;  %v6478_v57 = vmul.f32 %v14755_v16, %v14754_v0 }
 0x69d   : > { %v7670_v3 = vsel %vm2127_vm8, %v7556_v14, 0.0 }
 0x69f   : > { %v12969_v49 = vpop.permute.xlu0 %6872 }
 0x6a0   : > { %6911 = vperm.xlu1 %7842, %v6474_v43   ;;  %v12973_v53 = vpop.permute.xlu1 %6719  ;;  %v6482_v43 = vmul.f32 %v14759_v5, %v14758_v19  ;;  %v7183_v5 = vrot.slane %v12793_v4, %v9307_v21  ;;  %v14767_v4 = vld [vmem:[#allocation19_spill] sm:$0xff] }
 0x6a3   : > { %7668 = vadd.xlane.f32.xlu0 %v7667_v62  ;;  %v12981_v18 = vpop.permute.xlu0 %6878 }
 0x6a4   : > { %6917 = vperm.xlu1 %7842, %v6476_v13   ;;  %v12984_v24 = vpop.permute.xlu1 %6725  ;;  %v6484_v13 = vmul.f32 %v14761_v61, %v14760_v40 }
 0x6a7   : > { %7671 = vadd.xlane.f32.xlu0 %v7670_v3  ;;  %v12989_v27 = vpop.permute.xlu0 %6884  ;;  %v7167_v3 = vrot.slane %v12770_v30, %v9307_v21 }
 0x6a8   : > { %6923 = vperm.xlu1 %7842, %v6478_v57   ;;  %v12991_v28 = vpop.permute.xlu1 %6731 }
 0x6ab   : > { %v12995_v26 = vpop.permute.xlu0 %6890 }
 0x6ac   : > { %6929 = vperm.xlu1 %7842, %v6480_v45   ;;  %v6738_v58 = vpop.permute.xlu1 %6737  ;;  %v6486_v45 = vmul.f32 %v14763_v44, %v14762_v29 }
 0x6ad   : > { %v7155_v35 = vrot.slane %v6738_v58, %v9307_v21 }
 0x6af   : > { %v13000_v36 = vpop.permute.xlu0 %6896  ;;  %v7564_v62 = vsel %vm1992_vm1, %v7159_v38, %v7155_v35  ;;  %v7175_v35 = vrot.slane %v12780_v60, %v9307_v21  ;;  %v14764_v38 = vld [vmem:[#allocation198_spill] sm:$0xff] }
 0x6b0   : > { %6935 = vperm.xlu1 %7842, %v6482_v43   ;;  %v6744_v20 = vpop.permute.xlu1 %6743 }
 0x6b1   : > { %v7163_v52 = vrot.slane %v6744_v20, %v9307_v21  ;;  %v14765_v20 = vld [vmem:[#allocation242_spill] sm:$0xff] }
 0x6b3   : > { %v7565_v14 = vsel %vm1994_vm2, %v7163_v52, %v7564_v62  ;;  %v13011_v0 = vpop.permute.xlu0 %6902  ;;  %v6489_v52 = vmul.f32 %v14765_v20, %v14764_v38 }
 0x6b4   : > { %6941 = vperm.xlu1 %7842, %v6484_v13   ;;  %v6750_v16 = vpop.permute.xlu1 %6749  ;;  %v7566_v57 = vsel %vm1996_vm3, %v7167_v3, %v7565_v14  ;;  %v14766_v3 = vld [vmem:[#allocation206_spill] sm:$0xff] }
 0x6b5   : > { %v7171_v12 = vrot.slane %v6750_v16, %v9307_v21  ;;  %v6497_v16 = vmul.f32 %v14767_v4, %v14766_v3  ;;  %v7215_v3 = vrot.slane %v12838_v1, %v9307_v21  ;;  %v14772_v4 = vld [vmem:[#allocation200_spill] sm:$0xff]  ;;  %v7223_v1 = vrot.slane %v12847_v22, %v9307_v21 }
 0x6b7   : > { %v7567_v58 = vsel %vm1998_vm4, %v7171_v12, %v7566_v57  ;;  %v13023_v43 = vpop.permute.xlu0 %6908  ;;  %v7191_v12 = vrot.slane %v12802_v34, %v9307_v21 }
 0x6b8   : > { %6947 = vperm.xlu1 %7842, %v6486_v45   ;;  %v6756_v19 = vpop.permute.xlu1 %6755  ;;  %v7568_v62 = vsel %vm2000_vm5, %v7175_v35, %v7567_v58  ;;  %v14768_v58 = vld [vmem:[#allocation214_spill] sm:$0xff]  ;;  %v14769_v35 = vld [vmem:[#allocation247_spill] sm:$0xff] }
 0x6b9   : > { %v7179_v30 = vrot.slane %v6756_v19, %v9307_v21  ;;  %v6505_v19 = vmul.f32 %v14769_v35, %v14768_v58 }
 0x6bb   : > { %v7569_v40 = vsel %vm2002_vm6, %v7179_v30, %v7568_v62  ;;  %v13036_v57 = vpop.permute.xlu0 %6914  ;;  %v14770_v62 = vld [vmem:[#allocation209_spill] sm:$0xff] }
 0x6bc   : > { %6956 = vperm.xlu1 %7842, %v6489_v52   ;;  %v6762_v61 = vpop.permute.xlu1 %6761  ;;  %v7570_v60 = vsel %vm2004_vm7, %v7183_v5, %v7569_v40  ;;  %v7199_v5 = vrot.slane %v12815_v39, %v9307_v21  ;;  %v14771_v40 = vld [vmem:[#allocation42_spill] sm:$0xff] }
 0x6bd   : > { %v7676_v13 = vsel %vm2127_vm8, %v7570_v60, 0.0  ;;  %v7187_v14 = vrot.slane %v6762_v61, %v9307_v21  ;;  %v6498_v61 = vmul.f32 %v14771_v40, %v14770_v62 }
 0x6be   : > { %7677 = vadd.xlane.f32.xlu0 %v7676_v13  ;;  %v7207_v13 = vrot.slane %v12825_v37, %v9307_v21 }
 0x6bf   : > { %v7571_v45 = vsel %vm1992_vm1, %v7191_v12, %v7187_v14  ;;  %v13046_v20 = vpop.permute.xlu0 %6920 }
 0x6c0   : > { %6980 = vperm.xlu1 %7842, %v6497_v16   ;;  %v6768_v29 = vpop.permute.xlu1 %6767  ;;  %v14773_v16 = vld [vmem:[#allocation61_spill] sm:$0xff] }
 0x6c1   : > { %v7195_v44 = vrot.slane %v6768_v29, %v9307_v21  ;;  %v6491_v12 = vmul.f32 %v14773_v16, %v14772_v4  ;;  %v14778_v4 = vld [vmem:[#allocation202_spill] sm:$0xff] }
 0x6c2   : > { %v14779_v16 = vld [vmem:[#allocation246_spill] sm:$0xff] }
 0x6c3   : > { %v7572_v30 = vsel %vm1994_vm2, %v7195_v44, %v7571_v45  ;;  %v13061_v45 = vpop.permute.xlu0 %6926 }
 0x6c4   : > { %7004 = vperm.xlu1 %7842, %v6505_v19   ;;  %v6774_v38 = vpop.permute.xlu1 %6773  ;;  %v7573_v52 = vsel %vm1996_vm3, %v7199_v5, %v7572_v30  ;;  %v14774_v19 = vld [vmem:[#allocation216_spill] sm:$0xff]  ;;  %v14775_v30 = vld [vmem:[#allocation83_spill] sm:$0xff] }
 0x6c5   : > { %v7203_v34 = vrot.slane %v6774_v38, %v9307_v21  ;;  %v6507_v5 = vmul.f32 %v14775_v30, %v14774_v19  ;;  %v7247_v19 = vrot.slane %v12879_v8, %v9307_v21  ;;  %v14780_v30 = vld [vmem:[#allocation218_spill] sm:$0xff]  ;;  %v14783_v8 = vld [vmem:[#allocation44_spill] sm:$0xff] }
 0x6c7   : > { %v7574_v60 = vsel %vm1998_vm4, %v7203_v34, %v7573_v52  ;;  %v7231_v52 = vrot.slane %v12860_v25, %v9307_v21  ;;  %v13074_v62 = vpop.permute.xlu0 %6932 }
 0x6c8   : > { %6983 = vperm.xlu1 %7842, %v6498_v61   ;;  %v6780_v14 = vpop.permute.xlu1 %6779  ;;  %v7575_v29 = vsel %vm2000_vm5, %v7207_v13, %v7574_v60  ;;  %v14776_v61 = vld [vmem:[#allocation211_spill] sm:$0xff]  ;;  %v14777_v60 = vld [vmem:[#allocation84_spill] sm:$0xff] }
 0x6c9   : > { %v7211_v39 = vrot.slane %v6780_v14, %v9307_v21  ;;  %v6500_v13 = vmul.f32 %v14777_v60, %v14776_v61 }
 0x6cb   : > { %v7576_v44 = vsel %vm2002_vm6, %v7211_v39, %v7575_v29  ;;  %v7239_v29 = vrot.slane %v12871_v11, %v9307_v21 }
 0x6cc   : > { %6962 = vperm.xlu1 %7842, %v6491_v12   ;;  %v6786_v58 = vpop.permute.xlu1 %6785  ;;  %v13064_v37 = vsel %vm2004_vm7, %v7215_v3, %v7576_v44  ;;  %v6493_v12 = vmul.f32 %v14779_v16, %v14778_v4  ;;  %v13087_v44 = vpop.permute.xlu0 %6938  ;;  %v7263_v4 = vrot.slane %v12895_v59, %v9307_v21  ;;  %v14787_v59 = vld [vmem:[#allocation79_spill] sm:$0xff] }
 0x6cd   : > { %v7219_v35 = vrot.slane %v6786_v58, %v9307_v21 }
 0x6cf   : > { %v7578_v40 = vsel %vm1992_vm1, %v7223_v1, %v7219_v35 }
 0x6d0   : > { %7010 = vperm.xlu1 %7842, %v6507_v5   ;;  %v6792_v38 = vpop.permute.xlu1 %6791  ;;  %v14781_v5 = vld [vmem:[#allocation32_spill] sm:$0xff]  ;;  %v13098_v61 = vpop.permute.xlu0 %6944 }
 0x6d1   : > { %v7227_v34 = vrot.slane %v6792_v38, %v9307_v21  ;;  %v6509_v1 = vmul.f32 %v14781_v5, %v14780_v30  ;;  %v7271_v5 = vrot.slane %v12901_v56, %v9307_v21 }
 0x6d3   : > { %v7579_v14 = vsel %vm1994_vm2, %v7227_v34, %v7578_v40 }
 0x6d4   : > { %6989 = vperm.xlu1 %7842, %v6500_v13   ;;  %v6798_v39 = vpop.permute.xlu1 %6797  ;;  %v7580_v22 = vsel %vm1996_vm3, %v7231_v52, %v7579_v14  ;;  %v14782_v13 = vld [vmem:[#allocation213_spill] sm:$0xff] }
 0x6d5   : > { %v7235_v3 = vrot.slane %v6798_v39, %v9307_v21  ;;  %v6502_v14 = vmul.f32 %v14783_v8, %v14782_v13  ;;  %v7255_v39 = vrot.slane %v12887_v33, %v9307_v21 }
 0x6d7   : > { %v7581_v25 = vsel %vm1998_vm4, %v7235_v3, %v7580_v22 }
 0x6d8   : > { %6968 = vperm.xlu1 %7842, %v6493_v12   ;;  %v6804_v58 = vpop.permute.xlu1 %6803  ;;  %v7582_v38 = vsel %vm2000_vm5, %v7239_v29, %v7581_v25  ;;  %v14784_v12 = vld [vmem:[#allocation196_spill] sm:$0xff]  ;;  %v14785_v25 = vld [vmem:[#allocation55_spill] sm:$0xff] }
 0x6d9   : > { %v7243_v35 = vrot.slane %v6804_v58, %v9307_v21  ;;  %v6487_v29 = vmul.f32 %v14785_v25, %v14784_v12 }
 0x6db   : > { %v7583_v34 = vsel %vm2002_vm6, %v7243_v35, %v7582_v38  ;;  %v13112_v35 = vpop.permute.xlu0 %6953 }
 0x6dc   : > { %7016 = vperm.xlu1 %7842, %v6509_v1   ;;  %v6810_v52 = vpop.permute.xlu1 %6809  ;;  %v7584_v11 = vsel %vm2004_vm7, %v7247_v19, %v7583_v34  ;;  %v14786_v1 = vld [vmem:[#allocation212_spill] sm:$0xff] }
 0x6dd   : > { %v7682_v40 = vsel %vm2127_vm8, %v7584_v11, 0.0  ;;  %v7251_v60 = vrot.slane %v6810_v52, %v9307_v21  ;;  %v6503_v38 = vmul.f32 %v14787_v59, %v14786_v1  ;;  %v7031_v59 = vrot.slane %v12577_v7, %v9307_v21 }
 0x6de   : > { %7683 = vadd.xlane.f32.xlu0 %v7682_v40 }
 0x6df   : > { %v7585_v16 = vsel %vm1992_vm1, %v7255_v39, %v7251_v60  ;;  %v7279_v60 = vrot.slane %v12907_v2, %v9307_v21  ;;  %v13125_v13 = vpop.permute.xlu0 %6977  ;;  %v7295_v2 = vrot.slane %v12915_v47, %v9307_v21  ;;  %v7303_v47 = vrot.slane %v12920_v46, %v9307_v21 }
 0x6e0   : > { %6995 = vperm.xlu1 %7842, %v6502_v14   ;;  %v6816_v22 = vpop.permute.xlu1 %6815  ;;  %v7043_v46 = vrot.slane %v12881_v23, %v9307_v21 }
 0x6e1   : > { %v7259_v3 = vrot.slane %v6816_v22, %v9307_v21  ;;  %v7287_v22 = vrot.slane %v12911_v41, %v9307_v21  ;;  %v7027_v41 = vrot.slane %v12863_v51, %v9307_v21 }
 0x6e3   : > { %v7586_v58 = vsel %vm1994_vm2, %v7259_v3, %v7585_v16  ;;  %v13134_v3 = vpop.permute.xlu0 %7001  ;;  %v7536_v51 = vsel %vm1992_vm1, %v7031_v59, %v7027_v41  ;;  %v7055_v59 = vrot.slane %v12613_v50, %v9307_v21 }
 0x6e4   : > { %6950 = vperm.xlu1 %7842, %v6487_v29   ;;  %v6822_v19 = vpop.permute.xlu1 %6821  ;;  %v7587_v33 = vsel %vm1996_vm3, %v7263_v4, %v7586_v58 }
 0x6e5   : > { %v7267_v30 = vrot.slane %v6822_v19, %v9307_v21 }
 0x6e7   : > { %v7588_v34 = vsel %vm1998_vm4, %v7267_v30, %v7587_v33  ;;  %v13143_v33 = vpop.permute.xlu0 %6959 }
 0x6e8   : > { %6998 = vperm.xlu1 %7842, %v6503_v38   ;;  %v6828_v52 = vpop.permute.xlu1 %6827  ;;  %v7589_v11 = vsel %vm2000_vm5, %v7271_v5, %v7588_v34  ;;  %v7035_v5 = vrot.slane %v12873_v17, %v9307_v21  ;;  %v7311_v34 = vrot.slane %v12929_v48, %v9307_v21  ;;  %v7039_v48 = vrot.slane %v12590_v15, %v9307_v21 }
 0x6e9   : > { %v7275_v40 = vrot.slane %v6828_v52, %v9307_v21 }
 0x6ea   : > { %v7537_v17 = vsel %vm1994_vm2, %v7035_v5, %v7536_v51 }
 0x6eb   : > { %v7590_v8 = vsel %vm2002_vm6, %v7275_v40, %v7589_v11  ;;  %v7123_v40 = vrot.slane %v12960_v6, %v9307_v21  ;;  %v13165_v7 = vpop.permute.xlu0 %7007  ;;  %v7538_v6 = vsel %vm1996_vm3, %v7039_v48, %v7537_v17 }
 0x6ec   : > { %v6834_v14 = vpop.permute.xlu1 %6833  ;;  %v13129_v56 = vsel %vm2004_vm7, %v7279_v60, %v7590_v8 }
 0x6ed   : > { %v7283_v39 = vrot.slane %v6834_v14, %v9307_v21  ;;  %v7131_v14 = vrot.slane %v12973_v53, %v9307_v21  ;;  %v7051_v53 = vrot.slane %v12889_v54, %v9307_v21 }
 0x6ef   : > { %v7592_v12 = vsel %vm1992_vm1, %v7287_v22, %v7283_v39  ;;  %v7127_v22 = vrot.slane %v12712_v63, %v9307_v21  ;;  %v7139_v63 = vrot.slane %v12984_v24, %v9307_v21 }
 0x6f0   : > { %v6840_v4 = vpop.permute.xlu1 %6839 }
 0x6f1   : > { %v7291_v16 = vrot.slane %v6840_v4, %v9307_v21  ;;  %v7539_v4 = vsel %vm1998_vm4, %v7043_v46, %v7538_v6  ;;  %v7557_v15 = vsel %vm1992_vm1, %v7127_v22, %v7123_v40 }
 0x6f3   : > { %v7593_v25 = vsel %vm1994_vm2, %v7291_v16, %v7592_v12  ;;  %v7319_v16 = vrot.slane %v12942_v42, %v9307_v21  ;;  %v7558_v12 = vsel %vm1994_vm2, %v7131_v14, %v7557_v15  ;;  %v7327_v42 = vrot.slane %v12955_v31, %v9307_v21 }
 0x6f4   : > { %v6846_v29 = vpop.permute.xlu1 %6845  ;;  %v7594_v58 = vsel %vm1996_vm3, %v7295_v2, %v7593_v25 }
 0x6f5   : > { %v7299_v19 = vrot.slane %v6846_v29, %v9307_v21  ;;  %v7047_v29 = vrot.slane %v12600_v9, %v9307_v21 }
 0x6f7   : > { %v7595_v30 = vsel %vm1998_vm4, %v7299_v19, %v7594_v58  ;;  %v7135_v58 = vrot.slane %v12725_v10, %v9307_v21  ;;  %v13193_v19 = vpop.permute.xlu0 %6986  ;;  %v7147_v10 = vrot.slane %v12991_v28, %v9307_v21 }
 0x6f8   : > { %v6852_v1 = vpop.permute.xlu1 %6851  ;;  %v7596_v52 = vsel %vm2000_vm5, %v7303_v47, %v7595_v30  ;;  %v7540_v47 = vsel %vm2000_vm5, %v7047_v29, %v7539_v4 }
 0x6f9   : > { %v7307_v38 = vrot.slane %v6852_v1, %v9307_v21  ;;  %v7559_v30 = vsel %vm1996_vm3, %v7135_v58, %v7558_v12  ;;  %v7541_v1 = vsel %vm2002_vm6, %v7051_v53, %v7540_v47  ;;  %v7679_v53 = vsel %vm2127_vm8, %v13064_v37, 0.0 }
 0x6fa   : > { %v7560_v9 = vsel %vm1998_vm4, %v7139_v63, %v7559_v30  ;;  %v7542_v28 = vsel %vm2004_vm7, %v7055_v59, %v7541_v1  ;;  %v7367_v58 = vrot.slane %v13000_v36, %v9307_v21  ;;  %v7391_v59 = vrot.slane %v13036_v57, %v9307_v21 }
 0x6fb   : > { %v7597_v11 = vsel %vm2002_vm6, %v7307_v38, %v7596_v52  ;;  %v7143_v38 = vrot.slane %v12735_v55, %v9307_v21  ;;  %v13212_v51 = vpop.permute.xlu0 %6965  ;;  %v7151_v55 = vrot.slane %v12748_v32, %v9307_v21  ;;  %v7351_v32 = vrot.slane %v12989_v27, %v9307_v21 }
 0x6fc   : > { %v6858_v60 = vpop.permute.xlu1 %6857  ;;  %v7598_v8 = vsel %vm2004_vm7, %v7311_v34, %v7597_v11  ;;  %v7335_v34 = vrot.slane %v12969_v49, %v9307_v21  ;;  %v7343_v49 = vrot.slane %v12981_v18, %v9307_v21 }
 0x6fd   : > { %v7688_v39 = vsel %vm2127_vm8, %v7598_v8, 0.0  ;;  %v7315_v23 = vrot.slane %v6858_v60, %v9307_v21  ;;  %v7561_v17 = vsel %vm2000_vm5, %v7143_v38, %v7560_v9  ;;  %v7664_v60 = vsel %vm2127_vm8, %v7542_v28, 0.0 }
 0x6fe   : > { %7689 = vadd.xlane.f32.xlu0 %v7688_v39  ;;  %v7562_v50 = vsel %vm2002_vm6, %v7147_v10, %v7561_v17 }
 0x6ff   : > { %v7599_v54 = vsel %vm1992_vm1, %v7319_v16, %v7315_v23  ;;  %v7563_v14 = vsel %vm2004_vm7, %v7151_v55, %v7562_v50  ;;  %v13227_v22 = vpop.permute.xlu0 %7013  ;;  %v7359_v16 = vrot.slane %v12995_v26, %v9307_v21  ;;  %v7685_v26 = vsel %vm2127_vm8, %v13129_v56, 0.0 }
 0x700   : > { %v6864_v2 = vpop.permute.xlu1 %6863  ;;  %v7673_v6 = vsel %vm2127_vm8, %v7563_v14, 0.0  ;;  %v7407_v50 = vrot.slane %v13061_v45, %v9307_v21 }
 0x701   : > { %v7323_v25 = vrot.slane %v6864_v2, %v9307_v21 }
 0x703   : > { %v7600_v41 = vsel %vm1994_vm2, %v7323_v25, %v7599_v54  ;;  %v13240_v12 = vpop.permute.xlu0 %6992  ;;  %v7375_v54 = vrot.slane %v13011_v0, %v9307_v21  ;;  %v7383_v0 = vrot.slane %v13023_v43, %v9307_v21 }
 0x704   : > { %v6870_v24 = vpop.permute.xlu1 %6869  ;;  %v7601_v5 = vsel %vm1996_vm3, %v7327_v42, %v7600_v41 }
 0x705   : > { %v7331_v31 = vrot.slane %v6870_v24, %v9307_v21 }
 0x707   : > { %v7602_v52 = vsel %vm1998_vm4, %v7331_v31, %v7601_v5  ;;  %v13252_v41 = vpop.permute.xlu0 %6971 }
 0x708   : > { %v6876_v11 = vpop.permute.xlu1 %6875  ;;  %v7603_v46 = vsel %vm2000_vm5, %v7335_v34, %v7602_v52 }
 0x709   : > { %v7339_v40 = vrot.slane %v6876_v11, %v9307_v21 }
 0x70b   : > { %v7604_v8 = vsel %vm2002_vm6, %v7339_v40, %v7603_v46  ;;  %v13262_v10 = vpop.permute.xlu0 %7019  ;;  %v7399_v46 = vrot.slane %v13046_v20, %v9307_v21  ;;  %v7415_v20 = vrot.slane %v13074_v62, %v9307_v21  ;;  %v7431_v62 = vrot.slane %v13098_v61, %v9307_v21 }
 0x70c   : > { %v6882_v48 = vpop.permute.xlu1 %6881  ;;  %7665 = vadd.xlane.f32.xlu1 %v7664_v60  ;;  %v7605_v39 = vsel %vm2004_vm7, %v7343_v49, %v7604_v8 }
 0x70d   : > { %v7347_v23 = vrot.slane %v6882_v48, %v9307_v21  ;;  %v7691_v24 = vsel %vm2127_vm8, %v7605_v39, 0.0 }
 0x70f   : > { %v7606_v15 = vsel %vm1992_vm1, %v7351_v32, %v7347_v23  ;;  %v13271_v17 = vpop.permute.xlu0 %6974  ;;  %v7423_v32 = vrot.slane %v13087_v44, %v9307_v21 }
 0x710   : > { %v6888_v18 = vpop.permute.xlu1 %6887  ;;  %7674 = vadd.xlane.f32.xlu1 %v7673_v6 }
 0x711   : > { %v7355_v4 = vrot.slane %v6888_v18, %v9307_v21 }
 0x713   : > { %v7607_v2 = vsel %vm1994_vm2, %v7355_v4, %v7606_v15  ;;  %v13281_v60 = vpop.permute.xlu0 %7022 }
 0x714   : > { %v6894_v63 = vpop.permute.xlu1 %6893  ;;  %v7608_v25 = vsel %vm1996_vm3, %v7359_v16, %v7607_v2  ;;  %7680 = vadd.xlane.f32.xlu1 %v7679_v53 }
 0x715   : > { %v7363_v27 = vrot.slane %v6894_v63, %v9307_v21 }
 0x717   : > { %v7609_v29 = vsel %vm1998_vm4, %v7363_v27, %v7608_v25 }
 0x718   : > { %v6900_v42 = vpop.permute.xlu1 %6899  ;;  %7686 = vadd.xlane.f32.xlu1 %v7685_v26  ;;  %v7610_v30 = vsel %vm2000_vm5, %v7367_v58, %v7609_v29  ;;  %v7443_v29 = vrot.slane %v13112_v35, %v9307_v21  ;;  %v7451_v58 = vrot.slane %v13143_v33, %v9307_v21  ;;  %v7515_v35 = vrot.slane %v13165_v7, %v9307_v21 }
 0x719   : > { %v7371_v37 = vrot.slane %v6900_v42, %v9307_v21  ;;  %v7475_v33 = vrot.slane %v13125_v13, %v9307_v21 }
 0x71b   : > { %v7611_v5 = vsel %vm2002_vm6, %v7371_v37, %v7610_v30  ;;  %v7507_v30 = vrot.slane %v13134_v3, %v9307_v21  ;;  %v7487_v3 = vrot.slane %v13193_v19, %v9307_v21 }
 0x71c   : > { %v6906_v47 = vpop.permute.xlu1 %6905  ;;  %7692 = vadd.xlane.f32.xlu1 %v7691_v24  ;;  %v7612_v56 = vsel %vm2004_vm7, %v7375_v54, %v7611_v5 }
 0x71d   : > { %v7694_v36 = vsel %vm2127_vm8, %v7612_v56, 0.0  ;;  %v7379_v9 = vrot.slane %v6906_v47, %v9307_v21 }
 0x71e   : > { %7695 = vadd.xlane.f32.xlu0 %v7694_v36 }
 0x71f   : > { %v7613_v38 = vsel %vm1992_vm1, %v7383_v0, %v7379_v9 }
 0x720   : > { %v6912_v31 = vpop.permute.xlu1 %6911 }
 0x721   : > { %v7387_v1 = vrot.slane %v6912_v31, %v9307_v21 }
 0x723   : > { %v7614_v34 = vsel %vm1994_vm2, %v7387_v1, %v7613_v38  ;;  %v7459_v38 = vrot.slane %v13212_v51, %v9307_v21  ;;  %v7495_v51 = vrot.slane %v13240_v12, %v9307_v21 }
 0x724   : > { %v6918_v52 = vpop.permute.xlu1 %6917  ;;  %v7615_v11 = vsel %vm1996_vm3, %v7391_v59, %v7614_v34 }
 0x725   : > { %v7395_v28 = vrot.slane %v6918_v52, %v9307_v21 }
 0x727   : > { %v7616_v43 = vsel %vm1998_vm4, %v7395_v28, %v7615_v11  ;;  %v7523_v28 = vrot.slane %v13227_v22, %v9307_v21  ;;  %v7467_v22 = vrot.slane %v13252_v41, %v9307_v21  ;;  %v7535_v41 = vrot.slane %v13281_v60, %v9307_v21 }
 0x728   : > { %v6924_v40 = vpop.permute.xlu1 %6923  ;;  %v7617_v55 = vsel %vm2000_vm5, %v7399_v46, %v7616_v43 }
 0x729   : > { %v7403_v57 = vrot.slane %v6924_v40, %v9307_v21 }
 0x72b   : > { %v7618_v49 = vsel %vm2002_vm6, %v7403_v57, %v7617_v55 }
 0x72c   : > { %v6930_v8 = vpop.permute.xlu1 %6929  ;;  %v7619_v48 = vsel %vm2004_vm7, %v7407_v50, %v7618_v49 }
 0x72d   : > { %v7697_v14 = vsel %vm2127_vm8, %v7619_v48, 0.0  ;;  %v7411_v39 = vrot.slane %v6930_v8, %v9307_v21  ;;  %v7471_v48 = vrot.slane %v13271_v17, %v9307_v21 }
 0x72e   : > { %7698 = vadd.xlane.f32.xlu1 %v7697_v14 }
 0x72f   : > { %v7620_v18 = vsel %vm1992_vm1, %v7415_v20, %v7411_v39 }
 0x730   : > { %v6936_v45 = vpop.permute.xlu1 %6935  ;;  %v7669_v23 = vpop.xlane.xlu0 %7668 }
 0x731   : > { %v7419_v6 = vrot.slane %v6936_v45, %v9307_v21  ;;  %7714 = vst.msk [vmem:[%s13291_s30 + $0x8] sm:$0xff] %vm7712_vm9, %v7669_v23  ;;  %v7531_v23 = vrot.slane %v13262_v10, %v9307_v21 }
 0x733   : > { %v7621_v4 = vsel %vm1994_vm2, %v7419_v6, %v7620_v18 }
 0x734   : > { %v6942_v16 = vpop.permute.xlu1 %6941  ;;  %v7622_v15 = vsel %vm1996_vm3, %v7423_v32, %v7621_v4  ;;  %v7672_v2 = vpop.xlane.xlu0 %7671 }
 0x735   : > { %v7427_v53 = vrot.slane %v6942_v16, %v9307_v21  ;;  %7715 = vst.msk [vmem:[%s13291_s30 + $0x10] sm:$0xff] %vm7712_vm9, %v7672_v2 }
 0x737   : > { %v7623_v63 = vsel %vm1998_vm4, %v7427_v53, %v7622_v15 }
 0x738   : > { %v13309_v25 = vpop.permute.xlu1 %6947  ;;  %v13312_v44 = vsel %vm2000_vm5, %v7431_v62, %v7623_v63 }
 0x739   : > { %v7435_v16 = vrot.slane %v13309_v25, %v9307_v21 }
 0x73b   : > { %v7625_v53 = vsel %vm2002_vm6, %v7435_v16, %v13312_v44 }
 0x73c   : > { %v6957_v27 = vpop.permute.xlu1 %6956 }
 0x73d   : > { %v7447_v26 = vrot.slane %v6957_v27, %v9307_v21 }
 0x73f   : > { %v7627_v42 = vsel %vm1992_vm1, %v7447_v26, %v7443_v29 }
 0x740   : > { %v6981_v37 = vpop.permute.xlu1 %6980  ;;  %v7628_v61 = vsel %vm1994_vm2, %v7451_v58, %v7627_v42 }
 0x741   : > { %v7479_v5 = vrot.slane %v6981_v37, %v9307_v21 }
 0x743   : > { %v7634_v0 = vsel %vm1992_vm1, %v7479_v5, %v7475_v33 }
 0x744   : > { %v7005_v54 = vpop.permute.xlu1 %7004 }
 0x745   : > { %v7511_v24 = vrot.slane %v7005_v54, %v9307_v21 }
 0x747   : > { %v7641_v47 = vsel %vm1992_vm1, %v7511_v24, %v7507_v30 }
 0x748   : > { %v6984_v56 = vpop.permute.xlu1 %6983  ;;  %v7642_v36 = vsel %vm1994_vm2, %v7515_v35, %v7641_v47 }
 0x749   : > { %v7483_v9 = vrot.slane %v6984_v56, %v9307_v21 }
 0x74b   : > { %v7635_v31 = vsel %vm1994_vm2, %v7483_v9, %v7634_v0  ;;  %v7678_v7 = vpop.xlane.xlu0 %7677 }
 0x74c   : > { %7717 = vst.msk [vmem:[%s13291_s30 + $0x20] sm:$0xff] %vm7712_vm9, %v7678_v7  ;;  %v6963_v1 = vpop.permute.xlu1 %6962  ;;  %v7636_v59 = vsel %vm1996_vm3, %v7487_v3, %v7635_v31 }
 0x74d   : > { %v7455_v13 = vrot.slane %v6963_v1, %v9307_v21 }
 0x74f   : > { %v7629_v34 = vsel %vm1996_vm3, %v7455_v13, %v7628_v61 }
 0x750   : > { %v7011_v52 = vpop.permute.xlu1 %7010  ;;  %v7630_v19 = vsel %vm1998_vm4, %v7459_v38, %v7629_v34 }
 0x751   : > { %v7519_v11 = vrot.slane %v7011_v52, %v9307_v21 }
 0x753   : > { %v7643_v43 = vsel %vm1996_vm3, %v7519_v11, %v7642_v36 }
 0x754   : > { %v6990_v46 = vpop.permute.xlu1 %6989  ;;  %v7644_v40 = vsel %vm1998_vm4, %v7523_v28, %v7643_v43 }
 0x755   : > { %v7491_v57 = vrot.slane %v6990_v46, %v9307_v21 }
 0x757   : > { %v7637_v50 = vsel %vm1998_vm4, %v7491_v57, %v7636_v59 }
 0x758   : > { %v6969_v55 = vpop.permute.xlu1 %6968  ;;  %v7638_v49 = vsel %vm2000_vm5, %v7495_v51, %v7637_v50 }
 0x759   : > { %v7463_v8 = vrot.slane %v6969_v55, %v9307_v21 }
 0x75b   : > { %v7631_v14 = vsel %vm2000_vm5, %v7463_v8, %v7630_v19 }
 0x75c   : > { %v7017_v39 = vpop.permute.xlu1 %7016  ;;  %v7632_v20 = vsel %vm2002_vm6, %v7467_v22, %v7631_v14 }
 0x75d   : > { %v7527_v12 = vrot.slane %v7017_v39, %v9307_v21  ;;  %v7633_v45 = vsel %vm2004_vm7, %v7471_v48, %v7632_v20 }
 0x75e   : > { %v7703_v6 = vsel %vm2127_vm8, %v7633_v45, 0.0 }
 0x75f   : > { %v7645_v32 = vsel %vm2000_vm5, %v7527_v12, %v7644_v40  ;;  %7704 = vadd.xlane.f32.xlu1 %v7703_v6 }
 0x760   : > { %v6996_v17 = vpop.permute.xlu1 %6995  ;;  %v7646_v18 = vsel %vm2002_vm6, %v7531_v23, %v7645_v32 }
 0x761   : > { %v7647_v4 = vsel %vm2004_vm7, %v7535_v41, %v7646_v18  ;;  %v7499_v60 = vrot.slane %v6996_v17, %v9307_v21 }
 0x762   : > { %v7709_v15 = vsel %vm2127_vm8, %v7647_v4, 0.0 }
 0x763   : > { %7710 = vadd.xlane.f32.xlu1 %v7709_v15  ;;  %v7639_v29 = vsel %vm2002_vm6, %v7499_v60, %v7638_v49 }
 0x764   : > { %v6951_v10 = vpop.permute.xlu1 %6950 }
 0x765   : > { %v7439_v2 = vrot.slane %v6951_v10, %v9307_v21 }
 0x767   : > { %v7626_v62 = vsel %vm2004_vm7, %v7439_v2, %v7625_v53 }
 0x768   : > { %v6999_v63 = vpop.permute.xlu1 %6998  ;;  %v7700_v27 = vsel %vm2127_vm8, %v7626_v62, 0.0 }
 0x769   : > { %v7503_v25 = vrot.slane %v6999_v63, %v9307_v21  ;;  %7701 = vadd.xlane.f32.xlu0 %v7700_v27 }
 0x76b   : > { %v7684_v26 = vpop.xlane.xlu0 %7683  ;;  %v7640_v58 = vsel %vm2004_vm7, %v7503_v25, %v7639_v29 }
 0x76c   : > { %7719 = vst.msk [vmem:[%s13291_s30 + $0x30] sm:$0xff] %vm7712_vm9, %v7684_v26  ;;  %v7706_v44 = vsel %vm2127_vm8, %v7640_v58, 0.0 }
 0x76d   : > { %7707 = vadd.xlane.f32.xlu0 %v7706_v44 }
 0x78b   : > { %v7690_v42 = vpop.xlane.xlu0 %7689 }
 0x78c   : > { %7721 = vst.msk [vmem:[%s13291_s30 + $0x40] sm:$0xff] %vm7712_vm9, %v7690_v42 }
 0x799   : > { %v7666_v21 = vpop.xlane.xlu1 %7665 }
 0x79a   : > { %7713 = vst.msk [vmem:[%s13291_s30] sm:$0xff] %vm7712_vm9, %v7666_v21 }
 0x79d   : > { %v7675_v37 = vpop.xlane.xlu1 %7674 }
 0x79e   : > { %7716 = vst.msk [vmem:[%s13291_s30 + $0x18] sm:$0xff] %vm7712_vm9, %v7675_v37 }
 0x7a1   : > { %v7681_v61 = vpop.xlane.xlu1 %7680 }
 0x7a2   : > { %7718 = vst.msk [vmem:[%s13291_s30 + $0x28] sm:$0xff] %vm7712_vm9, %v7681_v61 }
 0x7a5   : > { %v7687_v54 = vpop.xlane.xlu1 %7686 }
 0x7a6   : > { %7720 = vst.msk [vmem:[%s13291_s30 + $0x38] sm:$0xff] %vm7712_vm9, %v7687_v54 }
 0x7a9   : > { %v7693_v30 = vpop.xlane.xlu1 %7692 }
 0x7aa   : > { %7722 = vst.msk [vmem:[%s13291_s30 + $0x48] sm:$0xff] %vm7712_vm9, %v7693_v30 }
 0x7ab   : > { %v7696_v24 = vpop.xlane.xlu0 %7695 }
 0x7ac   : > { %7723 = vst.msk [vmem:[%s13291_s30 + $0x50] sm:$0xff] %vm7712_vm9, %v7696_v24 }
 0x7bb   : > { %v7699_v35 = vpop.xlane.xlu1 %7698 }
 0x7bc   : > { %7724 = vst.msk [vmem:[%s13291_s30 + $0x58] sm:$0xff] %vm7712_vm9, %v7699_v35 }
 0x7ec   : > { %v7705_v5 = vpop.xlane.xlu1 %7704 }
 0x7ed   : > { %7726 = vst.msk [vmem:[%s13291_s30 + $0x68] sm:$0xff] %vm7712_vm9, %v7705_v5 }
 0x7f0   : > { %v7711_v47 = vpop.xlane.xlu1 %7710 }
 0x7f1   : > { %7728 = vst.msk [vmem:[%s13291_s30 + $0x78] sm:$0xff] %vm7712_vm9, %v7711_v47 }
 0x7f6   : > { %v7702_v33 = vpop.xlane.xlu0 %7701 }
 0x7f7   : > { %7725 = vst.msk [vmem:[%s13291_s30 + $0x60] sm:$0xff] %vm7712_vm9, %v7702_v33 }
 0x7fa   : > { %v7708_v56 = vpop.xlane.xlu0 %7707 }
 0x7fb   : > { %7727 = vst.msk [vmem:[%s13291_s30 + $0x70] sm:$0xff] %vm7712_vm9, %v7708_v56 }
 0x7fc PF: > { %s14_s12 = sadd.s32 1, %s8266_s12  }
 0x7fd   : > { %p11_p5 = scmp.ge.s32.totalorder %s14_s12, 4  }
 0x7ff   :  { %13 = sbr.rel (!%p11_p5) target bundleno = 1 (0x1), region = 70 }

</bundles_post_ra>
